<compile_context>
chip_gen: v7x
topology: tpu7x:2x2x1
jax: 0.10.0
libtpu: 0.0.40
codegen_flags: <defaults>
</compile_context>

<pallas_src>
import jax
import jax.numpy as jnp
from jax.experimental import pallas as pl
from jax.experimental.pallas import tpu as pltpu

_GN_EPS = 1e-5  # PyTorch GroupNorm default eps


def _gelu(x):
    # NOTE: tanh-approx GELU (PyTorch nn.GELU default is erf-based; the tanh
    # approximation matches to ~1e-3 and lowers reliably on Mosaic).
    return jax.nn.gelu(x, approximate=True)


def _groupnorm1(x, gamma, beta):
    # GroupNorm(num_groups=1): stats over the whole (C, H, W) sample,
    # per-channel affine.  One-pass sum / sum-of-squares, all in f32.
    # x: (C, H, W) f32;  gamma / beta: (C, 1) f32.
    c, h, w = x.shape
    n = c * h * w
    s = jnp.sum(x)
    ss = jnp.sum(x * x)
    mean = s / n
    var = jnp.maximum(ss / n - mean * mean, 0.0)  # clamp one-pass fp error
    inv = jax.lax.rsqrt(var + _GN_EPS)
    return (x - mean) * inv * gamma.reshape(c, 1, 1) + beta.reshape(c, 1, 1)


def _conv3x3(x, w_r):
    # 3x3 'same' convolution, no bias, as ONE im2col matmul on the MXU.
    # x:   (Cin, H, W)  f32 activation (channels-first, spatial in lanes)
    # w_r: (Cout, 9*Cin) bf16 weight, K ordered (ky, kx, cin)
    cin, h, w = x.shape
    cout = w_r.shape[0]
    xb = x.astype(jnp.bfloat16)                               # bf16 MXU operand
    # zero-pad spatially by 1 on each side, in-register (no HBM jnp.pad pass)
    zr = jnp.zeros((cin, 1, w), xb.dtype)
    xp = jnp.concatenate([zr, xb, zr], axis=1)                # (Cin, H+2, W)
    zc = jnp.zeros((cin, h + 2, 1), xb.dtype)
    xp = jnp.concatenate([zc, xp, zc], axis=2)                # (Cin, H+2, W+2)
    # im2col patch slab: rows ordered (ky, kx, cin) -> (9*Cin, H, W)
    taps = [xp[:, ky:ky + h, kx:kx + w] for ky in range(3) for kx in range(3)]
    patches = jnp.concatenate(taps, axis=0).reshape(9 * cin, h * w)
    acc = jnp.dot(w_r, patches, preferred_element_type=jnp.float32)  # (Cout, H*W)
    return acc.reshape(cout, h, w)


def _down_kernel(x_ref, w1a_ref, w1b_ref, w2a_ref, w2b_ref,
                 g1a_ref, b1a_ref, g1b_ref, b1b_ref,
                 g2a_ref, b2a_ref, g2b_ref, b2b_ref, o_ref):
    _, cin, h, w = x_ref.shape
    ho, wo = h // 2, w // 2

    # ---- MaxPool2d(2): unit-stride pairwise maxima via minor-dim splits ----
    x = x_ref[0].astype(jnp.float32)                         # (Cin, H, W)
    x = jnp.max(x.reshape(cin, h, wo, 2), axis=3)            # pool W -> (Cin, H, Wo)
    pooled = jnp.max(x.reshape(cin, ho, 2, wo), axis=2)      # pool H -> (Cin, Ho, Wo)

    # ---- DoubleConv(in, in, residual=True): gelu(x + GN(conv(gelu(GN(conv(x)))))) ----
    t = _conv3x3(pooled, w1a_ref[...])
    t = _gelu(_groupnorm1(t, g1a_ref[...], b1a_ref[...]))
    t = _conv3x3(t, w1b_ref[...])
    t = _groupnorm1(t, g1b_ref[...], b1b_ref[...])
    a = _gelu(pooled + t)

    # Dropout2d(p=0.3): identity in eval mode.
    # TODO(synk): training-mode channel dropout (pltpu.prng_seed / prng_random_bits).

    # ---- DoubleConv(in, out): GN(conv(gelu(GN(conv(x))))) ----
    t = _conv3x3(a, w2a_ref[...])
    t = _gelu(_groupnorm1(t, g2a_ref[...], b2a_ref[...]))
    t = _conv3x3(t, w2b_ref[...])
    y = _groupnorm1(t, g2b_ref[...], b2b_ref[...])

    cout = y.shape[0]
    # lane-dense store: (Cout, Ho*Wo); wrapper reshapes back to NCHW for free
    o_ref[0] = y.reshape(cout, ho * wo).astype(o_ref.dtype)


def _prep_weight(w):
    # PyTorch OIHW (Cout, Cin, 3, 3) -> (Cout, 9*Cin), K ordered (ky, kx, cin),
    # cast to bf16 (MXU operand; halves weight DMA).
    cout, cin = w.shape[0], w.shape[1]
    return jnp.transpose(w, (0, 2, 3, 1)).reshape(cout, 9 * cin).astype(jnp.bfloat16)


def _col(v):
    return v.reshape(-1, 1).astype(jnp.float32)


@jax.jit
def down_forward(x_nchw, params):
    # x_nchw: (N, C_in, H, W)  ->  (N, C_out, H//2, W//2)   (H, W even, like the test)
    n, cin, h, w = x_nchw.shape
    ho, wo = h // 2, w // 2
    hw = ho * wo
    cout = params["w2b"].shape[0]

    w1a, w1b = _prep_weight(params["w1a"]), _prep_weight(params["w1b"])
    w2a, w2b = _prep_weight(params["w2a"]), _prep_weight(params["w2b"])
    g1a, b1a = _col(params["g1a"]), _col(params["b1a"])
    g1b, b1b = _col(params["g1b"]), _col(params["b1b"])
    g2a, b2a = _col(params["g2a"]), _col(params["b2a"])
    g2b, b2b = _col(params["g2b"]), _col(params["b2b"])

    def full(shape):
        return pl.BlockSpec(shape, lambda i: (0,) * len(shape))

    out = pl.pallas_call(
        _down_kernel,
        out_shape=jax.ShapeDtypeStruct((n, cout, hw), jnp.float32),
        grid=(n,),
        in_specs=[
            pl.BlockSpec((1, cin, h, w), lambda i: (i, 0, 0, 0)),   # NCHW input, per sample
            full((cin, 9 * cin)), full((cin, 9 * cin)),             # residual DoubleConv weights
            full((cout, 9 * cin)), full((cout, 9 * cout)),          # second DoubleConv weights
            full((cin, 1)), full((cin, 1)), full((cin, 1)), full((cin, 1)),
            full((cout, 1)), full((cout, 1)), full((cout, 1)), full((cout, 1)),
        ],
        out_specs=pl.BlockSpec((1, cout, hw), lambda i: (i, 0, 0)),
        compiler_params=pltpu.CompilerParams(
            dimension_semantics=("parallel",),
        ),
    )(x_nchw, w1a, w1b, w2a, w2b, g1a, b1a, g1b, b1b, g2a, b2a, g2b, b2b)

    return out.reshape(n, cout, ho, wo)  # free row-major reshape, already NCHW


def init_params(key, in_ch, out_ch):
    k = jax.random.split(key, 4)
    f32 = jnp.float32
    return {
        # residual DoubleConv (in -> in -> in), PyTorch OIHW conv layout
        "w1a": jax.random.normal(k[0], (in_ch, in_ch, 3, 3), f32) * 0.1,
        "g1a": jnp.ones((in_ch,), f32), "b1a": jnp.zeros((in_ch,), f32),
        "w1b": jax.random.normal(k[1], (in_ch, in_ch, 3, 3), f32) * 0.1,
        "g1b": jnp.ones((in_ch,), f32), "b1b": jnp.zeros((in_ch,), f32),
        # plain DoubleConv (in -> out -> out)
        "w2a": jax.random.normal(k[2], (out_ch, in_ch, 3, 3), f32) * 0.1,
        "g2a": jnp.ones((out_ch,), f32), "b2a": jnp.zeros((out_ch,), f32),
        "w2b": jax.random.normal(k[3], (out_ch, out_ch, 3, 3), f32) * 0.1,
        "g2b": jnp.ones((out_ch,), f32), "b2b": jnp.zeros((out_ch,), f32),
    }
    # NOTE: emb_layer (SiLU + Linear) exists in Down.__init__ but is never used
    # in Down.forward, so it is intentionally not implemented.


if __name__ == "__main__":
    key = jax.random.PRNGKey(0)
    k_params, k_x = jax.random.split(key)

    N, in_ch, out_ch, H, W = 2, 4, 8, 16, 16
    params = init_params(k_params, in_ch, out_ch)
    x = jax.random.normal(k_x, (N, in_ch, H, W), jnp.float32)   # NCHW like PyTorch

    y = down_forward(x, params)
    y = jax.block_until_ready(y)
    assert y.shape == (N, out_ch, H // 2, W // 2), y.shape
    assert bool(jnp.all(jnp.isfinite(y)))
    print("KERNEL_OK")
</pallas_src>

<mosaic_0001>
module attributes {stable_mosaic.version = 11 : i64} {
  func.func @_down_kernel(%arg0: i32, %arg1: memref<1x4x16x16xf32, #tpu.memory_space<vmem>>, %arg2: memref<4x36xbf16, #tpu.memory_space<vmem>>, %arg3: memref<4x36xbf16, #tpu.memory_space<vmem>>, %arg4: memref<8x36xbf16, #tpu.memory_space<vmem>>, %arg5: memref<8x72xbf16, #tpu.memory_space<vmem>>, %arg6: memref<4x1xf32, #tpu.memory_space<vmem>>, %arg7: memref<4x1xf32, #tpu.memory_space<vmem>>, %arg8: memref<4x1xf32, #tpu.memory_space<vmem>>, %arg9: memref<4x1xf32, #tpu.memory_space<vmem>>, %arg10: memref<8x1xf32, #tpu.memory_space<vmem>>, %arg11: memref<8x1xf32, #tpu.memory_space<vmem>>, %arg12: memref<8x1xf32, #tpu.memory_space<vmem>>, %arg13: memref<8x1xf32, #tpu.memory_space<vmem>>, %arg14: memref<1x8x64xf32, #tpu.memory_space<vmem>>) attributes {dimension_semantics = [#tpu.dimension_semantics<parallel>], iteration_bounds = array<i64: 2>, scalar_prefetch = 0 : i64, scratch_operands = 0 : i64, tpu.core_type = #tpu.core_type<tc>, window_params = [{transform_indices = @transform_0, window_bounds = array<i64: 1, 4, 16, 16>}, {pipeline_mode = #tpu.pipeline_mode<synchronous>, transform_indices = @transform_1, window_bounds = array<i64: 4, 36>}, {pipeline_mode = #tpu.pipeline_mode<synchronous>, transform_indices = @transform_2, window_bounds = array<i64: 4, 36>}, {pipeline_mode = #tpu.pipeline_mode<synchronous>, transform_indices = @transform_3, window_bounds = array<i64: 8, 36>}, {pipeline_mode = #tpu.pipeline_mode<synchronous>, transform_indices = @transform_4, window_bounds = array<i64: 8, 72>}, {pipeline_mode = #tpu.pipeline_mode<synchronous>, transform_indices = @transform_5, window_bounds = array<i64: 4, 1>}, {pipeline_mode = #tpu.pipeline_mode<synchronous>, transform_indices = @transform_6, window_bounds = array<i64: 4, 1>}, {pipeline_mode = #tpu.pipeline_mode<synchronous>, transform_indices = @transform_7, window_bounds = array<i64: 4, 1>}, {pipeline_mode = #tpu.pipeline_mode<synchronous>, transform_indices = @transform_8, window_bounds = array<i64: 4, 1>}, {pipeline_mode = #tpu.pipeline_mode<synchronous>, transform_indices = @transform_9, window_bounds = array<i64: 8, 1>}, {pipeline_mode = #tpu.pipeline_mode<synchronous>, transform_indices = @transform_10, window_bounds = array<i64: 8, 1>}, {pipeline_mode = #tpu.pipeline_mode<synchronous>, transform_indices = @transform_11, window_bounds = array<i64: 8, 1>}, {pipeline_mode = #tpu.pipeline_mode<synchronous>, transform_indices = @transform_12, window_bounds = array<i64: 8, 1>}, {transform_indices = @transform_13, window_bounds = array<i64: 1, 8, 64>}]} {
    %c0 = arith.constant 0 : index
    %c0_0 = arith.constant 0 : index
    %c0_1 = arith.constant 0 : index
    %c0_2 = arith.constant 0 : index
    %0 = vector.load %arg1[%c0, %c0_0, %c0_1, %c0_2] : memref<1x4x16x16xf32, #tpu.memory_space<vmem>>, vector<1x4x16x16xf32>
    %1 = vector.shape_cast %0 : vector<1x4x16x16xf32> to vector<4x16x16xf32>
    %2 = vector.shape_cast %1 : vector<4x16x16xf32> to vector<4x16x8x2xf32>
    %cst = arith.constant dense<0xFF800000> : vector<4x16x8xf32>
    %3 = vector.multi_reduction <maximumf>, %2, %cst [3] : vector<4x16x8x2xf32> to vector<4x16x8xf32>
    %4 = vector.shape_cast %3 : vector<4x16x8xf32> to vector<4x8x2x8xf32>
    %cst_3 = arith.constant dense<0xFF800000> : vector<4x8x8xf32>
    %5 = vector.multi_reduction <maximumf>, %4, %cst_3 [2] : vector<4x8x2x8xf32> to vector<4x8x8xf32>
    %c0_4 = arith.constant 0 : index
    %c0_5 = arith.constant 0 : index
    %6 = vector.load %arg2[%c0_4, %c0_5] : memref<4x36xbf16, #tpu.memory_space<vmem>>, vector<4x36xbf16>
    %7 = arith.truncf %5 : vector<4x8x8xf32> to vector<4x8x8xbf16>
    %cst_6 = arith.constant 0.000000e+00 : bf16
    %8 = vector.broadcast %cst_6 : bf16 to vector<4x1x8xbf16>
    %9 = tpu.concatenate %8, %7, %8 in 1 : vector<4x1x8xbf16>, vector<4x8x8xbf16>, vector<4x1x8xbf16> -> vector<4x10x8xbf16>
    %cst_7 = arith.constant 0.000000e+00 : bf16
    %10 = vector.broadcast %cst_7 : bf16 to vector<4x10x1xbf16>
    %11 = tpu.concatenate %10, %9, %10 in 2 : vector<4x10x1xbf16>, vector<4x10x8xbf16>, vector<4x10x1xbf16> -> vector<4x10x10xbf16>
    %12 = vector.extract_strided_slice %11 {offsets = [0, 0, 0], sizes = [4, 8, 8], strides = [1, 1, 1]} : vector<4x10x10xbf16> to vector<4x8x8xbf16>
    %13 = vector.extract_strided_slice %11 {offsets = [0, 0, 1], sizes = [4, 8, 8], strides = [1, 1, 1]} : vector<4x10x10xbf16> to vector<4x8x8xbf16>
    %14 = vector.extract_strided_slice %11 {offsets = [0, 0, 2], sizes = [4, 8, 8], strides = [1, 1, 1]} : vector<4x10x10xbf16> to vector<4x8x8xbf16>
    %15 = vector.extract_strided_slice %11 {offsets = [0, 1, 0], sizes = [4, 8, 8], strides = [1, 1, 1]} : vector<4x10x10xbf16> to vector<4x8x8xbf16>
    %16 = vector.extract_strided_slice %11 {offsets = [0, 1, 1], sizes = [4, 8, 8], strides = [1, 1, 1]} : vector<4x10x10xbf16> to vector<4x8x8xbf16>
    %17 = vector.extract_strided_slice %11 {offsets = [0, 1, 2], sizes = [4, 8, 8], strides = [1, 1, 1]} : vector<4x10x10xbf16> to vector<4x8x8xbf16>
    %18 = vector.extract_strided_slice %11 {offsets = [0, 2, 0], sizes = [4, 8, 8], strides = [1, 1, 1]} : vector<4x10x10xbf16> to vector<4x8x8xbf16>
    %19 = vector.extract_strided_slice %11 {offsets = [0, 2, 1], sizes = [4, 8, 8], strides = [1, 1, 1]} : vector<4x10x10xbf16> to vector<4x8x8xbf16>
    %20 = vector.extract_strided_slice %11 {offsets = [0, 2, 2], sizes = [4, 8, 8], strides = [1, 1, 1]} : vector<4x10x10xbf16> to vector<4x8x8xbf16>
    %21 = tpu.concatenate %12, %13, %14, %15, %16, %17, %18, %19, %20 in 0 : vector<4x8x8xbf16>, vector<4x8x8xbf16>, vector<4x8x8xbf16>, vector<4x8x8xbf16>, vector<4x8x8xbf16>, vector<4x8x8xbf16>, vector<4x8x8xbf16>, vector<4x8x8xbf16>, vector<4x8x8xbf16> -> vector<36x8x8xbf16>
    %22 = vector.shape_cast %21 : vector<36x8x8xbf16> to vector<36x64xbf16>
    %cst_8 = arith.constant dense<0.000000e+00> : vector<4x64xf32>
    %23 = tpu.matmul %6, %22, %cst_8 {dimension_numbers = #tpu.dot_dimension_numbers<[1], [0], [0], [1], [0, 0, 1, 1], [], []>} : vector<4x36xbf16>, vector<36x64xbf16>, vector<4x64xf32> -> vector<4x64xf32>
    %24 = vector.shape_cast %23 : vector<4x64xf32> to vector<4x8x8xf32>
    %c0_9 = arith.constant 0 : index
    %c0_10 = arith.constant 0 : index
    %25 = vector.load %arg6[%c0_9, %c0_10] : memref<4x1xf32, #tpu.memory_space<vmem>>, vector<4x1xf32>
    %c0_11 = arith.constant 0 : index
    %c0_12 = arith.constant 0 : index
    %26 = vector.load %arg7[%c0_11, %c0_12] : memref<4x1xf32, #tpu.memory_space<vmem>>, vector<4x1xf32>
    %27 = vector.shape_cast %24 : vector<4x8x8xf32> to vector<1x4x8x8xf32>
    %cst_13 = arith.constant dense<0.000000e+00> : vector<1xf32>
    %28 = vector.multi_reduction <add>, %27, %cst_13 [1, 2, 3] : vector<1x4x8x8xf32> to vector<1xf32>
    %29 = vector.shape_cast %28 : vector<1xf32> to vector<1x1x1x1xf32>
    %30 = vector.extract %29[0, 0, 0, 0] : f32 from vector<1x1x1x1xf32>
    %31 = arith.mulf %24, %24 : vector<4x8x8xf32>
    %32 = vector.shape_cast %31 : vector<4x8x8xf32> to vector<1x4x8x8xf32>
    %cst_14 = arith.constant dense<0.000000e+00> : vector<1xf32>
    %33 = vector.multi_reduction <add>, %32, %cst_14 [1, 2, 3] : vector<1x4x8x8xf32> to vector<1xf32>
    %34 = vector.shape_cast %33 : vector<1xf32> to vector<1x1x1x1xf32>
    %35 = vector.extract %34[0, 0, 0, 0] : f32 from vector<1x1x1x1xf32>
    %cst_15 = arith.constant 2.560000e+02 : f32
    %36 = arith.divf %30, %cst_15 : f32
    %cst_16 = arith.constant 2.560000e+02 : f32
    %37 = arith.divf %35, %cst_16 : f32
    %38 = arith.mulf %36, %36 : f32
    %39 = arith.subf %37, %38 : f32
    %cst_17 = arith.constant 0.000000e+00 : f32
    %40 = arith.maximumf %39, %cst_17 : f32
    %cst_18 = arith.constant 9.99999974E-6 : f32
    %41 = arith.addf %40, %cst_18 : f32
    %42 = math.rsqrt %41 : f32
    %43 = vector.broadcast %36 : f32 to vector<4x8x8xf32>
    %44 = arith.subf %24, %43 : vector<4x8x8xf32>
    %45 = vector.broadcast %42 : f32 to vector<4x8x8xf32>
    %46 = arith.mulf %44, %45 : vector<4x8x8xf32>
    %47 = vector.shape_cast %25 : vector<4x1xf32> to vector<4x1x1xf32>
    %48 = vector.broadcast %47 : vector<4x1x1xf32> to vector<4x8x8xf32>
    %49 = arith.mulf %46, %48 : vector<4x8x8xf32>
    %50 = vector.shape_cast %26 : vector<4x1xf32> to vector<4x1x1xf32>
    %51 = vector.broadcast %50 : vector<4x1x1xf32> to vector<4x8x8xf32>
    %52 = arith.addf %49, %51 : vector<4x8x8xf32>
    %53 = arith.mulf %52, %52 : vector<4x8x8xf32>
    %54 = arith.mulf %52, %53 : vector<4x8x8xf32>
    %cst_19 = arith.constant 4.471500e-02 : f32
    %55 = vector.broadcast %cst_19 : f32 to vector<4x8x8xf32>
    %56 = arith.mulf %55, %54 : vector<4x8x8xf32>
    %57 = arith.addf %52, %56 : vector<4x8x8xf32>
    %cst_20 = arith.constant 0.797884583 : f32
    %58 = vector.broadcast %cst_20 : f32 to vector<4x8x8xf32>
    %59 = arith.mulf %58, %57 : vector<4x8x8xf32>
    %60 = math.tanh %59 : vector<4x8x8xf32>
    %cst_21 = arith.constant 1.000000e+00 : f32
    %61 = vector.broadcast %cst_21 : f32 to vector<4x8x8xf32>
    %62 = arith.addf %61, %60 : vector<4x8x8xf32>
    %cst_22 = arith.constant 5.000000e-01 : f32
    %63 = vector.broadcast %cst_22 : f32 to vector<4x8x8xf32>
    %64 = arith.mulf %63, %62 : vector<4x8x8xf32>
    %65 = arith.mulf %52, %64 : vector<4x8x8xf32>
    %c0_23 = arith.constant 0 : index
    %c0_24 = arith.constant 0 : index
    %66 = vector.load %arg3[%c0_23, %c0_24] : memref<4x36xbf16, #tpu.memory_space<vmem>>, vector<4x36xbf16>
    %67 = arith.truncf %65 : vector<4x8x8xf32> to vector<4x8x8xbf16>
    %cst_25 = arith.constant 0.000000e+00 : bf16
    %68 = vector.broadcast %cst_25 : bf16 to vector<4x1x8xbf16>
    %69 = tpu.concatenate %68, %67, %68 in 1 : vector<4x1x8xbf16>, vector<4x8x8xbf16>, vector<4x1x8xbf16> -> vector<4x10x8xbf16>
    %cst_26 = arith.constant 0.000000e+00 : bf16
    %70 = vector.broadcast %cst_26 : bf16 to vector<4x10x1xbf16>
    %71 = tpu.concatenate %70, %69, %70 in 2 : vector<4x10x1xbf16>, vector<4x10x8xbf16>, vector<4x10x1xbf16> -> vector<4x10x10xbf16>
    %72 = vector.extract_strided_slice %71 {offsets = [0, 0, 0], sizes = [4, 8, 8], strides = [1, 1, 1]} : vector<4x10x10xbf16> to vector<4x8x8xbf16>
    %73 = vector.extract_strided_slice %71 {offsets = [0, 0, 1], sizes = [4, 8, 8], strides = [1, 1, 1]} : vector<4x10x10xbf16> to vector<4x8x8xbf16>
    %74 = vector.extract_strided_slice %71 {offsets = [0, 0, 2], sizes = [4, 8, 8], strides = [1, 1, 1]} : vector<4x10x10xbf16> to vector<4x8x8xbf16>
    %75 = vector.extract_strided_slice %71 {offsets = [0, 1, 0], sizes = [4, 8, 8], strides = [1, 1, 1]} : vector<4x10x10xbf16> to vector<4x8x8xbf16>
    %76 = vector.extract_strided_slice %71 {offsets = [0, 1, 1], sizes = [4, 8, 8], strides = [1, 1, 1]} : vector<4x10x10xbf16> to vector<4x8x8xbf16>
    %77 = vector.extract_strided_slice %71 {offsets = [0, 1, 2], sizes = [4, 8, 8], strides = [1, 1, 1]} : vector<4x10x10xbf16> to vector<4x8x8xbf16>
    %78 = vector.extract_strided_slice %71 {offsets = [0, 2, 0], sizes = [4, 8, 8], strides = [1, 1, 1]} : vector<4x10x10xbf16> to vector<4x8x8xbf16>
    %79 = vector.extract_strided_slice %71 {offsets = [0, 2, 1], sizes = [4, 8, 8], strides = [1, 1, 1]} : vector<4x10x10xbf16> to vector<4x8x8xbf16>
    %80 = vector.extract_strided_slice %71 {offsets = [0, 2, 2], sizes = [4, 8, 8], strides = [1, 1, 1]} : vector<4x10x10xbf16> to vector<4x8x8xbf16>
    %81 = tpu.concatenate %72, %73, %74, %75, %76, %77, %78, %79, %80 in 0 : vector<4x8x8xbf16>, vector<4x8x8xbf16>, vector<4x8x8xbf16>, vector<4x8x8xbf16>, vector<4x8x8xbf16>, vector<4x8x8xbf16>, vector<4x8x8xbf16>, vector<4x8x8xbf16>, vector<4x8x8xbf16> -> vector<36x8x8xbf16>
    %82 = vector.shape_cast %81 : vector<36x8x8xbf16> to vector<36x64xbf16>
    %cst_27 = arith.constant dense<0.000000e+00> : vector<4x64xf32>
    %83 = tpu.matmul %66, %82, %cst_27 {dimension_numbers = #tpu.dot_dimension_numbers<[1], [0], [0], [1], [0, 0, 1, 1], [], []>} : vector<4x36xbf16>, vector<36x64xbf16>, vector<4x64xf32> -> vector<4x64xf32>
    %84 = vector.shape_cast %83 : vector<4x64xf32> to vector<4x8x8xf32>
    %c0_28 = arith.constant 0 : index
    %c0_29 = arith.constant 0 : index
    %85 = vector.load %arg8[%c0_28, %c0_29] : memref<4x1xf32, #tpu.memory_space<vmem>>, vector<4x1xf32>
    %c0_30 = arith.constant 0 : index
    %c0_31 = arith.constant 0 : index
    %86 = vector.load %arg9[%c0_30, %c0_31] : memref<4x1xf32, #tpu.memory_space<vmem>>, vector<4x1xf32>
    %87 = vector.shape_cast %84 : vector<4x8x8xf32> to vector<1x4x8x8xf32>
    %cst_32 = arith.constant dense<0.000000e+00> : vector<1xf32>
    %88 = vector.multi_reduction <add>, %87, %cst_32 [1, 2, 3] : vector<1x4x8x8xf32> to vector<1xf32>
    %89 = vector.shape_cast %88 : vector<1xf32> to vector<1x1x1x1xf32>
    %90 = vector.extract %89[0, 0, 0, 0] : f32 from vector<1x1x1x1xf32>
    %91 = arith.mulf %84, %84 : vector<4x8x8xf32>
    %92 = vector.shape_cast %91 : vector<4x8x8xf32> to vector<1x4x8x8xf32>
    %cst_33 = arith.constant dense<0.000000e+00> : vector<1xf32>
    %93 = vector.multi_reduction <add>, %92, %cst_33 [1, 2, 3] : vector<1x4x8x8xf32> to vector<1xf32>
    %94 = vector.shape_cast %93 : vector<1xf32> to vector<1x1x1x1xf32>
    %95 = vector.extract %94[0, 0, 0, 0] : f32 from vector<1x1x1x1xf32>
    %cst_34 = arith.constant 2.560000e+02 : f32
    %96 = arith.divf %90, %cst_34 : f32
    %cst_35 = arith.constant 2.560000e+02 : f32
    %97 = arith.divf %95, %cst_35 : f32
    %98 = arith.mulf %96, %96 : f32
    %99 = arith.subf %97, %98 : f32
    %cst_36 = arith.constant 0.000000e+00 : f32
    %100 = arith.maximumf %99, %cst_36 : f32
    %cst_37 = arith.constant 9.99999974E-6 : f32
    %101 = arith.addf %100, %cst_37 : f32
    %102 = math.rsqrt %101 : f32
    %103 = vector.broadcast %96 : f32 to vector<4x8x8xf32>
    %104 = arith.subf %84, %103 : vector<4x8x8xf32>
    %105 = vector.broadcast %102 : f32 to vector<4x8x8xf32>
    %106 = arith.mulf %104, %105 : vector<4x8x8xf32>
    %107 = vector.shape_cast %85 : vector<4x1xf32> to vector<4x1x1xf32>
    %108 = vector.broadcast %107 : vector<4x1x1xf32> to vector<4x8x8xf32>
    %109 = arith.mulf %106, %108 : vector<4x8x8xf32>
    %110 = vector.shape_cast %86 : vector<4x1xf32> to vector<4x1x1xf32>
    %111 = vector.broadcast %110 : vector<4x1x1xf32> to vector<4x8x8xf32>
    %112 = arith.addf %109, %111 : vector<4x8x8xf32>
    %113 = arith.addf %5, %112 : vector<4x8x8xf32>
    %114 = arith.mulf %113, %113 : vector<4x8x8xf32>
    %115 = arith.mulf %113, %114 : vector<4x8x8xf32>
    %cst_38 = arith.constant 4.471500e-02 : f32
    %116 = vector.broadcast %cst_38 : f32 to vector<4x8x8xf32>
    %117 = arith.mulf %116, %115 : vector<4x8x8xf32>
    %118 = arith.addf %113, %117 : vector<4x8x8xf32>
    %cst_39 = arith.constant 0.797884583 : f32
    %119 = vector.broadcast %cst_39 : f32 to vector<4x8x8xf32>
    %120 = arith.mulf %119, %118 : vector<4x8x8xf32>
    %121 = math.tanh %120 : vector<4x8x8xf32>
    %cst_40 = arith.constant 1.000000e+00 : f32
    %122 = vector.broadcast %cst_40 : f32 to vector<4x8x8xf32>
    %123 = arith.addf %122, %121 : vector<4x8x8xf32>
    %cst_41 = arith.constant 5.000000e-01 : f32
    %124 = vector.broadcast %cst_41 : f32 to vector<4x8x8xf32>
    %125 = arith.mulf %124, %123 : vector<4x8x8xf32>
    %126 = arith.mulf %113, %125 : vector<4x8x8xf32>
    %c0_42 = arith.constant 0 : index
    %c0_43 = arith.constant 0 : index
    %127 = vector.load %arg4[%c0_42, %c0_43] : memref<8x36xbf16, #tpu.memory_space<vmem>>, vector<8x36xbf16>
    %128 = arith.truncf %126 : vector<4x8x8xf32> to vector<4x8x8xbf16>
    %cst_44 = arith.constant 0.000000e+00 : bf16
    %129 = vector.broadcast %cst_44 : bf16 to vector<4x1x8xbf16>
    %130 = tpu.concatenate %129, %128, %129 in 1 : vector<4x1x8xbf16>, vector<4x8x8xbf16>, vector<4x1x8xbf16> -> vector<4x10x8xbf16>
    %cst_45 = arith.constant 0.000000e+00 : bf16
    %131 = vector.broadcast %cst_45 : bf16 to vector<4x10x1xbf16>
    %132 = tpu.concatenate %131, %130, %131 in 2 : vector<4x10x1xbf16>, vector<4x10x8xbf16>, vector<4x10x1xbf16> -> vector<4x10x10xbf16>
    %133 = vector.extract_strided_slice %132 {offsets = [0, 0, 0], sizes = [4, 8, 8], strides = [1, 1, 1]} : vector<4x10x10xbf16> to vector<4x8x8xbf16>
    %134 = vector.extract_strided_slice %132 {offsets = [0, 0, 1], sizes = [4, 8, 8], strides = [1, 1, 1]} : vector<4x10x10xbf16> to vector<4x8x8xbf16>
    %135 = vector.extract_strided_slice %132 {offsets = [0, 0, 2], sizes = [4, 8, 8], strides = [1, 1, 1]} : vector<4x10x10xbf16> to vector<4x8x8xbf16>
    %136 = vector.extract_strided_slice %132 {offsets = [0, 1, 0], sizes = [4, 8, 8], strides = [1, 1, 1]} : vector<4x10x10xbf16> to vector<4x8x8xbf16>
    %137 = vector.extract_strided_slice %132 {offsets = [0, 1, 1], sizes = [4, 8, 8], strides = [1, 1, 1]} : vector<4x10x10xbf16> to vector<4x8x8xbf16>
    %138 = vector.extract_strided_slice %132 {offsets = [0, 1, 2], sizes = [4, 8, 8], strides = [1, 1, 1]} : vector<4x10x10xbf16> to vector<4x8x8xbf16>
    %139 = vector.extract_strided_slice %132 {offsets = [0, 2, 0], sizes = [4, 8, 8], strides = [1, 1, 1]} : vector<4x10x10xbf16> to vector<4x8x8xbf16>
    %140 = vector.extract_strided_slice %132 {offsets = [0, 2, 1], sizes = [4, 8, 8], strides = [1, 1, 1]} : vector<4x10x10xbf16> to vector<4x8x8xbf16>
    %141 = vector.extract_strided_slice %132 {offsets = [0, 2, 2], sizes = [4, 8, 8], strides = [1, 1, 1]} : vector<4x10x10xbf16> to vector<4x8x8xbf16>
    %142 = tpu.concatenate %133, %134, %135, %136, %137, %138, %139, %140, %141 in 0 : vector<4x8x8xbf16>, vector<4x8x8xbf16>, vector<4x8x8xbf16>, vector<4x8x8xbf16>, vector<4x8x8xbf16>, vector<4x8x8xbf16>, vector<4x8x8xbf16>, vector<4x8x8xbf16>, vector<4x8x8xbf16> -> vector<36x8x8xbf16>
    %143 = vector.shape_cast %142 : vector<36x8x8xbf16> to vector<36x64xbf16>
    %cst_46 = arith.constant dense<0.000000e+00> : vector<8x64xf32>
    %144 = tpu.matmul %127, %143, %cst_46 {dimension_numbers = #tpu.dot_dimension_numbers<[1], [0], [0], [1], [0, 0, 1, 1], [], []>} : vector<8x36xbf16>, vector<36x64xbf16>, vector<8x64xf32> -> vector<8x64xf32>
    %145 = vector.shape_cast %144 : vector<8x64xf32> to vector<8x8x8xf32>
    %c0_47 = arith.constant 0 : index
    %c0_48 = arith.constant 0 : index
    %146 = vector.load %arg10[%c0_47, %c0_48] : memref<8x1xf32, #tpu.memory_space<vmem>>, vector<8x1xf32>
    %c0_49 = arith.constant 0 : index
    %c0_50 = arith.constant 0 : index
    %147 = vector.load %arg11[%c0_49, %c0_50] : memref<8x1xf32, #tpu.memory_space<vmem>>, vector<8x1xf32>
    %148 = vector.shape_cast %145 : vector<8x8x8xf32> to vector<1x8x8x8xf32>
    %cst_51 = arith.constant dense<0.000000e+00> : vector<1xf32>
    %149 = vector.multi_reduction <add>, %148, %cst_51 [1, 2, 3] : vector<1x8x8x8xf32> to vector<1xf32>
    %150 = vector.shape_cast %149 : vector<1xf32> to vector<1x1x1x1xf32>
    %151 = vector.extract %150[0, 0, 0, 0] : f32 from vector<1x1x1x1xf32>
    %152 = arith.mulf %145, %145 : vector<8x8x8xf32>
    %153 = vector.shape_cast %152 : vector<8x8x8xf32> to vector<1x8x8x8xf32>
    %cst_52 = arith.constant dense<0.000000e+00> : vector<1xf32>
    %154 = vector.multi_reduction <add>, %153, %cst_52 [1, 2, 3] : vector<1x8x8x8xf32> to vector<1xf32>
    %155 = vector.shape_cast %154 : vector<1xf32> to vector<1x1x1x1xf32>
    %156 = vector.extract %155[0, 0, 0, 0] : f32 from vector<1x1x1x1xf32>
    %cst_53 = arith.constant 5.120000e+02 : f32
    %157 = arith.divf %151, %cst_53 : f32
    %cst_54 = arith.constant 5.120000e+02 : f32
    %158 = arith.divf %156, %cst_54 : f32
    %159 = arith.mulf %157, %157 : f32
    %160 = arith.subf %158, %159 : f32
    %cst_55 = arith.constant 0.000000e+00 : f32
    %161 = arith.maximumf %160, %cst_55 : f32
    %cst_56 = arith.constant 9.99999974E-6 : f32
    %162 = arith.addf %161, %cst_56 : f32
    %163 = math.rsqrt %162 : f32
    %164 = vector.broadcast %157 : f32 to vector<8x8x8xf32>
    %165 = arith.subf %145, %164 : vector<8x8x8xf32>
    %166 = vector.broadcast %163 : f32 to vector<8x8x8xf32>
    %167 = arith.mulf %165, %166 : vector<8x8x8xf32>
    %168 = vector.shape_cast %146 : vector<8x1xf32> to vector<8x1x1xf32>
    %169 = vector.broadcast %168 : vector<8x1x1xf32> to vector<8x8x8xf32>
    %170 = arith.mulf %167, %169 : vector<8x8x8xf32>
    %171 = vector.shape_cast %147 : vector<8x1xf32> to vector<8x1x1xf32>
    %172 = vector.broadcast %171 : vector<8x1x1xf32> to vector<8x8x8xf32>
    %173 = arith.addf %170, %172 : vector<8x8x8xf32>
    %174 = arith.mulf %173, %173 : vector<8x8x8xf32>
    %175 = arith.mulf %173, %174 : vector<8x8x8xf32>
    %cst_57 = arith.constant 4.471500e-02 : f32
    %176 = vector.broadcast %cst_57 : f32 to vector<8x8x8xf32>
    %177 = arith.mulf %176, %175 : vector<8x8x8xf32>
    %178 = arith.addf %173, %177 : vector<8x8x8xf32>
    %cst_58 = arith.constant 0.797884583 : f32
    %179 = vector.broadcast %cst_58 : f32 to vector<8x8x8xf32>
    %180 = arith.mulf %179, %178 : vector<8x8x8xf32>
    %181 = math.tanh %180 : vector<8x8x8xf32>
    %cst_59 = arith.constant 1.000000e+00 : f32
    %182 = vector.broadcast %cst_59 : f32 to vector<8x8x8xf32>
    %183 = arith.addf %182, %181 : vector<8x8x8xf32>
    %cst_60 = arith.constant 5.000000e-01 : f32
    %184 = vector.broadcast %cst_60 : f32 to vector<8x8x8xf32>
    %185 = arith.mulf %184, %183 : vector<8x8x8xf32>
    %186 = arith.mulf %173, %185 : vector<8x8x8xf32>
    %c0_61 = arith.constant 0 : index
    %c0_62 = arith.constant 0 : index
    %187 = vector.load %arg5[%c0_61, %c0_62] : memref<8x72xbf16, #tpu.memory_space<vmem>>, vector<8x72xbf16>
    %188 = arith.truncf %186 : vector<8x8x8xf32> to vector<8x8x8xbf16>
    %cst_63 = arith.constant 0.000000e+00 : bf16
    %189 = vector.broadcast %cst_63 : bf16 to vector<8x1x8xbf16>
    %190 = tpu.concatenate %189, %188, %189 in 1 : vector<8x1x8xbf16>, vector<8x8x8xbf16>, vector<8x1x8xbf16> -> vector<8x10x8xbf16>
    %cst_64 = arith.constant 0.000000e+00 : bf16
    %191 = vector.broadcast %cst_64 : bf16 to vector<8x10x1xbf16>
    %192 = tpu.concatenate %191, %190, %191 in 2 : vector<8x10x1xbf16>, vector<8x10x8xbf16>, vector<8x10x1xbf16> -> vector<8x10x10xbf16>
    %193 = vector.extract_strided_slice %192 {offsets = [0, 0, 0], sizes = [8, 8, 8], strides = [1, 1, 1]} : vector<8x10x10xbf16> to vector<8x8x8xbf16>
    %194 = vector.extract_strided_slice %192 {offsets = [0, 0, 1], sizes = [8, 8, 8], strides = [1, 1, 1]} : vector<8x10x10xbf16> to vector<8x8x8xbf16>
    %195 = vector.extract_strided_slice %192 {offsets = [0, 0, 2], sizes = [8, 8, 8], strides = [1, 1, 1]} : vector<8x10x10xbf16> to vector<8x8x8xbf16>
    %196 = vector.extract_strided_slice %192 {offsets = [0, 1, 0], sizes = [8, 8, 8], strides = [1, 1, 1]} : vector<8x10x10xbf16> to vector<8x8x8xbf16>
    %197 = vector.extract_strided_slice %192 {offsets = [0, 1, 1], sizes = [8, 8, 8], strides = [1, 1, 1]} : vector<8x10x10xbf16> to vector<8x8x8xbf16>
    %198 = vector.extract_strided_slice %192 {offsets = [0, 1, 2], sizes = [8, 8, 8], strides = [1, 1, 1]} : vector<8x10x10xbf16> to vector<8x8x8xbf16>
    %199 = vector.extract_strided_slice %192 {offsets = [0, 2, 0], sizes = [8, 8, 8], strides = [1, 1, 1]} : vector<8x10x10xbf16> to vector<8x8x8xbf16>
    %200 = vector.extract_strided_slice %192 {offsets = [0, 2, 1], sizes = [8, 8, 8], strides = [1, 1, 1]} : vector<8x10x10xbf16> to vector<8x8x8xbf16>
    %201 = vector.extract_strided_slice %192 {offsets = [0, 2, 2], sizes = [8, 8, 8], strides = [1, 1, 1]} : vector<8x10x10xbf16> to vector<8x8x8xbf16>
    %202 = tpu.concatenate %193, %194, %195, %196, %197, %198, %199, %200, %201 in 0 : vector<8x8x8xbf16>, vector<8x8x8xbf16>, vector<8x8x8xbf16>, vector<8x8x8xbf16>, vector<8x8x8xbf16>, vector<8x8x8xbf16>, vector<8x8x8xbf16>, vector<8x8x8xbf16>, vector<8x8x8xbf16> -> vector<72x8x8xbf16>
    %203 = vector.shape_cast %202 : vector<72x8x8xbf16> to vector<72x64xbf16>
    %cst_65 = arith.constant dense<0.000000e+00> : vector<8x64xf32>
    %204 = tpu.matmul %187, %203, %cst_65 {dimension_numbers = #tpu.dot_dimension_numbers<[1], [0], [0], [1], [0, 0, 1, 1], [], []>} : vector<8x72xbf16>, vector<72x64xbf16>, vector<8x64xf32> -> vector<8x64xf32>
    %205 = vector.shape_cast %204 : vector<8x64xf32> to vector<8x8x8xf32>
    %c0_66 = arith.constant 0 : index
    %c0_67 = arith.constant 0 : index
    %206 = vector.load %arg12[%c0_66, %c0_67] : memref<8x1xf32, #tpu.memory_space<vmem>>, vector<8x1xf32>
    %c0_68 = arith.constant 0 : index
    %c0_69 = arith.constant 0 : index
    %207 = vector.load %arg13[%c0_68, %c0_69] : memref<8x1xf32, #tpu.memory_space<vmem>>, vector<8x1xf32>
    %208 = vector.shape_cast %205 : vector<8x8x8xf32> to vector<1x8x8x8xf32>
    %cst_70 = arith.constant dense<0.000000e+00> : vector<1xf32>
    %209 = vector.multi_reduction <add>, %208, %cst_70 [1, 2, 3] : vector<1x8x8x8xf32> to vector<1xf32>
    %210 = vector.shape_cast %209 : vector<1xf32> to vector<1x1x1x1xf32>
    %211 = vector.extract %210[0, 0, 0, 0] : f32 from vector<1x1x1x1xf32>
    %212 = arith.mulf %205, %205 : vector<8x8x8xf32>
    %213 = vector.shape_cast %212 : vector<8x8x8xf32> to vector<1x8x8x8xf32>
    %cst_71 = arith.constant dense<0.000000e+00> : vector<1xf32>
    %214 = vector.multi_reduction <add>, %213, %cst_71 [1, 2, 3] : vector<1x8x8x8xf32> to vector<1xf32>
    %215 = vector.shape_cast %214 : vector<1xf32> to vector<1x1x1x1xf32>
    %216 = vector.extract %215[0, 0, 0, 0] : f32 from vector<1x1x1x1xf32>
    %cst_72 = arith.constant 5.120000e+02 : f32
    %217 = arith.divf %211, %cst_72 : f32
    %cst_73 = arith.constant 5.120000e+02 : f32
    %218 = arith.divf %216, %cst_73 : f32
    %219 = arith.mulf %217, %217 : f32
    %220 = arith.subf %218, %219 : f32
    %cst_74 = arith.constant 0.000000e+00 : f32
    %221 = arith.maximumf %220, %cst_74 : f32
    %cst_75 = arith.constant 9.99999974E-6 : f32
    %222 = arith.addf %221, %cst_75 : f32
    %223 = math.rsqrt %222 : f32
    %224 = vector.broadcast %217 : f32 to vector<8x8x8xf32>
    %225 = arith.subf %205, %224 : vector<8x8x8xf32>
    %226 = vector.broadcast %223 : f32 to vector<8x8x8xf32>
    %227 = arith.mulf %225, %226 : vector<8x8x8xf32>
    %228 = vector.shape_cast %206 : vector<8x1xf32> to vector<8x1x1xf32>
    %229 = vector.broadcast %228 : vector<8x1x1xf32> to vector<8x8x8xf32>
    %230 = arith.mulf %227, %229 : vector<8x8x8xf32>
    %231 = vector.shape_cast %207 : vector<8x1xf32> to vector<8x1x1xf32>
    %232 = vector.broadcast %231 : vector<8x1x1xf32> to vector<8x8x8xf32>
    %233 = arith.addf %230, %232 : vector<8x8x8xf32>
    %234 = vector.shape_cast %233 : vector<8x8x8xf32> to vector<8x64xf32>
    %c0_76 = arith.constant 0 : index
    %c0_77 = arith.constant 0 : index
    %c0_78 = arith.constant 0 : index
    %235 = vector.load %arg14[%c0_76, %c0_77, %c0_78] : memref<1x8x64xf32, #tpu.memory_space<vmem>>, vector<1x8x64xf32>
    %236 = vector.shape_cast %235 : vector<1x8x64xf32> to vector<8x64xf32>
    %237 = vector.shape_cast %234 : vector<8x64xf32> to vector<1x8x64xf32>
    tpu.vector_store %arg14[%c0_76, %c0_77, %c0_78], %237 {strides = array<i32>} : memref<1x8x64xf32, #tpu.memory_space<vmem>>, vector<1x8x64xf32>,
    return
  }
  func.func @transform_0(%arg0: i32) -> (i32, i32, i32, i32) {
    %c0_i32 = arith.constant 0 : i32
    %c0_i32_0 = arith.constant 0 : i32
    %c0_i32_1 = arith.constant 0 : i32
    %c0_i32_2 = arith.constant 0 : i32
    return %arg0, %c0_i32, %c0_i32_0, %c0_i32_1 : i32, i32, i32, i32
  }
  func.func @transform_1(%arg0: i32) -> (i32, i32) {
    %c0_i32 = arith.constant 0 : i32
    %c0_i32_0 = arith.constant 0 : i32
    %c0_i32_1 = arith.constant 0 : i32
    return %c0_i32, %c0_i32_0 : i32, i32
  }
  func.func @transform_2(%arg0: i32) -> (i32, i32) {
    %c0_i32 = arith.constant 0 : i32
    %c0_i32_0 = arith.constant 0 : i32
    %c0_i32_1 = arith.constant 0 : i32
    return %c0_i32, %c0_i32_0 : i32, i32
  }
  func.func @transform_3(%arg0: i32) -> (i32, i32) {
    %c0_i32 = arith.constant 0 : i32
    %c0_i32_0 = arith.constant 0 : i32
    %c0_i32_1 = arith.constant 0 : i32
    return %c0_i32, %c0_i32_0 : i32, i32
  }
  func.func @transform_4(%arg0: i32) -> (i32, i32) {
    %c0_i32 = arith.constant 0 : i32
    %c0_i32_0 = arith.constant 0 : i32
    %c0_i32_1 = arith.constant 0 : i32
    return %c0_i32, %c0_i32_0 : i32, i32
  }
  func.func @transform_5(%arg0: i32) -> (i32, i32) {
    %c0_i32 = arith.constant 0 : i32
    %c0_i32_0 = arith.constant 0 : i32
    %c0_i32_1 = arith.constant 0 : i32
    return %c0_i32, %c0_i32_0 : i32, i32
  }
  func.func @transform_6(%arg0: i32) -> (i32, i32) {
    %c0_i32 = arith.constant 0 : i32
    %c0_i32_0 = arith.constant 0 : i32
    %c0_i32_1 = arith.constant 0 : i32
    return %c0_i32, %c0_i32_0 : i32, i32
  }
  func.func @transform_7(%arg0: i32) -> (i32, i32) {
    %c0_i32 = arith.constant 0 : i32
    %c0_i32_0 = arith.constant 0 : i32
    %c0_i32_1 = arith.constant 0 : i32
    return %c0_i32, %c0_i32_0 : i32, i32
  }
  func.func @transform_8(%arg0: i32) -> (i32, i32) {
    %c0_i32 = arith.constant 0 : i32
    %c0_i32_0 = arith.constant 0 : i32
    %c0_i32_1 = arith.constant 0 : i32
    return %c0_i32, %c0_i32_0 : i32, i32
  }
  func.func @transform_9(%arg0: i32) -> (i32, i32) {
    %c0_i32 = arith.constant 0 : i32
    %c0_i32_0 = arith.constant 0 : i32
    %c0_i32_1 = arith.constant 0 : i32
    return %c0_i32, %c0_i32_0 : i32, i32
  }
  func.func @transform_10(%arg0: i32) -> (i32, i32) {
    %c0_i32 = arith.constant 0 : i32
    %c0_i32_0 = arith.constant 0 : i32
    %c0_i32_1 = arith.constant 0 : i32
    return %c0_i32, %c0_i32_0 : i32, i32
  }
  func.func @transform_11(%arg0: i32) -> (i32, i32) {
    %c0_i32 = arith.constant 0 : i32
    %c0_i32_0 = arith.constant 0 : i32
    %c0_i32_1 = arith.constant 0 : i32
    return %c0_i32, %c0_i32_0 : i32, i32
  }
  func.func @transform_12(%arg0: i32) -> (i32, i32) {
    %c0_i32 = arith.constant 0 : i32
    %c0_i32_0 = arith.constant 0 : i32
    %c0_i32_1 = arith.constant 0 : i32
    return %c0_i32, %c0_i32_0 : i32, i32
  }
  func.func @transform_13(%arg0: i32) -> (i32, i32, i32) {
    %c0_i32 = arith.constant 0 : i32
    %c0_i32_0 = arith.constant 0 : i32
    %c0_i32_1 = arith.constant 0 : i32
    return %arg0, %c0_i32, %c0_i32_0 : i32, i32, i32
  }
}

</mosaic_0001>

<bundles_post_ra>
// kernel: down_forward.1
= control target key start
LH: loop header
LB: loop body
LE: loop exit
PB: predicated region body
PF: predicated region fallthrough
CT: control target
= control target key end

     0   :  { %s8770_s25 = smov 0   ;;  %s12039_s0 = inlined_call_operand.vmem [shape: f32[2,4,16,16], index: 0, kind: input, shape index: {}]   ;;  %s12040_s1 = inlined_call_operand.vmem [shape: bf16[4,36], index: 1, kind: input, shape index: {}]   ;;  %s12041_s2 = inlined_call_operand.vmem [shape: bf16[4,36], index: 2, kind: input, shape index: {}]   ;;  %s12042_s3 = inlined_call_operand.vmem [shape: bf16[8,36], index: 3, kind: input, shape index: {}]   ;;  %s12043_s4 = inlined_call_operand.vmem [shape: bf16[8,72], index: 4, kind: input, shape index: {}]   ;;  %s12044_s5 = inlined_call_operand.vmem [shape: f32[4,1], index: 5, kind: input, shape index: {}]   ;;  %s12045_s6 = inlined_call_operand.vmem [shape: f32[4,1], index: 6, kind: input, shape index: {}]   ;;  %s12046_s7 = inlined_call_operand.vmem [shape: f32[4,1], index: 7, kind: input, shape index: {}]   ;;  %s12047_s8 = inlined_call_operand.vmem [shape: f32[4,1], index: 8, kind: input, shape index: {}]   ;;  %s12048_s9 = inlined_call_operand.vmem [shape: f32[8,1], index: 9, kind: input, shape index: {}]   ;;  %s12049_s10 = inlined_call_operand.vmem [shape: f32[8,1], index: 10, kind: input, shape index: {}]   ;;  %s12050_s11 = inlined_call_operand.vmem [shape: f32[8,1], index: 11, kind: input, shape index: {}]   ;;  %s12051_s12 = inlined_call_operand.vmem [shape: f32[8,1], index: 12, kind: input, shape index: {}]   ;;  %s12052_s13 = inlined_call_operand.vmem [shape: f32[2,8,64], index: 13, kind: output, shape index: {}]  }
   0x1   :  { %12132 = sst [smem:[#allocation15_spill]] %s12039_s0 }
   0x2   :  { %12133 = sst [smem:[#allocation16_spill]] %s12040_s1 }
   0x3   :  { %12134 = sst [smem:[#allocation17_spill]] %s12041_s2 }
   0x4   :  { %12135 = sst [smem:[#allocation18_spill]] %s12042_s3 }
   0x5   :  { %12136 = sst [smem:[#allocation19_spill]] %s12044_s5 }
   0x6   :  { %12137 = sst [smem:[#allocation20_spill]] %s12045_s6 }
   0x7   :  { %12138 = sst [smem:[#allocation21_spill]] %s12046_s7 }
   0x8   :  { %12139 = sst [smem:[#allocation22_spill]] %s12047_s8 }
   0x9   :  { %12140 = sst [smem:[#allocation23_spill]] %s12048_s9 }
   0xa   :  { %12141 = sst [smem:[#allocation24_spill]] %s12049_s10 }
   0xb LB: > { %12142 = sst [smem:[#allocation2_spill]] %s8669_s25  ;;  %s8419_s26 = sadd.s32 4294967295, %s8669_s25   ;;  %s8669_s25 = sphi %s8770_s25, %s23_s25  }
   0xc   : > { %p8423_p0 = scmp.ge.s32.totalorder %s8669_s25, 1  ;;  %p387_p1 = scmp.lt.s32.totalorder %s8669_s25, 3 }
   0xe   : > { %p388_p2 = pnand %p8423_p0, %p387_p1 }
  0x10   : > { %391 = sbr.rel (%p388_p2) target bundleno = 5482 (0x156a), region = 72 }
  0x17   : > { %p430_p3 = scmp.lt.s32.totalorder %s8419_s26, 1  ;;  %s12143_s0 = sld [smem:[#allocation15_spill]]  ;;  %v8678_v28 = vmov 1983009808   ;;  %v12053_v30 = vlaneseq  ;;  %v8679_v38 = vmov 1934713408  }
  0x18   : > { %s12119_s14 = smov 126   ;;  %s8672_s15 = smov 124   ;;  %v627_v29 = vunpack.c.l.s4 %v8678_v28  ;;  %v691_v39 = vunpack.c.l.s4 %v8679_v38  ;;  %vm1712_vm0 = vcmask 15360   ;;  %vm2164_vm1 = vcmask 1042434  }
  0x19   : > { %s12267_s26 = smov (!%p430_p3, %s8419_s26), 1  ;;  %s8673_s16 = smov 122   ;;  %v8967_v34 = vshrl.u32 %v12053_v30, 7  ;;  %vm2166_vm2 = vcmask 1043459   ;;  %vm12086_vm3 = vcmask 1044484   ;;  %vm12085_vm4 = vcmask 1045509  }
  0x1a   : > { %s8437_s27 = sshll.u32 %s12267_s26, 6  ;;  %s12101_s17 = smov 120   ;;  %v628_v33 = vunpack.c.0.s8 %v627_v29  ;;  %v692_v49 = vunpack.c.0.s8 %v691_v39  ;;  %vm12084_vm5 = vcmask 1046534   ;;  %vm12083_vm6 = vcmask 1047559  }
  0x1b   : > { %s8675_s18 = smov 118   ;;  %s8676_s19 = smov 116   ;;  %12147 = vst [vmem:[#allocation6_spill] sm:$0xff] %v8967_v34  ;;  %vm2202_vm7 = vcmask 1040384   ;;  %vm2203_vm8 = vsmask.f32 256 }
  0x1c   : > { %s8677_s20 = smov 114   ;;  %v8980_v42 = vsub.s32 %v628_v33, %v8967_v34  ;;  %v9009_v62 = vsub.s32 %v692_v49, %v8967_v34  ;;  %vm2209_vm9 = vcmask 1044480   ;;  %vm2210_vm10 = vsmask.f32 4352  ;;  %vm9836_vm11 = vmand %vm2202_vm7, %vm2203_vm8  ;;  %s12123_s21 = smov 1  }
  0x1d   : > { %s8784_s30 = scalar_lea.vmem %s12143_s0, %s8437_s27  ;;  %vm9845_vm12 = vmand %vm2209_vm9, %vm2210_vm10  ;;  %vm2228_vm13 = vcmask 7168   ;;  %vm2238_vm14 = vcmask 72704   ;;  %s12121_s22 = smov 127   ;;  %vm8691_vm15 = vmmov 0   ;;  %vm2826_vm7 = vcmask 195584  }
  0x1e   : > { %v8787_v0 = vld [vmem:[%s8784_s30 + $0x20] sm:$0xff]  ;;  %v8797_v2 = vld [vmem:[%s8784_s30 + $0x30] sm:$0xff]  ;;  %v8855_v4 = vld [vmem:[%s8784_s30 + $0x18] sm:$0xff]  ;;  %s12117_s23 = smov 16   ;;  %s12115_s24 = smov 32   ;;  %vm2819_vm8 = vcmask 130048  }
  0x1f   : > { %v8790_v1 = vld [vmem:[%s8784_s30] sm:$0xff]  ;;  %464 = vrot.lane.b32.xlu1 %v8787_v0, %s12119_s14  ;;  %v8800_v3 = vld [vmem:[%s8784_s30 + $0x10] sm:$0xff]  ;;  %v8858_v5 = vld [vmem:[%s8784_s30 + $0x8] sm:$0xff]  ;;  %s12113_s27 = smov 48   ;;  %s12107_s28 = smov 40   ;;  %vm2833_vm9 = vcmask 261120  }
  0x20   : > { %456 = vrot.lane.b32.xlu0 %v8790_v1, %s12119_s14  ;;  %12144 = vst [vmem:[#allocation3_spill] sm:$0xff] %v8858_v5  ;;  %v8865_v6 = vld [vmem:[%s8784_s30 + $0x38] sm:$0xff]  ;;  %v8868_v7 = vld [vmem:[%s8784_s30 + $0x28] sm:$0xff]  ;;  %s12105_s29 = smov 56   ;;  %s12089_s30 = smov 8   ;;  %vm2840_vm10 = vcmask 326656  }
  0x21   : > { %12145 = vst [vmem:[#allocation4_spill] sm:$0xff] %v8865_v6  ;;  %12146 = vst [vmem:[#allocation5_spill] sm:$0xff] %v8868_v7  ;;  %s12191_s1 = sld [smem:[#allocation16_spill]]  ;;  %s12192_s5 = sld [smem:[#allocation19_spill]] }
  0x22   : > { %s12193_s6 = sld [smem:[#allocation20_spill]]  ;;  %s12200_s2 = sld [smem:[#allocation17_spill]] }
  0x23   : > { %468 = vrot.lane.b32.xlu1 %v8797_v2, %s12119_s14  ;;  %s12208_s7 = sld [smem:[#allocation21_spill]]  ;;  %s12209_s8 = sld [smem:[#allocation22_spill]] }
  0x24   : > { %460 = vrot.lane.b32.xlu0 %v8800_v3, %s12119_s14  ;;  %s12249_s3 = sld [smem:[#allocation18_spill]]  ;;  %s12251_s9 = sld [smem:[#allocation23_spill]] }
  0x25   : > { %s12252_s10 = sld [smem:[#allocation24_spill]] }
  0x27   : > { %484 = vrot.lane.b32.xlu1 %v8800_v3, %s8672_s15 }
  0x28   : > { %480 = vrot.lane.b32.xlu0 %v8790_v1, %s8672_s15 }
  0x2b   : > { %492 = vrot.lane.b32.xlu1 %v8797_v2, %s8672_s15 }
  0x2c   : > { %488 = vrot.lane.b32.xlu0 %v8787_v0, %s8672_s15 }
  0x2f   : > { %508 = vrot.lane.b32.xlu1 %v8800_v3, %s8673_s16 }
  0x30   : > { %504 = vrot.lane.b32.xlu0 %v8790_v1, %s8673_s16 }
  0x33   : > { %516 = vrot.lane.b32.xlu1 %v8797_v2, %s8673_s16 }
  0x34   : > { %512 = vrot.lane.b32.xlu0 %v8787_v0, %s8673_s16 }
  0x37   : > { %532 = vrot.lane.b32.xlu1 %v8800_v3, %s12101_s17 }
  0x38   : > { %528 = vrot.lane.b32.xlu0 %v8790_v1, %s12101_s17 }
  0x3b   : > { %540 = vrot.lane.b32.xlu1 %v8797_v2, %s12101_s17 }
  0x3c   : > { %536 = vrot.lane.b32.xlu0 %v8787_v0, %s12101_s17 }
  0x3f   : > { %556 = vrot.lane.b32.xlu1 %v8800_v3, %s8675_s18 }
  0x40   : > { %552 = vrot.lane.b32.xlu0 %v8790_v1, %s8675_s18 }
  0x43   : > { %564 = vrot.lane.b32.xlu1 %v8797_v2, %s8675_s18 }
  0x44   : > { %560 = vrot.lane.b32.xlu0 %v8787_v0, %s8675_s18 }
  0x47   : > { %580 = vrot.lane.b32.xlu1 %v8800_v3, %s8676_s19 }
  0x48   : > { %576 = vrot.lane.b32.xlu0 %v8790_v1, %s8676_s19 }
  0x4b   : > { %588 = vrot.lane.b32.xlu1 %v8797_v2, %s8676_s19 }
  0x4c   : > { %584 = vrot.lane.b32.xlu0 %v8787_v0, %s8676_s19 }
  0x4f   : > { %604 = vrot.lane.b32.xlu1 %v8800_v3, %s8677_s20 }
  0x50   : > { %600 = vrot.lane.b32.xlu0 %v8790_v1, %s8677_s20 }
  0x53   : > { %612 = vrot.lane.b32.xlu1 %v8797_v2, %s8677_s20 }
  0x54   : > { %608 = vrot.lane.b32.xlu0 %v8787_v0, %s8677_s20 }
  0x57   : > { %462 = vrot.lane.b32.xlu1 %v8855_v4, %s12119_s14 }
  0x58   : > { %458 = vrot.lane.b32.xlu0 %v8858_v5, %s12119_s14 }
  0x5b   : > { %470 = vrot.lane.b32.xlu1 %v8865_v6, %s12119_s14 }
  0x5c   : > { %466 = vrot.lane.b32.xlu0 %v8868_v7, %s12119_s14 }
  0x5f   : > { %486 = vrot.lane.b32.xlu1 %v8855_v4, %s8672_s15 }
  0x60   : > { %482 = vrot.lane.b32.xlu0 %v8858_v5, %s8672_s15 }
  0x63   : > { %494 = vrot.lane.b32.xlu1 %v8865_v6, %s8672_s15 }
  0x64   : > { %490 = vrot.lane.b32.xlu0 %v8868_v7, %s8672_s15  ;;  %s12087_s15 = smov 24  }
  0x67   : > { %510 = vrot.lane.b32.xlu1 %v8855_v4, %s8673_s16 }
  0x68   : > { %506 = vrot.lane.b32.xlu0 %v8858_v5, %s8673_s16 }
  0x6b   : > { %518 = vrot.lane.b32.xlu1 %v8865_v6, %s8673_s16 }
  0x6c   : > { %514 = vrot.lane.b32.xlu0 %v8868_v7, %s8673_s16  ;;  %s12097_s16 = smov 104  }
  0x6f   : > { %534 = vrot.lane.b32.xlu1 %v8855_v4, %s12101_s17 }
  0x70   : > { %530 = vrot.lane.b32.xlu0 %v8858_v5, %s12101_s17 }
  0x73   : > { %542 = vrot.lane.b32.xlu1 %v8865_v6, %s12101_s17 }
  0x74   : > { %538 = vrot.lane.b32.xlu0 %v8868_v7, %s12101_s17 }
  0x77   : > { %558 = vrot.lane.b32.xlu1 %v8855_v4, %s8675_s18 }
  0x78   : > { %554 = vrot.lane.b32.xlu0 %v8858_v5, %s8675_s18 }
  0x7b   : > { %566 = vrot.lane.b32.xlu1 %v8865_v6, %s8675_s18 }
  0x7c   : > { %562 = vrot.lane.b32.xlu0 %v8868_v7, %s8675_s18  ;;  %s12095_s18 = smov 80  }
  0x7f   : > { %582 = vrot.lane.b32.xlu1 %v8855_v4, %s8676_s19 }
  0x80   : > { %578 = vrot.lane.b32.xlu0 %v8858_v5, %s8676_s19 }
  0x83   : > { %590 = vrot.lane.b32.xlu1 %v8865_v6, %s8676_s19 }
  0x84   : > { %586 = vrot.lane.b32.xlu0 %v8868_v7, %s8676_s19  ;;  %s12103_s19 = smov 112  }
  0x87   : > { %606 = vrot.lane.b32.xlu1 %v8855_v4, %s8677_s20 }
  0x88   : > { %602 = vrot.lane.b32.xlu0 %v8858_v5, %s8677_s20 }
  0x8b   : > { %614 = vrot.lane.b32.xlu1 %v8865_v6, %s8677_s20 }
  0x8c   : > { %610 = vrot.lane.b32.xlu0 %v8868_v7, %s8677_s20  ;;  %s12099_s20 = smov 96  }
  0x91   : > { %v8922_v8 = vpop.permute.xlu1 %464 }
  0x92   : > { %v8924_v9 = vpop.permute.xlu0 %456 }
  0x95   : > { %v8926_v10 = vpop.permute.xlu1 %468 }
  0x96   : > { %v8928_v11 = vpop.permute.xlu0 %460 }
  0x99   : > { %v8930_v12 = vpop.permute.xlu1 %484 }
  0x9a   : > { %v8932_v13 = vpop.permute.xlu0 %480  ;;  %v896_v40 = vcombine.low %v8800_v3, %v8930_v12 }
  0x9b   : > { %v624_v43 = vcombine.low %v8790_v1, %v8932_v13 }
  0x9c   : > { %v904_v50 = vrot.slane %v896_v40, %v8980_v42 }
  0x9d   : > { %v8934_v14 = vpop.permute.xlu1 %492  ;;  %v632_v54 = vrot.slane %v624_v43, %v8980_v42 }
  0x9e   : > { %v8936_v15 = vpop.permute.xlu0 %488 }
  0xa1   : > { %v8938_v16 = vpop.permute.xlu1 %508 }
  0xa2   : > { %v8940_v17 = vpop.permute.xlu0 %504  ;;  %v912_v41 = vcombine.low %v8928_v11, %v8938_v16 }
  0xa3   : > { %v640_v35 = vcombine.low %v8924_v9, %v8940_v17 }
  0xa4   : > { %v920_v51 = vrot.slane %v912_v41, %v8980_v42  ;;  %v1168_v41 = vcombine.low %v8787_v0, %v8936_v15 }
  0xa5   : > { %v8942_v18 = vpop.permute.xlu1 %516  ;;  %v648_v44 = vrot.slane %v640_v35, %v8980_v42 }
  0xa6   : > { %v8944_v19 = vpop.permute.xlu0 %512  ;;  %v960_v33 = vcombine.low %v904_v50, %v920_v51 }
  0xa7   : > { %v688_v61 = vcombine.low %v632_v54, %v648_v44  ;;  %v1184_v63 = vcombine.low %v8922_v8, %v8944_v19  ;;  %v689_v39 = vcombine.high %v632_v54, %v648_v44 }
  0xa9   : > { %v8946_v20 = vpop.permute.xlu1 %532  ;;  %v1192_v54 = vrot.slane %v1184_v63, %v8980_v42  ;;  %v703_v34 = vrot.slane %v689_v39, %v9009_v62 }
  0xaa   : > { %v8948_v21 = vpop.permute.xlu0 %528 }
  0xad   : > { %v8950_v22 = vpop.permute.xlu1 %540 }
  0xae   : > { %v8952_v23 = vpop.permute.xlu0 %536 }
  0xb1   : > { %v8954_v24 = vpop.permute.xlu1 %556 }
  0xb2   : > { %v8956_v25 = vpop.permute.xlu0 %552 }
  0xb5   : > { %v8958_v26 = vpop.permute.xlu1 %564 }
  0xb6   : > { %v8960_v27 = vpop.permute.xlu0 %560 }
  0xb9   : > { %v8962_v31 = vpop.permute.xlu1 %580 }
  0xba   : > { %v8964_v32 = vpop.permute.xlu0 %576  ;;  %v928_v45 = vcombine.low %v8946_v20, %v8962_v31 }
  0xbb   : > { %v656_v46 = vcombine.low %v8948_v21, %v8964_v32 }
  0xbc   : > { %v936_v57 = vrot.slane %v928_v45, %v8980_v42 }
  0xbd   : > { %v8971_v36 = vpop.permute.xlu1 %588  ;;  %v664_v58 = vrot.slane %v656_v46, %v8980_v42 }
  0xbe   : > { %v8973_v37 = vpop.permute.xlu0 %584 }
  0xbf   : > { %v1200_v28 = vcombine.low %v8952_v23, %v8973_v37 }
  0xc1   : > { %v8989_v47 = vpop.permute.xlu1 %604 }
  0xc2   : > { %v8991_v48 = vpop.permute.xlu0 %600  ;;  %v944_v52 = vcombine.low %v8954_v24, %v8989_v47 }
  0xc3   : > { %v672_v53 = vcombine.low %v8956_v25, %v8991_v48 }
  0xc4   : > { %v952_v55 = vrot.slane %v944_v52, %v8980_v42  ;;  %v696_v52 = vrot.slane %v688_v61, %v9009_v62  ;;  %v1176_v61 = vrot.slane %v1168_v41, %v8980_v42  ;;  %v1440_v41 = vcombine.low %v8797_v2, %v8934_v14 }
  0xc5   : > { %v680_v56 = vrot.slane %v672_v53, %v8980_v42  ;;  %v9004_v59 = vpop.permute.xlu1 %612 }
  0xc6   : > { %v9006_v60 = vpop.permute.xlu0 %608  ;;  %v992_v38 = vcombine.low %v936_v57, %v952_v55  ;;  %v993_v45 = vcombine.high %v936_v57, %v952_v55 }
  0xc7   : > { %v1216_v29 = vcombine.low %v8960_v27, %v9006_v60  ;;  %v720_v35 = vcombine.low %v664_v58, %v680_v56  ;;  %v721_v40 = vcombine.high %v664_v58, %v680_v56  ;;  %v1208_v56 = vrot.slane %v1200_v28, %v8980_v42 }
  0xc8   : > { %v9027_v30 = vrot.slane %v992_v38, %v9009_v62  ;;  %v961_v58 = vcombine.high %v904_v50, %v920_v51 }
  0xc9   : > { %v1224_v43 = vrot.slane %v1216_v29, %v8980_v42  ;;  %v9020_v46 = vpop.permute.xlu1 %462  ;;  %v728_v53 = vrot.slane %v720_v35, %v9009_v62  ;;  %v735_v44 = vrot.slane %v721_v40, %v9009_v62  ;;  %v968_v29 = vrot.slane %v960_v33, %v9009_v62 }
  0xca   : > { %12148 = vst [vmem:[#allocation7_spill] sm:$0xff] %v9020_v46  ;;  %v9022_v49 = vpop.permute.xlu0 %458  ;;  %v9036_v35 = vrot.slane %v993_v45, %v9009_v62  ;;  %v1488_v33 = vcombine.low %v8958_v26, %v9004_v59  ;;  %v975_v39 = vrot.slane %v961_v58, %v9009_v62  ;;  %v1232_v45 = vcombine.low %v1176_v61, %v1192_v54 }
  0xcb   : > { %12149 = vst [vmem:[#allocation8_spill] sm:$0xff] %v9022_v49  ;;  %v753_v55 = vcombine.high %v696_v52, %v728_v53  ;;  %v752_v57 = vcombine.low %v696_v52, %v728_v53  ;;  %v1264_v38 = vcombine.low %v1208_v56, %v1224_v43  ;;  %v1024_v50 = vcombine.low %v968_v29, %v9027_v30 }
  0xcc   : > { %v754_v51 = vcombine.low %v703_v34, %v735_v44  ;;  %v1456_v52 = vcombine.low %v8926_v10, %v8942_v18  ;;  %v1472_v53 = vcombine.low %v8950_v22, %v8971_v36  ;;  %v755_v58 = vcombine.high %v703_v34, %v735_v44 }
  0xcd   : > { %v9038_v6 = vpop.permute.xlu1 %470  ;;  %v1716_v63 = vsel %vm1712_vm0, %v753_v55, -inf  ;;  %v1713_v28 = vsel %vm1712_vm0, %v752_v57, -inf  ;;  %v1026_v55 = vcombine.low %v975_v39, %v9036_v35  ;;  %v1496_v7 = vrot.slane %v1488_v33, %v8980_v42 }
  0xce   : > { %12150 = vst [vmem:[#allocation9_spill] sm:$0xff] %v9038_v6  ;;  %v9042_v40 = vpop.permute.xlu0 %466  ;;  %1717 = vmax.xlane.f32.xlu1 %v1716_v63  ;;  %1714 = vmax.xlane.f32.xlu0 %v1713_v28  ;;  %v1761_v6 = vsel %vm1712_vm0, %v1024_v50, -inf  ;;  %v1719_v63 = vsel %vm1712_vm0, %v754_v51, -inf  ;;  %v1265_v46 = vcombine.high %v1208_v56, %v1224_v43  ;;  %v1448_v49 = vrot.slane %v1440_v41, %v8980_v42 }
  0xcf   : > { %12151 = vst [vmem:[#allocation10_spill] sm:$0xff] %v9042_v40  ;;  %v9062_v40 = vrot.slane %v1264_v38, %v9009_v62  ;;  %v9067_v5 = vrot.slane %v1232_v45, %v9009_v62  ;;  %v1464_v50 = vrot.slane %v1456_v52, %v8980_v42  ;;  %v1480_v51 = vrot.slane %v1472_v53, %v8980_v42 }
  0xd0   : > { %v673_v34 = vcombine.high %v8956_v25, %v8991_v48  ;;  %v1233_v44 = vcombine.high %v1176_v61, %v1192_v54  ;;  %v1767_v33 = vsel %vm1712_vm0, %v1026_v55, -inf  ;;  %v1025_v56 = vcombine.high %v968_v29, %v9027_v30 }
  0xd1   : > { %v9055_v57 = vpop.permute.xlu1 %486  ;;  %v1296_v41 = vcombine.low %v9067_v5, %v9062_v40  ;;  %v9083_v45 = vrot.slane %v1265_v46, %v9009_v62  ;;  %v1536_v25 = vcombine.low %v1480_v51, %v1496_v7  ;;  %v625_v48 = vcombine.high %v8790_v1, %v8932_v13 }
  0xd2   : > { %v9059_v28 = vpop.permute.xlu0 %482  ;;  %1762 = vmax.xlane.f32.xlu1 %v1761_v6  ;;  %1720 = vmax.xlane.f32.xlu0 %v1719_v63  ;;  %v1722_v6 = vsel %vm1712_vm0, %v755_v58, -inf  ;;  %v641_v54 = vcombine.high %v8924_v9, %v8940_v17  ;;  %v657_v61 = vcombine.high %v8948_v21, %v8964_v32  ;;  %v945_v30 = vcombine.high %v8954_v24, %v8989_v47 }
  0xd3   : > { %v9094_v29 = vrot.slane %v1233_v44, %v9009_v62  ;;  %v1504_v52 = vcombine.low %v1448_v49, %v1464_v50  ;;  %v9097_v46 = vrot.slane %v673_v34, %v8980_v42  ;;  %v1764_v1 = vsel %vm1712_vm0, %v1025_v56, -inf }
  0xd4   : > { %v1809_v13 = vsel %vm1712_vm0, %v1296_v41, -inf  ;;  %v1027_v17 = vcombine.high %v975_v39, %v9036_v35  ;;  %v9109_v24 = vrot.slane %v1536_v25, %v9009_v62  ;;  %v1537_v32 = vcombine.high %v1480_v51, %v1496_v7 }
  0xd5   : > { %v9073_v38 = vpop.permute.xlu1 %494  ;;  %v1298_v21 = vcombine.low %v9094_v29, %v9083_v45  ;;  %v897_v47 = vcombine.high %v8800_v3, %v8930_v12  ;;  %v9114_v55 = vrot.slane %v625_v48, %v8980_v42  ;;  %v913_v63 = vcombine.high %v8928_v11, %v8938_v16 }
  0xd6   : > { %12152 = vst [vmem:[#allocation11_spill] sm:$0xff] %v9073_v38  ;;  %v9077_v43 = vpop.permute.xlu0 %490  ;;  %1768 = vmax.xlane.f32.xlu1 %v1767_v33  ;;  %1723 = vmax.xlane.f32.xlu0 %v1722_v6  ;;  %v9119_v35 = vrot.slane %v641_v54, %v8980_v42  ;;  %v929_v39 = vcombine.high %v8946_v20, %v8962_v31  ;;  %v1770_v11 = vsel %vm1712_vm0, %v1027_v17, -inf }
  0xd7   : > { %v9124_v58 = vrot.slane %v657_v61, %v8980_v42  ;;  %v1512_v7 = vrot.slane %v1504_v52, %v9009_v62  ;;  %v1505_v51 = vcombine.high %v1448_v49, %v1464_v50  ;;  %v9128_v3 = vrot.slane %v945_v30, %v8980_v42 }
  0xd8   : > { %v1217_v12 = vcombine.high %v8960_v27, %v9006_v60  ;;  %v1297_v20 = vcombine.high %v9067_v5, %v9062_v40  ;;  %v1815_v31 = vsel %vm1712_vm0, %v1298_v21, -inf  ;;  %v1551_v50 = vrot.slane %v1537_v32, %v9009_v62 }
  0xd9   : > { %v9099_v53 = vpop.permute.xlu1 %510  ;;  %v1568_v49 = vcombine.low %v1512_v7, %v9109_v24  ;;  %v736_v44 = vcombine.low %v9124_v58, %v9097_v46  ;;  %v9145_v27 = vrot.slane %v897_v47, %v8980_v42  ;;  %v1169_v60 = vcombine.high %v8787_v0, %v8936_v15 }
  0xda   : > { %v9103_v9 = vpop.permute.xlu0 %506  ;;  %1765 = vmax.xlane.f32.xlu0 %v1764_v1  ;;  %1810 = vmax.xlane.f32.xlu1 %v1809_v13  ;;  %v9150_v33 = vrot.slane %v913_v63, %v8980_v42  ;;  %v1185_v5 = vcombine.high %v8922_v8, %v8944_v19  ;;  %v9155_v40 = vrot.slane %v929_v39, %v8980_v42  ;;  %v1812_v8 = vsel %vm1712_vm0, %v1297_v20, -inf }
  0xdb   : > { %v1201_v6 = vcombine.high %v8952_v23, %v8973_v37  ;;  %v1519_v56 = vrot.slane %v1505_v51, %v9009_v62  ;;  %v704_v41 = vcombine.low %v9114_v55, %v9119_v35  ;;  %v1489_v0 = vcombine.high %v8958_v26, %v9004_v59 }
  0xdc   : > { %v9165_v15 = vrot.slane %v1217_v12, %v8980_v42  ;;  %v1299_v23 = vcombine.high %v9094_v29, %v9083_v45  ;;  %v1857_v37 = vsel %vm1712_vm0, %v1568_v49, -inf  ;;  %v744_v54 = vrot.slane %v736_v44, %v9009_v62 }
  0xdd   : > { %v9132_v34 = vpop.permute.xlu1 %518  ;;  %v1570_v48 = vcombine.low %v1519_v56, %v1551_v50  ;;  %v1008_v26 = vcombine.low %v9155_v40, %v9128_v3  ;;  %v1441_v59 = vcombine.high %v8797_v2, %v8934_v14  ;;  %v1457_v61 = vcombine.high %v8926_v10, %v8942_v18 }
  0xde   : > { %12153 = vst [vmem:[#allocation12_spill] sm:$0xff] %v9132_v34  ;;  %v9135_v16 = vpop.permute.xlu0 %514  ;;  %1771 = vmax.xlane.f32.xlu0 %v1770_v11  ;;  %1816 = vmax.xlane.f32.xlu1 %v1815_v31  ;;  %v9183_v30 = vrot.slane %v1185_v5, %v8980_v42  ;;  %v1473_v45 = vcombine.high %v8950_v22, %v8971_v36  ;;  %v1818_v18 = vsel %vm1712_vm0, %v1299_v23, -inf }
  0xdf   : > { %v9188_v29 = vrot.slane %v1201_v6, %v8980_v42  ;;  %v712_v52 = vrot.slane %v704_v41, %v9009_v62  ;;  %v976_v1 = vcombine.low %v9145_v27, %v9150_v33  ;;  %v9194_v2 = vrot.slane %v1169_v60, %v8980_v42 }
  0xe0   : > { %v9197_v10 = vrot.slane %v1489_v0, %v8980_v42  ;;  %v1569_v22 = vcombine.high %v1512_v7, %v9109_v24  ;;  %v1863_v36 = vsel %vm1712_vm0, %v1570_v48, -inf  ;;  %v1016_v21 = vrot.slane %v1008_v26, %v9009_v62 }
  0xe1   : > { %v9167_v25 = vpop.permute.xlu1 %534  ;;  %v756_v17 = vcombine.low %v712_v52, %v744_v54  ;;  %v1280_v32 = vcombine.low %v9188_v29, %v9165_v15  ;;  %v9210_v47 = vrot.slane %v1441_v59, %v8980_v42  ;;  %v9213_v63 = vrot.slane %v1457_v61, %v8980_v42 }
  0xe2   : > { %v9170_v19 = vpop.permute.xlu0 %530  ;;  %1813 = vmax.xlane.f32.xlu0 %v1812_v8  ;;  %1858 = vmax.xlane.f32.xlu1 %v1857_v37  ;;  %v9216_v39 = vrot.slane %v1473_v45, %v8980_v42  ;;  %v984_v24 = vrot.slane %v976_v1, %v9009_v62  ;;  %v1248_v7 = vcombine.low %v9194_v2, %v9183_v30  ;;  %v1860_v12 = vsel %vm1712_vm0, %v1569_v22, -inf }
  0xe3   : > { %v1571_v20 = vcombine.high %v1519_v56, %v1551_v50  ;;  %v1725_v31 = vsel %vm1712_vm0, %v756_v17, -inf  ;;  %v1288_v44 = vrot.slane %v1280_v32, %v9009_v62  ;;  %v1520_v6 = vcombine.low %v9210_v47, %v9213_v63 }
  0xe4   : > { %v1028_v49 = vcombine.low %v984_v24, %v1016_v21  ;;  %v1552_v60 = vcombine.low %v9216_v39, %v9197_v10  ;;  %v1256_v5 = vrot.slane %v1248_v7, %v9009_v62  ;;  %v757_v56 = vcombine.high %v712_v52, %v744_v54 }
  0xe5   : > { %v9199_v14 = vpop.permute.xlu1 %542  ;;  %v1866_v0 = vsel %vm1712_vm0, %v1571_v20, -inf  ;;  %v737_v48 = vcombine.high %v9124_v58, %v9097_v46  ;;  %v1528_v26 = vrot.slane %v1520_v6, %v9009_v62  ;;  %v705_v59 = vcombine.high %v9114_v55, %v9119_v35  ;;  %v12156_v20 = vld [vmem:[#allocation3_spill] sm:$0xff] }
  0xe6   : > { %12154 = vst [vmem:[#allocation13_spill] sm:$0xff] %v9199_v14  ;;  %v9202_v13 = vpop.permute.xlu0 %538  ;;  %1819 = vmax.xlane.f32.xlu0 %v1818_v18  ;;  %1864 = vmax.xlane.f32.xlu1 %v1863_v36  ;;  %v1773_v8 = vsel %vm1712_vm0, %v1028_v49, -inf  ;;  %v1300_v23 = vcombine.low %v1256_v5, %v1288_v44  ;;  %v1560_v37 = vrot.slane %v1552_v60, %v9009_v62  ;;  %v1728_v45 = vsel %vm1712_vm0, %v757_v56, -inf }
  0xe7   : > { %v1029_v52 = vcombine.high %v984_v24, %v1016_v21  ;;  %v1009_v1 = vcombine.high %v9155_v40, %v9128_v3  ;;  %v751_v58 = vrot.slane %v737_v48, %v9009_v62  ;;  %v977_v55 = vcombine.high %v9145_v27, %v9150_v33 }
  0xe8   : > { %v1821_v18 = vsel %vm1712_vm0, %v1300_v23, -inf  ;;  %v1572_v46 = vcombine.low %v1528_v26, %v1560_v37  ;;  %v1301_v35 = vcombine.high %v1256_v5, %v1288_v44  ;;  %v719_v22 = vrot.slane %v705_v59, %v9009_v62 }
  0xe9   : > { %v9221_v51 = vpop.permute.xlu1 %558  ;;  %v1776_v17 = vsel %vm1712_vm0, %v1029_v52, -inf  ;;  %v9263_v3 = vrot.slane %v1009_v1, %v9009_v62  ;;  %v1281_v40 = vcombine.high %v9188_v29, %v9165_v15  ;;  %v9269_v27 = vrot.slane %v977_v55, %v9009_v62  ;;  %v12157_v29 = vld [vmem:[#allocation8_spill] sm:$0xff] }
  0xea   : > { %v9224_v11 = vpop.permute.xlu0 %554  ;;  %1861 = vmax.xlane.f32.xlu0 %v1860_v12  ;;  %1726 = vmax.xlane.f32.xlu1 %v1725_v31  ;;  %v1869_v32 = vsel %vm1712_vm0, %v1572_v46, -inf  ;;  %v758_v24 = vcombine.low %v719_v22, %v751_v58  ;;  %v1249_v33 = vcombine.high %v9194_v2, %v9183_v30  ;;  %v1521_v7 = vcombine.high %v9210_v47, %v9213_v63 }
  0xeb   : > { %v1032_v12 = vcombine.low %v8855_v4, %v9055_v57  ;;  %v760_v15 = vcombine.low %v12156_v20, %v9059_v28  ;;  %v776_v31 = vcombine.low %v12157_v29, %v9103_v9  ;;  %v1824_v49 = vsel %vm1712_vm0, %v1301_v35, -inf }
  0xec   : > { %v1573_v5 = vcombine.high %v1528_v26, %v1560_v37  ;;  %v1030_v30 = vcombine.low %v9269_v27, %v9263_v3  ;;  %v9289_v2 = vrot.slane %v1281_v40, %v9009_v62  ;;  %v1553_v47 = vcombine.high %v9216_v39, %v9197_v10 }
  0xed   : > { %v9233_v41 = vpop.permute.xlu1 %566  ;;  %v1263_v37 = vrot.slane %v1249_v33, %v9009_v62  ;;  %v9304_v10 = vrot.slane %v1521_v7, %v9009_v62  ;;  %v9307_v39 = vrot.slane %v760_v15, %v8980_v42  ;;  %v9310_v48 = vrot.slane %v776_v31, %v8980_v42 }
  0xee   : > { %v9236_v50 = vpop.permute.xlu0 %562  ;;  %1867 = vmax.xlane.f32.xlu0 %v1866_v0  ;;  %1774 = vmax.xlane.f32.xlu1 %v1773_v8  ;;  %v1731_v0 = vsel %vm1712_vm0, %v758_v24, -inf  ;;  %v12158_v8 = vld [vmem:[#allocation7_spill] sm:$0xff]  ;;  %v759_v1 = vcombine.high %v719_v22, %v751_v58  ;;  %v1567_v46 = vrot.slane %v1553_v47, %v9009_v62  ;;  %v9323_v55 = vrot.slane %v1032_v12, %v8980_v42  ;;  %v12160_v22 = vld [vmem:[#allocation10_spill] sm:$0xff] }
  0xef   : > { %v1048_v23 = vcombine.low %v12158_v8, %v9099_v53  ;;  %v1779_v40 = vsel %vm1712_vm0, %v1030_v30, -inf  ;;  %v1320_v33 = vcombine.low %v12160_v22, %v9135_v16 }
  0xf0   : > { %v1734_v30 = vsel %vm1712_vm0, %v759_v1, -inf }
  0xf1   : > { %v9245_v61 = vpop.permute.xlu1 %582  ;;  %v9335_v58 = vrot.slane %v1048_v23, %v8980_v42 }
  0xf2   : > { %v9248_v54 = vpop.permute.xlu0 %578  ;;  %1729 = vmax.xlane.f32.xlu0 %v1728_v45  ;;  %1822 = vmax.xlane.f32.xlu1 %v1821_v18  ;;  %v1064_v26 = vcombine.low %v9167_v25, %v9245_v61  ;;  %v1872_v45 = vsel %vm1712_vm0, %v1573_v5, -inf  ;;  %v1302_v18 = vcombine.low %v1263_v37, %v9289_v2 }
  0xf3   : > { %v792_v63 = vcombine.low %v9170_v19, %v9248_v54 }
  0xf4   : > { %v9344_v15 = vrot.slane %v1064_v26, %v8980_v42  ;;  %v1827_v47 = vsel %vm1712_vm0, %v1302_v18, -inf }
  0xf5   : > { %v9257_v36 = vpop.permute.xlu1 %590  ;;  %v9326_v35 = vrot.slane %v792_v63, %v8980_v42  ;;  %v1031_v63 = vcombine.high %v9269_v27, %v9263_v3  ;;  %v12162_v3 = vld [vmem:[#allocation9_spill] sm:$0xff] }
  0xf6   : > { %12155 = vst [vmem:[#allocation14_spill] sm:$0xff] %v9257_v36  ;;  %v9260_v21 = vpop.permute.xlu0 %586  ;;  %1777 = vmax.xlane.f32.xlu0 %v1776_v17  ;;  %1870 = vmax.xlane.f32.xlu1 %v1869_v32  ;;  %v12159_v32 = vld [vmem:[#allocation5_spill] sm:$0xff]  ;;  %v1592_v27 = vcombine.low %v12162_v3, %v9132_v34  ;;  %v1303_v3 = vcombine.high %v1263_v37, %v9289_v2 }
  0xf7   : > { %v1304_v24 = vcombine.low %v12159_v32, %v9077_v43  ;;  %v1336_v31 = vcombine.low %v9202_v13, %v9260_v21 }
  0xf9   : > { %v9282_v44 = vpop.permute.xlu1 %606  ;;  %v9368_v18 = vrot.slane %v1304_v24, %v8980_v42  ;;  %v1782_v24 = vsel %vm1712_vm0, %v1031_v63, -inf  ;;  %v9396_v63 = vrot.slane %v1592_v27, %v8980_v42 }
  0xfa   : > { %v9284_v60 = vpop.permute.xlu0 %602  ;;  %v1080_v6 = vcombine.low %v9221_v51, %v9282_v44  ;;  %1825 = vmax.xlane.f32.xlu0 %v1824_v49  ;;  %1732 = vmax.xlane.f32.xlu1 %v1731_v0  ;;  %v824_v49 = vcombine.low %v9307_v39, %v9310_v48 }
  0xfb   : > { %v808_v56 = vcombine.low %v9224_v11, %v9284_v60 }
  0xfc   : > { %v9329_v17 = vrot.slane %v1080_v6, %v8980_v42  ;;  %v1574_v6 = vcombine.low %v9304_v10, %v1567_v46 }
  0xfd   : > { %v9315_v59 = vrot.slane %v808_v56, %v8980_v42  ;;  %v9339_v7 = vpop.permute.xlu1 %614 }
  0xfe   : > { %v9318_v52 = vpop.permute.xlu0 %610  ;;  %1873 = vmax.xlane.f32.xlu0 %v1872_v45  ;;  %1780 = vmax.xlane.f32.xlu1 %v1779_v40  ;;  %v1624_v0 = vcombine.low %v9233_v41, %v9339_v7  ;;  %v1128_v26 = vcombine.low %v9344_v15, %v9329_v17  ;;  %v12161_v45 = vld [vmem:[#allocation4_spill] sm:$0xff]  ;;  %v9373_v40 = vrot.slane %v1320_v33, %v8980_v42 }
  0xff   : > { %v1352_v12 = vcombine.low %v9236_v50, %v9318_v52  ;;  %v856_v5 = vcombine.low %v9326_v35, %v9315_v59  ;;  %v1576_v1 = vcombine.low %v12161_v45, %v9073_v38  ;;  %v1096_v45 = vcombine.low %v9323_v55, %v9335_v58 }
 0x100   : > { %v1875_v38 = vsel %vm1712_vm0, %v1574_v6, -inf  ;;  %v9387_v33 = vrot.slane %v1624_v0, %v8980_v42  ;;  %v1368_v37 = vcombine.low %v9368_v18, %v9373_v40  ;;  %v1830_v0 = vsel %vm1712_vm0, %v1303_v3, -inf }
 0x101   : > { %v9360_v56 = vrot.slane %v1352_v12, %v8980_v42  ;;  %v864_v23 = vrot.slane %v856_v5, %v9009_v62  ;;  %v1608_v12 = vcombine.low %v9199_v14, %v9257_v36  ;;  %v9378_v5 = vrot.slane %v1336_v31, %v8980_v42 }
 0x102   : > { %1735 = vmax.xlane.f32.xlu0 %v1734_v30  ;;  %1828 = vmax.xlane.f32.xlu1 %v1827_v47  ;;  %v832_v30 = vrot.slane %v824_v49, %v9009_v62  ;;  %v1136_v14 = vrot.slane %v1128_v26, %v9009_v62  ;;  %v9393_v49 = vrot.slane %v1576_v1, %v8980_v42 }
 0x103   : > { %v1400_v31 = vcombine.low %v9378_v5, %v9360_v56  ;;  %v9399_v6 = vrot.slane %v1608_v12, %v8980_v42  ;;  %v1104_v2 = vrot.slane %v1096_v45, %v9009_v62  ;;  %v1575_v26 = vcombine.high %v9304_v10, %v1567_v46 }
 0x104   : > { %v888_v47 = vcombine.low %v832_v30, %v864_v23  ;;  %v1376_v12 = vrot.slane %v1368_v37, %v9009_v62  ;;  %v1640_v45 = vcombine.low %v9393_v49, %v9396_v63  ;;  %v889_v3 = vcombine.high %v832_v30, %v864_v23 }
 0x105   : > { %v1672_v27 = vcombine.low %v9399_v6, %v9387_v33  ;;  %v1878_v36 = vsel %vm1712_vm0, %v1575_v26, -inf  ;;  %v825_v37 = vcombine.high %v9307_v39, %v9310_v48  ;;  %v1161_v34 = vcombine.high %v1104_v2, %v1136_v14 }
 0x106   : > { %1783 = vmax.xlane.f32.xlu0 %v1782_v24  ;;  %1876 = vmax.xlane.f32.xlu1 %v1875_v38  ;;  %v1737_v1 = vsel %vm1712_vm0, %v888_v47, -inf  ;;  %v1160_v24 = vcombine.low %v1104_v2, %v1136_v14  ;;  %v1408_v38 = vrot.slane %v1400_v31, %v9009_v62  ;;  %v857_v31 = vcombine.high %v9326_v35, %v9315_v59 }
 0x107   : > { %v1680_v47 = vrot.slane %v1672_v27, %v9009_v62  ;;  %v1129_v26 = vcombine.high %v9344_v15, %v9329_v17  ;;  %v839_v59 = vrot.slane %v825_v37, %v9009_v62  ;;  %v1097_v35 = vcombine.high %v9323_v55, %v9335_v58 }
 0x108   : > { %v1785_v10 = vsel %vm1712_vm0, %v1160_v24, -inf  ;;  %v1432_v46 = vcombine.low %v1376_v12, %v1408_v38  ;;  %v871_v30 = vrot.slane %v857_v31, %v9009_v62  ;;  %v809_v39 = vcombine.high %v9224_v11, %v9284_v60 }
 0x109   : > { %v1788_v14 = vsel %vm1712_vm0, %v1161_v34, -inf  ;;  %v1433_v48 = vcombine.high %v1376_v12, %v1408_v38  ;;  %v1401_v2 = vcombine.high %v9378_v5, %v9360_v56  ;;  %v9436_v17 = vrot.slane %v1129_v26, %v9009_v62 }
 0x10a   : > { %1831 = vmax.xlane.f32.xlu0 %v1830_v0  ;;  %1738 = vmax.xlane.f32.xlu1 %v1737_v1  ;;  %v1648_v0 = vrot.slane %v1640_v45, %v9009_v62  ;;  %v1740_v1 = vsel %vm1712_vm0, %v889_v3, -inf  ;;  %v890_v27 = vcombine.low %v839_v59, %v871_v30  ;;  %v793_v15 = vcombine.high %v9170_v19, %v9248_v54 }
 0x10b   : > { %v761_v11 = vcombine.high %v12156_v20, %v9059_v28  ;;  %v777_v34 = vcombine.high %v12157_v29, %v9103_v9  ;;  %v1369_v60 = vcombine.high %v9368_v18, %v9373_v40  ;;  %v1111_v55 = vrot.slane %v1097_v35, %v9009_v62  ;;  %v12167_v35 = vld [vmem:[#allocation14_spill] sm:$0xff] }
 0x10c   : > { %v1704_v23 = vcombine.low %v1648_v0, %v1680_v47  ;;  %v1081_v58 = vcombine.high %v9221_v51, %v9282_v44  ;;  %v9450_v56 = vrot.slane %v809_v39, %v8980_v42  ;;  %v1836_v19 = vsel %vm1712_vm0, %v1433_v48, -inf  ;;  %v12168_v39 = vld [vmem:[#allocation13_spill] sm:$0xff] }
 0x10d   : > { %v1705_v54 = vcombine.high %v1648_v0, %v1680_v47  ;;  %v1673_v28 = vcombine.high %v9399_v6, %v9387_v33  ;;  %v1743_v9 = vsel %vm1712_vm0, %v890_v27, -inf  ;;  %v1162_v20 = vcombine.low %v1111_v55, %v9436_v17 }
 0x10e   : > { %1879 = vmax.xlane.f32.xlu0 %v1878_v36  ;;  %1786 = vmax.xlane.f32.xlu1 %v1785_v10  ;;  %v1833_v36 = vsel %vm1712_vm0, %v1432_v46, -inf  ;;  %v1881_v24 = vsel %vm1712_vm0, %v1704_v23, -inf  ;;  %v1415_v29 = vrot.slane %v1401_v2, %v9009_v62  ;;  %v1033_v18 = vcombine.high %v8855_v4, %v9055_v57 }
 0x10f   : > { %v1049_v51 = vcombine.high %v12158_v8, %v9099_v53  ;;  %v1065_v44 = vcombine.high %v9167_v25, %v9245_v61  ;;  %v9465_v40 = vrot.slane %v793_v15, %v8980_v42  ;;  %v9468_v5 = vrot.slane %v761_v11, %v8980_v42 }
 0x110   : > { %v9471_v33 = vrot.slane %v777_v34, %v8980_v42  ;;  %v1641_v6 = vcombine.high %v9393_v49, %v9396_v63  ;;  %v1383_v4 = vrot.slane %v1369_v60, %v9009_v62  ;;  %v9477_v57 = vrot.slane %v1081_v58, %v8980_v42 }
 0x111   : > { %v872_v53 = vcombine.low %v9465_v40, %v9450_v56  ;;  %v1884_v25 = vsel %vm1712_vm0, %v1705_v54, -inf  ;;  %v891_v61 = vcombine.high %v839_v59, %v871_v30  ;;  %v1353_v8 = vcombine.high %v9236_v50, %v9318_v52  ;;  %v12166_v30 = vld [vmem:[#allocation9_spill] sm:$0xff] }
 0x112   : > { %1741 = vmax.xlane.f32.xlu0 %v1740_v1  ;;  %1834 = vmax.xlane.f32.xlu1 %v1833_v36  ;;  %v1791_v38 = vsel %vm1712_vm0, %v1162_v20, -inf  ;;  %v1434_v12 = vcombine.low %v1383_v4, %v1415_v29  ;;  %v1687_v49 = vrot.slane %v1673_v28, %v9009_v62  ;;  %v9487_v63 = vrot.slane %v1033_v18, %v8980_v42  ;;  %v12164_v1 = vld [vmem:[#allocation4_spill] sm:$0xff] }
 0x113   : > { %v1305_v45 = vcombine.high %v12159_v32, %v9077_v43  ;;  %v9492_v3 = vrot.slane %v1049_v51, %v8980_v42  ;;  %v9495_v10 = vrot.slane %v1065_v44, %v8980_v42  ;;  %v840_v50 = vcombine.low %v9468_v5, %v9471_v33 }
 0x114   : > { %v1321_v52 = vcombine.high %v12160_v22, %v9135_v16  ;;  %v1337_v46 = vcombine.high %v9202_v13, %v9260_v21  ;;  %v1655_v47 = vrot.slane %v1641_v6, %v9009_v62  ;;  %v1625_v32 = vcombine.high %v9233_v41, %v9339_v7  ;;  %v12163_v21 = vld [vmem:[#allocation11_spill] sm:$0xff]  ;;  %v12165_v7 = vld [vmem:[#allocation12_spill] sm:$0xff] }
 0x115   : > { %v1144_v43 = vcombine.low %v9495_v10, %v9477_v57  ;;  %v1746_v31 = vsel %vm1712_vm0, %v891_v61, -inf  ;;  %v1163_v0 = vcombine.high %v1111_v55, %v9436_v17  ;;  %v9511_v37 = vrot.slane %v1353_v8, %v8980_v42 }
 0x116   : > { %1789 = vmax.xlane.f32.xlu0 %v1788_v14  ;;  %1882 = vmax.xlane.f32.xlu1 %v1881_v24  ;;  %v1839_v16 = vsel %vm1712_vm0, %v1434_v12, -inf  ;;  %v1706_v22 = vcombine.low %v1655_v47, %v1687_v49  ;;  %v880_v13 = vrot.slane %v872_v53, %v9009_v62  ;;  %v1577_v36 = vcombine.high %v12164_v1, %v12163_v21 }
 0x117   : > { %v9518_v23 = vrot.slane %v1305_v45, %v8980_v42  ;;  %v1112_v41 = vcombine.low %v9487_v63, %v9492_v3  ;;  %v1593_v26 = vcombine.high %v12166_v30, %v12165_v7  ;;  %v9525_v59 = vrot.slane %v1321_v52, %v8980_v42 }
 0x118   : > { %v1609_v14 = vcombine.high %v12168_v39, %v12167_v35  ;;  %v9530_v48 = vrot.slane %v1337_v46, %v8980_v42  ;;  %v848_v2 = vrot.slane %v840_v50, %v9009_v62  ;;  %v9534_v24 = vrot.slane %v1625_v32, %v8980_v42 }
 0x119   : > { %v1794_v27 = vsel %vm1712_vm0, %v1163_v0, -inf  ;;  %v1435_v17 = vcombine.high %v1383_v4, %v1415_v29  ;;  %v1887_v11 = vsel %vm1712_vm0, %v1706_v22, -inf  ;;  %v1152_v60 = vrot.slane %v1144_v43, %v9009_v62 }
 0x11a   : > { %1837 = vmax.xlane.f32.xlu0 %v1836_v19  ;;  %1744 = vmax.xlane.f32.xlu1 %v1743_v9  ;;  %v1416_v15 = vcombine.low %v9530_v48, %v9511_v37  ;;  %v892_v34 = vcombine.low %v848_v2, %v880_v13  ;;  %v9542_v55 = vrot.slane %v1577_v36, %v8980_v42 }
 0x11b   : > { %v1607_v58 = vrot.slane %v1593_v26, %v8980_v42  ;;  %v1384_v19 = vcombine.low %v9518_v23, %v9525_v59  ;;  %v1623_v54 = vrot.slane %v1609_v14, %v8980_v42  ;;  %v1120_v28 = vrot.slane %v1112_v41, %v9009_v62 }
 0x11c   : > { %v1842_v9 = vsel %vm1712_vm0, %v1435_v17, -inf  ;;  %v1707_v20 = vcombine.high %v1655_v47, %v1687_v49  ;;  %v1749_v18 = vsel %vm1712_vm0, %v892_v34, -inf  ;;  %v1424_v44 = vrot.slane %v1416_v15, %v9009_v62 }
 0x11d   : > { %v1688_v29 = vcombine.low %v1623_v54, %v9534_v24  ;;  %v1164_v51 = vcombine.low %v1120_v28, %v1152_v60  ;;  %v1656_v6 = vcombine.low %v9542_v55, %v1607_v58  ;;  %v1392_v4 = vrot.slane %v1384_v19, %v9009_v62 }
 0x11e   : > { %1885 = vmax.xlane.f32.xlu0 %v1884_v25  ;;  %1792 = vmax.xlane.f32.xlu1 %v1791_v38  ;;  %v1890_v53 = vsel %vm1712_vm0, %v1707_v20, -inf  ;;  %v893_v25 = vcombine.high %v848_v2, %v880_v13  ;;  %v873_v61 = vcombine.high %v9465_v40, %v9450_v56  ;;  %v841_v49 = vcombine.high %v9468_v5, %v9471_v33 }
 0x11f   : > { %v1797_v8 = vsel %vm1712_vm0, %v1164_v51, -inf  ;;  %v1436_v38 = vcombine.low %v1392_v4, %v1424_v44  ;;  %v1696_v12 = vrot.slane %v1688_v29, %v9009_v62  ;;  %v1664_v45 = vrot.slane %v1656_v6, %v9009_v62 }
 0x120   : > { %v1752_v50 = vsel %vm1712_vm0, %v893_v25, -inf  ;;  %v1165_v52 = vcombine.high %v1120_v28, %v1152_v60  ;;  %v1145_v46 = vcombine.high %v9495_v10, %v9477_v57  ;;  %v887_v47 = vrot.slane %v873_v61, %v9009_v62 }
 0x121   : > { %v1845_v56 = vsel %vm1712_vm0, %v1436_v38, -inf  ;;  %v1708_v40 = vcombine.low %v1664_v45, %v1696_v12  ;;  %v1113_v43 = vcombine.high %v9487_v63, %v9492_v3  ;;  %v855_v5 = vrot.slane %v841_v49, %v9009_v62 }
 0x122   : > { %1747 = vmax.xlane.f32.xlu0 %v1746_v31  ;;  %1840 = vmax.xlane.f32.xlu1 %v1839_v16  ;;  %v1800_v33 = vsel %vm1712_vm0, %v1165_v52, -inf  ;;  %v1437_v32 = vcombine.high %v1392_v4, %v1424_v44  ;;  %v1417_v31 = vcombine.high %v9530_v48, %v9511_v37  ;;  %v1159_v0 = vrot.slane %v1145_v46, %v9009_v62 }
 0x123   : > { %v1893_v57 = vsel %vm1712_vm0, %v1708_v40, -inf  ;;  %v894_v10 = vcombine.low %v855_v5, %v887_v47  ;;  %v1385_v16 = vcombine.high %v9518_v23, %v9525_v59  ;;  %v1127_v63 = vrot.slane %v1113_v43, %v9009_v62 }
 0x124   : > { %v1848_v3 = vsel %vm1712_vm0, %v1437_v32, -inf  ;;  %v1709_v22 = vcombine.high %v1664_v45, %v1696_v12  ;;  %v1689_v13 = vcombine.high %v1623_v54, %v9534_v24  ;;  %v1431_v1 = vrot.slane %v1417_v31, %v9009_v62 }
 0x125   : > { %v1755_v37 = vsel %vm1712_vm0, %v894_v10, -inf  ;;  %v1166_v21 = vcombine.low %v1127_v63, %v1159_v0  ;;  %v1657_v36 = vcombine.high %v9542_v55, %v1607_v58  ;;  %v1399_v41 = vrot.slane %v1385_v16, %v9009_v62 }
 0x126   : > { %1795 = vmax.xlane.f32.xlu0 %v1794_v27  ;;  %1888 = vmax.xlane.f32.xlu1 %v1887_v11  ;;  %v1896_v23 = vsel %vm1712_vm0, %v1709_v22, -inf  ;;  %v895_v7 = vcombine.high %v855_v5, %v887_v47  ;;  %v1703_v59 = vrot.slane %v1689_v13, %v9009_v62  ;;  %v1167_v14 = vcombine.high %v1127_v63, %v1159_v0 }
 0x127   : > { %v1803_v30 = vsel %vm1712_vm0, %v1166_v21, -inf  ;;  %v1438_v26 = vcombine.low %v1399_v41, %v1431_v1  ;;  %v1671_v35 = vrot.slane %v1657_v36, %v9009_v62  ;;  %v1439_v27 = vcombine.high %v1399_v41, %v1431_v1 }
 0x128   : > { %v1758_v39 = vsel %vm1712_vm0, %v895_v7, -inf  ;;  %v1806_v24 = vsel %vm1712_vm0, %v1167_v14, -inf  ;;  %v12169_v14 = vlaneseq }
 0x129   : > { %v1851_v48 = vsel %vm1712_vm0, %v1438_v26, -inf  ;;  %v1710_v2 = vcombine.low %v1671_v35, %v1703_v59  ;;  %v1854_v15 = vsel %vm1712_vm0, %v1439_v27, -inf  ;;  %v1711_v11 = vcombine.high %v1671_v35, %v1703_v59 }
 0x12a   : > { %1843 = vmax.xlane.f32.xlu0 %v1842_v9  ;;  %1750 = vmax.xlane.f32.xlu1 %v1749_v18 }
 0x12b   : > { %v1899_v17 = vsel %vm1712_vm0, %v1710_v2, -inf  ;;  %v1902_v34 = vsel %vm1712_vm0, %v1711_v11, -inf  ;;  %vm2809_vm0 = vcmask 64512  }
 0x12e   : > { %1891 = vmax.xlane.f32.xlu0 %v1890_v53  ;;  %1798 = vmax.xlane.f32.xlu1 %v1797_v8 }
 0x132   : > { %1753 = vmax.xlane.f32.xlu0 %v1752_v50  ;;  %1846 = vmax.xlane.f32.xlu1 %v1845_v56 }
 0x136   : > { %1801 = vmax.xlane.f32.xlu0 %v1800_v33  ;;  %1894 = vmax.xlane.f32.xlu1 %v1893_v57 }
 0x13a   : > { %1849 = vmax.xlane.f32.xlu0 %v1848_v3  ;;  %1756 = vmax.xlane.f32.xlu1 %v1755_v37 }
 0x13e   : > { %1897 = vmax.xlane.f32.xlu0 %v1896_v23  ;;  %1804 = vmax.xlane.f32.xlu1 %v1803_v30 }
 0x142   : > { %1759 = vmax.xlane.f32.xlu0 %v1758_v39  ;;  %1852 = vmax.xlane.f32.xlu1 %v1851_v48  ;;  %v2035_v48 = vand.u32 127, %v12169_v14 }
 0x146   : > { %1807 = vmax.xlane.f32.xlu0 %v1806_v24  ;;  %1900 = vmax.xlane.f32.xlu1 %v1899_v17 }
 0x14a   : > { %1855 = vmax.xlane.f32.xlu0 %v1854_v15 }
 0x14e   : > { %1903 = vmax.xlane.f32.xlu0 %v1902_v34 }
 0x15b   : > { %v1718_v60 = vpop.xlane.xlu1 %1717  ;;  %v1715_v55 = vpop.xlane.xlu0 %1714 }
 0x15c   : > { %v9631_v23 = vmax.f32 %v1715_v55, %v1718_v60 }
 0x15e   : > { %v1938_v2 = vpack.c.bf16 %v9631_v23, %v9631_v23 }
 0x15f   : > { %v1763_v58 = vpop.xlane.xlu1 %1762  ;;  %v1721_v19 = vpop.xlane.xlu0 %1720 }
 0x163   : > { %v1769_v54 = vpop.xlane.xlu1 %1768  ;;  %v1724_v28 = vpop.xlane.xlu0 %1723 }
 0x164   : > { %v9627_v36 = vmax.f32 %v1721_v19, %v1724_v28 }
 0x166   : > { %v1939_v30 = vpack.c.bf16 %v9627_v36, %v9627_v36 }
 0x167   : > { %v1811_v9 = vpop.xlane.xlu1 %1810  ;;  %v1766_v20 = vpop.xlane.xlu0 %1765 }
 0x168   : > { %v9639_v59 = vmax.f32 %v1763_v58, %v1766_v20  ;;  %v2003_v17 = vunpack.c.l.b16 %v1939_v30  ;;  %v12170_v58 = vld [vmem:[#allocation6_spill] sm:$0xff] }
 0x169   : > { %v9661_v19 = vsub.s32 %v2035_v48, %v12170_v58 }
 0x16a   : > { %v1946_v11 = vpack.c.bf16 %v9639_v59, %v9639_v59 }
 0x16b   : > { %v1772_v29 = vpop.xlane.xlu0 %1771  ;;  %v1817_v18 = vpop.xlane.xlu1 %1816  ;;  %12171 = vst [vmem:[#allocation3_spill] sm:$0xff] %v9661_v19 }
 0x16c   : > { %v9637_v26 = vmax.f32 %v1769_v54, %v1772_v29  ;;  %v2002_v54 = vunpack.c.l.b16 %v1938_v2  ;;  %v2010_v30 = vunpack.c.l.b16 %v1946_v11 }
 0x16e   : > { %v1947_v15 = vpack.c.bf16 %v9637_v26, %v9637_v26  ;;  %v2039_v14 = vrot.slane %v2002_v54, %v9661_v19 }
 0x16f   : > { %v1814_v51 = vpop.xlane.xlu0 %1813  ;;  %v1859_v44 = vpop.xlane.xlu1 %1858 }
 0x170   : > { %v9648_v27 = vmax.f32 %v1811_v9, %v1814_v51 }
 0x172   : > { %v1954_v29 = vpack.c.bf16 %v9648_v27, %v9648_v27 }
 0x173   : > { %v1820_v6 = vpop.xlane.xlu0 %1819  ;;  %v1865_v4 = vpop.xlane.xlu1 %1864 }
 0x174   : > { %v9641_v35 = vmax.f32 %v1817_v18, %v1820_v6  ;;  %v2043_v6 = vrot.slane %v2003_v17, %v9661_v19 }
 0x176   : > { %v1955_v34 = vpack.c.bf16 %v9641_v35, %v9641_v35 }
 0x177   : > { %v1862_v53 = vpop.xlane.xlu0 %1861  ;;  %v1727_v25 = vpop.xlane.xlu1 %1726 }
 0x178   : > { %v9663_v28 = vmax.f32 %v1859_v44, %v1862_v53  ;;  %v2019_v44 = vunpack.c.l.b16 %v1955_v34 }
 0x17a   : > { %v2107_v17 = vrot.slane %v2019_v44, %v9661_v19 }
 0x17b   : > { %v1868_v61 = vpop.xlane.xlu0 %1867  ;;  %v1775_v8 = vpop.xlane.xlu1 %1774 }
 0x17c   : > { %v9671_v18 = vmax.f32 %v1865_v4, %v1868_v61  ;;  %v1962_v4 = vpack.c.bf16 %v9663_v28, %v9663_v28 }
 0x17e   : > { %v9707_v54 = vunpack.c.l.b16 %v1962_v4 }
 0x17f   : > { %v1730_v38 = vpop.xlane.xlu0 %1729  ;;  %v1823_v12 = vpop.xlane.xlu1 %1822 }
 0x180   : > { %v9656_v60 = vmax.f32 %v1727_v25, %v1730_v38  ;;  %v2011_v25 = vunpack.c.l.b16 %v1947_v15 }
 0x182   : > { %v1940_v53 = vpack.c.bf16 %v9656_v60, %v9656_v60  ;;  %v2075_v48 = vrot.slane %v2011_v25, %v9661_v19 }
 0x183   : > { %v1778_v49 = vpop.xlane.xlu0 %1777  ;;  %v9595_v45 = vpop.xlane.xlu1 %1870 }
 0x184   : > { %v9665_v9 = vmax.f32 %v1775_v8, %v1778_v49  ;;  %v2004_v15 = vunpack.c.l.b16 %v1940_v53 }
 0x186   : > { %v1948_v61 = vpack.c.bf16 %v9665_v9, %v9665_v9 }
 0x187   : > { %v1826_v50 = vpop.xlane.xlu0 %1825  ;;  %v1733_v52 = vpop.xlane.xlu1 %1732 }
 0x188   : > { %v9673_v51 = vmax.f32 %v1823_v12, %v1826_v50 }
 0x18b   : > { %v9597_v46 = vpop.xlane.xlu0 %1873  ;;  %v1781_v56 = vpop.xlane.xlu1 %1780 }
 0x18c   : > { %v9699_v2 = vmax.f32 %v9595_v45, %v9597_v46 }
 0x18e   : > { %v1964_v4 = vpack.c.bf16 %v9699_v2, %v9699_v2 }
 0x18f   : > { %v1736_v40 = vpop.xlane.xlu0 %1735  ;;  %v1829_v47 = vpop.xlane.xlu1 %1828 }
 0x190   : > { %v9676_v38 = vmax.f32 %v1733_v52, %v1736_v40  ;;  %v2018_v52 = vunpack.c.l.b16 %v1954_v29  ;;  %v1963_v40 = vpack.c.bf16 %v9671_v18, %v9671_v18  ;;  %v2012_v29 = vunpack.c.l.b16 %v1948_v61 }
 0x192   : > { %v2103_v25 = vrot.slane %v2018_v52, %v9661_v19  ;;  %v2047_v52 = vrot.slane %v2004_v15, %v9661_v19 }
 0x193   : > { %v1784_v43 = vpop.xlane.xlu0 %1783  ;;  %v9599_v5 = vpop.xlane.xlu1 %1876 }
 0x194   : > { %v9680_v8 = vmax.f32 %v1781_v56, %v1784_v43  ;;  %v1956_v56 = vpack.c.bf16 %v9673_v51, %v9673_v51  ;;  %v2165_v43 = vsel %vm2164_vm1, %v2043_v6, %v2039_v14 }
 0x196   : > { %v1949_v11 = vpack.c.bf16 %v9680_v8, %v9680_v8  ;;  %v2020_v44 = vunpack.c.l.b16 %v1956_v56 }
 0x197   : > { %v1832_v33 = vpop.xlane.xlu0 %1831  ;;  %v9601_v32 = vpop.xlane.xlu1 %1738 }
 0x198   : > { %v9687_v12 = vmax.f32 %v1829_v47, %v1832_v33  ;;  %v1941_v47 = vpack.c.bf16 %v9676_v38, %v9676_v38  ;;  %v2071_v33 = vrot.slane %v2010_v30, %v9661_v19  ;;  %v9718_v30 = vunpack.c.l.b16 %v1963_v40 }
 0x199   : > { %v2013_v40 = vunpack.c.l.b16 %v1949_v11 }
 0x19a   : > { %12172 = vst [vmem:[#allocation8_spill] sm:$0xff] %v9687_v12  ;;  %v1957_v45 = vpack.c.bf16 %v9687_v12, %v9687_v12  ;;  %v2176_v14 = vsel %vm2164_vm1, %v2075_v48, %v2071_v33  ;;  %v2005_v61 = vunpack.c.l.b16 %v1941_v47 }
 0x19b   : > { %v9603_v31 = vpop.xlane.xlu0 %1879  ;;  %v9605_v57 = vpop.xlane.xlu1 %1786 }
 0x19c   : > { %v2021_v48 = vunpack.c.l.b16 %v1957_v45  ;;  %v2051_v15 = vrot.slane %v2005_v61, %v9661_v19  ;;  %v9754_v11 = vmax.f32 %v9599_v5, %v9603_v31  ;;  %v2167_v45 = vsel %vm2166_vm2, %v2047_v52, %v2165_v43 }
 0x19e   : > { %v2115_v5 = vrot.slane %v2021_v48, %v9661_v19 }
 0x19f   : > { %v9607_v10 = vpop.xlane.xlu0 %1741  ;;  %v9609_v0 = vpop.xlane.xlu1 %1834 }
 0x1a0   : > { %v9713_v46 = vmax.f32 %v9601_v32, %v9607_v10  ;;  %v2182_v10 = vsel %vm2164_vm1, %v2107_v17, %v2103_v25  ;;  %v9749_v17 = vunpack.c.l.b16 %v1964_v4  ;;  %v2083_v25 = vrot.slane %v2013_v40, %v9661_v19 }
 0x1a2   : > { %v1942_v47 = vpack.c.bf16 %v9713_v46, %v9713_v46 }
 0x1a3   : > { %v9611_v16 = vpop.xlane.xlu0 %1789  ;;  %v9613_v63 = vpop.xlane.xlu1 %1882 }
 0x1a4   : > { %v9722_v53 = vmax.f32 %v9605_v57, %v9611_v16  ;;  %v2079_v16 = vrot.slane %v2012_v29, %v9661_v19  ;;  %v2006_v31 = vunpack.c.l.b16 %v1942_v47 }
 0x1a6   : > { %v2177_v4 = vsel %vm2166_vm2, %v2079_v16, %v2176_v14 }
 0x1a7   : > { %v9615_v3 = vpop.xlane.xlu0 %1837  ;;  %v9617_v22 = vpop.xlane.xlu1 %1744 }
 0x1a8   : > { %v9769_v61 = vmax.f32 %v9609_v0, %v9615_v3  ;;  %v2169_v0 = vsel %vm12086_vm3, %v2051_v15, %v2167_v45  ;;  %v1965_v3 = vpack.c.bf16 %v9754_v11, %v9754_v11 }
 0x1aa   : > { %v1958_v15 = vpack.c.bf16 %v9769_v61, %v9769_v61 }
 0x1ab   : > { %v9619_v13 = vpop.xlane.xlu0 %1885  ;;  %v9621_v37 = vpop.xlane.xlu1 %1792 }
 0x1af   : > { %v9623_v21 = vpop.xlane.xlu0 %1747  ;;  %v9625_v1 = vpop.xlane.xlu1 %1840 }
 0x1b0   : > { %v9729_v32 = vmax.f32 %v9617_v22, %v9623_v21  ;;  %v2111_v21 = vrot.slane %v2020_v44, %v9661_v19 }
 0x1b2   : > { %v1943_v29 = vpack.c.bf16 %v9729_v32, %v9729_v32  ;;  %v2183_v43 = vsel %vm2166_vm2, %v2111_v21, %v2182_v10  ;;  %v2178_v10 = vsel %vm12086_vm3, %v2083_v25, %v2177_v4  ;;  %v9798_v25 = vmax.f32 %v9613_v63, %v9619_v13 }
 0x1b3   : > { %v9629_v41 = vpop.xlane.xlu0 %1795  ;;  %v9633_v7 = vpop.xlane.xlu1 %1888  ;;  %v2184_v21 = vsel %vm12086_vm3, %v2115_v5, %v2183_v43 }
 0x1b4   : > { %v2007_v40 = vunpack.c.l.b16 %v1943_v29 }
 0x1b6   : > { %v2059_v4 = vrot.slane %v2007_v40, %v9661_v19 }
 0x1b7   : > { %v9643_v39 = vpop.xlane.xlu0 %1843  ;;  %v1751_v24 = vpop.xlane.xlu1 %1750 }
 0x1bb   : > { %v9658_v55 = vpop.xlane.xlu0 %1891  ;;  %v9667_v20 = vpop.xlane.xlu1 %1798 }
 0x1bc   : > { %v9807_v5 = vmax.f32 %v9633_v7, %v9658_v55  ;;  %v1966_v55 = vpack.c.bf16 %v9798_v25, %v9798_v25 }
 0x1bf   : > { %v1754_v49 = vpop.xlane.xlu0 %1753  ;;  %v9689_v50 = vpop.xlane.xlu1 %1846 }
 0x1c0   : > { %v9733_v56 = vmax.f32 %v1751_v24, %v1754_v49  ;;  %v1950_v24 = vpack.c.bf16 %v9722_v53, %v9722_v53  ;;  %v9747_v49 = vmax.f32 %v9621_v37, %v9629_v41 }
 0x1c2   : > { %12173 = vst [vmem:[#allocation7_spill] sm:$0xff] %v9733_v56  ;;  %v1944_v37 = vpack.c.bf16 %v9733_v56, %v9733_v56  ;;  %v2014_v52 = vunpack.c.l.b16 %v1950_v24  ;;  %v2055_v24 = vrot.slane %v2006_v31, %v9661_v19 }
 0x1c3   : > { %v1802_v34 = vpop.xlane.xlu0 %1801  ;;  %v9715_v6 = vpop.xlane.xlu1 %1894 }
 0x1c4   : > { %v9763_v41 = vmax.f32 %v9667_v20, %v1802_v34  ;;  %v1951_v20 = vpack.c.bf16 %v9747_v49, %v9747_v49  ;;  %v9776_v34 = vmax.f32 %v9625_v1, %v9643_v39  ;;  %v2008_v16 = vunpack.c.l.b16 %v1944_v37 }
 0x1c5   : > { %v2087_v29 = vrot.slane %v2014_v52, %v9661_v19 }
 0x1c6   : > { %12174 = vst [vmem:[#allocation5_spill] sm:$0xff] %v9763_v41  ;;  %v1952_v48 = vpack.c.bf16 %v9763_v41, %v9763_v41  ;;  %v2015_v37 = vunpack.c.l.b16 %v1951_v20  ;;  %v2063_v31 = vrot.slane %v2008_v16, %v9661_v19  ;;  %v2171_v20 = vsel %vm12085_vm4, %v2055_v24, %v2169_v0 }
 0x1c7   : > { %v1850_v12 = vpop.xlane.xlu0 %1849  ;;  %v1757_v33 = vpop.xlane.xlu1 %1756  ;;  %v2179_v7 = vsel %vm12085_vm4, %v2087_v29, %v2178_v10 }
 0x1c8   : > { %v9787_v1 = vmax.f32 %v9689_v50, %v1850_v12  ;;  %v1959_v12 = vpack.c.bf16 %v9776_v34, %v9776_v34  ;;  %v9802_v50 = vunpack.c.l.b16 %v1965_v3  ;;  %v2016_v43 = vunpack.c.l.b16 %v1952_v48 }
 0x1c9   : > { %v2022_v3 = vunpack.c.l.b16 %v1958_v15  ;;  %v2091_v16 = vrot.slane %v2015_v37, %v9661_v19 }
 0x1ca   : > { %12175 = vst [vmem:[#allocation10_spill] sm:$0xff] %v9787_v1  ;;  %v1960_v63 = vpack.c.bf16 %v9787_v1, %v9787_v1  ;;  %v2023_v48 = vunpack.c.l.b16 %v1959_v12  ;;  %v2095_v24 = vrot.slane %v2016_v43, %v9661_v19  ;;  %v12182_v43 = vmov 0 }
 0x1cb   : > { %v1898_v44 = vpop.xlane.xlu0 %1897  ;;  %v1805_v39 = vpop.xlane.xlu1 %1804  ;;  %v12183_v43 = vsel %vm9845_vm12, 4294967295, %v12182_v43 }
 0x1cc   : > { %v9815_v13 = vmax.f32 %v9715_v6, %v1898_v44  ;;  %v1967_v6 = vpack.c.bf16 %v9807_v5, %v9807_v5  ;;  %v2024_v10 = vunpack.c.l.b16 %v1960_v63  ;;  %12184 = vst [vmem:[#allocation14_spill] sm:$0xff] %v12183_v43  ;;  %v2030_v63 = vunpack.c.l.b16 %v1966_v55 }
 0x1ce   : > { %12177 = vst [vmem:[#allocation4_spill] sm:$0xff] %v9815_v13  ;;  %v1968_v15 = vpack.c.bf16 %v9815_v13, %v9815_v13  ;;  %v2031_v22 = vunpack.c.l.b16 %v1967_v6 }
 0x1cf   : > { %v1760_v47 = vpop.xlane.xlu0 %1759  ;;  %v1853_v14 = vpop.xlane.xlu1 %1852 }
 0x1d0   : > { %v9793_v45 = vmax.f32 %v1757_v33, %v1760_v47 }
 0x1d2   : > { %12176 = vst [vmem:[#allocation11_spill] sm:$0xff] %v9793_v45  ;;  %v1945_v33 = vpack.c.bf16 %v9793_v45, %v9793_v45 }
 0x1d3   : > { %v1808_v52 = vpop.xlane.xlu0 %1807 }
 0x1d4   : > { %v2009_v40 = vunpack.c.l.b16 %v1945_v33  ;;  %v9818_v47 = vmax.f32 %v1805_v39, %v1808_v52  ;;  %v2173_v39 = vsel %vm12084_vm5, %v2059_v4, %v2171_v20  ;;  %v2119_v33 = vrot.slane %v2022_v3, %v9661_v19 }
 0x1d5   : > { %v2175_v37 = vsel %vm12083_vm6, %v2063_v31, %v2173_v39  ;;  %v2147_v31 = vrot.slane %v9802_v50, %v9661_v19  ;;  %v2123_v20 = vrot.slane %v2023_v48, %v9661_v19  ;;  %v2180_v39 = vsel %vm12084_vm5, %v2091_v16, %v2179_v7 }
 0x1d6   : > { %12178 = vst [vmem:[#allocation12_spill] sm:$0xff] %v9818_v47  ;;  %v2067_v44 = vrot.slane %v2009_v40, %v9661_v19  ;;  %v1953_v0 = vpack.c.bf16 %v9818_v47, %v9818_v47  ;;  %v2181_v55 = vsel %vm12083_vm6, %v2095_v24, %v2180_v39  ;;  %v2185_v7 = vsel %vm12085_vm4, %v2119_v33, %v2184_v21 }
 0x1d7   : > { %v1856_v29 = vpop.xlane.xlu0 %1855  ;;  %v2186_v24 = vsel %vm12084_vm5, %v2123_v20, %v2185_v7  ;;  %v2155_v21 = vrot.slane %v2031_v22, %v9661_v19 }
 0x1d8   : > { %v2017_v52 = vunpack.c.l.b16 %v1953_v0  ;;  %v9841_v40 = vmax.f32 %v1853_v14, %v1856_v29  ;;  %v2194_v4 = vpack.c.b16 %v2067_v44, %v2175_v37  ;;  %v2127_v0 = vrot.slane %v2024_v10, %v9661_v19  ;;  %v1901_v37 = vpop.xlane.xlu1 %1900 }
 0x1d9   : > { %v2032_v29 = vunpack.c.l.b16 %v1968_v15  ;;  %v12186_v10 = vrot.slane %v9707_v54, %v9661_v19  ;;  %v12187_v15 = vrot.slane %v9718_v30, %v9661_v19  ;;  %v12188_v54 = vrot.slane %v9749_v17, %v9661_v19 }
 0x1da   : > { %12181 = vst [vmem:[#allocation9_spill] sm:$0xff] %v9841_v40  ;;  %v2099_v3 = vrot.slane %v2017_v52, %v9661_v19  ;;  %v1961_v14 = vpack.c.bf16 %v9841_v40, %v9841_v40  ;;  %v2205_v44 = vsel %vm9836_vm11, 0, %v2194_v4  ;;  %v2151_v4 = vrot.slane %v2030_v63, %v9661_v19 }
 0x1db   : > { %v1904_v57 = vpop.xlane.xlu0 %1903  ;;  %v2212_v50 = vsel %vm9845_vm12, %v2205_v44, 0  ;;  %v2188_v52 = vsel %vm2164_vm1, %v12187_v15, %v12186_v10  ;;  %v2187_v22 = vsel %vm12083_vm6, %v2127_v0, %v2186_v24 }
 0x1dc   : > { %v2025_v16 = vunpack.c.l.b16 %v1961_v14  ;;  %v9863_v48 = vmax.f32 %v1901_v37, %v1904_v57  ;;  %2220 = vrot.lane.b32.xlu1 %v2212_v50, %s12123_s21  ;;  %v2195_v6 = vpack.c.b16 %v2099_v3, %v2181_v55  ;;  %v2189_v30 = vsel %vm2166_vm2, %v12188_v54, %v2188_v52 }
 0x1dd   : > { %v2159_v3 = vrot.slane %v2032_v29, %v9661_v19  ;;  %v2190_v20 = vsel %vm12086_vm3, %v2147_v31, %v2189_v30  ;;  %vm12127_vm3 = vcmask 293888  }
 0x1de   : > { %12185 = vst [vmem:[#allocation13_spill] sm:$0xff] %v9863_v48  ;;  %v2131_v57 = vrot.slane %v2025_v16, %v9661_v19  ;;  %v1969_v33 = vpack.c.bf16 %v9863_v48, %v9863_v48  ;;  %v2206_v39 = vsel %vm9836_vm11, 0, %v2195_v6  ;;  %v2191_v37 = vsel %vm12085_vm4, %v2151_v4, %v2190_v20 }
 0x1df   : > { %v2213_v63 = vsel %vm9845_vm12, %v2206_v39, 0  ;;  %v2192_v29 = vsel %vm12084_vm5, %v2155_v21, %v2191_v37  ;;  %vm12129_vm5 = vcmask 457728   ;;  %vm12128_vm4 = vcmask 1041408  }
 0x1e0   : > { %v2033_v14 = vunpack.c.l.b16 %v1969_v33  ;;  %2222 = vrot.lane.b32.xlu0 %v2213_v63, %s12123_s21  ;;  %v2196_v44 = vpack.c.b16 %v2131_v57, %v2187_v22  ;;  %v2193_v0 = vsel %vm12083_vm6, %v2159_v3, %v2192_v29  ;;  %vm12130_vm6 = vcmask 392192  }
 0x1e2   : > { %v2163_v50 = vrot.slane %v2033_v14, %v9661_v19  ;;  %v2207_v17 = vsel %vm9836_vm11, 0, %v2196_v44 }
 0x1e3   : > { %v2214_v55 = vsel %vm9845_vm12, %v2207_v17, 0 }
 0x1e4   : > { %2224 = vrot.lane.b32.xlu1 %v2214_v55, %s12123_s21  ;;  %v2197_v31 = vpack.c.b16 %v2163_v50, %v2193_v0 }
 0x1e6   : > { %v2208_v7 = vsel %vm9836_vm11, 0, %v2197_v31 }
 0x1e7   : > { %v2215_v16 = vsel %vm9845_vm12, %v2208_v7, 0 }
 0x1e8   : > { %2226 = vrot.lane.b32.xlu1 %v2215_v16, %s12123_s21 }
 0x24e   : > { %v2221_v6 = vpop.permute.xlu1 %2220 }
 0x24f   : > { %v2231_v10 = vsel %vm2228_vm13, 0, %v2221_v6 }
 0x250   : > { %v9907_v15 = vsel %vm2238_vm14, %v2231_v10, 0 }
 0x251   : > { %2251 = vrot.lane.b32.xlu0 %v9907_v15, %s12121_s22  ;;  %v2277_v3 = vshll.u32 %v9907_v15, 16  ;;  %v9934_v63 = vrot.slane %v9907_v15, 1  ;;  %v2275_v50 = vshrl.u32 %v9907_v15, 16 }
 0x252   : > { %v2223_v52 = vpop.permute.xlu0 %2222 }
 0x253   : > { %v2233_v4 = vsel %vm2228_vm13, 0, %v2223_v52  ;;  %v2279_v22 = vrot.slane %v2277_v3, 1 }
 0x254   : > { %v9913_v24 = vsel %vm2238_vm14, %v2233_v4, 0 }
 0x255   : > { %2253 = vrot.lane.b32.xlu1 %v9913_v24, %s12121_s22  ;;  %v9943_v14 = vrot.slane %v9913_v24, 1  ;;  %v2283_v37 = vshll.u32 %v9913_v24, 16  ;;  %v2280_v17 = vor.u32 %v2279_v22, %v2275_v50  ;;  %v2281_v16 = vshrl.u32 %v9913_v24, 16 }
 0x256   : > { %v2225_v21 = vpop.permute.xlu1 %2224 }
 0x257   : > { %v2235_v57 = vsel %vm2228_vm13, 0, %v2225_v21  ;;  %v2285_v0 = vrot.slane %v2283_v37, 1 }
 0x258   : > { %v9919_v33 = vsel %vm2238_vm14, %v2235_v57, 0  ;;  %v12071_v57 = vmov 0  }
 0x259   : > { %2255 = vrot.lane.b32.xlu0 %v9919_v33, %s12121_s22  ;;  %v9940_v20 = vrot.slane %v9919_v33, 1  ;;  %v2289_v44 = vshll.u32 %v9919_v33, 16  ;;  %v2287_v7 = vshrl.u32 %v9919_v33, 16  ;;  %v2286_v10 = vor.u32 %v2285_v0, %v2281_v16  ;;  %8562 = vset.pattern.permute.xlu1 %v12071_v57 }
 0x25a   : > { %v2227_v39 = vpop.permute.xlu1 %2226  ;;  %8561 = vset.pattern.permute.xlu0 %v12071_v57 }
 0x25b   : > { %v2237_v54 = vsel %vm2228_vm13, 0, %v2227_v39  ;;  %v2291_v55 = vrot.slane %v2289_v44, 1 }
 0x25c   : > { %v2245_v30 = vsel %vm2238_vm14, %v2237_v54, 0 }
 0x25d   : > { %2263 = vrot.lane.b32.xlu0 %v9907_v15, %s12119_s14  ;;  %2257 = vrot.lane.b32.xlu1 %v2245_v30, %s12121_s22  ;;  %v9952_v29 = vrot.slane %v2245_v30, 1  ;;  %v2295_v31 = vshll.u32 %v2245_v30, 16  ;;  %v2292_v6 = vor.u32 %v2291_v55, %v2287_v7  ;;  %v2293_v4 = vshrl.u32 %v2245_v30, 16 }
 0x25f   : > { %v2297_v52 = vrot.slane %v2295_v31, 1 }
 0x261   : > { %2267 = vrot.lane.b32.xlu0 %v9919_v33, %s12119_s14  ;;  %2265 = vrot.lane.b32.xlu1 %v9913_v24, %s12119_s14  ;;  %v2298_v21 = vor.u32 %v2297_v52, %v2293_v4 }
 0x265   : > { %2335 = vrot.lane.b32.xlu0 %v9934_v63, %s12121_s22  ;;  %2269 = vrot.lane.b32.xlu1 %v2245_v30, %s12119_s14 }
 0x269   : > { %2339 = vrot.lane.b32.xlu0 %v9940_v20, %s12121_s22  ;;  %2337 = vrot.lane.b32.xlu1 %v9943_v14, %s12121_s22 }
 0x26d   : > { %2303 = vrot.lane.b32.xlu0 %v2280_v17, %s12121_s22  ;;  %2341 = vrot.lane.b32.xlu1 %v9952_v29, %s12121_s22 }
 0x271   : > { %2307 = vrot.lane.b32.xlu0 %v2292_v6, %s12121_s22  ;;  %2305 = vrot.lane.b32.xlu1 %v2286_v10, %s12121_s22 }
 0x275   : > { %2315 = vrot.lane.b32.xlu0 %v2280_v17, %s12119_s14  ;;  %2309 = vrot.lane.b32.xlu1 %v2298_v21, %s12121_s22 }
 0x279   : > { %2319 = vrot.lane.b32.xlu0 %v2292_v6, %s12119_s14  ;;  %2317 = vrot.lane.b32.xlu1 %v2286_v10, %s12119_s14 }
 0x27d   : > { %2347 = vrot.lane.b32.xlu0 %v9934_v63, %s12119_s14  ;;  %2321 = vrot.lane.b32.xlu1 %v2298_v21, %s12119_s14 }
 0x281   : > { %2351 = vrot.lane.b32.xlu0 %v9940_v20, %s12119_s14  ;;  %2349 = vrot.lane.b32.xlu1 %v9943_v14, %s12119_s14 }
 0x285   : > { %2353 = vrot.lane.b32.xlu1 %v9952_v29, %s12119_s14 }
 0x2c3   : > { %v2252_v39 = vpop.permute.xlu0 %2251 }
 0x2c4   : > { %v2355_v7 = vcombine.low %v9907_v15, %v2252_v39 }
 0x2c7   : > { %v2254_v54 = vpop.permute.xlu1 %2253 }
 0x2c8   : > { %v2423_v16 = vcombine.low %v9913_v24, %v2254_v54 }
 0x2cb   : > { %v2256_v3 = vpop.permute.xlu0 %2255 }
 0x2cc   : > { %v2363_v37 = vcombine.low %v9919_v33, %v2256_v3 }
 0x2ce   : > { %v2370_v4 = vrot.slane %v2363_v37, %v8980_v42 }
 0x2cf   : > { %v2258_v22 = vpop.permute.xlu1 %2257  ;;  %v2264_v44 = vpop.permute.xlu0 %2263 }
 0x2d0   : > { %v2431_v50 = vcombine.low %v2245_v30, %v2258_v22  ;;  %v2371_v55 = vcombine.low %v2264_v44, %v2280_v17  ;;  %v2362_v30 = vrot.slane %v2355_v7, %v8980_v42  ;;  %v2430_v17 = vrot.slane %v2423_v16, %v8980_v42 }
 0x2d2   : > { %v2438_v57 = vrot.slane %v2431_v50, %v8980_v42  ;;  %v2378_v19 = vrot.slane %v2371_v55, %v8980_v42  ;;  %v2387_v24 = vcombine.low %v2362_v30, %v2370_v4 }
 0x2d3   : > { %v2266_v0 = vpop.permute.xlu1 %2265  ;;  %v2268_v31 = vpop.permute.xlu0 %2267 }
 0x2d4   : > { %v2379_v52 = vcombine.low %v2268_v31, %v2292_v6  ;;  %v2439_v40 = vcombine.low %v2266_v0, %v2286_v10  ;;  %v2455_v6 = vcombine.low %v2430_v17, %v2438_v57  ;;  %v2456_v22 = vcombine.high %v2430_v17, %v2438_v57 }
 0x2d5   : > { %v2388_v31 = vcombine.high %v2362_v30, %v2370_v4  ;;  %v2395_v7 = vrot.slane %v2387_v24, %v9009_v62 }
 0x2d6   : > { %v2386_v48 = vrot.slane %v2379_v52, %v8980_v42  ;;  %v2446_v54 = vrot.slane %v2439_v40, %v8980_v42  ;;  %v2463_v16 = vrot.slane %v2455_v6, %v9009_v62  ;;  %v2470_v57 = vrot.slane %v2456_v22, %v9009_v62 }
 0x2d7   : > { %v2270_v45 = vpop.permute.xlu1 %2269  ;;  %v9983_v33 = vpop.permute.xlu0 %2335  ;;  %v2402_v4 = vrot.slane %v2388_v31, %v9009_v62 }
 0x2d8   : > { %v2403_v15 = vcombine.low %v2378_v19, %v2386_v48  ;;  %v2447_v39 = vcombine.low %v2270_v45, %v2298_v21  ;;  %v2404_v37 = vcombine.high %v2378_v19, %v2386_v48 }
 0x2da   : > { %v2454_v3 = vrot.slane %v2447_v39, %v8980_v42  ;;  %v2411_v50 = vrot.slane %v2403_v15, %v9009_v62  ;;  %v2418_v17 = vrot.slane %v2404_v37, %v9009_v62 }
 0x2db   : > { %v2338_v44 = vpop.permute.xlu1 %2337  ;;  %v2340_v10 = vpop.permute.xlu0 %2339 }
 0x2dc   : > { %v2471_v55 = vcombine.low %v2446_v54, %v2454_v3  ;;  %v2472_v0 = vcombine.high %v2446_v54, %v2454_v3  ;;  %v9996_v19 = vcombine.high %v2395_v7, %v2411_v50  ;;  %v10005_v24 = vcombine.low %v2395_v7, %v2411_v50 }
 0x2dd   : > { %v2421_v3 = vcombine.low %v2402_v4, %v2418_v17  ;;  %v2422_v31 = vcombine.high %v2402_v4, %v2418_v17  ;;  %v2515_v50 = vcombine.low %v9940_v20, %v2340_v10 }
 0x2de   : > { %v2479_v45 = vrot.slane %v2471_v55, %v9009_v62  ;;  %v2486_v21 = vrot.slane %v2472_v0, %v9009_v62 }
 0x2df   : > { %v2342_v40 = vpop.permute.xlu1 %2341  ;;  %v2304_v52 = vpop.permute.xlu0 %2303  ;;  %v2522_v17 = vrot.slane %v2515_v50, %v8980_v42 }
 0x2e0   : > { %v9998_v48 = vcombine.high %v2463_v16, %v2479_v45  ;;  %v10000_v15 = vcombine.low %v2463_v16, %v2479_v45  ;;  %v2489_v39 = vcombine.low %v2470_v57, %v2486_v21  ;;  %v2490_v55 = vcombine.high %v2470_v57, %v2486_v21 }
 0x2e1   : > { %v2583_v7 = vcombine.low %v9952_v29, %v2342_v40  ;;  %v2575_v21 = vcombine.low %v9943_v14, %v2338_v44 }
 0x2e2   : > { %v2703_v30 = vpack.i.b16 %v9998_v48, %v9996_v19  ;;  %v2709_v37 = vpack.i.b16 %v2489_v39, %v2421_v3  ;;  %v2715_v47 = vpack.i.b16 %v2490_v55, %v2422_v31  ;;  %v2711_v1 = vshrl.u32 %v2489_v39, 16 }
 0x2e3   : > { %v2306_v6 = vpop.permute.xlu1 %2305  ;;  %v2308_v54 = vpop.permute.xlu0 %2307  ;;  %v2590_v20 = vrot.slane %v2583_v7, %v8980_v42  ;;  %v2717_v29 = vshrl.u32 %v2490_v55, 16  ;;  %v2582_v44 = vrot.slane %v2575_v21, %v8980_v42 }
 0x2e4   : > { %2773 = vrot.lane.b32.xlu1 %v2703_v30, %s12117_s23  ;;  %v2507_v30 = vcombine.low %v9934_v63, %v9983_v33 }
 0x2e6   : > { %v2514_v33 = vrot.slane %v2507_v30, %v8980_v42 }
 0x2e7   : > { %v2310_v0 = vpop.permute.xlu1 %2309  ;;  %v2316_v16 = vpop.permute.xlu0 %2315 }
 0x2e8   : > { %2785 = vrot.lane.b32.xlu1 %v2709_v37, %s12115_s24  ;;  %v2491_v45 = vcombine.low %v2304_v52, %v2316_v16  ;;  %v2710_v37 = vshrl.u32 %v2421_v3, 16  ;;  %v2540_v3 = vcombine.high %v2514_v33, %v2522_v17  ;;  %v2539_v41 = vcombine.low %v2514_v33, %v2522_v17 }
 0x2ea   : > { %v2498_v10 = vrot.slane %v2491_v45, %v8980_v42  ;;  %v2712_v63 = vpack.i.b16 %v2711_v1, %v2710_v37 }
 0x2eb   : > { %v2318_v13 = vpop.permute.xlu1 %2317  ;;  %v2320_v22 = vpop.permute.xlu0 %2319 }
 0x2ec   : > { %v2499_v57 = vcombine.low %v2308_v54, %v2320_v22  ;;  %2797 = vrot.lane.b32.xlu1 %v2715_v47, %s12113_s27  ;;  %v2559_v40 = vcombine.low %v2306_v6, %v2318_v13  ;;  %v2716_v54 = vshrl.u32 %v2422_v31, 16  ;;  %v2608_v22 = vcombine.high %v2582_v44, %v2590_v20 }
 0x2ee   : > { %v2506_v52 = vrot.slane %v2499_v57, %v8980_v42  ;;  %v2566_v55 = vrot.slane %v2559_v40, %v8980_v42  ;;  %v2718_v6 = vpack.i.b16 %v2717_v29, %v2716_v54  ;;  %v2622_v31 = vrot.slane %v2608_v22, %v9009_v62 }
 0x2ef   : > { %v2322_v4 = vpop.permute.xlu1 %2321  ;;  %v2348_v14 = vpop.permute.xlu0 %2347  ;;  %v2607_v54 = vcombine.low %v2582_v44, %v2590_v20 }
 0x2f0   : > { %v2524_v39 = vcombine.high %v2498_v10, %v2506_v52  ;;  %v2567_v47 = vcombine.low %v2310_v0, %v2322_v4  ;;  %2791 = vrot.lane.b32.xlu1 %v2712_v63, %s12107_s28  ;;  %v2554_v0 = vrot.slane %v2540_v3, %v9009_v62  ;;  %v2634_v21 = vrot.slane %v2348_v14, %v8980_v42 }
 0x2f1   : > { %v2523_v3 = vcombine.low %v2498_v10, %v2506_v52  ;;  %v2615_v10 = vrot.slane %v2607_v54, %v9009_v62 }
 0x2f2   : > { %v2574_v13 = vrot.slane %v2567_v47, %v8980_v42  ;;  %v2538_v1 = vrot.slane %v2524_v39, %v9009_v62 }
 0x2f3   : > { %v2350_v16 = vpop.permute.xlu1 %2349  ;;  %v2352_v50 = vpop.permute.xlu0 %2351  ;;  %v2531_v17 = vrot.slane %v2523_v3, %v9009_v62 }
 0x2f4   : > { %v2592_v7 = vcombine.high %v2566_v55, %v2574_v13  ;;  %2803 = vrot.lane.b32.xlu1 %v2718_v6, %s12105_s29  ;;  %v2642_v45 = vrot.slane %v2352_v50, %v8980_v42  ;;  %v2591_v57 = vcombine.low %v2566_v55, %v2574_v13  ;;  %v2668_v37 = vrot.slane %v2350_v16, %v8980_v42 }
 0x2f5   : > { %v2557_v40 = vcombine.low %v2538_v1, %v2554_v0  ;;  %v2558_v14 = vcombine.high %v2538_v1, %v2554_v0  ;;  %v2547_v0 = vrot.slane %v2539_v41, %v9009_v62 }
 0x2f6   : > { %v2606_v30 = vrot.slane %v2592_v7, %v9009_v62  ;;  %v2643_v63 = vcombine.low %v2634_v21, %v2642_v45  ;;  %v2644_v4 = vcombine.high %v2634_v21, %v2642_v45  ;;  %v2599_v7 = vrot.slane %v2591_v57, %v9009_v62 }
 0x2f7   : > { %v2354_v29 = vpop.permute.xlu1 %2353 }
 0x2f8   : > { %v2676_v39 = vrot.slane %v2354_v29, %v8980_v42  ;;  %v2625_v47 = vcombine.low %v2606_v30, %v2622_v31  ;;  %v2626_v22 = vcombine.high %v2606_v30, %v2622_v31  ;;  %v10037_v55 = vrot.slane %v2643_v63, %v9009_v62 }
 0x2f9   : > { %v10040_v13 = vrot.slane %v2644_v4, %v9009_v62  ;;  %v10055_v45 = vcombine.low %v2599_v7, %v2615_v10  ;;  %v10060_v30 = vcombine.low %v2531_v17, %v2547_v0  ;;  %v12189_v29 = vmov 0  }
 0x2fa   : > { %v2677_v6 = vcombine.low %v2668_v37, %v2676_v39  ;;  %v2678_v50 = vcombine.high %v2668_v37, %v2676_v39  ;;  %v2733_v56 = vpack.i.b16 %v2625_v47, %v2557_v40  ;;  %v2739_v52 = vpack.i.b16 %v2626_v22, %v2558_v14 }
 0x2fb   : > { %v2735_v44 = vshrl.u32 %v2625_v47, 16  ;;  %v2746_v31 = vshrl.u32 %v10037_v55, 16  ;;  %v2741_v21 = vshrl.u32 %v2626_v22, 16  ;;  %v2721_v4 = vpack.i.b16 %v10055_v45, %v10060_v30 }
 0x2fc   : > { %v10043_v16 = vrot.slane %v2677_v6, %v9009_v62  ;;  %v10046_v20 = vrot.slane %v2678_v50, %v9009_v62  ;;  %2787 = vrot.lane.b32.xlu1 %v2733_v56, %s12115_s24  ;;  %v2734_v56 = vshrl.u32 %v2557_v40, 16  ;;  %v2740_v40 = vshrl.u32 %v2558_v14, 16 }
 0x2fd   : > { %v2659_v39 = vcombine.high %v10037_v55, %v12189_v29  ;;  %v2699_v6 = vshrl.u32 %v10000_v15, 16  ;;  %v2660_v50 = vcombine.high %v10040_v13, %v12189_v29  ;;  %v2698_v22 = vshrl.u32 %v10005_v24, 16 }
 0x2fe   : > { %v2757_v33 = vpack.i.b16 %v10046_v20, %v10040_v13  ;;  %v2747_v1 = vshrl.u32 %v10043_v16, 16  ;;  %v2736_v57 = vpack.i.b16 %v2735_v44, %v2734_v56  ;;  %v2693_v63 = vcombine.high %v10043_v16, %v12189_v29 }
 0x2ff   : > { %v2745_v41 = vpack.i.b16 %v10043_v16, %v10037_v55  ;;  %v2742_v47 = vpack.i.b16 %v2741_v21, %v2740_v40  ;;  %v2694_v3 = vcombine.high %v10046_v20, %v12189_v29  ;;  %v12109_v14 = vmov 0.0  }
 0x300   : > { %2799 = vrot.lane.b32.xlu1 %v2739_v52, %s12113_s27  ;;  %2789 = vrot.lane.b32.xlu0 %v2757_v33, %s12115_s24  ;;  %v2748_v37 = vpack.i.b16 %v2747_v1, %v2746_v31  ;;  %v2751_v54 = vpack.i.b16 %v2693_v63, %v2659_v39  ;;  %v2700_v33 = vpack.i.b16 %v2699_v6, %v2698_v22  ;;  %v2705_v44 = vshrl.u32 %v9998_v48, 16 }
 0x301   : > { %8456 = vmatprep.subr.bf16.mxu0 %v12109_v14  ;;  %8466 = vmatprep.subr.bf16.mxu1 %v12109_v14  ;;  %v2763_v52 = vpack.i.b16 %v2694_v3, %v2660_v50  ;;  %v2704_v1 = vshrl.u32 %v9996_v19, 16  ;;  %v2753_v31 = vshrl.u32 %v2693_v63, 16  ;;  %v2752_v21 = vshrl.u32 %v2659_v39, 16 }
 0x302   : > { %v2556_v40 = vcombine.high %v2531_v17, %v2547_v0  ;;  %v2723_v48 = vshrl.u32 %v10055_v45, 16  ;;  %v2759_v39 = vshrl.u32 %v10046_v20, 16  ;;  %8462 = vmatprep.mubr.msk.bf16.mxu0 %vm8691_vm15, %v12109_v14  ;;  %8472 = vmatprep.mubr.msk.bf16.mxu1 %vm8691_vm15, %v12109_v14  ;;  %v2765_v17 = vshrl.u32 %v2694_v3, 16 }
 0x303   : > { %v2706_v56 = vpack.i.b16 %v2705_v44, %v2704_v1  ;;  %v2764_v0 = vshrl.u32 %v2660_v50, 16 }
 0x304   : > { %2793 = vrot.lane.b32.xlu1 %v2736_v57, %s12107_s28  ;;  %2771 = vrot.lane.b32.xlu0 %v2748_v37, %s12089_s30  ;;  %v2754_v57 = vpack.i.b16 %v2753_v31, %v2752_v21  ;;  %v2624_v37 = vcombine.high %v2599_v7, %v2615_v10  ;;  %v2728_v63 = vshrl.u32 %v2556_v40, 16  ;;  %v2758_v7 = vshrl.u32 %v10040_v13, 16 }
 0x305   : > { %v12190_v13 = vpack.i.b16 %v10000_v15, %v10005_v24 }
 0x306   : > { %v2729_v19 = vshrl.u32 %v2624_v37, 16  ;;  %v2760_v10 = vpack.i.b16 %v2759_v39, %v2758_v7 }
 0x308   : > { %2805 = vrot.lane.b32.xlu1 %v2742_v47, %s12105_s29  ;;  %2777 = vrot.lane.b32.xlu0 %v2751_v54, %s12117_s23  ;;  %v2727_v47 = vpack.i.b16 %v2624_v37, %v2556_v40  ;;  %v2722_v54 = vshrl.u32 %v10060_v30, 16  ;;  %v2730_v22 = vpack.i.b16 %v2729_v19, %v2728_v63 }
 0x30a   : > { %v2724_v6 = vpack.i.b16 %v2723_v48, %v2722_v54 }
 0x30c   : > { %2801 = vrot.lane.b32.xlu1 %v2763_v52, %s12113_s27  ;;  %2767 = vrot.lane.b32.xlu0 %v2700_v33, %s12089_s30  ;;  %v2766_v52 = vpack.i.b16 %v2765_v17, %v2764_v0 }
 0x310   : > { %2779 = vrot.lane.b32.xlu0 %v2706_v56, %s12087_s15 }
 0x314   : > { %2783 = vrot.lane.b32.xlu0 %v2754_v57, %s12087_s15 }
 0x318   : > { %2775 = vrot.lane.b32.xlu0 %v2727_v47, %s12117_s23 }
 0x31c   : > { %2769 = vrot.lane.b32.xlu0 %v2724_v6, %s12089_s30  ;;  %s12091_s30 = smov 72  }
 0x320   : > { %2781 = vrot.lane.b32.xlu0 %v2730_v22, %s12087_s15  ;;  %s12093_s15 = smov 88  }
 0x324   : > { %2795 = vrot.lane.b32.xlu0 %v2760_v10, %s12107_s28 }
 0x328   : > { %2807 = vrot.lane.b32.xlu0 %v2766_v52, %s12105_s29 }
 0x356   : > { %v2774_v20 = vpop.permute.xlu1 %2773 }
 0x35a   : > { %v2786_v33 = vpop.permute.xlu1 %2785 }
 0x35e   : > { %v2798_v44 = vpop.permute.xlu1 %2797 }
 0x362   : > { %v2792_v31 = vpop.permute.xlu1 %2791 }
 0x366   : > { %v2804_v57 = vpop.permute.xlu1 %2803 }
 0x36e   : > { %v2788_v50 = vpop.permute.xlu1 %2787 }
 0x372   : > { %v2790_v1 = vpop.permute.xlu0 %2789  ;;  %v2800_v24 = vpop.permute.xlu1 %2799 }
 0x376   : > { %v2772_v56 = vpop.permute.xlu0 %2771  ;;  %v2794_v39 = vpop.permute.xlu1 %2793 }
 0x377   : > { %v2818_v17 = vsel %vm2809_vm0, %v2745_v41, %v2772_v56 }
 0x37a   : > { %v2778_v21 = vpop.permute.xlu0 %2777 }
 0x37b   : > { %v2825_v0 = vsel %vm2819_vm8, %v2818_v17, %v2778_v21 }
 0x37e   : > { %v2768_v37 = vpop.permute.xlu0 %2767 }
 0x37f   : > { %v2812_v3 = vsel %vm2809_vm0, %v12190_v13, %v2768_v37 }
 0x380   : > { %v2821_v40 = vsel %vm2819_vm8, %v2812_v3, %v2774_v20 }
 0x382   : > { %v2780_v47 = vpop.permute.xlu0 %2779 }
 0x383   : > { %v2828_v48 = vsel %vm2826_vm7, %v2821_v40, %v2780_v47 }
 0x384   : > { %v2835_v54 = vsel %vm2833_vm9, %v2828_v48, %v2786_v33  ;;  %v2806_v33 = vpop.permute.xlu1 %2805 }
 0x385   : > { %v2842_v6 = vsel %vm2840_vm10, %v2835_v54, %v2792_v31 }
 0x386   : > { %v2784_v19 = vpop.permute.xlu0 %2783  ;;  %v2849_v15 = vsel %vm12130_vm6, %v2842_v6, %v2798_v44 }
 0x387   : > { %v2856_v63 = vsel %vm12129_vm5, %v2849_v15, %v2804_v57  ;;  %v2832_v44 = vsel %vm2826_vm7, %v2825_v0, %v2784_v19 }
 0x388   : > { %8457 = vmatpush3.bf16.msra.mxu0 %v2856_v63  ;;  %v2839_v30 = vsel %vm2833_vm9, %v2832_v44, %v2790_v1  ;;  %v2802_v56 = vpop.permute.xlu1 %2801  ;;  %v1937_v1 = vld [vmem:[%s12191_s1] sm:$0x3] }
 0x389   : > { %8458 = vmatprep.subr.bf16.mxu0 %v12109_v14 }
 0x38a   : > { %v2776_v22 = vpop.permute.xlu0 %2775 }
 0x38e   : > { %v2770_v7 = vpop.permute.xlu0 %2769 }
 0x38f   : > { %v2815_v10 = vsel %vm2809_vm0, %v2721_v4, %v2770_v7 }
 0x390   : > { %v2823_v52 = vsel %vm2819_vm8, %v2815_v10, %v2776_v22 }
 0x392   : > { %v2782_v20 = vpop.permute.xlu0 %2781 }
 0x393   : > { %v2830_v31 = vsel %vm2826_vm7, %v2823_v52, %v2782_v20 }
 0x394   : > { %v2837_v57 = vsel %vm2833_vm9, %v2830_v31, %v2788_v50 }
 0x395   : > { %v2844_v45 = vsel %vm2840_vm10, %v2837_v57, %v2794_v39 }
 0x396   : > { %v2796_v4 = vpop.permute.xlu0 %2795  ;;  %v2851_v55 = vsel %vm12130_vm6, %v2844_v45, %v2800_v24 }
 0x397   : > { %v2846_v16 = vsel %vm2840_vm10, %v2839_v30, %v2796_v4  ;;  %v2859_v41 = vsel %vm12129_vm5, %v2851_v55, %v2806_v33 }
 0x398   : > { %8459 = vmatpush3.bf16.msra.mxu0 %v2859_v41  ;;  %v2853_v21 = vsel %vm12130_vm6, %v2846_v16, %v2802_v56 }
 0x399   : > { %8460 = vmatprep.subr.bf16.mxu0 %v12109_v14 }
 0x39a   : > { %v2808_v37 = vpop.permute.xlu0 %2807 }
 0x39b   : > { %v2862_v13 = vsel %vm12129_vm5, %v2853_v21, %v2808_v37 }
 0x39c   : > { %v2868_v3 = vsel %vm12128_vm4, %v2862_v13, 0 }
 0x39d   : > { %8461 = vmatpush3.bf16.msra.mxu0 %v2868_v3 }
 0x39e   : > { %8476 = vmatprep.subr.bf16.mxu0 %v12109_v14 }
 0x3a0   : > { %8463 = vmatmul.mubr.msk.bf16.vlgmr.msra.gmra.mrb[0].mxu0 %vm12127_vm3, %v1937_v1 }
 0x3a1   : > { %8482 = vmatprep.mubr.msk.bf16.mxu0 %vm8691_vm15, %v12109_v14 }
 0x473   : > { %v2904_v50 = vpop.f32.mrb[0].mxu0 }
 0x474   : > { %2914 = vrot.lane.b32.xlu0 %v2904_v50, %s12103_s19  ;;  %2911 = vrot.lane.b32.xlu1 %v2904_v50, %s12101_s17  ;;  %v8464_v40 = vpop.f32.mrb[1].mxu0  ;;  %s12125_s19 = smov 0.0  }
 0x475   : > { %v2907_v47 = vpop.f32.mrb[2].mxu0 }
 0x476   : > { %v8465_v48 = vpop.f32.mrb[3].mxu0 }
 0x478   : > { %2920 = vrot.lane.b32.xlu0 %v2904_v50, %s12099_s20  ;;  %2917 = vrot.lane.b32.xlu1 %v2904_v50, %s12097_s16 }
 0x47c   : > { %2926 = vrot.lane.b32.xlu0 %v2904_v50, %s12095_s18  ;;  %2923 = vrot.lane.b32.xlu1 %v2904_v50, %s12093_s15 }
 0x480   : > { %2929 = vrot.lane.b32.xlu1 %v2904_v50, %s12091_s30 }
 0x4e6   : > { %v2915_v54 = vpop.permute.xlu0 %2914  ;;  %v2912_v6 = vpop.permute.xlu1 %2911 }
 0x4e7   : > { %v2932_v39 = vcombine.low %v2904_v50, %v2915_v54 }
 0x4e9   : > { %v2939_v0 = vrot.slane %v2932_v39, %v8980_v42 }
 0x4ea   : > { %v2921_v19 = vpop.permute.xlu0 %2920  ;;  %v2918_v15 = vpop.permute.xlu1 %2917 }
 0x4eb   : > { %v2940_v24 = vcombine.low %v2912_v6, %v2918_v15 }
 0x4ed   : > { %v2947_v7 = vrot.slane %v2940_v24, %v8980_v42 }
 0x4ee   : > { %v2927_v63 = vpop.permute.xlu0 %2926  ;;  %v2924_v22 = vpop.permute.xlu1 %2923 }
 0x4ef   : > { %v2948_v10 = vcombine.low %v2921_v19, %v2927_v63  ;;  %v2964_v20 = vcombine.low %v2939_v0, %v2947_v7  ;;  %v2965_v33 = vcombine.high %v2939_v0, %v2947_v7 }
 0x4f1   : > { %v2955_v44 = vrot.slane %v2948_v10, %v8980_v42  ;;  %v2972_v30 = vrot.slane %v2964_v20, %v9009_v62  ;;  %v2979_v4 = vrot.slane %v2965_v33, %v9009_v62  ;;  %v8428_v33 = vld.sshfl [vmem:[%s12192_s5] sm:$0x33 pattern:$0x75316420] }
 0x4f2   : > { %v2930_v17 = vpop.permute.xlu1 %2929 }
 0x4f3   : > { %v2956_v52 = vcombine.low %v2924_v22, %v2930_v17  ;;  %v8698_v17 = vmov 1966171168  }
 0x4f4   : > { %v3071_v0 = vunpack.c.l.s4 %v8698_v17 }
 0x4f5   : > { %v2963_v31 = vrot.slane %v2956_v52, %v8980_v42 }
 0x4f6   : > { %v3072_v20 = vunpack.c.0.s8 %v3071_v0 }
 0x4f7   : > { %v2980_v57 = vcombine.low %v2955_v44, %v2963_v31  ;;  %v2981_v45 = vcombine.high %v2955_v44, %v2963_v31  ;;  %v3069_v44 = vcombine.high %v8428_v33, %v8428_v33 }
 0x4f8   : > { %v10188_v31 = vsub.s32 %v3072_v20, %v12170_v58 }
 0x4f9   : > { %v2988_v55 = vrot.slane %v2980_v57, %v9009_v62  ;;  %v2995_v16 = vrot.slane %v2981_v45, %v9009_v62  ;;  %v10192_v45 = vsub.s32 0, %v12170_v58 }
 0x4fa   : > { %v3083_v57 = vrot.slane %v3069_v44, %v10188_v31 }
 0x4fb   : > { %v10156_v41 = vcombine.low %v2972_v30, %v2988_v55  ;;  %v10158_v56 = vcombine.high %v2972_v30, %v2988_v55  ;;  %v10160_v21 = vcombine.low %v2979_v4, %v2995_v16  ;;  %v10162_v37 = vcombine.high %v2979_v4, %v2995_v16 }
 0x4fc   : > { %v3076_v30 = vrot.slane %v8428_v33, %v10188_v31  ;;  %v3093_v4 = vrot.slane %v3083_v57, %v10192_v45 }
 0x4fd   : > { %v3002_v13 = vsel %vm2809_vm0, %v10156_v41, 0.0  ;;  %v3003_v3 = vsel %vm2809_vm0, %v10158_v56, 0.0  ;;  %v3018_v50 = vmul.f32 %v10156_v41, %v10156_v41  ;;  %v3019_v40 = vmul.f32 %v10158_v56, %v10158_v56 }
 0x4fe   : > { %v3004_v1 = vadd.f32 %v3003_v3, %v3002_v13  ;;  %v3020_v47 = vmul.f32 %v10160_v21, %v10160_v21  ;;  %v3005_v48 = vsel %vm2809_vm0, %v10160_v21, 0.0  ;;  %v3021_v6 = vmul.f32 %v10162_v37, %v10162_v37 }
 0x4ff   : > { %v3022_v19 = vsel %vm2809_vm0, %v3018_v50, 0.0  ;;  %v3023_v15 = vsel %vm2809_vm0, %v3019_v40, 0.0  ;;  %v3007_v24 = vsel %vm2809_vm0, %v10162_v37, 0.0  ;;  %v3084_v55 = vcombine.high %v3076_v30, %v3076_v30 }
 0x500   : > { %v3006_v54 = vadd.f32 %v3005_v48, %v3004_v1  ;;  %v3024_v63 = vadd.f32 %v3023_v15, %v3022_v19  ;;  %v3025_v39 = vsel %vm2809_vm0, %v3020_v47, 0.0  ;;  %v3027_v10 = vsel %vm2809_vm0, %v3021_v6, 0.0  ;;  %v8429_v1 = vld.sshfl [vmem:[%s12193_s6] sm:$0x33 pattern:$0x75316420] }
 0x501   : > { %v3089_v16 = vrot.slane %v3076_v30, %v10192_v45  ;;  %v3097_v13 = vrot.slane %v3084_v55, %v10192_v45  ;;  %v3085_v3 = vcombine.high %v3083_v57, %v3083_v57  ;;  %v3137_v40 = vrot.slane %v8429_v1, %v10188_v31 }
 0x502   : > { %v3008_v22 = vadd.f32 %v3007_v24, %v3006_v54  ;;  %v3026_v7 = vadd.f32 %v3025_v39, %v3024_v63  ;;  %v3130_v47 = vcombine.high %v8429_v1, %v8429_v1 }
 0x503   : > { %v3101_v50 = vrot.slane %v3085_v3, %v10192_v45  ;;  %v3150_v48 = vrot.slane %v3137_v40, %v10192_v45  ;;  %v3145_v19 = vcombine.high %v3137_v40, %v3137_v40 }
 0x504   : > { %3009 = vadd.xlane.f32.xlu0 %v3008_v22  ;;  %v3028_v52 = vadd.f32 %v3027_v10, %v3026_v7  ;;  %v3144_v54 = vrot.slane %v3130_v47, %v10188_v31 }
 0x505   : > { %v3158_v15 = vrot.slane %v3145_v19, %v10192_v45 }
 0x506   : > { %3029 = vadd.xlane.f32.xlu1 %v3028_v52  ;;  %v3154_v6 = vrot.slane %v3144_v54, %v10192_v45  ;;  %v3146_v24 = vcombine.high %v3144_v54, %v3144_v54 }
 0x508   : > { %v3162_v63 = vrot.slane %v3146_v24, %v10192_v45 }
 0x517   : > { %3107 = vperm.xlu1 %8562, %v3093_v4  }
 0x51a   : > { %3103 = vperm.xlu0 %8561, %v3089_v16  }
 0x51b   : > { %3111 = vperm.xlu1 %8562, %v3097_v13  }
 0x51f   : > { %3115 = vperm.xlu1 %8562, %v3101_v50  }
 0x523   : > { %3164 = vperm.xlu1 %8562, %v3150_v48  }
 0x527   : > { %3168 = vperm.xlu1 %8562, %v3154_v6  }
 0x52b   : > { %3172 = vperm.xlu1 %8562, %v3158_v15  }
 0x52f   : > { %3176 = vperm.xlu1 %8562, %v3162_v63  }
 0x591   : > { %v3010_v22 = vpop.xlane.xlu0 %3009 }
 0x592   : > { %v3011_v39 = vrot.slane %v3010_v22, 4 }
 0x593   : > { %v3030_v10 = vpop.xlane.xlu1 %3029 }
 0x594   : > { %v3012_v7 = vadd.f32 %v3011_v39, %v3010_v22  ;;  %v3031_v17 = vrot.slane %v3030_v10, 4 }
 0x596   : > { %v3013_v0 = vrot.slane %v3012_v7, 2  ;;  %v3032_v52 = vadd.f32 %v3031_v17, %v3030_v10 }
 0x597   : > { %v3108_v3 = vpop.permute.xlu1 %3107 }
 0x598   : > { %v3014_v20 = vadd.f32 %v3013_v0, %v3012_v7  ;;  %v3033_v33 = vrot.slane %v3032_v52, 2 }
 0x599   : > { %v3104_v22 = vpop.permute.xlu0 %3103 }
 0x59a   : > { %v3015_v44 = vrot.slane %v3014_v20, 1  ;;  %v3034_v57 = vadd.f32 %v3033_v33, %v3032_v52 }
 0x59b   : > { %v3112_v1 = vpop.permute.xlu1 %3111 }
 0x59c   : > { %v3016_v30 = vadd.f32 %v3015_v44, %v3014_v20  ;;  %v3035_v4 = vrot.slane %v3034_v57, 1 }
 0x59e   : > { %8500 = vpush %v3016_v30  ;;  %v3036_v55 = vadd.f32 %v3035_v4, %v3034_v57 }
 0x59f   : > { %v3116_v50 = vpop.permute.xlu1 %3115 }
 0x5a0   : > { %8502 = vpush %v3036_v55 }
 0x5a3   : > { %v3165_v40 = vpop.permute.xlu1 %3164 }
 0x5a7   : > { %v3169_v47 = vpop.permute.xlu1 %3168 }
 0x5ab   : > { %v3173_v54 = vpop.permute.xlu1 %3172 }
 0x5af   : > { %v3177_v44 = vpop.permute.xlu1 %3176 }
 0x5cf   : > { %s8501_s30 = spop %8500 }
 0x5d0   : > { %s3040_s15 = smul.f32 0.00390625, %s8501_s30 }
 0x5d1   : > { %s8503_s16 = spop %8502 }
 0x5d2   : > { %s3044_s18 = smul.f32 %s3040_s15, %s3040_s15  ;;  %v3051_v48 = vstv %s3040_s15  ;;  %s12201_s15 = smov 112  }
 0x5d3   : > { %s3043_s20 = smul.f32 0.00390625, %s8503_s16  ;;  %v3053_v6 = vsub.f32 %v10158_v56, %v3051_v48  ;;  %v3054_v19 = vsub.f32 %v10160_v21, %v3051_v48  ;;  %v3055_v15 = vsub.f32 %v10162_v37, %v3051_v48  ;;  %v3052_v24 = vsub.f32 %v10156_v41, %v3051_v48  ;;  %s12205_s16 = smov 80  }
 0x5d5   : > { %s3045_s17 = ssub.f32 %s3043_s20, %s3044_s18  ;;  %s12197_s20 = smov 24  }
 0x5d6   : > { %s12206_s18 = smov 88  }
 0x5d7   : > { %s3046_s29 = smax.f32 %s12125_s19, %s3045_s17  ;;  %s12194_s17 = smov 40  }
 0x5d8   : > { %s3047_s28 = sadd.f32 1e-05, %s3046_s29  ;;  %s12196_s29 = smov 8  }
 0x5da   : > { %v3048_v16 = vstv %s3047_s28  ;;  %s12195_s28 = smov 56  }
 0x5db   : > { %8567 = vrsqrt.f32 %v3048_v16 }
 0x5e5   : > { %v8568_v13 = vpop.eup %8567 }
 0x5e6   : > { %8504 = vpush %v8568_v13 }
 0x617   : > { %s8505_s30 = spop %8504 }
 0x618   : > { %v3056_v63 = vstv %s8505_s30  ;;  %s12202_s30 = smov 120  }
 0x619   : > { %v3058_v39 = vmul.f32 %v3056_v63, %v3053_v6  ;;  %v3059_v7 = vmul.f32 %v3056_v63, %v3054_v19  ;;  %v3060_v10 = vmul.f32 %v3056_v63, %v3055_v15  ;;  %v3057_v17 = vmul.f32 %v3056_v63, %v3052_v24 }
 0x61b   : > { %v3119_v0 = vmul.f32 %v3108_v3, %v3058_v39  ;;  %v3120_v52 = vmul.f32 %v3112_v1, %v3059_v7  ;;  %v3121_v20 = vmul.f32 %v3116_v50, %v3060_v10  ;;  %v3118_v33 = vmul.f32 %v3104_v22, %v3057_v17 }
 0x61d   : > { %v3180_v57 = vadd.f32 %v3169_v47, %v3119_v0  ;;  %v3181_v30 = vadd.f32 %v3173_v54, %v3120_v52  ;;  %v3182_v56 = vadd.f32 %v3177_v44, %v3121_v20  ;;  %v3179_v4 = vadd.f32 %v3165_v40, %v3118_v33 }
 0x61f   : > { %v3184_v21 = vmul.f32 %v3180_v57, %v3180_v57  ;;  %v3185_v55 = vmul.f32 %v3181_v30, %v3181_v30  ;;  %v3186_v37 = vmul.f32 %v3182_v56, %v3182_v56  ;;  %v3183_v16 = vmul.f32 %v3179_v4, %v3179_v4 }
 0x621   : > { %v3188_v41 = vmul.f32 %v3184_v21, %v3180_v57  ;;  %v3189_v13 = vmul.f32 %v3185_v55, %v3181_v30  ;;  %v3190_v48 = vmul.f32 %v3186_v37, %v3182_v56  ;;  %v3187_v6 = vmul.f32 %v3183_v16, %v3179_v4 }
 0x623   : > { %v3192_v19 = vmul.f32 0.044715, %v3188_v41  ;;  %v3193_v15 = vmul.f32 0.044715, %v3189_v13  ;;  %v3194_v24 = vmul.f32 0.044715, %v3190_v48 }
 0x624   : > { %v3191_v3 = vmul.f32 0.044715, %v3187_v6 }
 0x625   : > { %v3196_v1 = vadd.f32 %v3192_v19, %v3180_v57  ;;  %v3197_v50 = vadd.f32 %v3193_v15, %v3181_v30  ;;  %v3198_v63 = vadd.f32 %v3194_v24, %v3182_v56 }
 0x626   : > { %v3195_v22 = vadd.f32 %v3191_v3, %v3179_v4 }
 0x627   : > { %v3200_v47 = vmul.f32 0.7978846, %v3196_v1  ;;  %v3202_v54 = vmul.f32 0.7978846, %v3198_v63  ;;  %v3201_v40 = vmul.f32 0.7978846, %v3197_v50 }
 0x628   : > { %v3199_v39 = vmul.f32 0.7978846, %v3195_v22 }
 0x629   : > { %8569 = vtanh.f32 %v3200_v47 }
 0x62a   : > { %8571 = vtanh.f32 %v3199_v39 }
 0x62b   : > { %8573 = vtanh.f32 %v3202_v54 }
 0x62c   : > { %8575 = vtanh.f32 %v3201_v40 }
 0x633   : > { %v8570_v7 = vpop.eup %8569 }
 0x634   : > { %v8572_v10 = vpop.eup %8571  ;;  %v3208_v17 = vadd.f32 1.0, %v8570_v7 }
 0x635   : > { %v8574_v0 = vpop.eup %8573  ;;  %v3207_v52 = vadd.f32 1.0, %v8572_v10 }
 0x636   : > { %v8576_v20 = vpop.eup %8575  ;;  %v3212_v33 = vmul.f32 0.5, %v3208_v17  ;;  %v3210_v44 = vadd.f32 1.0, %v8574_v0 }
 0x637   : > { %v3211_v21 = vmul.f32 0.5, %v3207_v52  ;;  %v3209_v55 = vadd.f32 1.0, %v8576_v20 }
 0x638   : > { %v3216_v37 = vmul.f32 %v3212_v33, %v3180_v57  ;;  %v3214_v16 = vmul.f32 0.5, %v3210_v44 }
 0x639   : > { %v3215_v41 = vmul.f32 %v3211_v21, %v3179_v4  ;;  %v3213_v13 = vmul.f32 0.5, %v3209_v55 }
 0x63a   : > { %v3221_v48 = vpack.c.bf16 %v3216_v37, %v3216_v37  ;;  %v3218_v6 = vmul.f32 %v3214_v16, %v3182_v56 }
 0x63b   : > { %v3220_v19 = vpack.c.bf16 %v3215_v41, %v3215_v41  ;;  %v3217_v15 = vmul.f32 %v3213_v13, %v3181_v30 }
 0x63c   : > { %v3232_v24 = vshrl.u32 %v3221_v48, 16  ;;  %v3223_v3 = vpack.c.bf16 %v3218_v6, %v3218_v6  ;;  %v3235_v22 = vshll.u32 %v3221_v48, 16 }
 0x63d   : > { %v3225_v1 = vshrl.u32 %v3220_v19, 16  ;;  %v3222_v50 = vpack.c.bf16 %v3217_v15, %v3217_v15  ;;  %v3228_v39 = vshll.u32 %v3220_v19, 16 }
 0x63e   : > { %v3234_v63 = vrot.slane %v3232_v24, 7  ;;  %v3246_v47 = vshrl.u32 %v3223_v3, 16  ;;  %v3249_v57 = vshll.u32 %v3223_v3, 16 }
 0x63f   : > { %v3227_v54 = vrot.slane %v3225_v1, 7  ;;  %v3239_v40 = vshrl.u32 %v3222_v50, 16  ;;  %v3242_v0 = vshll.u32 %v3222_v50, 16 }
 0x640   : > { %v3237_v7 = vor.u32 %v3235_v22, %v3234_v63  ;;  %v3248_v10 = vrot.slane %v3246_v47, 7 }
 0x641   : > { %v3230_v17 = vor.u32 %v3228_v39, %v3227_v54  ;;  %v3241_v4 = vrot.slane %v3239_v40, 7 }
 0x642   : > { %v3257_v56 = vsel %vm9836_vm11, 0, %v3237_v7  ;;  %v3251_v30 = vor.u32 %v3249_v57, %v3248_v10 }
 0x643   : > { %v3261_v52 = vsel %vm9845_vm12, %v3257_v56, 0  ;;  %v3256_v20 = vsel %vm9836_vm11, 0, %v3230_v17  ;;  %v3244_v33 = vor.u32 %v3242_v0, %v3241_v4 }
 0x644   : > { %3270 = vrot.lane.b32.xlu1 %v3261_v52, %s12123_s21  ;;  %v3260_v44 = vsel %vm9845_vm12, %v3256_v20, 0  ;;  %v3259_v21 = vsel %vm9836_vm11, 0, %v3251_v30 }
 0x645   : > { %3268 = vrot.lane.b32.xlu0 %v3260_v44, %s12123_s21  ;;  %v3258_v55 = vsel %vm9836_vm11, 0, %v3244_v33  ;;  %v3263_v37 = vsel %vm9845_vm12, %v3259_v21, 0 }
 0x646   : > { %v3262_v16 = vsel %vm9845_vm12, %v3258_v55, 0 }
 0x648   : > { %3274 = vrot.lane.b32.xlu1 %v3263_v37, %s12123_s21 }
 0x649   : > { %3272 = vrot.lane.b32.xlu0 %v3262_v16, %s12123_s21 }
 0x6b6   : > { %v3271_v41 = vpop.permute.xlu1 %3270 }
 0x6b7   : > { %v3279_v13 = vsel %vm2228_vm13, 0, %v3271_v41  ;;  %v3269_v48 = vpop.permute.xlu0 %3268 }
 0x6b8   : > { %v10235_v6 = vsel %vm2238_vm14, %v3279_v13, 0  ;;  %v3277_v19 = vsel %vm2228_vm13, 0, %v3269_v48 }
 0x6b9   : > { %v10239_v15 = vsel %vm2238_vm14, %v3277_v19, 0  ;;  %3298 = vrot.lane.b32.xlu1 %v10235_v6, %s12121_s22  ;;  %v10258_v47 = vrot.slane %v10235_v6, 1  ;;  %v3328_v54 = vshll.u32 %v10235_v6, 16  ;;  %v3326_v56 = vshrl.u32 %v10235_v6, 16 }
 0x6ba   : > { %3296 = vrot.lane.b32.xlu0 %v10239_v15, %s12121_s22  ;;  %v3275_v24 = vpop.permute.xlu1 %3274  ;;  %v10262_v39 = vrot.slane %v10239_v15, 1  ;;  %v3322_v40 = vshll.u32 %v10239_v15, 16  ;;  %v3320_v30 = vshrl.u32 %v10239_v15, 16 }
 0x6bb   : > { %v3283_v3 = vsel %vm2228_vm13, 0, %v3275_v24  ;;  %v3273_v1 = vpop.permute.xlu0 %3272  ;;  %v3330_v10 = vrot.slane %v3328_v54, 1 }
 0x6bc   : > { %v3290_v50 = vsel %vm2238_vm14, %v3283_v3, 0  ;;  %v3281_v63 = vsel %vm2228_vm13, 0, %v3273_v1  ;;  %v3324_v4 = vrot.slane %v3322_v40, 1 }
 0x6bd   : > { %v3288_v22 = vsel %vm2238_vm14, %v3281_v63, 0  ;;  %3302 = vrot.lane.b32.xlu1 %v3290_v50, %s12121_s22  ;;  %v10269_v7 = vrot.slane %v3290_v50, 1  ;;  %v3340_v57 = vshll.u32 %v3290_v50, 16  ;;  %v3331_v52 = vor.u32 %v3330_v10, %v3326_v56 }
 0x6be   : > { %3300 = vrot.lane.b32.xlu0 %v3288_v22, %s12121_s22  ;;  %v10271_v17 = vrot.slane %v3288_v22, 1  ;;  %v3334_v0 = vshll.u32 %v3288_v22, 16  ;;  %v3325_v33 = vor.u32 %v3324_v4, %v3320_v30  ;;  %v3338_v21 = vshrl.u32 %v3290_v50, 16 }
 0x6bf   : > { %v3342_v20 = vrot.slane %v3340_v57, 1  ;;  %v3332_v55 = vshrl.u32 %v3288_v22, 16 }
 0x6c0   : > { %v3336_v44 = vrot.slane %v3334_v0, 1 }
 0x6c1   : > { %3310 = vrot.lane.b32.xlu1 %v10235_v6, %s12119_s14  ;;  %v3343_v37 = vor.u32 %v3342_v20, %v3338_v21 }
 0x6c2   : > { %3308 = vrot.lane.b32.xlu0 %v10239_v15, %s12119_s14  ;;  %v3337_v16 = vor.u32 %v3336_v44, %v3332_v55 }
 0x6c5   : > { %3314 = vrot.lane.b32.xlu1 %v3290_v50, %s12119_s14 }
 0x6c6   : > { %3312 = vrot.lane.b32.xlu0 %v3288_v22, %s12119_s14 }
 0x6c9   : > { %3382 = vrot.lane.b32.xlu1 %v10258_v47, %s12121_s22 }
 0x6ca   : > { %3380 = vrot.lane.b32.xlu0 %v10262_v39, %s12121_s22 }
 0x6cd   : > { %3386 = vrot.lane.b32.xlu1 %v10269_v7, %s12121_s22 }
 0x6ce   : > { %3384 = vrot.lane.b32.xlu0 %v10271_v17, %s12121_s22 }
 0x6d1   : > { %3350 = vrot.lane.b32.xlu1 %v3331_v52, %s12121_s22 }
 0x6d2   : > { %3348 = vrot.lane.b32.xlu0 %v3325_v33, %s12121_s22 }
 0x6d5   : > { %3354 = vrot.lane.b32.xlu1 %v3343_v37, %s12121_s22 }
 0x6d6   : > { %3352 = vrot.lane.b32.xlu0 %v3337_v16, %s12121_s22 }
 0x6d9   : > { %3362 = vrot.lane.b32.xlu1 %v3331_v52, %s12119_s14 }
 0x6da   : > { %3360 = vrot.lane.b32.xlu0 %v3325_v33, %s12119_s14 }
 0x6dd   : > { %3366 = vrot.lane.b32.xlu1 %v3343_v37, %s12119_s14 }
 0x6de   : > { %3364 = vrot.lane.b32.xlu0 %v3337_v16, %s12119_s14 }
 0x6e1   : > { %3394 = vrot.lane.b32.xlu1 %v10258_v47, %s12119_s14 }
 0x6e2   : > { %3392 = vrot.lane.b32.xlu0 %v10262_v39, %s12119_s14 }
 0x6e5   : > { %3398 = vrot.lane.b32.xlu1 %v10269_v7, %s12119_s14 }
 0x6e6   : > { %3396 = vrot.lane.b32.xlu0 %v10271_v17, %s12119_s14 }
 0x72b   : > { %v3299_v41 = vpop.permute.xlu1 %3298 }
 0x72c   : > { %v3297_v13 = vpop.permute.xlu0 %3296  ;;  %v3468_v63 = vcombine.low %v10235_v6, %v3299_v41 }
 0x72d   : > { %v3400_v40 = vcombine.low %v10239_v15, %v3297_v13 }
 0x72e   : > { %v3475_v30 = vrot.slane %v3468_v63, %v8980_v42 }
 0x72f   : > { %v3303_v48 = vpop.permute.xlu1 %3302 }
 0x730   : > { %v3301_v19 = vpop.permute.xlu0 %3300  ;;  %v3476_v24 = vcombine.low %v3290_v50, %v3303_v48  ;;  %v3407_v50 = vrot.slane %v3400_v40, %v8980_v42 }
 0x731   : > { %v3408_v3 = vcombine.low %v3288_v22, %v3301_v19 }
 0x732   : > { %v3483_v10 = vrot.slane %v3476_v24, %v8980_v42 }
 0x733   : > { %v3311_v1 = vpop.permute.xlu1 %3310  ;;  %v3415_v4 = vrot.slane %v3408_v3, %v8980_v42 }
 0x734   : > { %v3309_v54 = vpop.permute.xlu0 %3308  ;;  %v3484_v57 = vcombine.low %v3311_v1, %v3331_v52  ;;  %v3500_v21 = vcombine.low %v3475_v30, %v3483_v10  ;;  %v3501_v24 = vcombine.high %v3475_v30, %v3483_v10 }
 0x735   : > { %v3416_v0 = vcombine.low %v3309_v54, %v3325_v33  ;;  %v3432_v15 = vcombine.low %v3407_v50, %v3415_v4 }
 0x736   : > { %v3491_v6 = vrot.slane %v3484_v57, %v8980_v42  ;;  %v3515_v10 = vrot.slane %v3501_v24, %v9009_v62 }
 0x737   : > { %v3315_v56 = vpop.permute.xlu1 %3314  ;;  %v3423_v41 = vrot.slane %v3416_v0, %v8980_v42  ;;  %v3440_v54 = vrot.slane %v3432_v15, %v9009_v62 }
 0x738   : > { %v3492_v20 = vcombine.low %v3315_v56, %v3343_v37  ;;  %v3313_v44 = vpop.permute.xlu0 %3312  ;;  %v3433_v37 = vcombine.high %v3407_v50, %v3415_v4 }
 0x739   : > { %v3424_v22 = vcombine.low %v3313_v44, %v3337_v16  ;;  %v3508_v16 = vrot.slane %v3500_v21, %v9009_v62 }
 0x73a   : > { %v3499_v55 = vrot.slane %v3492_v20, %v8980_v42  ;;  %v3447_v4 = vrot.slane %v3433_v37, %v9009_v62 }
 0x73b   : > { %v3431_v52 = vrot.slane %v3424_v22, %v8980_v42  ;;  %v3383_v13 = vpop.permute.xlu1 %3382 }
 0x73c   : > { %v3516_v33 = vcombine.low %v3491_v6, %v3499_v55  ;;  %v3517_v48 = vcombine.high %v3491_v6, %v3499_v55  ;;  %v3381_v19 = vpop.permute.xlu0 %3380 }
 0x73d   : > { %v3448_v3 = vcombine.low %v3423_v41, %v3431_v52  ;;  %v3449_v1 = vcombine.high %v3423_v41, %v3431_v52 }
 0x73e   : > { %v3524_v63 = vrot.slane %v3516_v33, %v9009_v62  ;;  %v3531_v40 = vrot.slane %v3517_v48, %v9009_v62 }
 0x73f   : > { %v3456_v57 = vrot.slane %v3448_v3, %v9009_v62  ;;  %v3463_v0 = vrot.slane %v3449_v1, %v9009_v62  ;;  %v3387_v56 = vpop.permute.xlu1 %3386 }
 0x740   : > { %v3385_v20 = vpop.permute.xlu0 %3384  ;;  %v10311_v44 = vcombine.high %v3508_v16, %v3524_v63  ;;  %v3534_v6 = vcombine.low %v3515_v10, %v3531_v40  ;;  %v10319_v55 = vcombine.low %v3508_v16, %v3524_v63  ;;  %v3535_v24 = vcombine.high %v3515_v10, %v3531_v40 }
 0x741   : > { %v10315_v30 = vcombine.high %v3440_v54, %v3456_v57  ;;  %v3466_v21 = vcombine.low %v3447_v4, %v3463_v0  ;;  %v10321_v15 = vcombine.low %v3440_v54, %v3456_v57  ;;  %v3467_v48 = vcombine.high %v3447_v4, %v3463_v0 }
 0x742   : > { %v3628_v1 = vcombine.low %v10269_v7, %v3387_v56  ;;  %v3560_v16 = vcombine.low %v10271_v17, %v3385_v20  ;;  %v3756_v14 = vshrl.u32 %v3534_v6, 16  ;;  %v3552_v0 = vcombine.low %v10262_v39, %v3381_v19 }
 0x743   : > { %v3351_v50 = vpop.permute.xlu1 %3350  ;;  %v3748_v22 = vpack.i.b16 %v10311_v44, %v10315_v30  ;;  %v3754_v33 = vpack.i.b16 %v3534_v6, %v3466_v21  ;;  %v3760_v54 = vpack.i.b16 %v3535_v24, %v3467_v48  ;;  %v3755_v57 = vshrl.u32 %v3466_v21, 16 }
 0x744   : > { %v3349_v41 = vpop.permute.xlu0 %3348  ;;  %v3635_v40 = vrot.slane %v3628_v1, %v8980_v42  ;;  %v3567_v10 = vrot.slane %v3560_v16, %v8980_v42  ;;  %v3761_v17 = vshrl.u32 %v3467_v48, 16  ;;  %v3762_v20 = vshrl.u32 %v3535_v24, 16 }
 0x745   : > { %3818 = vrot.lane.b32.xlu1 %v3748_v22, %s12117_s23  ;;  %v3620_v22 = vcombine.low %v10258_v47, %v3383_v13  ;;  %v3757_v56 = vpack.i.b16 %v3756_v14, %v3755_v57  ;;  %v3559_v47 = vrot.slane %v3552_v0, %v8980_v42 }
 0x746   : > { %v3763_v48 = vpack.i.b16 %v3762_v20, %v3761_v17 }
 0x747   : > { %v3355_v52 = vpop.permute.xlu1 %3354  ;;  %v3627_v21 = vrot.slane %v3620_v22, %v8980_v42  ;;  %v3584_v20 = vcombine.low %v3559_v47, %v3567_v10 }
 0x748   : > { %v3353_v37 = vpop.permute.xlu0 %3352 }
 0x749   : > { %3830 = vrot.lane.b32.xlu1 %v3754_v33, %s12115_s24  ;;  %v3653_v39 = vcombine.high %v3627_v21, %v3635_v40 }
 0x74b   : > { %v3363_v63 = vpop.permute.xlu1 %3362 }
 0x74c   : > { %v3361_v43 = vpop.permute.xlu0 %3360  ;;  %v3604_v4 = vcombine.low %v3351_v50, %v3363_v63  ;;  %v3585_v50 = vcombine.high %v3559_v47, %v3567_v10  ;;  %v3652_v63 = vcombine.low %v3627_v21, %v3635_v40 }
 0x74d   : > { %3842 = vrot.lane.b32.xlu1 %v3760_v54, %s12113_s27  ;;  %v3536_v33 = vcombine.low %v3349_v41, %v3361_v43 }
 0x74e   : > { %v3611_v19 = vrot.slane %v3604_v4, %v8980_v42  ;;  %v3599_v54 = vrot.slane %v3585_v50, %v9009_v62 }
 0x74f   : > { %v3367_v7 = vpop.permute.xlu1 %3366  ;;  %v3543_v43 = vrot.slane %v3536_v33, %v8980_v42 }
 0x750   : > { %v3612_v6 = vcombine.low %v3355_v52, %v3367_v7  ;;  %v3365_v3 = vpop.permute.xlu0 %3364 }
 0x751   : > { %v3544_v13 = vcombine.low %v3353_v37, %v3365_v3  ;;  %3836 = vrot.lane.b32.xlu1 %v3757_v56, %s12194_s17  ;;  %v3667_v37 = vrot.slane %v3653_v39, %v9009_v62 }
 0x752   : > { %v3619_v1 = vrot.slane %v3612_v6, %v8980_v42 }
 0x753   : > { %v3551_v14 = vrot.slane %v3544_v13, %v8980_v42  ;;  %v3395_v41 = vpop.permute.xlu1 %3394 }
 0x754   : > { %v3637_v24 = vcombine.high %v3611_v19, %v3619_v1  ;;  %v3393_v52 = vpop.permute.xlu0 %3392  ;;  %v3636_v57 = vcombine.low %v3611_v19, %v3619_v1  ;;  %v3713_v33 = vrot.slane %v3395_v41, %v8980_v42 }
 0x755   : > { %v3569_v16 = vcombine.high %v3543_v43, %v3551_v14  ;;  %3848 = vrot.lane.b32.xlu1 %v3763_v48, %s12195_s28  ;;  %v3568_v4 = vcombine.low %v3543_v43, %v3551_v14  ;;  %v3679_v6 = vrot.slane %v3393_v52, %v8980_v42 }
 0x756   : > { %v3651_v3 = vrot.slane %v3637_v24, %v9009_v62  ;;  %v3644_v43 = vrot.slane %v3636_v57, %v9009_v62 }
 0x757   : > { %v3583_v22 = vrot.slane %v3569_v16, %v9009_v62  ;;  %v3399_v0 = vpop.permute.xlu1 %3398  ;;  %v3576_v14 = vrot.slane %v3568_v4, %v9009_v62  ;;  %v3660_v16 = vrot.slane %v3652_v63, %v9009_v62 }
 0x758   : > { %v3721_v7 = vrot.slane %v3399_v0, %v8980_v42  ;;  %v3397_v56 = vpop.permute.xlu0 %3396  ;;  %v3670_v17 = vcombine.low %v3651_v3, %v3667_v37  ;;  %v3671_v19 = vcombine.high %v3651_v3, %v3667_v37  ;;  %v3592_v37 = vrot.slane %v3584_v20, %v9009_v62 }
 0x759   : > { %v3687_v13 = vrot.slane %v3397_v56, %v8980_v42  ;;  %v3602_v39 = vcombine.low %v3583_v22, %v3599_v54  ;;  %v3603_v50 = vcombine.high %v3583_v22, %v3599_v54 }
 0x75a   : > { %v3722_v40 = vcombine.low %v3713_v33, %v3721_v7  ;;  %v3723_v21 = vcombine.high %v3713_v33, %v3721_v7  ;;  %v3780_v54 = vshrl.u32 %v3670_v17, 16  ;;  %v10365_v33 = vcombine.low %v3644_v43, %v3660_v16 }
 0x75b   : > { %v3688_v1 = vcombine.low %v3679_v6, %v3687_v13  ;;  %v3689_v48 = vcombine.high %v3679_v6, %v3687_v13  ;;  %v3778_v24 = vpack.i.b16 %v3670_v17, %v3602_v39  ;;  %v3784_v3 = vpack.i.b16 %v3671_v19, %v3603_v50 }
 0x75c   : > { %v10353_v41 = vrot.slane %v3722_v40, %v9009_v62  ;;  %v3737_v10 = vrot.slane %v3723_v21, %v9009_v62  ;;  %v3779_v22 = vshrl.u32 %v3602_v39, 16  ;;  %v10367_v7 = vcombine.low %v3576_v14, %v3592_v37 }
 0x75d   : > { %v10357_v47 = vrot.slane %v3688_v1, %v9009_v62  ;;  %v3703_v52 = vrot.slane %v3689_v48, %v9009_v62  ;;  %3832 = vrot.lane.b32.xlu1 %v3778_v24, %s12115_s24  ;;  %v3785_v56 = vshrl.u32 %v3603_v50, 16  ;;  %v3786_v63 = vshrl.u32 %v3671_v19, 16 }
 0x75e   : > { %v3792_v4 = vshrl.u32 %v10353_v41, 16  ;;  %v3781_v6 = vpack.i.b16 %v3780_v54, %v3779_v22  ;;  %v3738_v13 = vcombine.high %v10353_v41, %v12189_v29  ;;  %v3766_v40 = vpack.i.b16 %v10365_v33, %v10367_v7 }
 0x75f   : > { %v3802_v57 = vpack.i.b16 %v3737_v10, %v3703_v52  ;;  %v3791_v0 = vshrl.u32 %v10357_v47, 16  ;;  %v3704_v17 = vcombine.high %v10357_v47, %v12189_v29  ;;  %v3790_v39 = vpack.i.b16 %v10353_v41, %v10357_v47 }
 0x760   : > { %v3743_v21 = vshrl.u32 %v10321_v15, 16  ;;  %v3744_v50 = vshrl.u32 %v10319_v55, 16  ;;  %v3787_v19 = vpack.i.b16 %v3786_v63, %v3785_v56  ;;  %v3705_v48 = vcombine.high %v3703_v52, %v12189_v29 }
 0x761   : > { %3844 = vrot.lane.b32.xlu1 %v3784_v3, %s12113_s27  ;;  %3834 = vrot.lane.b32.xlu0 %v3802_v57, %s12115_s24  ;;  %v3793_v20 = vpack.i.b16 %v3792_v4, %v3791_v0  ;;  %v3796_v1 = vpack.i.b16 %v3738_v13, %v3704_v17  ;;  %v3739_v24 = vcombine.high %v3737_v10, %v12189_v29  ;;  %v3749_v57 = vshrl.u32 %v10315_v30, 16  ;;  %s12204_s24 = smov 104  }
 0x762   : > { %v3745_v54 = vpack.i.b16 %v3744_v50, %v3743_v21  ;;  %v3750_v22 = vshrl.u32 %v10311_v44, 16  ;;  %v3797_v4 = vshrl.u32 %v3704_v17, 16  ;;  %v3798_v56 = vshrl.u32 %v3738_v13, 16 }
 0x763   : > { %v3808_v3 = vpack.i.b16 %v3739_v24, %v3705_v48  ;;  %v3767_v21 = vshrl.u32 %v10367_v7, 16  ;;  %v3768_v30 = vshrl.u32 %v10365_v33, 16  ;;  %v3803_v13 = vshrl.u32 %v3703_v52, 16 }
 0x764   : > { %v3751_v0 = vpack.i.b16 %v3750_v22, %v3749_v57  ;;  %v3799_v63 = vpack.i.b16 %v3798_v56, %v3797_v4 }
 0x765   : > { %3838 = vrot.lane.b32.xlu1 %v3781_v6, %s12194_s17  ;;  %3816 = vrot.lane.b32.xlu0 %v3793_v20, %s12196_s29  ;;  %v3601_v6 = vcombine.high %v3576_v14, %v3592_v37  ;;  %v3669_v20 = vcombine.high %v3644_v43, %v3660_v16  ;;  %v3769_v44 = vpack.i.b16 %v3768_v30, %v3767_v21  ;;  %v3809_v14 = vshrl.u32 %v3705_v48, 16 }
 0x766   : > { %v3810_v16 = vshrl.u32 %v3739_v24, 16 }
 0x767   : > { %v3773_v50 = vshrl.u32 %v3601_v6, 16 }
 0x768   : > { %v3811_v37 = vpack.i.b16 %v3810_v16, %v3809_v14 }
 0x769   : > { %3850 = vrot.lane.b32.xlu1 %v3787_v19, %s12195_s28  ;;  %3822 = vrot.lane.b32.xlu0 %v3796_v1, %s12117_s23  ;;  %v3772_v19 = vpack.i.b16 %v3669_v20, %v3601_v6  ;;  %v3774_v1 = vshrl.u32 %v3669_v20, 16 }
 0x76b   : > { %v3775_v17 = vpack.i.b16 %v3774_v1, %v3773_v50 }
 0x76d   : > { %3846 = vrot.lane.b32.xlu1 %v3808_v3, %s12113_s27  ;;  %3812 = vrot.lane.b32.xlu0 %v3745_v54, %s12196_s29  ;;  %v3804_v3 = vshrl.u32 %v3737_v10, 16  ;;  %v12198_v10 = vpack.i.b16 %v10319_v55, %v10321_v15  ;;  %v12199_v55 = vmov 0.0   ;;  %s12203_s27 = smov 96  }
 0x76f   : > { %v3805_v43 = vpack.i.b16 %v3804_v3, %v3803_v13 }
 0x771   : > { %3824 = vrot.lane.b32.xlu0 %v3751_v0, %s12197_s20 }
 0x775   : > { %3828 = vrot.lane.b32.xlu0 %v3799_v63, %s12197_s20 }
 0x779   : > { %3820 = vrot.lane.b32.xlu0 %v3772_v19, %s12117_s23  ;;  %s12207_s23 = smov 72  }
 0x77d   : > { %3814 = vrot.lane.b32.xlu0 %v3769_v44, %s12196_s29 }
 0x781   : > { %3826 = vrot.lane.b32.xlu0 %v3775_v17, %s12197_s20 }
 0x785   : > { %3840 = vrot.lane.b32.xlu0 %v3805_v43, %s12194_s17 }
 0x789   : > { %3852 = vrot.lane.b32.xlu0 %v3811_v37, %s12195_s28 }
 0x7b7   : > { %v3819_v54 = vpop.permute.xlu1 %3818 }
 0x7bb   : > { %v3831_v57 = vpop.permute.xlu1 %3830 }
 0x7bf   : > { %v3843_v22 = vpop.permute.xlu1 %3842 }
 0x7c3   : > { %v3837_v56 = vpop.permute.xlu1 %3836 }
 0x7c7   : > { %v3849_v6 = vpop.permute.xlu1 %3848 }
 0x7cf   : > { %v3833_v24 = vpop.permute.xlu1 %3832 }
 0x7d3   : > { %v3835_v0 = vpop.permute.xlu0 %3834  ;;  %v3845_v17 = vpop.permute.xlu1 %3844 }
 0x7d7   : > { %v3817_v4 = vpop.permute.xlu0 %3816  ;;  %v3839_v3 = vpop.permute.xlu1 %3838 }
 0x7d8   : > { %v3862_v16 = vsel %vm2809_vm0, %v3790_v39, %v3817_v4 }
 0x7db   : > { %v3823_v63 = vpop.permute.xlu0 %3822 }
 0x7dc   : > { %v3868_v37 = vsel %vm2819_vm8, %v3862_v16, %v3823_v63 }
 0x7df   : > { %v3813_v52 = vpop.permute.xlu0 %3812 }
 0x7e0   : > { %v3856_v48 = vsel %vm2809_vm0, %v12198_v10, %v3813_v52 }
 0x7e1   : > { %v3864_v20 = vsel %vm2819_vm8, %v3856_v48, %v3819_v54 }
 0x7e3   : > { %v3825_v19 = vpop.permute.xlu0 %3824 }
 0x7e4   : > { %v3870_v21 = vsel %vm2826_vm7, %v3864_v20, %v3825_v19 }
 0x7e5   : > { %v3876_v30 = vsel %vm2833_vm9, %v3870_v21, %v3831_v57 }
 0x7e6   : > { %v3882_v44 = vsel %vm2840_vm10, %v3876_v30, %v3837_v56 }
 0x7e7   : > { %v3829_v50 = vpop.permute.xlu0 %3828  ;;  %v3888_v1 = vsel %vm12130_vm6, %v3882_v44, %v3843_v22  ;;  %v3851_v22 = vpop.permute.xlu1 %3850 }
 0x7e8   : > { %v3894_v13 = vsel %vm12129_vm5, %v3888_v1, %v3849_v6  ;;  %v3874_v56 = vsel %vm2826_vm7, %v3868_v37, %v3829_v50 }
 0x7e9   : > { %8467 = vmatpush3.bf16.msra.mxu1 %v3894_v13  ;;  %v3880_v7 = vsel %vm2833_vm9, %v3874_v56, %v3835_v0  ;;  %v3219_v0 = vld [vmem:[%s12200_s2] sm:$0x3]  ;;  %s12210_s2 = smov 0.0  }
 0x7ea   : > { %8468 = vmatprep.subr.bf16.mxu1 %v12199_v55 }
 0x7eb   : > { %v3821_v15 = vpop.permute.xlu0 %3820  ;;  %v3847_v4 = vpop.permute.xlu1 %3846 }
 0x7ef   : > { %v3815_v43 = vpop.permute.xlu0 %3814 }
 0x7f0   : > { %v3859_v14 = vsel %vm2809_vm0, %v3766_v40, %v3815_v43 }
 0x7f1   : > { %v3866_v54 = vsel %vm2819_vm8, %v3859_v14, %v3821_v15 }
 0x7f3   : > { %v3827_v57 = vpop.permute.xlu0 %3826 }
 0x7f4   : > { %v3872_v6 = vsel %vm2826_vm7, %v3866_v54, %v3827_v57 }
 0x7f5   : > { %v3878_v52 = vsel %vm2833_vm9, %v3872_v6, %v3833_v24 }
 0x7f6   : > { %v3884_v33 = vsel %vm2840_vm10, %v3878_v52, %v3839_v3 }
 0x7f7   : > { %v3841_v40 = vpop.permute.xlu0 %3840  ;;  %v3890_v41 = vsel %vm12130_vm6, %v3884_v33, %v3845_v17 }
 0x7f8   : > { %v3886_v47 = vsel %vm2840_vm10, %v3880_v7, %v3841_v40  ;;  %v3897_v39 = vsel %vm12129_vm5, %v3890_v41, %v3851_v22 }
 0x7f9   : > { %8469 = vmatpush3.bf16.msra.mxu1 %v3897_v39  ;;  %v3892_v63 = vsel %vm12130_vm6, %v3886_v47, %v3847_v4 }
 0x7fa   : > { %8470 = vmatprep.subr.bf16.mxu1 %v12199_v55 }
 0x7fb   : > { %v3853_v10 = vpop.permute.xlu0 %3852 }
 0x7fc   : > { %v3900_v48 = vsel %vm12129_vm5, %v3892_v63, %v3853_v10 }
 0x7fd   : > { %v3904_v24 = vsel %vm12128_vm4, %v3900_v48, 0  ;;  %vm12224_vm4 = vcmask 1045509  }
 0x7fe   : > { %8471 = vmatpush3.bf16.msra.mxu1 %v3904_v24  ;;  %vm12225_vm5 = vmmov %vm12224_vm4 }
 0x7ff   : > { %8486 = vmatprep.subr.bf16.mxu1 %v12199_v55 }
 0x801   : > { %8473 = vmatmul.mubr.msk.bf16.vlgmr.msra.gmra.mrb[0].mxu1 %vm12127_vm3, %v3219_v0 }
 0x802   : > { %8496 = vmatprep.mubr.msk.bf16.mxu1 %vm8691_vm15, %v12199_v55  ;;  %vm12221_vm15 = vcmask 1044484  }
 0x8d4   : > { %v3940_v20 = vpop.f32.mrb[0].mxu1 }
 0x8d5   : > { %3950 = vrot.lane.b32.xlu0 %v3940_v20, %s12201_s15  ;;  %3947 = vrot.lane.b32.xlu1 %v3940_v20, %s12202_s30  ;;  %v8474_v19 = vpop.f32.mrb[1].mxu1 }
 0x8d6   : > { %v3943_v21 = vpop.f32.mrb[2].mxu1 }
 0x8d7   : > { %v8475_v30 = vpop.f32.mrb[3].mxu1 }
 0x8d9   : > { %3956 = vrot.lane.b32.xlu0 %v3940_v20, %s12203_s27  ;;  %3953 = vrot.lane.b32.xlu1 %v3940_v20, %s12204_s24 }
 0x8dd   : > { %3962 = vrot.lane.b32.xlu0 %v3940_v20, %s12205_s16  ;;  %3959 = vrot.lane.b32.xlu1 %v3940_v20, %s12206_s18 }
 0x8e1   : > { %3965 = vrot.lane.b32.xlu1 %v3940_v20, %s12207_s23 }
 0x947   : > { %v3951_v44 = vpop.permute.xlu0 %3950  ;;  %v3948_v50 = vpop.permute.xlu1 %3947 }
 0x948   : > { %v3968_v43 = vcombine.low %v3940_v20, %v3951_v44 }
 0x94a   : > { %v3975_v54 = vrot.slane %v3968_v43, %v8980_v42 }
 0x94b   : > { %v3957_v1 = vpop.permute.xlu0 %3956  ;;  %v3954_v17 = vpop.permute.xlu1 %3953 }
 0x94c   : > { %v3976_v13 = vcombine.low %v3948_v50, %v3954_v17 }
 0x94e   : > { %v3983_v14 = vrot.slane %v3976_v13, %v8980_v42 }
 0x94f   : > { %v3963_v15 = vpop.permute.xlu0 %3962  ;;  %v3960_v3 = vpop.permute.xlu1 %3959 }
 0x950   : > { %v3984_v16 = vcombine.low %v3957_v1, %v3963_v15  ;;  %v4000_v22 = vcombine.low %v3975_v54, %v3983_v14  ;;  %v4001_v56 = vcombine.high %v3975_v54, %v3983_v14 }
 0x952   : > { %v3991_v6 = vrot.slane %v3984_v16, %v8980_v42  ;;  %v4008_v40 = vrot.slane %v4000_v22, %v9009_v62  ;;  %v4015_v41 = vrot.slane %v4001_v56, %v9009_v62 }
 0x953   : > { %v3966_v37 = vpop.permute.xlu1 %3965 }
 0x954   : > { %v3992_v57 = vcombine.low %v3960_v3, %v3966_v37 }
 0x956   : > { %v3999_v52 = vrot.slane %v3992_v57, %v8980_v42  ;;  %v8431_v57 = vld.sshfl [vmem:[%s12208_s7] sm:$0x33 pattern:$0x75316420] }
 0x957   : > { %v4105_v22 = vcombine.high %v8431_v57, %v8431_v57 }
 0x958   : > { %v4016_v33 = vcombine.low %v3991_v6, %v3999_v52  ;;  %v4017_v7 = vcombine.high %v3991_v6, %v3999_v52  ;;  %v8432_v6 = vld.sshfl [vmem:[%s12209_s8] sm:$0x33 pattern:$0x75316420]  ;;  %v4112_v52 = vrot.slane %v8431_v57, %v10188_v31 }
 0x959   : > { %v4119_v56 = vrot.slane %v4105_v22, %v10188_v31 }
 0x95a   : > { %v4024_v47 = vrot.slane %v4016_v33, %v9009_v62  ;;  %v4031_v39 = vrot.slane %v4017_v7, %v9009_v62 }
 0x95b   : > { %v4129_v33 = vrot.slane %v4119_v56, %v10192_v45  ;;  %v4121_v7 = vcombine.high %v4119_v56, %v4119_v56 }
 0x95c   : > { %v10455_v4 = vcombine.low %v4008_v40, %v4024_v47  ;;  %v10457_v63 = vcombine.high %v4008_v40, %v4024_v47  ;;  %v10459_v10 = vcombine.low %v4015_v41, %v4031_v39  ;;  %v10461_v48 = vcombine.high %v4015_v41, %v4031_v39 }
 0x95d   : > { %v4166_v40 = vcombine.high %v8432_v6, %v8432_v6  ;;  %v4125_v41 = vrot.slane %v4112_v52, %v10192_v45  ;;  %v4120_v47 = vcombine.high %v4112_v52, %v4112_v52  ;;  %v4137_v39 = vrot.slane %v4121_v7, %v10192_v45 }
 0x95e   : > { %v4038_v24 = vsel %vm2809_vm0, %v10455_v4, 0.0  ;;  %v4039_v0 = vsel %vm2809_vm0, %v10457_v63, 0.0  ;;  %v4054_v19 = vmul.f32 %v10455_v4, %v10455_v4  ;;  %v4055_v21 = vmul.f32 %v10457_v63, %v10457_v63 }
 0x95f   : > { %v4040_v20 = vadd.f32 %v4039_v0, %v4038_v24  ;;  %v4056_v30 = vmul.f32 %v10459_v10, %v10459_v10  ;;  %v4041_v44 = vsel %vm2809_vm0, %v10459_v10, 0.0  ;;  %v4057_v1 = vmul.f32 %v10461_v48, %v10461_v48 }
 0x960   : > { %v4058_v17 = vsel %vm2809_vm0, %v4054_v19, 0.0  ;;  %v4059_v13 = vsel %vm2809_vm0, %v4055_v21, 0.0  ;;  %v4043_v15 = vsel %vm2809_vm0, %v10461_v48, 0.0  ;;  %v4180_v24 = vrot.slane %v4166_v40, %v10188_v31 }
 0x961   : > { %v4042_v50 = vadd.f32 %v4041_v44, %v4040_v20  ;;  %v4060_v3 = vadd.f32 %v4059_v13, %v4058_v17  ;;  %v4061_v14 = vsel %vm2809_vm0, %v4056_v30, 0.0  ;;  %v4063_v37 = vsel %vm2809_vm0, %v4057_v1, 0.0 }
 0x962   : > { %v4133_v0 = vrot.slane %v4120_v47, %v10192_v45  ;;  %v4173_v20 = vrot.slane %v8432_v6, %v10188_v31  ;;  %v4190_v19 = vrot.slane %v4180_v24, %v10192_v45  ;;  %v4182_v21 = vcombine.high %v4180_v24, %v4180_v24 }
 0x963   : > { %v4044_v43 = vadd.f32 %v4043_v15, %v4042_v50  ;;  %v4062_v16 = vadd.f32 %v4061_v14, %v4060_v3 }
 0x964   : > { %v4186_v30 = vrot.slane %v4173_v20, %v10192_v45  ;;  %v4181_v44 = vcombine.high %v4173_v20, %v4173_v20  ;;  %v4198_v50 = vrot.slane %v4182_v21, %v10192_v45 }
 0x965   : > { %4045 = vadd.xlane.f32.xlu0 %v4044_v43  ;;  %v4064_v54 = vadd.f32 %v4063_v37, %v4062_v16 }
 0x966   : > { %v4194_v1 = vrot.slane %v4181_v44, %v10192_v45 }
 0x967   : > { %4065 = vadd.xlane.f32.xlu1 %v4064_v54 }
 0x978   : > { %4143 = vperm.xlu1 %8562, %v4129_v33  }
 0x97b   : > { %4139 = vperm.xlu0 %8561, %v4125_v41  }
 0x97c   : > { %4151 = vperm.xlu1 %8562, %v4137_v39  }
 0x97f   : > { %4147 = vperm.xlu0 %8561, %v4133_v0  }
 0x980   : > { %4204 = vperm.xlu1 %8562, %v4190_v19  }
 0x983   : > { %4200 = vperm.xlu0 %8561, %v4186_v30  }
 0x984   : > { %4212 = vperm.xlu1 %8562, %v4198_v50  }
 0x987   : > { %4208 = vperm.xlu0 %8561, %v4194_v1  }
 0x9f2   : > { %v4046_v17 = vpop.xlane.xlu0 %4045 }
 0x9f3   : > { %v4047_v13 = vrot.slane %v4046_v17, 4 }
 0x9f4   : > { %v4066_v3 = vpop.xlane.xlu1 %4065 }
 0x9f5   : > { %v4048_v15 = vadd.f32 %v4047_v13, %v4046_v17  ;;  %v4067_v43 = vrot.slane %v4066_v3, 4  ;;  %v4232_v13 = vsub.s32 1, %v12170_v58 }
 0x9f7   : > { %v4049_v14 = vrot.slane %v4048_v15, 2  ;;  %v4068_v16 = vadd.f32 %v4067_v43, %v4066_v3 }
 0x9f8   : > { %v4144_v41 = vpop.permute.xlu1 %4143 }
 0x9f9   : > { %v4050_v37 = vadd.f32 %v4049_v14, %v4048_v15  ;;  %v4069_v54 = vrot.slane %v4068_v16, 2 }
 0x9fa   : > { %v4140_v40 = vpop.permute.xlu0 %4139 }
 0x9fb   : > { %v4051_v57 = vrot.slane %v4050_v37, 1  ;;  %v4070_v22 = vadd.f32 %v4069_v54, %v4068_v16 }
 0x9fc   : > { %v4152_v20 = vpop.permute.xlu1 %4151 }
 0x9fd   : > { %v4052_v56 = vadd.f32 %v4051_v57, %v4050_v37  ;;  %v4071_v6 = vrot.slane %v4070_v22, 1 }
 0x9fe   : > { %v4148_v39 = vpop.permute.xlu0 %4147 }
 0x9ff   : > { %8506 = vpush %v4052_v56  ;;  %v4072_v52 = vadd.f32 %v4071_v6, %v4070_v22 }
 0xa00   : > { %v4205_v14 = vpop.permute.xlu1 %4204 }
 0xa01   : > { %8508 = vpush %v4072_v52 }
 0xa02   : > { %v4201_v15 = vpop.permute.xlu0 %4200 }
 0xa04   : > { %v4213_v6 = vpop.permute.xlu1 %4212 }
 0xa06   : > { %v4209_v54 = vpop.permute.xlu0 %4208 }
 0xa30   : > { %s8507_s14 = spop %8506 }
 0xa31   : > { %s4076_s21 = smul.f32 0.00390625, %s8507_s14  ;;  %s12241_s14 = smov 48  }
 0xa32   : > { %s8509_s19 = spop %8508 }
 0xa33   : > { %s4080_s22 = smul.f32 %s4076_s21, %s4076_s21  ;;  %v4087_v47 = vstv %s4076_s21 }
 0xa34   : > { %s4079_s0 = smul.f32 0.00390625, %s8509_s19  ;;  %v4088_v24 = vsub.f32 %v10455_v4, %v4087_v47  ;;  %v4089_v0 = vsub.f32 %v10457_v63, %v4087_v47  ;;  %v4090_v21 = vsub.f32 %v10459_v10, %v4087_v47  ;;  %v4091_v3 = vsub.f32 %v10461_v48, %v4087_v47 }
 0xa35   : > { %v4239_v47 = vsub.s32 2, %v12170_v58 }
 0xa36   : > { %s4081_s1 = ssub.f32 %s4079_s0, %s4080_s22  ;;  %s12236_s0 = smov 1  }
 0xa38   : > { %s4082_s5 = smax.f32 %s12210_s2, %s4081_s1  ;;  %s12237_s1 = smov 127  }
 0xa39   : > { %s4083_s6 = sadd.f32 1e-05, %s4082_s5  ;;  %s12238_s5 = smov 126  }
 0xa3b   : > { %v4084_v33 = vstv %s4083_s6  ;;  %s12239_s6 = smov 16  }
 0xa3c   : > { %8577 = vrsqrt.f32 %v4084_v33 }
 0xa46   : > { %v8578_v7 = vpop.eup %8577 }
 0xa47   : > { %8510 = vpush %v8578_v7 }
 0xa78   : > { %s8511_s7 = spop %8510 }
 0xa79   : > { %v4092_v19 = vstv %s8511_s7  ;;  %s12240_s7 = smov 32  }
 0xa7a   : > { %v4093_v30 = vmul.f32 %v4092_v19, %v4088_v24  ;;  %v4094_v44 = vmul.f32 %v4092_v19, %v4089_v0  ;;  %v4095_v50 = vmul.f32 %v4092_v19, %v4090_v21  ;;  %v4096_v4 = vmul.f32 %v4092_v19, %v4091_v3 }
 0xa7b   : > { %v4246_v19 = vsub.s32 3, %v12170_v58 }
 0xa7c   : > { %v4154_v1 = vmul.f32 %v4140_v40, %v4093_v30  ;;  %v4155_v17 = vmul.f32 %v4144_v41, %v4094_v44  ;;  %v4156_v16 = vmul.f32 %v4148_v39, %v4095_v50  ;;  %v4157_v57 = vmul.f32 %v4152_v20, %v4096_v4 }
 0xa7e   : > { %v10507_v43 = vadd.f32 %v4201_v15, %v4154_v1  ;;  %v10509_v63 = vadd.f32 %v4205_v14, %v4155_v17  ;;  %v10514_v22 = vadd.f32 %v4209_v54, %v4156_v16  ;;  %v4218_v52 = vadd.f32 %v4213_v6, %v4157_v57 }
 0xa7f   : > { %v4253_v1 = vsub.s32 4, %v12170_v58  ;;  %v4260_v14 = vsub.s32 5, %v12170_v58  ;;  %v4267_v54 = vsub.s32 6, %v12170_v58 }
 0xa80   : > { %v4233_v37 = vrot.slane %v10507_v43, %v4232_v13  ;;  %v4226_v10 = vrot.slane %v10507_v43, %v10192_v45  ;;  %v4289_v48 = vrot.slane %v10509_v63, %v4232_v13  ;;  %v4282_v56 = vrot.slane %v10509_v63, %v10192_v45 }
 0xa81   : > { %v4345_v33 = vrot.slane %v10514_v22, %v4232_v13  ;;  %v4338_v7 = vrot.slane %v10514_v22, %v10192_v45  ;;  %v4401_v40 = vrot.slane %v4218_v52, %v4232_v13  ;;  %v4394_v41 = vrot.slane %v4218_v52, %v10192_v45 }
 0xa82   : > { %4235 = vbcast.lane.b32.xlu1 %v4233_v37, 256  ;;  %4228 = vbcast.lane.b32.xlu0 %v4226_v10, 256  ;;  %v4296_v39 = vrot.slane %v10509_v63, %v4239_v47  ;;  %v4240_v24 = vrot.slane %v10507_v43, %v4239_v47  ;;  %v4408_v0 = vrot.slane %v4218_v52, %v4239_v47 }
 0xa83   : > { %v4352_v20 = vrot.slane %v10514_v22, %v4239_v47  ;;  %v4303_v21 = vrot.slane %v10509_v63, %v4246_v19  ;;  %v4247_v30 = vrot.slane %v10507_v43, %v4246_v19  ;;  %v4415_v44 = vrot.slane %v4218_v52, %v4246_v19 }
 0xa84   : > { %v4359_v50 = vrot.slane %v10514_v22, %v4246_v19  ;;  %v4310_v17 = vrot.slane %v10509_v63, %v4253_v1  ;;  %v4254_v13 = vrot.slane %v10507_v43, %v4253_v1  ;;  %v4422_v15 = vrot.slane %v4218_v52, %v4253_v1 }
 0xa85   : > { %v4366_v3 = vrot.slane %v10514_v22, %v4253_v1  ;;  %v4317_v4 = vrot.slane %v10509_v63, %v4260_v14  ;;  %v4261_v16 = vrot.slane %v10507_v43, %v4260_v14  ;;  %v4429_v37 = vrot.slane %v4218_v52, %v4260_v14 }
 0xa86   : > { %4291 = vbcast.lane.b32.xlu1 %v4289_v48, 256  ;;  %4284 = vbcast.lane.b32.xlu0 %v4282_v56, 256  ;;  %v4373_v10 = vrot.slane %v10514_v22, %v4260_v14  ;;  %v4324_v57 = vrot.slane %v10509_v63, %v4267_v54  ;;  %v4268_v48 = vrot.slane %v10507_v43, %v4267_v54 }
 0xa87   : > { %v4436_v56 = vrot.slane %v4218_v52, %v4267_v54  ;;  %v4380_v6 = vrot.slane %v10514_v22, %v4267_v54 }
 0xa8a   : > { %4347 = vbcast.lane.b32.xlu1 %v4345_v33, 256  ;;  %4340 = vbcast.lane.b32.xlu0 %v4338_v7, 256  ;;  %v4274_v33 = vsub.s32 7, %v12170_v58 }
 0xa8c   : > { %v4331_v7 = vrot.slane %v10509_v63, %v4274_v33  ;;  %v4387_v47 = vrot.slane %v10514_v22, %v4274_v33 }
 0xa8e   : > { %4403 = vbcast.lane.b32.xlu1 %v4401_v40, 256  ;;  %4396 = vbcast.lane.b32.xlu0 %v4394_v41, 256  ;;  %v4275_v40 = vrot.slane %v10507_v43, %v4274_v33  ;;  %v4443_v41 = vrot.slane %v4218_v52, %v4274_v33 }
 0xa92   : > { %4298 = vbcast.lane.b32.xlu1 %v4296_v39, 256  ;;  %4242 = vbcast.lane.b32.xlu0 %v4240_v24, 256 }
 0xa96   : > { %4410 = vbcast.lane.b32.xlu1 %v4408_v0, 256  ;;  %4354 = vbcast.lane.b32.xlu0 %v4352_v20, 256 }
 0xa9a   : > { %4305 = vbcast.lane.b32.xlu1 %v4303_v21, 256  ;;  %4249 = vbcast.lane.b32.xlu0 %v4247_v30, 256 }
 0xa9e   : > { %4417 = vbcast.lane.b32.xlu1 %v4415_v44, 256  ;;  %4361 = vbcast.lane.b32.xlu0 %v4359_v50, 256 }
 0xaa2   : > { %4312 = vbcast.lane.b32.xlu1 %v4310_v17, 256  ;;  %4256 = vbcast.lane.b32.xlu0 %v4254_v13, 256 }
 0xaa6   : > { %4424 = vbcast.lane.b32.xlu1 %v4422_v15, 256  ;;  %4368 = vbcast.lane.b32.xlu0 %v4366_v3, 256 }
 0xaaa   : > { %4319 = vbcast.lane.b32.xlu1 %v4317_v4, 256  ;;  %4263 = vbcast.lane.b32.xlu0 %v4261_v16, 256 }
 0xaae   : > { %4431 = vbcast.lane.b32.xlu1 %v4429_v37, 256  ;;  %4375 = vbcast.lane.b32.xlu0 %v4373_v10, 256 }
 0xab2   : > { %4326 = vbcast.lane.b32.xlu1 %v4324_v57, 256  ;;  %4270 = vbcast.lane.b32.xlu0 %v4268_v48, 256 }
 0xab6   : > { %4438 = vbcast.lane.b32.xlu1 %v4436_v56, 256  ;;  %4382 = vbcast.lane.b32.xlu0 %v4380_v6, 256 }
 0xaba   : > { %4333 = vbcast.lane.b32.xlu1 %v4331_v7, 256  ;;  %4277 = vbcast.lane.b32.xlu0 %v4275_v40, 256 }
 0xabe   : > { %4445 = vbcast.lane.b32.xlu1 %v4443_v41, 256  ;;  %4389 = vbcast.lane.b32.xlu0 %v4387_v47, 256 }
 0xaf4   : > { %v4236_v39 = vpop.permute.xlu1 %4235  ;;  %v4229_v24 = vpop.permute.xlu0 %4228 }
 0xaf5   : > { %v10548_v0 = vadd.f32 %v4236_v39, %v9627_v36  ;;  %v10551_v58 = vadd.f32 %v4229_v24, %v9631_v23 }
 0xaf7   : > { %v4512_v63 = vmul.f32 %v10548_v0, %v10548_v0  ;;  %v4511_v43 = vmul.f32 %v10551_v58, %v10551_v58 }
 0xaf8   : > { %v4292_v20 = vpop.permute.xlu1 %4291  ;;  %v4285_v52 = vpop.permute.xlu0 %4284 }
 0xaf9   : > { %v4544_v22 = vmul.f32 %v4512_v63, %v10548_v0  ;;  %v4543_v19 = vmul.f32 %v4511_v43, %v10551_v58  ;;  %v10560_v21 = vadd.f32 %v4292_v20, %v9637_v26  ;;  %v10563_v36 = vadd.f32 %v4285_v52, %v9639_v59 }
 0xafb   : > { %v4576_v23 = vmul.f32 0.044715, %v4544_v22  ;;  %v4575_v30 = vmul.f32 0.044715, %v4543_v19  ;;  %v4520_v44 = vmul.f32 %v10560_v21, %v10560_v21  ;;  %v4519_v50 = vmul.f32 %v10563_v36, %v10563_v36 }
 0xafc   : > { %v4348_v1 = vpop.permute.xlu1 %4347  ;;  %v4341_v17 = vpop.permute.xlu0 %4340 }
 0xafd   : > { %v4608_v13 = vadd.f32 %v4576_v23, %v10548_v0  ;;  %v4552_v15 = vmul.f32 %v4520_v44, %v10560_v21  ;;  %v4551_v26 = vmul.f32 %v4519_v50, %v10563_v36  ;;  %v10573_v3 = vadd.f32 %v4348_v1, %v9641_v35 }
 0xafe   : > { %v10576_v59 = vadd.f32 %v4341_v17, %v9648_v27  ;;  %v4607_v4 = vadd.f32 %v4575_v30, %v10551_v58 }
 0xaff   : > { %v4640_v14 = vmul.f32 0.7978846, %v4608_v13  ;;  %v4584_v16 = vmul.f32 0.044715, %v4552_v15  ;;  %v4583_v37 = vmul.f32 0.044715, %v4551_v26  ;;  %v4528_v10 = vmul.f32 %v10573_v3, %v10573_v3 }
 0xb00   : > { %v4527_v54 = vmul.f32 %v10576_v59, %v10576_v59  ;;  %v4404_v57 = vpop.permute.xlu1 %4403  ;;  %v4397_v48 = vpop.permute.xlu0 %4396  ;;  %v4639_v40 = vmul.f32 0.7978846, %v4607_v4 }
 0xb01   : > { %8579 = vtanh.f32 %v4640_v14  ;;  %v4616_v35 = vadd.f32 %v4584_v16, %v10560_v21  ;;  %v10585_v56 = vadd.f32 %v4404_v57, %v9671_v18  ;;  %v10588_v27 = vadd.f32 %v4397_v48, %v9663_v28 }
 0xb02   : > { %v4615_v6 = vadd.f32 %v4583_v37, %v10563_v36  ;;  %v4560_v33 = vmul.f32 %v4528_v10, %v10573_v3  ;;  %v4559_v7 = vmul.f32 %v4527_v54, %v10576_v59  ;;  %8581 = vtanh.f32 %v4639_v40 }
 0xb03   : > { %v4536_v41 = vmul.f32 %v10585_v56, %v10585_v56  ;;  %v4535_v47 = vmul.f32 %v10588_v27, %v10588_v27  ;;  %v4648_v39 = vmul.f32 0.7978846, %v4616_v35 }
 0xb04   : > { %v4592_v24 = vmul.f32 0.044715, %v4560_v33  ;;  %v4591_v18 = vmul.f32 0.044715, %v4559_v7  ;;  %v4299_v63 = vpop.permute.xlu1 %4298  ;;  %v4243_v43 = vpop.permute.xlu0 %4242  ;;  %v4647_v22 = vmul.f32 0.7978846, %v4615_v6 }
 0xb05   : > { %v4568_v28 = vmul.f32 %v4536_v41, %v10585_v56  ;;  %v4567_v20 = vmul.f32 %v4535_v47, %v10588_v27  ;;  %v10600_v52 = vadd.f32 %v4299_v63, %v9665_v9  ;;  %v10605_v30 = vadd.f32 %v4243_v43, %v9656_v60 }
 0xb06   : > { %v4624_v19 = vadd.f32 %v4592_v24, %v10573_v3  ;;  %v4623_v23 = vadd.f32 %v4591_v18, %v10576_v59  ;;  %8583 = vtanh.f32 %v4648_v39 }
 0xb07   : > { %v4600_v44 = vmul.f32 0.044715, %v4568_v28  ;;  %v4599_v50 = vmul.f32 0.044715, %v4567_v20  ;;  %v4521_v1 = vmul.f32 %v10600_v52, %v10600_v52  ;;  %v4513_v9 = vmul.f32 %v10605_v30, %v10605_v30 }
 0xb08   : > { %v4656_v17 = vmul.f32 0.7978846, %v4624_v19  ;;  %v4655_v13 = vmul.f32 0.7978846, %v4623_v23  ;;  %v4411_v15 = vpop.permute.xlu1 %4410  ;;  %v4355_v26 = vpop.permute.xlu0 %4354  ;;  %8585 = vtanh.f32 %v4647_v22 }
 0xb09   : > { %v4632_v14 = vadd.f32 %v4600_v44, %v10585_v56  ;;  %v4631_v4 = vadd.f32 %v4599_v50, %v10588_v27  ;;  %v4553_v60 = vmul.f32 %v4521_v1, %v10600_v52  ;;  %v10615_v16 = vadd.f32 %v4411_v15, %v9699_v2 }
 0xb0a   : > { %v4545_v37 = vmul.f32 %v4513_v9, %v10605_v30  ;;  %v10619_v10 = vadd.f32 %v4355_v26, %v9673_v51  ;;  %8587 = vtanh.f32 %v4656_v17 }
 0xb0b   : > { %v8580_v54 = vpop.eup %8579  ;;  %v4664_v57 = vmul.f32 0.7978846, %v4632_v14  ;;  %v4663_v48 = vmul.f32 0.7978846, %v4631_v4  ;;  %v4585_v35 = vmul.f32 0.044715, %v4553_v60  ;;  %v4537_v33 = vmul.f32 %v10615_v16, %v10615_v16 }
 0xb0c   : > { %v4577_v6 = vmul.f32 0.044715, %v4545_v37  ;;  %v4529_v7 = vmul.f32 %v10619_v10, %v10619_v10  ;;  %v4306_v2 = vpop.permute.xlu1 %4305  ;;  %v4250_v40 = vpop.permute.xlu0 %4249  ;;  %v4704_v41 = vadd.f32 1.0, %v8580_v54  ;;  %8589 = vtanh.f32 %v4655_v13  ;;  %v12211_v14 = vld [vmem:[#allocation8_spill] sm:$0xff] }
 0xb0d   : > { %v4617_v47 = vadd.f32 %v4585_v35, %v10600_v52  ;;  %v10627_v51 = vadd.f32 %v4306_v2, %v9680_v8  ;;  %v10630_v39 = vadd.f32 %v4250_v40, %v9676_v38  ;;  %8591 = vtanh.f32 %v4664_v57  ;;  %v8582_v44 = vpop.eup %8581 }
 0xb0e   : > { %v4609_v24 = vadd.f32 %v4577_v6, %v10605_v30  ;;  %v4569_v18 = vmul.f32 %v4537_v33, %v10615_v16  ;;  %v4561_v63 = vmul.f32 %v4529_v7, %v10619_v10  ;;  %v4736_v22 = vmul.f32 0.5, %v4704_v41 }
 0xb0f   : > { %v4649_v43 = vmul.f32 0.7978846, %v4617_v47  ;;  %v4522_v28 = vmul.f32 %v10627_v51, %v10627_v51  ;;  %v4514_v20 = vmul.f32 %v10630_v39, %v10630_v39  ;;  %8593 = vtanh.f32 %v4663_v48 }
 0xb10   : > { %v4601_v8 = vmul.f32 0.044715, %v4569_v18  ;;  %v4593_v19 = vmul.f32 0.044715, %v4561_v63  ;;  %v4418_v38 = vpop.permute.xlu1 %4417  ;;  %v4362_v23 = vpop.permute.xlu0 %4361  ;;  %v4641_v50 = vmul.f32 0.7978846, %v4609_v24  ;;  %v4768_v57 = vmul.f32 %v4736_v22, %v10548_v0 }
 0xb11   : > { %v4554_v1 = vmul.f32 %v4522_v28, %v10627_v51  ;;  %v4546_v17 = vmul.f32 %v4514_v20, %v10630_v39  ;;  %v10642_v13 = vadd.f32 %v4418_v38, %v9754_v11  ;;  %v10644_v9 = vpop.eup %8583  ;;  %8595 = vtanh.f32 %v4649_v43 }
 0xb12   : > { %v4633_v15 = vadd.f32 %v4601_v8, %v10615_v16  ;;  %v4625_v26 = vadd.f32 %v4593_v19, %v10619_v10  ;;  %v10649_v4 = vadd.f32 %v4362_v23, %v12211_v14  ;;  %v8586_v48 = vpop.eup %8585  ;;  %v4703_v2 = vadd.f32 1.0, %v8582_v44 }
 0xb13   : > { %v4586_v60 = vmul.f32 0.044715, %v4554_v1  ;;  %v4578_v37 = vmul.f32 0.044715, %v4546_v17  ;;  %v4538_v54 = vmul.f32 %v10642_v13, %v10642_v13  ;;  %8597 = vtanh.f32 %v4641_v50 }
 0xb14   : > { %v4665_v11 = vmul.f32 0.7978846, %v4633_v15  ;;  %v4657_v35 = vmul.f32 0.7978846, %v4625_v26  ;;  %v4530_v6 = vmul.f32 %v10649_v4, %v10649_v4  ;;  %v4313_v33 = vpop.permute.xlu1 %4312  ;;  %v4257_v7 = vpop.permute.xlu0 %4256  ;;  %v4801_v43 = vpack.c.bf16 %v4768_v57, %v4768_v57 }
 0xb15   : > { %v10656_v40 = vpop.eup %8587  ;;  %v4618_v41 = vadd.f32 %v4586_v60, %v10627_v51  ;;  %v4610_v47 = vadd.f32 %v4578_v37, %v10630_v39  ;;  %v4570_v24 = vmul.f32 %v4538_v54, %v10642_v13  ;;  %v10662_v18 = vadd.f32 %v4313_v33, %v9722_v53 }
 0xb16   : > { %v4562_v0 = vmul.f32 %v4530_v6, %v10649_v4  ;;  %v10666_v63 = vadd.f32 %v4257_v7, %v9713_v46  ;;  %v10668_v28 = vpop.eup %8589  ;;  %8599 = vtanh.f32 %v4665_v11  ;;  %v4865_v44 = vunpack.c.l.b16 %v4801_v43 }
 0xb17   : > { %v4650_v20 = vmul.f32 0.7978846, %v4618_v41  ;;  %v4642_v22 = vmul.f32 0.7978846, %v4610_v47  ;;  %v4602_v8 = vmul.f32 0.044715, %v4570_v24  ;;  %v10670_v19 = vpop.eup %8591  ;;  %v4523_v53 = vmul.f32 %v10662_v18, %v10662_v18 }
 0xb18   : > { %v4594_v38 = vmul.f32 0.044715, %v4562_v0  ;;  %v4515_v23 = vmul.f32 %v10666_v63, %v10666_v63  ;;  %v4425_v50 = vpop.permute.xlu1 %4424  ;;  %v4369_v46 = vpop.permute.xlu0 %4368  ;;  %8601 = vtanh.f32 %v4657_v35  ;;  %v4735_v17 = vmul.f32 0.5, %v4703_v2  ;;  %4900 = vperm.xlu1 %8562, %v4865_v44  }
 0xb19   : > { %v4634_v1 = vadd.f32 %v4602_v8, %v10642_v13  ;;  %v10678_v15 = vadd.f32 %v4425_v50, %v9798_v25  ;;  %v10680_v26 = vpop.eup %8593  ;;  %8603 = vtanh.f32 %v4650_v20  ;;  %v4555_v60 = vmul.f32 %v4523_v53, %v10662_v18 }
 0xb1a   : > { %v4626_v14 = vadd.f32 %v4594_v38, %v10649_v4  ;;  %v4547_v37 = vmul.f32 %v4515_v23, %v10666_v63  ;;  %v4767_v57 = vmul.f32 %v4735_v17, %v10551_v58  ;;  %v10689_v35 = vadd.f32 %v4369_v46, %v9769_v61 }
 0xb1b   : > { %v4666_v54 = vmul.f32 0.7978846, %v4634_v1  ;;  %v4539_v11 = vmul.f32 %v10678_v15, %v10678_v15  ;;  %v10691_v25 = vpop.eup %8595  ;;  %8605 = vtanh.f32 %v4642_v22  ;;  %v4587_v33 = vmul.f32 0.044715, %v4555_v60 }
 0xb1c   : > { %v4658_v6 = vmul.f32 0.7978846, %v4626_v14  ;;  %v4579_v7 = vmul.f32 0.044715, %v4547_v37  ;;  %v4800_v2 = vpack.c.bf16 %v4767_v57, %v4767_v57  ;;  %v4531_v47 = vmul.f32 %v10689_v35, %v10689_v35  ;;  %v4320_v58 = vpop.permute.xlu1 %4319  ;;  %v4264_v43 = vpop.permute.xlu0 %4263 }
 0xb1d   : > { %8607 = vtanh.f32 %v4666_v54  ;;  %v4571_v41 = vmul.f32 %v4539_v11, %v10678_v15  ;;  %v4619_v24 = vadd.f32 %v4587_v33, %v10662_v18  ;;  %v4712_v0 = vadd.f32 1.0, %v10644_v9  ;;  %v10700_v53 = vpop.eup %8597 }
 0xb1e   : > { %8609 = vtanh.f32 %v4658_v6  ;;  %v4611_v61 = vadd.f32 %v4579_v7, %v10666_v63  ;;  %v4864_v20 = vunpack.c.l.b16 %v4800_v2  ;;  %v4563_v8 = vmul.f32 %v4531_v47, %v10689_v35 }
 0xb1f   : > { %v4603_v22 = vmul.f32 0.044715, %v4571_v41  ;;  %v4711_v38 = vadd.f32 1.0, %v8586_v48  ;;  %v4651_v23 = vmul.f32 0.7978846, %v4619_v24  ;;  %v4744_v50 = vmul.f32 0.5, %v4712_v0 }
 0xb20   : > { %v4643_v44 = vmul.f32 0.7978846, %v4611_v61  ;;  %v10703_v46 = vadd.f32 %v4320_v58, %v9747_v49  ;;  %v10705_v1 = vpop.eup %8599  ;;  %4897 = vperm.xlu0 %8561, %v4864_v20   ;;  %v4595_v9 = vmul.f32 0.044715, %v4563_v8  ;;  %v10709_v60 = vadd.f32 %v4264_v43, %v9729_v32  ;;  %v4432_v33 = vpop.permute.xlu1 %4431 }
 0xb21   : > { %v4635_v17 = vadd.f32 %v4603_v22, %v10678_v15  ;;  %v4743_v14 = vmul.f32 0.5, %v4711_v38  ;;  %8611 = vtanh.f32 %v4651_v23  ;;  %v4776_v48 = vmul.f32 %v4744_v50, %v10560_v21  ;;  %v4376_v47 = vpop.permute.xlu0 %4375 }
 0xb22   : > { %v4524_v37 = vmul.f32 %v10703_v46, %v10703_v46  ;;  %v4720_v54 = vadd.f32 1.0, %v10656_v40  ;;  %v10715_v49 = vpop.eup %8601  ;;  %8613 = vtanh.f32 %v4643_v44  ;;  %v4627_v11 = vadd.f32 %v4595_v9, %v10689_v35 }
 0xb23   : > { %v4667_v57 = vmul.f32 0.7978846, %v4635_v17  ;;  %v4775_v6 = vmul.f32 %v4743_v14, %v10563_v36  ;;  %v10719_v7 = vpop.eup %8603  ;;  %v4809_v32 = vpack.c.bf16 %v4776_v48, %v4776_v48  ;;  %v4516_v21 = vmul.f32 %v10709_v60, %v10709_v60 }
 0xb24   : > { %v4556_v2 = vmul.f32 %v4524_v37, %v10703_v46  ;;  %v4752_v41 = vmul.f32 0.5, %v4720_v54  ;;  %v4659_v40 = vmul.f32 0.7978846, %v4627_v11  ;;  %v4719_v24 = vadd.f32 1.0, %v10668_v28  ;;  %v4327_v37 = vpop.permute.xlu1 %4326 }
 0xb25   : > { %8615 = vtanh.f32 %v4667_v57  ;;  %v4808_v58 = vpack.c.bf16 %v4775_v6, %v4775_v6  ;;  %v10725_v61 = vpop.eup %8605  ;;  %v4873_v0 = vunpack.c.l.b16 %v4809_v32  ;;  %v4548_v43 = vmul.f32 %v4516_v21, %v10709_v60 }
 0xb26   : > { %v4588_v36 = vmul.f32 0.044715, %v4556_v2  ;;  %v4784_v20 = vmul.f32 %v4752_v41, %v10573_v3  ;;  %8617 = vtanh.f32 %v4659_v40  ;;  %v4751_v38 = vmul.f32 0.5, %v4719_v24  ;;  %v12212_v41 = vld [vmem:[#allocation5_spill] sm:$0xff] }
 0xb27   : > { %v10729_v22 = vpop.eup %8607  ;;  %v4872_v8 = vunpack.c.l.b16 %v4808_v58  ;;  %v10732_v23 = vadd.f32 %v4432_v33, %v9807_v5  ;;  %4924 = vperm.xlu1 %8562, %v4873_v0   ;;  %v4580_v50 = vmul.f32 0.044715, %v4548_v43  ;;  %v10738_v9 = vadd.f32 %v4376_v47, %v9776_v34  ;;  %v4271_v34 = vpop.permute.xlu0 %4270 }
 0xb28   : > { %v10734_v44 = vpop.eup %8609  ;;  %v4620_v28 = vadd.f32 %v4588_v36, %v10703_v46  ;;  %v4817_v17 = vpack.c.bf16 %v4784_v20, %v4784_v20  ;;  %v4783_v3 = vmul.f32 %v4751_v38, %v10576_v59  ;;  %v4728_v48 = vadd.f32 1.0, %v10670_v19 }
 0xb29   : > { %4921 = vperm.xlu0 %8561, %v4872_v8   ;;  %v4540_v14 = vmul.f32 %v10732_v23, %v10732_v23  ;;  %v4727_v5 = vadd.f32 1.0, %v10680_v26  ;;  %v4612_v57 = vadd.f32 %v4580_v50, %v10709_v60  ;;  %v4532_v6 = vmul.f32 %v10738_v9, %v10738_v9  ;;  %v12213_v8 = vld [vmem:[#allocation7_spill] sm:$0xff] }
 0xb2a   : > { %v4652_v54 = vmul.f32 0.7978846, %v4620_v28  ;;  %v4881_v11 = vunpack.c.l.b16 %v4817_v17  ;;  %v4816_v33 = vpack.c.bf16 %v4783_v3, %v4783_v3  ;;  %v4760_v59 = vmul.f32 0.5, %v4728_v48 }
 0xb2b   : > { %v4572_v32 = vmul.f32 %v4540_v14, %v10732_v23  ;;  %v4759_v2 = vmul.f32 0.5, %v4727_v5  ;;  %v10749_v21 = vpop.eup %8611  ;;  %v4644_v19 = vmul.f32 0.7978846, %v4612_v57  ;;  %v4564_v26 = vmul.f32 %v4532_v6, %v10738_v9 }
 0xb2c   : > { %8619 = vtanh.f32 %v4652_v54  ;;  %4948 = vperm.xlu1 %8562, %v4881_v11   ;;  %v10753_v47 = vadd.f32 %v4327_v37, %v12212_v41  ;;  %v10755_v40 = vpop.eup %8613  ;;  %v4880_v58 = vunpack.c.l.b16 %v4816_v33  ;;  %v4792_v0 = vmul.f32 %v4760_v59, %v10585_v56  ;;  %v4439_v37 = vpop.permute.xlu1 %4438  ;;  %v12215_v41 = vld [vmem:[#allocation10_spill] sm:$0xff] }
 0xb2d   : > { %v4604_v24 = vmul.f32 0.044715, %v4572_v32  ;;  %v4791_v36 = vmul.f32 %v4759_v2, %v10588_v27  ;;  %8621 = vtanh.f32 %v4644_v19  ;;  %v4596_v43 = vmul.f32 0.044715, %v4564_v26  ;;  %v4383_v54 = vpop.permute.xlu0 %4382  ;;  %v12214_v26 = vld [vmem:[#allocation4_spill] sm:$0xff] }
 0xb2e   : > { %v4525_v20 = vmul.f32 %v10753_v47, %v10753_v47  ;;  %v10762_v38 = vadd.f32 %v4271_v34, %v12213_v8  ;;  %4945 = vperm.xlu0 %8561, %v4880_v58   ;;  %v4825_v17 = vpack.c.bf16 %v4792_v0, %v4792_v0  ;;  %v4713_v14 = vadd.f32 1.0, %v10691_v25 }
 0xb2f   : > { %v10764_v28 = vpop.eup %8615  ;;  %v4636_v50 = vadd.f32 %v4604_v24, %v10732_v23  ;;  %v4824_v3 = vpack.c.bf16 %v4791_v36, %v4791_v36  ;;  %v4628_v56 = vadd.f32 %v4596_v43, %v10738_v9  ;;  %v4705_v5 = vadd.f32 1.0, %v10700_v53 }
 0xb30   : > { %v4557_v27 = vmul.f32 %v4525_v20, %v10753_v47  ;;  %v4517_v48 = vmul.f32 %v10762_v38, %v10762_v38  ;;  %v10773_v57 = vpop.eup %8617  ;;  %v4889_v6 = vunpack.c.l.b16 %v4825_v17  ;;  %v4745_v33 = vmul.f32 0.5, %v4713_v14 }
 0xb31   : > { %v4668_v11 = vmul.f32 0.7978846, %v4636_v50  ;;  %v4888_v34 = vunpack.c.l.b16 %v4824_v3  ;;  %v4660_v32 = vmul.f32 0.7978846, %v4628_v56  ;;  %v4737_v2 = vmul.f32 0.5, %v4705_v5 }
 0xb32   : > { %v4589_v59 = vmul.f32 0.044715, %v4557_v27  ;;  %v4549_v25 = vmul.f32 %v4517_v48, %v10762_v38  ;;  %4972 = vperm.xlu1 %8562, %v4889_v6   ;;  %v4777_v19 = vmul.f32 %v4745_v33, %v10600_v52  ;;  %v10778_v53 = vadd.f32 %v4439_v37, %v12214_v26  ;;  %v4334_v27 = vpop.permute.xlu1 %4333  ;;  %v4278_v48 = vpop.permute.xlu0 %4277 }
 0xb33   : > { %8623 = vtanh.f32 %v4668_v11  ;;  %4969 = vperm.xlu0 %8561, %v4888_v34   ;;  %v10781_v58 = vadd.f32 %v4383_v54, %v12215_v41  ;;  %v4769_v36 = vmul.f32 %v4737_v2, %v10605_v30  ;;  %v4729_v52 = vadd.f32 1.0, %v10705_v1 }
 0xb34   : > { %8625 = vtanh.f32 %v4660_v32  ;;  %v4621_v24 = vadd.f32 %v4589_v59, %v10753_v47  ;;  %v4581_v0 = vmul.f32 0.044715, %v4549_v25  ;;  %v4810_v43 = vpack.c.bf16 %v4777_v19, %v4777_v19  ;;  %v12217_v19 = vld [vmem:[#allocation11_spill] sm:$0xff] }
 0xb35   : > { %v4541_v20 = vmul.f32 %v10778_v53, %v10778_v53  ;;  %v4533_v8 = vmul.f32 %v10781_v58, %v10781_v58  ;;  %v4802_v14 = vpack.c.bf16 %v4769_v36, %v4769_v36  ;;  %v4721_v56 = vadd.f32 1.0, %v10715_v49  ;;  %v12216_v49 = vld [vmem:[#allocation12_spill] sm:$0xff] }
 0xb36   : > { %v10790_v50 = vpop.eup %8619  ;;  %v4653_v17 = vmul.f32 0.7978846, %v4621_v24  ;;  %v4613_v3 = vadd.f32 %v4581_v0, %v10762_v38  ;;  %v4874_v30 = vunpack.c.l.b16 %v4810_v43  ;;  %v4761_v54 = vmul.f32 0.5, %v4729_v52  ;;  %v4446_v52 = vpop.permute.xlu1 %4445 }
 0xb37   : > { %v4573_v5 = vmul.f32 %v4541_v20, %v10778_v53  ;;  %v4565_v37 = vmul.f32 %v4533_v8, %v10781_v58  ;;  %v10796_v11 = vpop.eup %8621  ;;  %v4866_v6 = vunpack.c.l.b16 %v4802_v14  ;;  %v4753_v34 = vmul.f32 0.5, %v4721_v56 }
 0xb38   : > { %8627 = vtanh.f32 %v4653_v17  ;;  %v4645_v1 = vmul.f32 0.7978846, %v4613_v3  ;;  %4927 = vperm.xlu1 %8562, %v4874_v30   ;;  %v4793_v59 = vmul.f32 %v4761_v54, %v10615_v16  ;;  %v10800_v25 = vadd.f32 %v4334_v27, %v12216_v49  ;;  %v4390_v17 = vpop.permute.xlu0 %4389 }
 0xb39   : > { %v4605_v33 = vmul.f32 0.044715, %v4573_v5  ;;  %v4597_v32 = vmul.f32 0.044715, %v4565_v37  ;;  %4903 = vperm.xlu0 %8561, %v4866_v6   ;;  %v4785_v2 = vmul.f32 %v4753_v34, %v10619_v10  ;;  %v10804_v26 = vadd.f32 %v4278_v48, %v12217_v19  ;;  %v12219_v34 = vld [vmem:[#allocation9_spill] sm:$0xff] }
 0xb3a   : > { %8629 = vtanh.f32 %v4645_v1  ;;  %v4714_v41 = vadd.f32 1.0, %v10719_v7  ;;  %v4826_v36 = vpack.c.bf16 %v4793_v59, %v4793_v59  ;;  %v4526_v16 = vmul.f32 %v10800_v25, %v10800_v25  ;;  %v12218_v1 = vld [vmem:[#allocation13_spill] sm:$0xff] }
 0xb3b   : > { %v4637_v24 = vadd.f32 %v4605_v33, %v10778_v53  ;;  %v4629_v0 = vadd.f32 %v4597_v32, %v10781_v58  ;;  %v4818_v43 = vpack.c.bf16 %v4785_v2, %v4785_v2  ;;  %v4518_v20 = vmul.f32 %v10804_v26, %v10804_v26 }
 0xb3c   : > { %v4746_v8 = vmul.f32 0.5, %v4714_v41  ;;  %v4706_v10 = vadd.f32 1.0, %v10725_v61  ;;  %v4890_v56 = vunpack.c.l.b16 %v4826_v36  ;;  %v4558_v27 = vmul.f32 %v4526_v16, %v10800_v25 }
 0xb3d   : > { %v10814_v3 = vpop.eup %8623  ;;  %v4669_v7 = vmul.f32 0.7978846, %v4637_v24  ;;  %v4661_v14 = vmul.f32 0.7978846, %v4629_v0  ;;  %v4882_v30 = vunpack.c.l.b16 %v4818_v43  ;;  %v4550_v5 = vmul.f32 %v4518_v20, %v10804_v26 }
 0xb3e   : > { %v10817_v48 = vpop.eup %8625  ;;  %v4778_v37 = vmul.f32 %v4746_v8, %v10627_v51  ;;  %v4738_v54 = vmul.f32 0.5, %v4706_v10  ;;  %4975 = vperm.xlu1 %8562, %v4890_v56   ;;  %v4590_v61 = vmul.f32 0.044715, %v4558_v27  ;;  %v10822_v6 = vadd.f32 %v4446_v52, %v12218_v1 }
 0xb3f   : > { %8631 = vtanh.f32 %v4669_v7  ;;  %v10825_v33 = vadd.f32 %v4390_v17, %v12219_v34  ;;  %4951 = vperm.xlu0 %8561, %v4882_v30   ;;  %v4582_v32 = vmul.f32 0.044715, %v4550_v5  ;;  %v4730_v41 = vadd.f32 1.0, %v10729_v22 }
 0xb40   : > { %8633 = vtanh.f32 %v4661_v14  ;;  %v4811_v59 = vpack.c.bf16 %v4778_v37, %v4778_v37  ;;  %v4770_v49 = vmul.f32 %v4738_v54, %v10630_v39  ;;  %v4622_v2 = vadd.f32 %v4590_v61, %v10800_v25 }
 0xb41   : > { %v4542_v51 = vmul.f32 %v10822_v6, %v10822_v6  ;;  %v4534_v19 = vmul.f32 %v10825_v33, %v10825_v33  ;;  %v4614_v0 = vadd.f32 %v4582_v32, %v10804_v26  ;;  %v4722_v43 = vadd.f32 1.0, %v10734_v44 }
 0xb42   : > { %v8628_v24 = vpop.eup %8627  ;;  %v4875_v36 = vunpack.c.l.b16 %v4811_v59  ;;  %v4803_v16 = vpack.c.bf16 %v4770_v49, %v4770_v49  ;;  %v4654_v20 = vmul.f32 0.7978846, %v4622_v2  ;;  %v4762_v10 = vmul.f32 0.5, %v4730_v41 }
 0xb43   : > { %v4574_v39 = vmul.f32 %v4542_v51, %v10822_v6  ;;  %v4566_v8 = vmul.f32 %v4534_v19, %v10825_v33  ;;  %v4646_v17 = vmul.f32 0.7978846, %v4614_v0  ;;  %v4754_v14 = vmul.f32 0.5, %v4722_v43 }
 0xb44   : > { %v8630_v52 = vpop.eup %8629  ;;  %4930 = vperm.xlu1 %8562, %v4875_v36   ;;  %v4867_v7 = vunpack.c.l.b16 %v4803_v16  ;;  %v4715_v22 = vadd.f32 1.0, %v10749_v21  ;;  %8635 = vtanh.f32 %v4654_v20  ;;  %v4794_v30 = vmul.f32 %v4762_v10, %v10642_v13 }
 0xb45   : > { %v4606_v56 = vmul.f32 0.044715, %v4574_v39  ;;  %v4598_v27 = vmul.f32 0.044715, %v4566_v8  ;;  %8637 = vtanh.f32 %v4646_v17  ;;  %v4786_v44 = vmul.f32 %v4754_v14, %v10649_v4 }
 0xb46   : > { %4906 = vperm.xlu0 %8561, %v4867_v7   ;;  %v4747_v5 = vmul.f32 0.5, %v4715_v22  ;;  %v4707_v37 = vadd.f32 1.0, %v10755_v40  ;;  %v4827_v1 = vpack.c.bf16 %v4794_v30, %v4794_v30  ;;  %v4731_v34 = vadd.f32 1.0, %v10764_v28 }
 0xb47   : > { %v4638_v54 = vadd.f32 %v4606_v56, %v10822_v6  ;;  %v4630_v61 = vadd.f32 %v4598_v27, %v10825_v33  ;;  %v4819_v21 = vpack.c.bf16 %v4786_v44, %v4786_v44  ;;  %v4723_v13 = vadd.f32 1.0, %v10773_v57 }
 0xb48   : > { %v4779_v32 = vmul.f32 %v4747_v5, %v10662_v18  ;;  %v4739_v59 = vmul.f32 0.5, %v4707_v37  ;;  %v4891_v4 = vunpack.c.l.b16 %v4827_v1  ;;  %v4763_v19 = vmul.f32 0.5, %v4731_v34 }
 0xb49   : > { %v8632_v49 = vpop.eup %8631  ;;  %v4670_v2 = vmul.f32 0.7978846, %v4638_v54  ;;  %v4662_v51 = vmul.f32 0.7978846, %v4630_v61  ;;  %v4883_v40 = vunpack.c.l.b16 %v4819_v21  ;;  %v4755_v16 = vmul.f32 0.5, %v4723_v13 }
 0xb4a   : > { %v8634_v41 = vpop.eup %8633  ;;  %v4812_v0 = vpack.c.bf16 %v4779_v32, %v4779_v32  ;;  %v4771_v36 = vmul.f32 %v4739_v59, %v10666_v63  ;;  %4978 = vperm.xlu1 %8562, %v4891_v4   ;;  %v4795_v28 = vmul.f32 %v4763_v19, %v10678_v15  ;;  %v4716_v18 = vadd.f32 1.0, %v10790_v50 }
 0xb4b   : > { %8639 = vtanh.f32 %v4670_v2  ;;  %v4708_v43 = vadd.f32 1.0, %v10796_v11  ;;  %4954 = vperm.xlu0 %8561, %v4883_v40   ;;  %v4787_v39 = vmul.f32 %v4755_v16, %v10689_v35  ;;  %v4732_v63 = vadd.f32 1.0, %v10814_v3 }
 0xb4c   : > { %8641 = vtanh.f32 %v4662_v51  ;;  %v4876_v57 = vunpack.c.l.b16 %v4812_v0  ;;  %v4804_v20 = vpack.c.bf16 %v4771_v36, %v4771_v36  ;;  %v4828_v8 = vpack.c.bf16 %v4795_v28, %v4795_v28 }
 0xb4d   : > { %v4748_v10 = vmul.f32 0.5, %v4716_v18  ;;  %v4740_v17 = vmul.f32 0.5, %v4708_v43  ;;  %v4820_v14 = vpack.c.bf16 %v4787_v39, %v4787_v39  ;;  %v4724_v22 = vadd.f32 1.0, %v10817_v48 }
 0xb4e   : > { %v4868_v7 = vunpack.c.l.b16 %v4804_v20  ;;  %v4717_v15 = vadd.f32 1.0, %v8628_v24  ;;  %v8636_v56 = vpop.eup %8635  ;;  %4933 = vperm.xlu1 %8562, %v4876_v57   ;;  %v4892_v50 = vunpack.c.l.b16 %v4828_v8  ;;  %v4764_v30 = vmul.f32 0.5, %v4732_v63 }
 0xb4f   : > { %v4780_v11 = vmul.f32 %v4748_v10, %v10703_v46  ;;  %v4772_v27 = vmul.f32 %v4740_v17, %v10709_v60  ;;  %v8638_v44 = vpop.eup %8637  ;;  %v4884_v35 = vunpack.c.l.b16 %v4820_v14  ;;  %v4756_v5 = vmul.f32 0.5, %v4724_v22 }
 0xb50   : > { %4909 = vperm.xlu0 %8561, %v4868_v7   ;;  %v4749_v37 = vmul.f32 0.5, %v4717_v15  ;;  %v4709_v54 = vadd.f32 1.0, %v8630_v52  ;;  %v4796_v1 = vmul.f32 %v4764_v30, %v10732_v23  ;;  %v4733_v48 = vadd.f32 1.0, %v8632_v49 }
 0xb51   : > { %v4813_v3 = vpack.c.bf16 %v4780_v11, %v4780_v11  ;;  %v4805_v61 = vpack.c.bf16 %v4772_v27, %v4772_v27  ;;  %v4788_v24 = vmul.f32 %v4756_v5, %v10738_v9  ;;  %v4725_v46 = vadd.f32 1.0, %v8634_v41 }
 0xb52   : > { %v4781_v34 = vmul.f32 %v4749_v37, %v10753_v47  ;;  %v4741_v21 = vmul.f32 0.5, %v4709_v54  ;;  %4981 = vperm.xlu1 %8562, %v4892_v50   ;;  %v4829_v32 = vpack.c.bf16 %v4796_v1, %v4796_v1  ;;  %v4765_v59 = vmul.f32 0.5, %v4733_v48 }
 0xb53   : > { %v4877_v60 = vunpack.c.l.b16 %v4813_v3  ;;  %v4869_v13 = vunpack.c.l.b16 %v4805_v61  ;;  %v4821_v2 = vpack.c.bf16 %v4788_v24, %v4788_v24  ;;  %v4757_v51 = vmul.f32 0.5, %v4725_v46 }
 0xb54   : > { %4957 = vperm.xlu0 %8561, %v4884_v35   ;;  %v4773_v52 = vmul.f32 %v4741_v21, %v10762_v38  ;;  %v4718_v19 = vadd.f32 1.0, %v8636_v56  ;;  %v4710_v23 = vadd.f32 1.0, %v8638_v44  ;;  %v4893_v40 = vunpack.c.l.b16 %v4829_v32 }
 0xb55   : > { %v8640_v4 = vpop.eup %8639  ;;  %v4814_v9 = vpack.c.bf16 %v4781_v34, %v4781_v34  ;;  %v4885_v47 = vunpack.c.l.b16 %v4821_v2  ;;  %v4797_v41 = vmul.f32 %v4765_v59, %v10778_v53  ;;  %v4789_v28 = vmul.f32 %v4757_v51, %v10781_v58 }
 0xb56   : > { %v8642_v49 = vpop.eup %8641  ;;  %4936 = vperm.xlu1 %8562, %v4877_v60   ;;  %v4750_v0 = vmul.f32 0.5, %v4718_v19  ;;  %v4734_v36 = vadd.f32 1.0, %v8640_v4  ;;  %v4806_v16 = vpack.c.bf16 %v4773_v52, %v4773_v52  ;;  %v4742_v18 = vmul.f32 0.5, %v4710_v23  ;;  %v12220_v19 = vld [vmem:[#allocation3_spill] sm:$0xff] }
 0xb57   : > { %v4726_v43 = vadd.f32 1.0, %v8642_v49  ;;  %v4878_v38 = vunpack.c.l.b16 %v4814_v9  ;;  %v4830_v57 = vpack.c.bf16 %v4797_v41, %v4797_v41  ;;  %v4822_v10 = vpack.c.bf16 %v4789_v28, %v4789_v28 }
 0xb58   : > { %4912 = vperm.xlu0 %8561, %v4869_v13   ;;  %v4782_v20 = vmul.f32 %v4750_v0, %v10800_v25  ;;  %v4766_v39 = vmul.f32 0.5, %v4734_v36  ;;  %v4870_v8 = vunpack.c.l.b16 %v4806_v16  ;;  %v4774_v17 = vmul.f32 %v4742_v18, %v10804_v26 }
 0xb59   : > { %v4758_v53 = vmul.f32 0.5, %v4726_v43  ;;  %v4894_v63 = vunpack.c.l.b16 %v4830_v57  ;;  %v4886_v58 = vunpack.c.l.b16 %v4822_v10 }
 0xb5a   : > { %4984 = vperm.xlu1 %8562, %v4893_v40   ;;  %v4815_v7 = vpack.c.bf16 %v4782_v20, %v4782_v20  ;;  %v4798_v14 = vmul.f32 %v4766_v39, %v10822_v6  ;;  %v4807_v22 = vpack.c.bf16 %v4774_v17, %v4774_v17 }
 0xb5b   : > { %v4790_v15 = vmul.f32 %v4758_v53, %v10825_v33 }
 0xb5c   : > { %4960 = vperm.xlu0 %8561, %v4885_v47   ;;  %v4879_v56 = vunpack.c.l.b16 %v4815_v7  ;;  %v4831_v25 = vpack.c.bf16 %v4798_v14, %v4798_v14  ;;  %v4871_v50 = vunpack.c.l.b16 %v4807_v22 }
 0xb5d   : > { %v4823_v11 = vpack.c.bf16 %v4790_v15, %v4790_v15 }
 0xb5e   : > { %4939 = vperm.xlu1 %8562, %v4878_v38   ;;  %v4895_v27 = vunpack.c.l.b16 %v4831_v25 }
 0xb5f   : > { %v4887_v26 = vunpack.c.l.b16 %v4823_v11 }
 0xb60   : > { %4915 = vperm.xlu0 %8561, %v4870_v8  }
 0xb62   : > { %4987 = vperm.xlu1 %8562, %v4894_v63  }
 0xb64   : > { %4963 = vperm.xlu0 %8561, %v4886_v58  }
 0xb66   : > { %4942 = vperm.xlu1 %8562, %v4879_v56  }
 0xb68   : > { %4918 = vperm.xlu0 %8561, %v4871_v50  }
 0xb6a   : > { %4990 = vperm.xlu1 %8562, %v4895_v27  }
 0xb6c   : > { %4966 = vperm.xlu0 %8561, %v4887_v26  }
 0xb97   : > { %v4901_v30 = vpop.permute.xlu1 %4900 }
 0xb98   : > { %v4999_v23 = vrot.slane %v4901_v30, %v12220_v19 }
 0xb9f   : > { %v4898_v44 = vpop.permute.xlu0 %4897 }
 0xba0   : > { %v4995_v49 = vrot.slane %v4898_v44, %v12220_v19 }
 0xba2   : > { %v5120_v39 = vsel %vm2164_vm1, %v4999_v23, %v4995_v49 }
 0xba6   : > { %v4925_v6 = vpop.permute.xlu1 %4924 }
 0xba7   : > { %v5031_v40 = vrot.slane %v4925_v6, %v12220_v19 }
 0xba8   : > { %v4922_v35 = vpop.permute.xlu0 %4921 }
 0xba9   : > { %v5027_v9 = vrot.slane %v4922_v35, %v12220_v19 }
 0xbab   : > { %v4949_v5 = vpop.permute.xlu1 %4948  ;;  %v5126_v8 = vsel %vm2164_vm1, %v5031_v40, %v5027_v9 }
 0xbac   : > { %v5063_v47 = vrot.slane %v4949_v5, %v12220_v19 }
 0xbad   : > { %v4946_v37 = vpop.permute.xlu0 %4945 }
 0xbae   : > { %v5059_v41 = vrot.slane %v4946_v37, %v12220_v19 }
 0xbb0   : > { %v5132_v53 = vsel %vm2164_vm1, %v5063_v47, %v5059_v41 }
 0xbb1   : > { %v4973_v54 = vpop.permute.xlu1 %4972 }
 0xbb2   : > { %v4970_v33 = vpop.permute.xlu0 %4969  ;;  %v5095_v0 = vrot.slane %v4973_v54, %v12220_v19 }
 0xbb3   : > { %v5091_v36 = vrot.slane %v4970_v33, %v12220_v19 }
 0xbb5   : > { %v5138_v63 = vsel %vm2164_vm1, %v5095_v0, %v5091_v36  ;;  %vm12222_vm1 = vmmov %vm12221_vm15 }
 0xbb6   : > { %vm12223_vm3 = vmmov %vm12222_vm1 }
 0xbb7   : > { %v4928_v3 = vpop.permute.xlu1 %4927 }
 0xbb8   : > { %v4904_v61 = vpop.permute.xlu0 %4903  ;;  %v5035_v28 = vrot.slane %v4928_v3, %v12220_v19 }
 0xbb9   : > { %v5003_v18 = vrot.slane %v4904_v61, %v12220_v19 }
 0xbba   : > { %v5127_v22 = vsel %vm2166_vm2, %v5035_v28, %v5126_v8 }
 0xbbb   : > { %v5121_v15 = vsel %vm2166_vm2, %v5003_v18, %v5120_v39 }
 0xbbd   : > { %v4976_v1 = vpop.permute.xlu1 %4975 }
 0xbbe   : > { %v4952_v48 = vpop.permute.xlu0 %4951  ;;  %v5099_v43 = vrot.slane %v4976_v1, %v12220_v19 }
 0xbbf   : > { %v5067_v57 = vrot.slane %v4952_v48, %v12220_v19 }
 0xbc0   : > { %v5139_v56 = vsel %vm2166_vm2, %v5099_v43, %v5138_v63 }
 0xbc1   : > { %v5133_v11 = vsel %vm2166_vm2, %v5067_v57, %v5132_v53  ;;  %vm12226_vm2 = vcmask 1046534  }
 0xbc3   : > { %v4931_v24 = vpop.permute.xlu1 %4930 }
 0xbc4   : > { %v5039_v20 = vrot.slane %v4931_v24, %v12220_v19 }
 0xbc5   : > { %v4907_v34 = vpop.permute.xlu0 %4906 }
 0xbc6   : > { %v5007_v10 = vrot.slane %v4907_v34, %v12220_v19  ;;  %v5128_v27 = vsel %vm12221_vm15, %v5039_v20, %v5127_v22 }
 0xbc8   : > { %v5122_v44 = vsel %vm12222_vm1, %v5007_v10, %v5121_v15 }
 0xbc9   : > { %v4979_v21 = vpop.permute.xlu1 %4978 }
 0xbca   : > { %v4955_v46 = vpop.permute.xlu0 %4954  ;;  %v5103_v17 = vrot.slane %v4979_v21, %v12220_v19 }
 0xbcb   : > { %v5071_v35 = vrot.slane %v4955_v46, %v12220_v19 }
 0xbcc   : > { %v5140_v6 = vsel %vm12223_vm3, %v5103_v17, %v5139_v56  ;;  %vm12227_vm3 = vmmov %vm12226_vm2 }
 0xbcd   : > { %v4934_v60 = vpop.permute.xlu1 %4933  ;;  %vm12233_vm6 = vmmov %vm12227_vm3 }
 0xbce   : > { %v5043_v7 = vrot.slane %v4934_v60, %v12220_v19 }
 0xbcf   : > { %v4910_v32 = vpop.permute.xlu0 %4909 }
 0xbd0   : > { %v5011_v14 = vrot.slane %v4910_v32, %v12220_v19  ;;  %v5129_v37 = vsel %vm12224_vm4, %v5043_v7, %v5128_v27  ;;  %vm12228_vm4 = vcmask 1047559  }
 0xbd1   : > { %v10866_v59 = vpop.permute.xlu1 %4981  ;;  %vm12230_vm15 = vmmov %vm12228_vm4 }
 0xbd2   : > { %v5123_v54 = vsel %vm12225_vm5, %v5011_v14, %v5122_v44  ;;  %v5107_v33 = vrot.slane %v10866_v59, %v12220_v19  ;;  %vm12229_vm5 = vmmov %vm12222_vm1  ;;  %vm12231_vm1 = vcmask 1045509  }
 0xbd3   : > { %v10868_v13 = vpop.permute.xlu0 %4957 }
 0xbd4   : > { %v5075_v3 = vrot.slane %v10868_v13, %v12220_v19  ;;  %v5134_v13 = vsel %vm12229_vm5, %v5071_v35, %v5133_v11  ;;  %vm12235_vm5 = vmmov %vm12228_vm4 }
 0xbd5   : > { %v4937_v2 = vpop.permute.xlu1 %4936 }
 0xbd6   : > { %v5047_v25 = vrot.slane %v4937_v2, %v12220_v19 }
 0xbd7   : > { %v4913_v52 = vpop.permute.xlu0 %4912 }
 0xbd8   : > { %v5015_v26 = vrot.slane %v4913_v52, %v12220_v19  ;;  %v5130_v1 = vsel %vm12226_vm2, %v5047_v25, %v5129_v37  ;;  %vm12232_vm2 = vmmov %vm12231_vm1 }
 0xbd9   : > { %v10870_v51 = vpop.permute.xlu1 %4984  ;;  %v5135_v23 = vsel %vm12232_vm2, %v5075_v3, %v5134_v13 }
 0xbda   : > { %v5111_v48 = vrot.slane %v10870_v51, %v12220_v19  ;;  %v5124_v46 = vsel %vm12227_vm3, %v5015_v26, %v5123_v54 }
 0xbdb   : > { %v10872_v4 = vpop.permute.xlu0 %4960 }
 0xbdc   : > { %v5079_v24 = vrot.slane %v10872_v4, %v12220_v19  ;;  %v5141_v4 = vsel %vm12231_vm1, %v5107_v33, %v5140_v6 }
 0xbdd   : > { %v4940_v16 = vpop.permute.xlu1 %4939  ;;  %v5142_v9 = vsel %vm12227_vm3, %v5111_v48, %v5141_v4 }
 0xbde   : > { %v5051_v30 = vrot.slane %v4940_v16, %v12220_v19  ;;  %v5136_v47 = vsel %vm12233_vm6, %v5079_v24, %v5135_v23  ;;  %vm12242_vm6 = vcmask 392192  }
 0xbdf   : > { %v4916_v38 = vpop.permute.xlu0 %4915  ;;  %vm12244_vm1 = vmmov %vm12242_vm6 }
 0xbe0   : > { %v5019_v5 = vrot.slane %v4916_v38, %v12220_v19  ;;  %v5131_v32 = vsel %vm12228_vm4, %v5051_v30, %v5130_v1  ;;  %vm12246_vm3 = vmmov %vm12244_vm1 }
 0xbe1   : > { %v4988_v58 = vpop.permute.xlu1 %4987 }
 0xbe2   : > { %v5115_v60 = vrot.slane %v4988_v58, %v12220_v19  ;;  %v5125_v51 = vsel %vm12230_vm15, %v5019_v5, %v5124_v46  ;;  %vm12243_vm15 = vcmask 457728  }
 0xbe3   : > { %v4964_v50 = vpop.permute.xlu0 %4963  ;;  %vm12245_vm2 = vmmov %vm12243_vm15 }
 0xbe4   : > { %v5083_v2 = vrot.slane %v4964_v50, %v12220_v19  ;;  %v5143_v16 = vsel %vm12228_vm4, %v5115_v60, %v5142_v9  ;;  %vm12247_vm4 = vmmov %vm12245_vm2 }
 0xbe5   : > { %v4943_v61 = vpop.permute.xlu1 %4942 }
 0xbe6   : > { %v5055_v34 = vrot.slane %v4943_v61, %v12220_v19  ;;  %v5137_v20 = vsel %vm12235_vm5, %v5083_v2, %v5136_v47  ;;  %vm12248_vm5 = vcmask 1041408  }
 0xbe7   : > { %v4919_v21 = vpop.permute.xlu0 %4918 }
 0xbe8   : > { %v5023_v59 = vrot.slane %v4919_v21, %v12220_v19  ;;  %v5145_v52 = vpack.c.b16 %v5055_v34, %v5131_v32 }
 0xbe9   : > { %v4991_v40 = vpop.permute.xlu1 %4990 }
 0xbea   : > { %v5144_v49 = vpack.c.b16 %v5023_v59, %v5125_v51  ;;  %v5119_v41 = vrot.slane %v4991_v40, %v12220_v19  ;;  %v5153_v36 = vsel %vm9836_vm11, 0, %v5145_v52 }
 0xbeb   : > { %v4967_v0 = vpop.permute.xlu0 %4966  ;;  %v5157_v43 = vsel %vm9845_vm12, %v5153_v36, 0 }
 0xbec   : > { %v5087_v28 = vrot.slane %v4967_v0, %v12220_v19  ;;  %v5152_v38 = vsel %vm9836_vm11, 0, %v5144_v49  ;;  %v5147_v57 = vpack.c.b16 %v5119_v41, %v5143_v16  ;;  %5166 = vrot.lane.b32.xlu1 %v5157_v43, %s12236_s0 }
 0xbed   : > { %v5156_v39 = vsel %vm9845_vm12, %v5152_v38, 0 }
 0xbee   : > { %v5146_v8 = vpack.c.b16 %v5087_v28, %v5137_v20  ;;  %5164 = vrot.lane.b32.xlu0 %v5156_v39, %s12236_s0  ;;  %v5155_v19 = vsel %vm9836_vm11, 0, %v5147_v57 }
 0xbef   : > { %v5159_v10 = vsel %vm9845_vm12, %v5155_v19, 0 }
 0xbf0   : > { %v5154_v17 = vsel %vm9836_vm11, 0, %v5146_v8  ;;  %5170 = vrot.lane.b32.xlu1 %v5159_v10, %s12236_s0 }
 0xbf1   : > { %v5158_v53 = vsel %vm9845_vm12, %v5154_v17, 0 }
 0xbf2   : > { %5168 = vrot.lane.b32.xlu0 %v5158_v53, %s12236_s0 }
 0xc5e   : > { %v5167_v63 = vpop.permute.xlu1 %5166 }
 0xc5f   : > { %v5175_v7 = vsel %vm2228_vm13, 0, %v5167_v63 }
 0xc60   : > { %v5165_v14 = vpop.permute.xlu0 %5164  ;;  %v10956_v58 = vsel %vm2238_vm14, %v5175_v7, 0 }
 0xc61   : > { %v5173_v22 = vsel %vm2228_vm13, 0, %v5165_v14  ;;  %5194 = vrot.lane.b32.xlu1 %v10956_v58, %s12237_s1  ;;  %v10979_v30 = vrot.slane %v10956_v58, 1  ;;  %v5224_v44 = vshll.u32 %v10956_v58, 16  ;;  %v5222_v1 = vshrl.u32 %v10956_v58, 16 }
 0xc62   : > { %v10960_v15 = vsel %vm2238_vm14, %v5173_v22, 0  ;;  %v5171_v56 = vpop.permute.xlu1 %5170 }
 0xc63   : > { %5192 = vrot.lane.b32.xlu0 %v10960_v15, %s12237_s1  ;;  %v5179_v25 = vsel %vm2228_vm13, 0, %v5171_v56  ;;  %v10983_v6 = vrot.slane %v10960_v15, 1  ;;  %v5218_v35 = vshll.u32 %v10960_v15, 16  ;;  %v5226_v37 = vrot.slane %v5224_v44, 1 }
 0xc64   : > { %v5169_v50 = vpop.permute.xlu0 %5168  ;;  %v5186_v11 = vsel %vm2238_vm14, %v5179_v25, 0  ;;  %v5216_v48 = vshrl.u32 %v10960_v15, 16 }
 0xc65   : > { %v5177_v27 = vsel %vm2228_vm13, 0, %v5169_v50  ;;  %5198 = vrot.lane.b32.xlu1 %v5186_v11, %s12237_s1  ;;  %v10990_v5 = vrot.slane %v5186_v11, 1  ;;  %v5236_v54 = vshll.u32 %v5186_v11, 16  ;;  %v5220_v3 = vrot.slane %v5218_v35, 1 }
 0xc66   : > { %v5184_v26 = vsel %vm2238_vm14, %v5177_v27, 0  ;;  %v5227_v24 = vor.u32 %v5226_v37, %v5222_v1  ;;  %v5234_v60 = vshrl.u32 %v5186_v11, 16 }
 0xc67   : > { %5196 = vrot.lane.b32.xlu0 %v5184_v26, %s12237_s1  ;;  %v10992_v33 = vrot.slane %v5184_v26, 1  ;;  %v5230_v61 = vshll.u32 %v5184_v26, 16  ;;  %v5238_v34 = vrot.slane %v5236_v54, 1  ;;  %v5221_v21 = vor.u32 %v5220_v3, %v5216_v48 }
 0xc68   : > { %v5228_v32 = vshrl.u32 %v5184_v26, 16 }
 0xc69   : > { %5206 = vrot.lane.b32.xlu1 %v10956_v58, %s12238_s5  ;;  %v5232_v46 = vrot.slane %v5230_v61, 1  ;;  %v5239_v59 = vor.u32 %v5238_v34, %v5234_v60 }
 0xc6b   : > { %5204 = vrot.lane.b32.xlu0 %v10960_v15, %s12238_s5  ;;  %v5233_v13 = vor.u32 %v5232_v46, %v5228_v32 }
 0xc6d   : > { %5210 = vrot.lane.b32.xlu1 %v5186_v11, %s12238_s5 }
 0xc6f   : > { %5208 = vrot.lane.b32.xlu0 %v5184_v26, %s12238_s5 }
 0xc71   : > { %5278 = vrot.lane.b32.xlu1 %v10979_v30, %s12237_s1 }
 0xc73   : > { %5276 = vrot.lane.b32.xlu0 %v10983_v6, %s12237_s1 }
 0xc75   : > { %5282 = vrot.lane.b32.xlu1 %v10990_v5, %s12237_s1 }
 0xc77   : > { %5280 = vrot.lane.b32.xlu0 %v10992_v33, %s12237_s1 }
 0xc79   : > { %5246 = vrot.lane.b32.xlu1 %v5227_v24, %s12237_s1 }
 0xc7b   : > { %5244 = vrot.lane.b32.xlu0 %v5221_v21, %s12237_s1 }
 0xc7d   : > { %5250 = vrot.lane.b32.xlu1 %v5239_v59, %s12237_s1 }
 0xc7f   : > { %5248 = vrot.lane.b32.xlu0 %v5233_v13, %s12237_s1 }
 0xc81   : > { %5258 = vrot.lane.b32.xlu1 %v5227_v24, %s12238_s5 }
 0xc83   : > { %5256 = vrot.lane.b32.xlu0 %v5221_v21, %s12238_s5 }
 0xc85   : > { %5262 = vrot.lane.b32.xlu1 %v5239_v59, %s12238_s5 }
 0xc87   : > { %5260 = vrot.lane.b32.xlu0 %v5233_v13, %s12238_s5 }
 0xc89   : > { %5290 = vrot.lane.b32.xlu1 %v10979_v30, %s12238_s5 }
 0xc8b   : > { %5288 = vrot.lane.b32.xlu0 %v10983_v6, %s12238_s5 }
 0xc8d   : > { %5294 = vrot.lane.b32.xlu1 %v10990_v5, %s12238_s5 }
 0xc8f   : > { %5292 = vrot.lane.b32.xlu0 %v10992_v33, %s12238_s5 }
 0xcd3   : > { %v5195_v2 = vpop.permute.xlu1 %5194 }
 0xcd4   : > { %v5364_v9 = vcombine.low %v10956_v58, %v5195_v2 }
 0xcd5   : > { %v5193_v52 = vpop.permute.xlu0 %5192 }
 0xcd6   : > { %v5296_v41 = vcombine.low %v10960_v15, %v5193_v52  ;;  %v5371_v38 = vrot.slane %v5364_v9, %v8980_v42 }
 0xcd7   : > { %v5199_v51 = vpop.permute.xlu1 %5198 }
 0xcd8   : > { %v5372_v23 = vcombine.low %v5186_v11, %v5199_v51  ;;  %v5303_v39 = vrot.slane %v5296_v41, %v8980_v42 }
 0xcd9   : > { %v5197_v4 = vpop.permute.xlu0 %5196 }
 0xcda   : > { %v5304_v49 = vcombine.low %v5184_v26, %v5197_v4  ;;  %v5379_v0 = vrot.slane %v5372_v23, %v8980_v42 }
 0xcdb   : > { %v5207_v40 = vpop.permute.xlu1 %5206 }
 0xcdc   : > { %v5380_v36 = vcombine.low %v5207_v40, %v5227_v24  ;;  %v5311_v16 = vrot.slane %v5304_v49, %v8980_v42  ;;  %v5396_v19 = vcombine.low %v5371_v38, %v5379_v0  ;;  %v5397_v56 = vcombine.high %v5371_v38, %v5379_v0 }
 0xcdd   : > { %v5205_v47 = vpop.permute.xlu0 %5204 }
 0xcde   : > { %v5312_v28 = vcombine.low %v5205_v47, %v5221_v21  ;;  %v5387_v10 = vrot.slane %v5380_v36, %v8980_v42  ;;  %v5328_v53 = vcombine.low %v5303_v39, %v5311_v16  ;;  %v5329_v25 = vcombine.high %v5303_v39, %v5311_v16 }
 0xcdf   : > { %v5211_v43 = vpop.permute.xlu1 %5210  ;;  %v5404_v27 = vrot.slane %v5396_v19, %v9009_v62  ;;  %v5411_v48 = vrot.slane %v5397_v56, %v9009_v62 }
 0xce0   : > { %v5388_v57 = vcombine.low %v5211_v43, %v5239_v59  ;;  %v5319_v63 = vrot.slane %v5312_v28, %v8980_v42  ;;  %v5336_v44 = vrot.slane %v5328_v53, %v9009_v62  ;;  %v5343_v24 = vrot.slane %v5329_v25, %v9009_v62 }
 0xce1   : > { %v5209_v20 = vpop.permute.xlu0 %5208 }
 0xce2   : > { %v5320_v8 = vcombine.low %v5209_v20, %v5233_v13  ;;  %v5395_v17 = vrot.slane %v5388_v57, %v8980_v42 }
 0xce3   : > { %v5279_v14 = vpop.permute.xlu1 %5278 }
 0xce4   : > { %v5327_v7 = vrot.slane %v5320_v8, %v8980_v42  ;;  %v5412_v58 = vcombine.low %v5387_v10, %v5395_v17  ;;  %v5413_v22 = vcombine.high %v5387_v10, %v5395_v17  ;;  %v5516_v28 = vcombine.low %v10979_v30, %v5279_v14 }
 0xce5   : > { %v5277_v15 = vpop.permute.xlu0 %5276 }
 0xce6   : > { %v5344_v50 = vcombine.low %v5319_v63, %v5327_v7  ;;  %v5345_v11 = vcombine.high %v5319_v63, %v5327_v7  ;;  %v5420_v26 = vrot.slane %v5412_v58, %v9009_v62  ;;  %v5427_v35 = vrot.slane %v5413_v22, %v9009_v62 }
 0xce7   : > { %v5283_v3 = vpop.permute.xlu1 %5282  ;;  %v5448_v38 = vcombine.low %v10983_v6, %v5277_v15  ;;  %v5523_v17 = vrot.slane %v5516_v28, %v8980_v42 }
 0xce8   : > { %v5352_v37 = vrot.slane %v5344_v50, %v9009_v62  ;;  %v5359_v54 = vrot.slane %v5345_v11, %v9009_v62  ;;  %v11032_v1 = vcombine.high %v5404_v27, %v5420_v26  ;;  %v5430_v32 = vcombine.low %v5411_v48, %v5427_v35 }
 0xce9   : > { %v5281_v61 = vpop.permute.xlu0 %5280  ;;  %v11040_v59 = vcombine.low %v5404_v27, %v5420_v26  ;;  %v5431_v23 = vcombine.high %v5411_v48, %v5427_v35  ;;  %v5524_v9 = vcombine.low %v10990_v5, %v5283_v3  ;;  %v5455_v30 = vrot.slane %v5448_v38, %v8980_v42 }
 0xcea   : > { %v11036_v34 = vcombine.high %v5336_v44, %v5352_v37  ;;  %v5362_v60 = vcombine.low %v5343_v24, %v5359_v54  ;;  %v11042_v13 = vcombine.low %v5336_v44, %v5352_v37  ;;  %v5363_v4 = vcombine.high %v5343_v24, %v5359_v54 }
 0xceb   : > { %v5247_v21 = vpop.permute.xlu1 %5246  ;;  %v5456_v47 = vcombine.low %v10992_v33, %v5281_v61  ;;  %v5652_v16 = vshrl.u32 %v5430_v32, 16  ;;  %v5531_v57 = vrot.slane %v5524_v9, %v8980_v42  ;;  %v5658_v10 = vshrl.u32 %v5431_v23, 16 }
 0xcec   : > { %v5644_v46 = vpack.i.b16 %v11032_v1, %v11036_v34  ;;  %v5650_v51 = vpack.i.b16 %v5430_v32, %v5362_v60  ;;  %v5638_v40 = vpack.i.b16 %v11040_v59, %v11042_v13  ;;  %v5656_v0 = vpack.i.b16 %v5431_v23, %v5363_v4 }
 0xced   : > { %v5245_v2 = vpop.permute.xlu0 %5244  ;;  %v5651_v36 = vshrl.u32 %v5362_v60, 16  ;;  %v5463_v20 = vrot.slane %v5456_v47, %v8980_v42  ;;  %v5657_v33 = vshrl.u32 %v5363_v4, 16  ;;  %v5549_v6 = vcombine.high %v5523_v17, %v5531_v57 }
 0xcee   : > { %5714 = vrot.lane.b32.xlu1 %v5644_v46, %s12239_s6  ;;  %v5548_v37 = vcombine.low %v5523_v17, %v5531_v57 }
 0xcef   : > { %v5251_v52 = vpop.permute.xlu1 %5250  ;;  %v5653_v19 = vpack.i.b16 %v5652_v16, %v5651_v36  ;;  %v5481_v22 = vcombine.high %v5455_v30, %v5463_v20  ;;  %v5659_v50 = vpack.i.b16 %v5658_v10, %v5657_v33  ;;  %v5563_v44 = vrot.slane %v5549_v6, %v9009_v62 }
 0xcf1   : > { %v5249_v49 = vpop.permute.xlu0 %5248  ;;  %v5495_v54 = vrot.slane %v5481_v22, %v9009_v62 }
 0xcf2   : > { %5726 = vrot.lane.b32.xlu1 %v5650_v51, %s12240_s7 }
 0xcf3   : > { %v5259_v41 = vpop.permute.xlu1 %5258 }
 0xcf4   : > { %v5500_v39 = vcombine.low %v5247_v21, %v5259_v41 }
 0xcf5   : > { %v5257_v43 = vpop.permute.xlu0 %5256 }
 0xcf6   : > { %5738 = vrot.lane.b32.xlu1 %v5656_v0, %s12241_s14  ;;  %v5432_v8 = vcombine.low %v5245_v2, %v5257_v43  ;;  %v5507_v14 = vrot.slane %v5500_v39, %v8980_v42  ;;  %v5480_v2 = vcombine.low %v5455_v30, %v5463_v20  ;;  %v5556_v39 = vrot.slane %v5548_v37, %v9009_v62 }
 0xcf7   : > { %v5263_v5 = vpop.permute.xlu1 %5262 }
 0xcf8   : > { %v5508_v53 = vcombine.low %v5251_v52, %v5263_v5  ;;  %v5439_v15 = vrot.slane %v5432_v8, %v8980_v42  ;;  %v5488_v8 = vrot.slane %v5480_v2, %v9009_v62 }
 0xcf9   : > { %v5261_v63 = vpop.permute.xlu0 %5260 }
 0xcfa   : > { %v5440_v7 = vcombine.low %v5249_v49, %v5261_v63  ;;  %5732 = vrot.lane.b32.xlu1 %v5653_v19, %s12194_s17  ;;  %v5515_v58 = vrot.slane %v5508_v53, %v8980_v42 }
 0xcfb   : > { %v5291_v25 = vpop.permute.xlu1 %5290 }
 0xcfc   : > { %v5447_v56 = vrot.slane %v5440_v7, %v8980_v42  ;;  %v5533_v11 = vcombine.high %v5507_v14, %v5515_v58  ;;  %v5532_v3 = vcombine.low %v5507_v14, %v5515_v58  ;;  %v5609_v21 = vrot.slane %v5291_v25, %v8980_v42 }
 0xcfd   : > { %v5289_v27 = vpop.permute.xlu0 %5288 }
 0xcfe   : > { %v5465_v26 = vcombine.high %v5439_v15, %v5447_v56  ;;  %5744 = vrot.lane.b32.xlu1 %v5659_v50, %s12195_s28  ;;  %v5547_v35 = vrot.slane %v5533_v11, %v9009_v62  ;;  %v5464_v24 = vcombine.low %v5439_v15, %v5447_v56  ;;  %v5575_v52 = vrot.slane %v5289_v27, %v8980_v42 }
 0xcff   : > { %v5295_v48 = vpop.permute.xlu1 %5294  ;;  %v5540_v16 = vrot.slane %v5532_v3, %v9009_v62  ;;  %v5639_v50 = vshrl.u32 %v11042_v13, 16  ;;  %v5640_v11 = vshrl.u32 %v11040_v59, 16  ;;  %v5645_v3 = vshrl.u32 %v11036_v34, 16 }
 0xd00   : > { %v5479_v61 = vrot.slane %v5465_v26, %v9009_v62  ;;  %v5617_v46 = vrot.slane %v5295_v48, %v8980_v42  ;;  %v5566_v32 = vcombine.low %v5547_v35, %v5563_v44  ;;  %v5567_v47 = vcombine.high %v5547_v35, %v5563_v44 }
 0xd01   : > { %v5293_v60 = vpop.permute.xlu0 %5292  ;;  %v5472_v28 = vrot.slane %v5464_v24, %v9009_v62  ;;  %v11086_v63 = vcombine.low %v5540_v16, %v5556_v39 }
 0xd02   : > { %v5583_v51 = vrot.slane %v5293_v60, %v8980_v42  ;;  %v5498_v4 = vcombine.low %v5479_v61, %v5495_v54  ;;  %v5618_v23 = vcombine.low %v5609_v21, %v5617_v46  ;;  %v5619_v49 = vcombine.high %v5609_v21, %v5617_v46 }
 0xd03   : > { %v5499_v9 = vcombine.high %v5479_v61, %v5495_v54  ;;  %v5676_v19 = vshrl.u32 %v5566_v32, 16  ;;  %v11088_v30 = vcombine.low %v5472_v28, %v5488_v8  ;;  %v5682_v6 = vshrl.u32 %v5567_v47, 16 }
 0xd04   : > { %v5584_v41 = vcombine.low %v5575_v52, %v5583_v51  ;;  %v5585_v0 = vcombine.high %v5575_v52, %v5583_v51  ;;  %v5674_v36 = vpack.i.b16 %v5566_v32, %v5498_v4  ;;  %v11074_v43 = vrot.slane %v5618_v23, %v9009_v62 }
 0xd05   : > { %v5633_v38 = vrot.slane %v5619_v49, %v9009_v62  ;;  %v5680_v5 = vpack.i.b16 %v5567_v47, %v5499_v9  ;;  %v5675_v10 = vshrl.u32 %v5498_v4, 16  ;;  %v5681_v7 = vshrl.u32 %v5499_v9, 16 }
 0xd06   : > { %v11078_v57 = vrot.slane %v5584_v41, %v9009_v62  ;;  %v5599_v20 = vrot.slane %v5585_v0, %v9009_v62  ;;  %5728 = vrot.lane.b32.xlu1 %v5674_v36, %s12240_s7  ;;  %v5688_v53 = vshrl.u32 %v11074_v43, 16  ;;  %v5634_v15 = vcombine.high %v11074_v43, %v12189_v29 }
 0xd07   : > { %v5677_v14 = vpack.i.b16 %v5676_v19, %v5675_v10  ;;  %v5662_v25 = vpack.i.b16 %v11086_v63, %v11088_v30  ;;  %v5683_v27 = vpack.i.b16 %v5682_v6, %v5681_v7  ;;  %v5635_v35 = vcombine.high %v5633_v38, %v12189_v29 }
 0xd08   : > { %v5698_v33 = vpack.i.b16 %v5633_v38, %v5599_v20  ;;  %v5687_v17 = vshrl.u32 %v11078_v57, 16  ;;  %v5600_v22 = vcombine.high %v11078_v57, %v12189_v29  ;;  %v5686_v56 = vpack.i.b16 %v11074_v43, %v11078_v57 }
 0xd09   : > { %v5601_v44 = vcombine.high %v5599_v20, %v12189_v29  ;;  %v5641_v54 = vpack.i.b16 %v5640_v11, %v5639_v50  ;;  %v5646_v61 = vshrl.u32 %v11032_v1, 16  ;;  %v5694_v21 = vshrl.u32 %v5634_v15, 16 }
 0xd0a   : > { %5740 = vrot.lane.b32.xlu1 %v5680_v5, %s12241_s14  ;;  %5730 = vrot.lane.b32.xlu0 %v5698_v33, %s12240_s7  ;;  %v5689_v58 = vpack.i.b16 %v5688_v53, %v5687_v17  ;;  %v5692_v26 = vpack.i.b16 %v5634_v15, %v5600_v22  ;;  %v5693_v24 = vshrl.u32 %v5600_v22, 16  ;;  %v5497_v60 = vcombine.high %v5472_v28, %v5488_v8 }
 0xd0b   : > { %v5704_v37 = vpack.i.b16 %v5635_v35, %v5601_v44  ;;  %v5647_v48 = vpack.i.b16 %v5646_v61, %v5645_v3  ;;  %v5565_v32 = vcombine.high %v5540_v16, %v5556_v39  ;;  %v5663_v52 = vshrl.u32 %v11088_v30, 16 }
 0xd0c   : > { %v5695_v46 = vpack.i.b16 %v5694_v21, %v5693_v24  ;;  %v5664_v34 = vshrl.u32 %v11086_v63, 16  ;;  %v5669_v51 = vshrl.u32 %v5497_v60, 16  ;;  %v5699_v49 = vshrl.u32 %v5599_v20, 16 }
 0xd0d   : > { %v5668_v2 = vpack.i.b16 %v5565_v32, %v5497_v60  ;;  %v5670_v4 = vshrl.u32 %v5565_v32, 16  ;;  %v5700_v9 = vshrl.u32 %v5633_v38, 16  ;;  %v5705_v41 = vshrl.u32 %v5601_v44, 16 }
 0xd0e   : > { %5734 = vrot.lane.b32.xlu1 %v5677_v14, %s12194_s17  ;;  %5712 = vrot.lane.b32.xlu0 %v5689_v58, %s12196_s29  ;;  %v5665_v1 = vpack.i.b16 %v5664_v34, %v5663_v52  ;;  %v5706_v0 = vshrl.u32 %v5635_v35, 16 }
 0xd0f   : > { %v5671_v23 = vpack.i.b16 %v5670_v4, %v5669_v51  ;;  %v5701_v47 = vpack.i.b16 %v5700_v9, %v5699_v49 }
 0xd10   : > { %v5707_v36 = vpack.i.b16 %v5706_v0, %v5705_v41 }
 0xd12   : > { %5746 = vrot.lane.b32.xlu1 %v5683_v27, %s12195_s28  ;;  %5718 = vrot.lane.b32.xlu0 %v5692_v26, %s12239_s6 }
 0xd16   : > { %5742 = vrot.lane.b32.xlu1 %v5704_v37, %s12241_s14  ;;  %5708 = vrot.lane.b32.xlu0 %v5641_v54, %s12196_s29 }
 0xd1a   : > { %5720 = vrot.lane.b32.xlu0 %v5647_v48, %s12197_s20 }
 0xd1e   : > { %5724 = vrot.lane.b32.xlu0 %v5695_v46, %s12197_s20 }
 0xd22   : > { %5716 = vrot.lane.b32.xlu0 %v5668_v2, %s12239_s6  ;;  %v4799_v2 = vld [vmem:[%s12249_s3] sm:$0xf] }
 0xd26   : > { %5710 = vrot.lane.b32.xlu0 %v5665_v1, %s12196_s29 }
 0xd2a   : > { %5722 = vrot.lane.b32.xlu0 %v5671_v23, %s12197_s20 }
 0xd2e   : > { %5736 = vrot.lane.b32.xlu0 %v5701_v47, %s12194_s17 }
 0xd32   : > { %5748 = vrot.lane.b32.xlu0 %v5707_v36, %s12195_s28 }
 0xd60   : > { %v5715_v16 = vpop.permute.xlu1 %5714 }
 0xd64   : > { %v5727_v28 = vpop.permute.xlu1 %5726 }
 0xd68   : > { %v5739_v39 = vpop.permute.xlu1 %5738 }
 0xd6c   : > { %v5733_v19 = vpop.permute.xlu1 %5732 }
 0xd70   : > { %v5745_v10 = vpop.permute.xlu1 %5744 }
 0xd78   : > { %v5729_v17 = vpop.permute.xlu1 %5728 }
 0xd7c   : > { %v5731_v8 = vpop.permute.xlu0 %5730  ;;  %v5741_v50 = vpop.permute.xlu1 %5740 }
 0xd80   : > { %v5713_v5 = vpop.permute.xlu0 %5712  ;;  %v5735_v13 = vpop.permute.xlu1 %5734 }
 0xd81   : > { %v5758_v26 = vsel %vm2809_vm0, %v5686_v56, %v5713_v5 }
 0xd84   : > { %v5719_v33 = vpop.permute.xlu0 %5718  ;;  %v5747_v54 = vpop.permute.xlu1 %5746 }
 0xd85   : > { %v5764_v44 = vsel %vm2819_vm8, %v5758_v26, %v5719_v33 }
 0xd88   : > { %v5709_v20 = vpop.permute.xlu0 %5708  ;;  %v5743_v24 = vpop.permute.xlu1 %5742 }
 0xd89   : > { %v5752_v38 = vsel %vm2809_vm0, %v5638_v40, %v5709_v20 }
 0xd8a   : > { %v5760_v53 = vsel %vm2819_vm8, %v5752_v38, %v5715_v16 }
 0xd8c   : > { %v5721_v7 = vpop.permute.xlu0 %5720 }
 0xd8d   : > { %v5766_v6 = vsel %vm2826_vm7, %v5760_v53, %v5721_v7 }
 0xd8e   : > { %v5772_v14 = vsel %vm2833_vm9, %v5766_v6, %v5727_v28 }
 0xd8f   : > { %v5778_v58 = vsel %vm2840_vm10, %v5772_v14, %v5733_v19 }
 0xd90   : > { %v5725_v22 = vpop.permute.xlu0 %5724  ;;  %v5784_v15 = vsel %vm12242_vm6, %v5778_v58, %v5739_v39  ;;  %vm12250_vm6 = vcmask 293888  }
 0xd91   : > { %v5790_v11 = vsel %vm12243_vm15, %v5784_v15, %v5745_v10  ;;  %v5770_v3 = vsel %vm2826_vm7, %v5764_v44, %v5725_v22  ;;  %vm12257_vm15 = vmmov %vm12244_vm1 }
 0xd92   : > { %8477 = vmatpush3.bf16.msra.mxu0 %v5790_v11  ;;  %v5776_v30 = vsel %vm2833_vm9, %v5770_v3, %v5731_v8 }
 0xd93   : > { %8478 = vmatprep.subr.bf16.mxu0 %v12199_v55 }
 0xd94   : > { %v5717_v59 = vpop.permute.xlu0 %5716 }
 0xd98   : > { %v5711_v40 = vpop.permute.xlu0 %5710 }
 0xd99   : > { %v5755_v27 = vsel %vm2809_vm0, %v5662_v25, %v5711_v40 }
 0xd9a   : > { %v5762_v35 = vsel %vm2819_vm8, %v5755_v27, %v5717_v59 }
 0xd9c   : > { %v5723_v37 = vpop.permute.xlu0 %5722 }
 0xd9d   : > { %v5768_v61 = vsel %vm2826_vm7, %v5762_v35, %v5723_v37 }
 0xd9e   : > { %v5774_v48 = vsel %vm2833_vm9, %v5768_v61, %v5729_v17 }
 0xd9f   : > { %v5780_v63 = vsel %vm2840_vm10, %v5774_v48, %v5735_v13 }
 0xda0   : > { %v5737_v25 = vpop.permute.xlu0 %5736  ;;  %v5786_v43 = vsel %vm12244_vm1, %v5780_v63, %v5741_v50 }
 0xda1   : > { %v5782_v57 = vsel %vm2840_vm10, %v5776_v30, %v5737_v25  ;;  %v5793_v56 = vsel %vm12245_vm2, %v5786_v43, %v5747_v54 }
 0xda2   : > { %8479 = vmatpush3.bf16.msra.mxu0 %v5793_v56  ;;  %v5788_v21 = vsel %vm12246_vm3, %v5782_v57, %v5743_v24 }
 0xda3   : > { %8480 = vmatprep.subr.bf16.mxu0 %v12199_v55 }
 0xda4   : > { %v5749_v46 = vpop.permute.xlu0 %5748 }
 0xda5   : > { %v5796_v60 = vsel %vm12247_vm4, %v5788_v21, %v5749_v46  ;;  %vm7659_vm4 = vcmask 1043456  }
 0xda6   : > { %v5800_v32 = vsel %vm12248_vm5, %v5796_v60, 0 }
 0xda7   : > { %8481 = vmatpush3.bf16.msra.mxu0 %v5800_v32 }
 0xdaa   : > { %8483 = vmatmul.mubr.msk.bf16.vlgmr.msra.gmra.mrb[4].mxu0 %vm12250_vm6, %v4799_v2 }
 0xe7d   : > { %v5836_v52 = vpop.f32.mrb[4].mxu0 }
 0xe7e   : > { %5846 = vrot.lane.b32.xlu0 %v5836_v52, %s12201_s15  ;;  %5843 = vrot.lane.b32.xlu1 %v5836_v52, %s12202_s30  ;;  %v8484_v34 = vpop.f32.mrb[5].mxu0 }
 0xe7f   : > { %v5839_v1 = vpop.f32.mrb[6].mxu0 }
 0xe80   : > { %v8485_v51 = vpop.f32.mrb[7].mxu0 }
 0xe82   : > { %5852 = vrot.lane.b32.xlu0 %v5836_v52, %s12203_s27  ;;  %5849 = vrot.lane.b32.xlu1 %v5836_v52, %s12204_s24 }
 0xe86   : > { %5858 = vrot.lane.b32.xlu0 %v5836_v52, %s12205_s16  ;;  %5855 = vrot.lane.b32.xlu1 %v5836_v52, %s12206_s18 }
 0xe8a   : > { %5861 = vrot.lane.b32.xlu1 %v5836_v52, %s12207_s23 }
 0xef0   : > { %v5847_v4 = vpop.permute.xlu0 %5846  ;;  %v5844_v23 = vpop.permute.xlu1 %5843 }
 0xef1   : > { %v5864_v41 = vcombine.low %v5836_v52, %v5847_v4  ;;  %v5865_v5 = vcombine.high %v5836_v52, %v5847_v4 }
 0xef3   : > { %v5872_v19 = vrot.slane %v5864_v41, %v8980_v42  ;;  %v5879_v22 = vrot.slane %v5865_v5, %v8980_v42 }
 0xef4   : > { %v5853_v49 = vpop.permute.xlu0 %5852  ;;  %v5850_v9 = vpop.permute.xlu1 %5849 }
 0xef5   : > { %v5880_v47 = vcombine.low %v5844_v23, %v5850_v9  ;;  %v5881_v16 = vcombine.high %v5844_v23, %v5850_v9 }
 0xef7   : > { %v5888_v28 = vrot.slane %v5880_v47, %v8980_v42  ;;  %v5895_v38 = vrot.slane %v5881_v16, %v8980_v42 }
 0xef8   : > { %v5859_v0 = vpop.permute.xlu0 %5858  ;;  %v5856_v36 = vpop.permute.xlu1 %5855 }
 0xef9   : > { %v5896_v39 = vcombine.low %v5853_v49, %v5859_v0  ;;  %v5897_v8 = vcombine.high %v5853_v49, %v5859_v0  ;;  %v5928_v17 = vcombine.low %v5872_v19, %v5888_v28  ;;  %v5929_v53 = vcombine.high %v5872_v19, %v5888_v28 }
 0xefa   : > { %v5944_v59 = vcombine.low %v5879_v22, %v5895_v38  ;;  %v5945_v61 = vcombine.high %v5879_v22, %v5895_v38 }
 0xefb   : > { %v5904_v7 = vrot.slane %v5896_v39, %v8980_v42  ;;  %v5911_v6 = vrot.slane %v5897_v8, %v8980_v42  ;;  %v5936_v13 = vrot.slane %v5928_v17, %v9009_v62  ;;  %v5943_v40 = vrot.slane %v5929_v53, %v9009_v62 }
 0xefc   : > { %v5862_v33 = vpop.permute.xlu1 %5861  ;;  %v5952_v48 = vrot.slane %v5944_v59, %v9009_v62  ;;  %v5959_v32 = vrot.slane %v5945_v61, %v9009_v62 }
 0xefd   : > { %v5912_v10 = vcombine.low %v5856_v36, %v5862_v33  ;;  %v5913_v20 = vcombine.high %v5856_v36, %v5862_v33 }
 0xeff   : > { %v5920_v14 = vrot.slane %v5912_v10, %v8980_v42  ;;  %v5927_v58 = vrot.slane %v5913_v20, %v8980_v42 }
 0xf01   : > { %v5960_v15 = vcombine.low %v5904_v7, %v5920_v14  ;;  %v5961_v50 = vcombine.high %v5904_v7, %v5920_v14  ;;  %v5976_v11 = vcombine.low %v5911_v6, %v5927_v58  ;;  %v5977_v44 = vcombine.high %v5911_v6, %v5927_v58 }
 0xf03   : > { %v5968_v27 = vrot.slane %v5960_v15, %v9009_v62  ;;  %v5975_v26 = vrot.slane %v5961_v50, %v9009_v62  ;;  %v5984_v35 = vrot.slane %v5976_v11, %v9009_v62  ;;  %v5991_v24 = vrot.slane %v5977_v44, %v9009_v62 }
 0xf05   : > { %v11178_v37 = vcombine.low %v5936_v13, %v5968_v27  ;;  %v11180_v54 = vcombine.high %v5936_v13, %v5968_v27  ;;  %v11182_v3 = vcombine.low %v5943_v40, %v5975_v26  ;;  %v11185_v63 = vcombine.high %v5943_v40, %v5975_v26  ;;  %v6000_v13 = vld [vmem:[%s12251_s9] sm:$0xff] }
 0xf06   : > { %v11196_v21 = vcombine.low %v5952_v48, %v5984_v35  ;;  %v11203_v2 = vcombine.high %v5952_v48, %v5984_v35  ;;  %v11211_v9 = vcombine.low %v5959_v32, %v5991_v24  ;;  %v11218_v28 = vcombine.high %v5959_v32, %v5991_v24 }
 0xf07   : > { %v6002_v30 = vsel %vm2809_vm0, %v11178_v37, 0.0  ;;  %v6003_v25 = vsel %vm2809_vm0, %v11180_v54, 0.0  ;;  %v6026_v43 = vmul.f32 %v11178_v37, %v11178_v37  ;;  %v6027_v57 = vmul.f32 %v11180_v54, %v11180_v54 }
 0xf08   : > { %v6004_v56 = vadd.f32 %v6003_v25, %v6002_v30  ;;  %v6028_v46 = vmul.f32 %v11182_v3, %v11182_v3  ;;  %v6005_v60 = vsel %vm2809_vm0, %v11182_v3, 0.0  ;;  %v6007_v34 = vsel %vm2809_vm0, %v11185_v63, 0.0 }
 0xf09   : > { %v6029_v1 = vmul.f32 %v11185_v63, %v11185_v63  ;;  %v6034_v51 = vsel %vm2809_vm0, %v6026_v43, 0.0  ;;  %v6035_v4 = vsel %vm2809_vm0, %v6027_v57, 0.0  ;;  %v6009_v47 = vsel %vm2809_vm0, %v11196_v21, 0.0 }
 0xf0a   : > { %v6006_v52 = vadd.f32 %v6005_v60, %v6004_v56  ;;  %v6036_v49 = vadd.f32 %v6035_v4, %v6034_v51  ;;  %v6030_v41 = vmul.f32 %v11196_v21, %v11196_v21  ;;  %v6037_v0 = vsel %vm2809_vm0, %v6028_v46, 0.0  ;;  %v6001_v56 = vld [vmem:[%s12252_s10] sm:$0xff] }
 0xf0b   : > { %v6011_v39 = vsel %vm2809_vm0, %v11203_v2, 0.0  ;;  %v6031_v8 = vmul.f32 %v11203_v2, %v11203_v2  ;;  %v6039_v5 = vsel %vm2809_vm0, %v6029_v1, 0.0  ;;  %v6013_v10 = vsel %vm2809_vm0, %v11211_v9, 0.0 }
 0xf0c   : > { %v6008_v23 = vadd.f32 %v6007_v34, %v6006_v52  ;;  %v6038_v16 = vadd.f32 %v6037_v0, %v6036_v49  ;;  %v6032_v20 = vmul.f32 %v11211_v9, %v11211_v9  ;;  %v6041_v38 = vsel %vm2809_vm0, %v6030_v41, 0.0 }
 0xf0d   : > { %v6015_v7 = vsel %vm2809_vm0, %v11218_v28, 0.0  ;;  %v6033_v6 = vmul.f32 %v11218_v28, %v11218_v28  ;;  %v6043_v14 = vsel %vm2809_vm0, %v6031_v8, 0.0  ;;  %v6097_v40 = vrot.slane %v6000_v13, %v10188_v31 }
 0xf0e   : > { %v6010_v36 = vadd.f32 %v6009_v47, %v6008_v23  ;;  %v6040_v33 = vadd.f32 %v6039_v5, %v6038_v16  ;;  %v6045_v15 = vsel %vm2809_vm0, %v6032_v20, 0.0  ;;  %v6090_v26 = vcombine.high %v6000_v13, %v6000_v13 }
 0xf0f   : > { %v6047_v11 = vsel %vm2809_vm0, %v6033_v6, 0.0  ;;  %v6105_v27 = vcombine.high %v6097_v40, %v6097_v40  ;;  %v6113_v61 = vrot.slane %v6097_v40, %v10188_v31  ;;  %v6219_v60 = vrot.slane %v6001_v56, %v10188_v31 }
 0xf10   : > { %v6012_v19 = vadd.f32 %v6011_v39, %v6010_v36  ;;  %v6042_v53 = vadd.f32 %v6041_v38, %v6040_v33  ;;  %v6104_v35 = vrot.slane %v6090_v26, %v10188_v31  ;;  %v6212_v4 = vcombine.high %v6001_v56, %v6001_v56 }
 0xf11   : > { %v6127_v44 = vrot.slane %v6105_v27, %v10188_v31  ;;  %v6142_v43 = vrot.slane %v6113_v61, %v10192_v45  ;;  %v6135_v57 = vcombine.high %v6113_v61, %v6113_v61  ;;  %v6227_v51 = vcombine.high %v6219_v60, %v6219_v60 }
 0xf12   : > { %v6014_v17 = vadd.f32 %v6013_v10, %v6012_v19  ;;  %v6044_v22 = vadd.f32 %v6043_v14, %v6042_v53  ;;  %v6106_v25 = vcombine.high %v6104_v35, %v6104_v35  ;;  %v6120_v52 = vrot.slane %v6104_v35, %v10188_v31 }
 0xf13   : > { %v6146_v48 = vrot.slane %v6127_v44, %v10192_v45  ;;  %v6137_v30 = vcombine.high %v6127_v44, %v6127_v44  ;;  %v6150_v32 = vrot.slane %v6135_v57, %v10192_v45  ;;  %v6249_v41 = vrot.slane %v6227_v51, %v10188_v31 }
 0xf14   : > { %v6016_v58 = vadd.f32 %v6015_v7, %v6014_v17  ;;  %v6046_v50 = vadd.f32 %v6045_v15, %v6044_v22  ;;  %v6134_v46 = vrot.slane %v6106_v25, %v10188_v31  ;;  %v6158_v23 = vrot.slane %v6120_v52, %v10192_v45 }
 0xf15   : > { %v6154_v24 = vrot.slane %v6137_v30, %v10192_v45  ;;  %v6136_v49 = vcombine.high %v6120_v52, %v6120_v52  ;;  %v6226_v0 = vrot.slane %v6212_v4, %v10188_v31  ;;  %v6235_v16 = vrot.slane %v6219_v60, %v10188_v31 }
 0xf16   : > { %6017 = vadd.xlane.f32.xlu0 %v6016_v58  ;;  %v6048_v59 = vadd.f32 %v6047_v11, %v6046_v50  ;;  %v6162_v34 = vrot.slane %v6134_v46, %v10192_v45  ;;  %v6138_v1 = vcombine.high %v6134_v46, %v6134_v46  ;;  %v6268_v39 = vrot.slane %v6249_v41, %v10192_v45 }
 0xf17   : > { %v6166_v36 = vrot.slane %v6136_v49, %v10192_v45  ;;  %v6259_v8 = vcombine.high %v6249_v41, %v6249_v41  ;;  %v6228_v5 = vcombine.high %v6226_v0, %v6226_v0  ;;  %v6264_v19 = vrot.slane %v6235_v16, %v10192_v45 }
 0xf18   : > { %6049 = vadd.xlane.f32.xlu1 %v6048_v59  ;;  %v6170_v47 = vrot.slane %v6138_v1, %v10192_v45  ;;  %v6257_v33 = vcombine.high %v6235_v16, %v6235_v16  ;;  %v6242_v17 = vrot.slane %v6226_v0, %v10188_v31 }
 0xf19   : > { %v6276_v10 = vrot.slane %v6259_v8, %v10192_v45  ;;  %v6256_v20 = vrot.slane %v6228_v5, %v10188_v31 }
 0xf1a   : > { %v6272_v38 = vrot.slane %v6257_v33, %v10192_v45  ;;  %v6280_v6 = vrot.slane %v6242_v17, %v10192_v45  ;;  %v6258_v14 = vcombine.high %v6242_v17, %v6242_v17 }
 0xf1b   : > { %v6284_v53 = vrot.slane %v6256_v20, %v10192_v45  ;;  %v6260_v7 = vcombine.high %v6256_v20, %v6256_v20 }
 0xf1c   : > { %v6288_v22 = vrot.slane %v6258_v14, %v10192_v45 }
 0xf1d   : > { %v6292_v58 = vrot.slane %v6260_v7, %v10192_v45 }
 0xf29   : > { %6176 = vperm.xlu1 %8562, %v6146_v48  }
 0xf2c   : > { %6172 = vperm.xlu0 %8561, %v6142_v43  }
 0xf2d   : > { %6184 = vperm.xlu1 %8562, %v6154_v24  }
 0xf30   : > { %6180 = vperm.xlu0 %8561, %v6150_v32  }
 0xf31   : > { %6192 = vperm.xlu1 %8562, %v6162_v34  }
 0xf34   : > { %6188 = vperm.xlu0 %8561, %v6158_v23  }
 0xf35   : > { %6200 = vperm.xlu1 %8562, %v6170_v47  }
 0xf38   : > { %6196 = vperm.xlu0 %8561, %v6166_v36  }
 0xf39   : > { %6298 = vperm.xlu1 %8562, %v6268_v39  }
 0xf3c   : > { %6294 = vperm.xlu0 %8561, %v6264_v19  }
 0xf3d   : > { %6306 = vperm.xlu1 %8562, %v6276_v10  }
 0xf40   : > { %6302 = vperm.xlu0 %8561, %v6272_v38  }
 0xf41   : > { %6314 = vperm.xlu1 %8562, %v6284_v53  }
 0xf44   : > { %6310 = vperm.xlu0 %8561, %v6280_v6  }
 0xf45   : > { %6322 = vperm.xlu1 %8562, %v6292_v58  }
 0xf48   : > { %6318 = vperm.xlu0 %8561, %v6288_v22  }
 0xfa3   : > { %v6018_v15 = vpop.xlane.xlu0 %6017 }
 0xfa4   : > { %v6019_v50 = vrot.slane %v6018_v15, 4 }
 0xfa5   : > { %v6050_v59 = vpop.xlane.xlu1 %6049 }
 0xfa6   : > { %v6020_v11 = vadd.f32 %v6019_v50, %v6018_v15  ;;  %v6051_v13 = vrot.slane %v6050_v59, 4 }
 0xfa8   : > { %v6021_v40 = vrot.slane %v6020_v11, 2  ;;  %v6052_v27 = vadd.f32 %v6051_v13, %v6050_v59 }
 0xfa9   : > { %v6177_v56 = vpop.permute.xlu1 %6176 }
 0xfaa   : > { %v6022_v26 = vadd.f32 %v6021_v40, %v6020_v11  ;;  %v6053_v35 = vrot.slane %v6052_v27, 2 }
 0xfab   : > { %v6173_v24 = vpop.permute.xlu0 %6172 }
 0xfac   : > { %v6023_v44 = vrot.slane %v6022_v26, 1  ;;  %v6054_v48 = vadd.f32 %v6053_v35, %v6052_v27 }
 0xfad   : > { %v6185_v46 = vpop.permute.xlu1 %6184 }
 0xfae   : > { %v6024_v61 = vadd.f32 %v6023_v44, %v6022_v26  ;;  %v6055_v30 = vrot.slane %v6054_v48, 1 }
 0xfaf   : > { %v6181_v60 = vpop.permute.xlu0 %6180 }
 0xfb0   : > { %8512 = vpush %v6024_v61  ;;  %v6056_v25 = vadd.f32 %v6055_v30, %v6054_v48 }
 0xfb1   : > { %v6193_v32 = vpop.permute.xlu1 %6192 }
 0xfb2   : > { %8514 = vpush %v6056_v25 }
 0xfb3   : > { %v6189_v52 = vpop.permute.xlu0 %6188 }
 0xfb5   : > { %v6201_v34 = vpop.permute.xlu1 %6200 }
 0xfb7   : > { %v6197_v1 = vpop.permute.xlu0 %6196 }
 0xfb9   : > { %v6299_v51 = vpop.permute.xlu1 %6298 }
 0xfbb   : > { %v6295_v4 = vpop.permute.xlu0 %6294 }
 0xfbd   : > { %v6307_v23 = vpop.permute.xlu1 %6306 }
 0xfbf   : > { %v6303_v49 = vpop.permute.xlu0 %6302 }
 0xfc1   : > { %v6315_v0 = vpop.permute.xlu1 %6314 }
 0xfc3   : > { %v6311_v36 = vpop.permute.xlu0 %6310 }
 0xfc7   : > { %v6319_v11 = vpop.permute.xlu0 %6318 }
 0xfe1   : > { %s8513_s21 = spop %8512 }
 0xfe2   : > { %s6060_s22 = smul.f32 0.001953125, %s8513_s21 }
 0xfe3   : > { %s8515_s3 = spop %8514 }
 0xfe4   : > { %s6064_s19 = smul.f32 %s6060_s22, %s6060_s22  ;;  %v6071_v47 = vstv %s6060_s22 }
 0xfe5   : > { %s6063_s8 = smul.f32 0.001953125, %s8515_s3  ;;  %v6072_v41 = vsub.f32 %v11178_v37, %v6071_v47  ;;  %v6073_v16 = vsub.f32 %v11180_v54, %v6071_v47  ;;  %v6074_v39 = vsub.f32 %v11182_v3, %v6071_v47  ;;  %v6075_v8 = vsub.f32 %v11185_v63, %v6071_v47 }
 0xfe6   : > { %v6076_v5 = vsub.f32 %v11196_v21, %v6071_v47  ;;  %v6077_v19 = vsub.f32 %v11203_v2, %v6071_v47  ;;  %v6078_v33 = vsub.f32 %v11211_v9, %v6071_v47  ;;  %v6079_v10 = vsub.f32 %v11218_v28, %v6071_v47  ;;  %v6323_v9 = vpop.permute.xlu1 %6322 }
 0xfe7   : > { %s6065_s9 = ssub.f32 %s6063_s8, %s6064_s19 }
 0xfe9   : > { %s6066_s10 = smax.f32 %s12210_s2, %s6065_s9 }
 0xfea   : > { %s6067_s25 = sadd.f32 1e-05, %s6066_s10 }
 0xfec   : > { %v6068_v43 = vstv %s6067_s25 }
 0xfed   : > { %8643 = vrsqrt.f32 %v6068_v43 }
 0xff7   : > { %v8644_v57 = vpop.eup %8643 }
 0xff8   : > { %8516 = vpush %v8644_v57 }
0x1029   : > { %s8517_s3 = spop %8516 }
0x102a   : > { %v6080_v20 = vstv %s8517_s3 }
0x102b   : > { %v6081_v38 = vmul.f32 %v6080_v20, %v6072_v41  ;;  %v6082_v37 = vmul.f32 %v6080_v20, %v6073_v16  ;;  %v6083_v17 = vmul.f32 %v6080_v20, %v6074_v39  ;;  %v6084_v53 = vmul.f32 %v6080_v20, %v6075_v8 }
0x102c   : > { %v6085_v7 = vmul.f32 %v6080_v20, %v6076_v5  ;;  %v6086_v6 = vmul.f32 %v6080_v20, %v6077_v19  ;;  %v6087_v54 = vmul.f32 %v6080_v20, %v6078_v33  ;;  %v6088_v14 = vmul.f32 %v6080_v20, %v6079_v10 }
0x102d   : > { %v6203_v3 = vmul.f32 %v6173_v24, %v6081_v38  ;;  %v6204_v58 = vmul.f32 %v6177_v56, %v6082_v37  ;;  %v6205_v63 = vmul.f32 %v6181_v60, %v6083_v17  ;;  %v6206_v22 = vmul.f32 %v6185_v46, %v6084_v53 }
0x102e   : > { %v6207_v21 = vmul.f32 %v6189_v52, %v6085_v7  ;;  %v6208_v15 = vmul.f32 %v6193_v32, %v6086_v6  ;;  %v6209_v2 = vmul.f32 %v6197_v1, %v6087_v54  ;;  %v6210_v50 = vmul.f32 %v6201_v34, %v6088_v14 }
0x102f   : > { %v11280_v28 = vadd.f32 %v6299_v51, %v6204_v58  ;;  %v11282_v59 = vadd.f32 %v6295_v4, %v6203_v3  ;;  %v11284_v13 = vadd.f32 %v6307_v23, %v6206_v22  ;;  %v11286_v40 = vadd.f32 %v6303_v49, %v6205_v63 }
0x1030   : > { %v11288_v27 = vadd.f32 %v6315_v0, %v6208_v15  ;;  %v11290_v26 = vadd.f32 %v6311_v36, %v6207_v21  ;;  %v11292_v44 = vadd.f32 %v6323_v9, %v6210_v50  ;;  %v11294_v35 = vadd.f32 %v6319_v11, %v6209_v2 }
0x1031   : > { %v6334_v61 = vmul.f32 %v11280_v28, %v11280_v28  ;;  %v6333_v48 = vmul.f32 %v11282_v59, %v11282_v59  ;;  %v6336_v30 = vmul.f32 %v11284_v13, %v11284_v13  ;;  %v6335_v25 = vmul.f32 %v11286_v40, %v11286_v40 }
0x1032   : > { %v6338_v43 = vmul.f32 %v11288_v27, %v11288_v27  ;;  %v6337_v57 = vmul.f32 %v11290_v26, %v11290_v26  ;;  %v6340_v56 = vmul.f32 %v11292_v44, %v11292_v44  ;;  %v6339_v24 = vmul.f32 %v11294_v35, %v11294_v35 }
0x1033   : > { %v6342_v46 = vmul.f32 %v6334_v61, %v11280_v28  ;;  %v6341_v60 = vmul.f32 %v6333_v48, %v11282_v59  ;;  %v6344_v32 = vmul.f32 %v6336_v30, %v11284_v13  ;;  %v6343_v52 = vmul.f32 %v6335_v25, %v11286_v40 }
0x1034   : > { %v6346_v34 = vmul.f32 %v6338_v43, %v11288_v27  ;;  %v6345_v1 = vmul.f32 %v6337_v57, %v11290_v26  ;;  %v6348_v51 = vmul.f32 %v6340_v56, %v11292_v44  ;;  %v6347_v4 = vmul.f32 %v6339_v24, %v11294_v35 }
0x1035   : > { %v6350_v23 = vmul.f32 0.044715, %v6342_v46  ;;  %v6349_v49 = vmul.f32 0.044715, %v6341_v60  ;;  %v6352_v47 = vmul.f32 0.044715, %v6344_v32 }
0x1036   : > { %v6351_v41 = vmul.f32 0.044715, %v6343_v52  ;;  %v6354_v0 = vmul.f32 0.044715, %v6346_v34  ;;  %v6353_v36 = vmul.f32 0.044715, %v6345_v1 }
0x1037   : > { %v6358_v16 = vadd.f32 %v6350_v23, %v11280_v28  ;;  %v6357_v39 = vadd.f32 %v6349_v49, %v11282_v59  ;;  %v6360_v8 = vadd.f32 %v6352_v47, %v11284_v13  ;;  %v6356_v5 = vmul.f32 0.044715, %v6348_v51 }
0x1038   : > { %v6359_v19 = vadd.f32 %v6351_v41, %v11286_v40  ;;  %v6362_v33 = vadd.f32 %v6354_v0, %v11288_v27  ;;  %v6361_v10 = vadd.f32 %v6353_v36, %v11290_v26  ;;  %v6355_v20 = vmul.f32 0.044715, %v6347_v4 }
0x1039   : > { %v6366_v38 = vmul.f32 0.7978846, %v6358_v16  ;;  %v6365_v37 = vmul.f32 0.7978846, %v6357_v39  ;;  %v6368_v17 = vmul.f32 0.7978846, %v6360_v8  ;;  %v6364_v53 = vadd.f32 %v6356_v5, %v11292_v44 }
0x103a   : > { %v6367_v7 = vmul.f32 0.7978846, %v6359_v19  ;;  %v6363_v6 = vadd.f32 %v6355_v20, %v11294_v35  ;;  %v6370_v54 = vmul.f32 0.7978846, %v6362_v33  ;;  %v6369_v14 = vmul.f32 0.7978846, %v6361_v10 }
0x103b   : > { %8645 = vtanh.f32 %v6366_v38  ;;  %v6372_v3 = vmul.f32 0.7978846, %v6364_v53 }
0x103c   : > { %8647 = vtanh.f32 %v6365_v37  ;;  %v6371_v58 = vmul.f32 0.7978846, %v6363_v6 }
0x103d   : > { %8649 = vtanh.f32 %v6368_v17 }
0x103e   : > { %8651 = vtanh.f32 %v6367_v7 }
0x103f   : > { %8653 = vtanh.f32 %v6370_v54 }
0x1040   : > { %8655 = vtanh.f32 %v6369_v14 }
0x1041   : > { %8657 = vtanh.f32 %v6372_v3 }
0x1042   : > { %8659 = vtanh.f32 %v6371_v58 }
0x1045   : > { %v8646_v63 = vpop.eup %8645 }
0x1046   : > { %v8648_v22 = vpop.eup %8647  ;;  %v6382_v21 = vadd.f32 1.0, %v8646_v63 }
0x1047   : > { %v8650_v15 = vpop.eup %8649  ;;  %v6381_v2 = vadd.f32 1.0, %v8648_v22 }
0x1048   : > { %v8652_v50 = vpop.eup %8651  ;;  %v6390_v9 = vmul.f32 0.5, %v6382_v21  ;;  %v6384_v11 = vadd.f32 1.0, %v8650_v15 }
0x1049   : > { %v8654_v61 = vpop.eup %8653  ;;  %v6389_v48 = vmul.f32 0.5, %v6381_v2  ;;  %v6383_v30 = vadd.f32 1.0, %v8652_v50 }
0x104a   : > { %v8656_v25 = vpop.eup %8655  ;;  %v6398_v43 = vmul.f32 %v6390_v9, %v11280_v28  ;;  %v6392_v57 = vmul.f32 0.5, %v6384_v11  ;;  %v6386_v56 = vadd.f32 1.0, %v8654_v61 }
0x104b   : > { %v8658_v24 = vpop.eup %8657  ;;  %v6397_v46 = vmul.f32 %v6389_v48, %v11282_v59  ;;  %v6391_v60 = vmul.f32 0.5, %v6383_v30  ;;  %v6385_v32 = vadd.f32 1.0, %v8656_v25 }
0x104c   : > { %v8660_v52 = vpop.eup %8659  ;;  %v6407_v34 = vpack.c.bf16 %v6398_v43, %v6398_v43  ;;  %v6400_v1 = vmul.f32 %v6392_v57, %v11284_v13  ;;  %v6394_v51 = vmul.f32 0.5, %v6386_v56  ;;  %v6388_v4 = vadd.f32 1.0, %v8658_v24 }
0x104d   : > { %v6406_v23 = vpack.c.bf16 %v6397_v46, %v6397_v46  ;;  %v6399_v49 = vmul.f32 %v6391_v60, %v11286_v40  ;;  %v6393_v47 = vmul.f32 0.5, %v6385_v32  ;;  %v6387_v41 = vadd.f32 1.0, %v8660_v52 }
0x104e   : > { %v6422_v0 = vshrl.u32 %v6407_v34, 16  ;;  %v6425_v28 = vshll.u32 %v6407_v34, 16  ;;  %v6409_v36 = vpack.c.bf16 %v6400_v1, %v6400_v1  ;;  %v6402_v16 = vmul.f32 %v6394_v51, %v11288_v27 }
0x104f   : > { %v6415_v39 = vshrl.u32 %v6406_v23, 16  ;;  %v6418_v59 = vshll.u32 %v6406_v23, 16  ;;  %v6408_v8 = vpack.c.bf16 %v6399_v49, %v6399_v49  ;;  %v6401_v5 = vmul.f32 %v6393_v47, %v11290_v26 }
0x1050   : > { %v6424_v19 = vrot.slane %v6422_v0, 7  ;;  %v6436_v33 = vshrl.u32 %v6409_v36, 16  ;;  %v6439_v13 = vshll.u32 %v6409_v36, 16  ;;  %v6411_v10 = vpack.c.bf16 %v6402_v16, %v6402_v16 }
0x1051   : > { %v6417_v20 = vrot.slane %v6415_v39, 7  ;;  %v6429_v38 = vshrl.u32 %v6408_v8, 16  ;;  %v6432_v37 = vshll.u32 %v6408_v8, 16  ;;  %v6410_v40 = vpack.c.bf16 %v6401_v5, %v6401_v5 }
0x1052   : > { %v6427_v17 = vor.u32 %v6425_v28, %v6424_v19  ;;  %v6438_v53 = vrot.slane %v6436_v33, 7  ;;  %v6450_v7 = vshrl.u32 %v6411_v10, 16  ;;  %v6453_v6 = vshll.u32 %v6411_v10, 16 }
0x1053   : > { %v6420_v54 = vor.u32 %v6418_v59, %v6417_v20  ;;  %v6431_v14 = vrot.slane %v6429_v38, 7  ;;  %v6443_v27 = vshrl.u32 %v6410_v40, 16  ;;  %v6446_v3 = vshll.u32 %v6410_v40, 16 }
0x1054   : > { %v6479_v58 = vsel %vm9836_vm11, 0, %v6427_v17  ;;  %v6441_v26 = vor.u32 %v6439_v13, %v6438_v53  ;;  %v6452_v63 = vrot.slane %v6450_v7, 7  ;;  %v6396_v22 = vmul.f32 0.5, %v6388_v4 }
0x1055   : > { %v6487_v21 = vsel %vm9845_vm12, %v6479_v58, 0  ;;  %v6478_v15 = vsel %vm9836_vm11, 0, %v6420_v54  ;;  %v6434_v2 = vor.u32 %v6432_v37, %v6431_v14  ;;  %v6445_v50 = vrot.slane %v6443_v27, 7 }
0x1056   : > { %6504 = vrot.lane.b32.xlu1 %v6487_v21, %s12236_s0  ;;  %v6486_v9 = vsel %vm9845_vm12, %v6478_v15, 0  ;;  %v6481_v11 = vsel %vm9836_vm11, 0, %v6441_v26  ;;  %v6455_v61 = vor.u32 %v6453_v6, %v6452_v63  ;;  %v6404_v48 = vmul.f32 %v6396_v22, %v11292_v44 }
0x1057   : > { %6502 = vrot.lane.b32.xlu0 %v6486_v9, %s12236_s0  ;;  %v6480_v30 = vsel %vm9836_vm11, 0, %v6434_v2  ;;  %v6448_v25 = vor.u32 %v6446_v3, %v6445_v50  ;;  %v6395_v43 = vmul.f32 0.5, %v6387_v41  ;;  %v6489_v56 = vsel %vm9845_vm12, %v6481_v11, 0 }
0x1058   : > { %v6413_v57 = vpack.c.bf16 %v6404_v48, %v6404_v48  ;;  %v6488_v46 = vsel %vm9845_vm12, %v6480_v30, 0  ;;  %v6483_v44 = vsel %vm9836_vm11, 0, %v6455_v61 }
0x1059   : > { %v6403_v24 = vmul.f32 %v6395_v43, %v11294_v35  ;;  %v6482_v32 = vsel %vm9836_vm11, 0, %v6448_v25  ;;  %v6491_v35 = vsel %vm9845_vm12, %v6483_v44, 0 }
0x105a   : > { %6508 = vrot.lane.b32.xlu1 %v6489_v56, %s12236_s0  ;;  %v6464_v60 = vshrl.u32 %v6413_v57, 16  ;;  %v6467_v1 = vshll.u32 %v6413_v57, 16  ;;  %v6490_v4 = vsel %vm9845_vm12, %v6482_v32, 0 }
0x105b   : > { %6506 = vrot.lane.b32.xlu0 %v6488_v46, %s12236_s0  ;;  %v6412_v52 = vpack.c.bf16 %v6403_v24, %v6403_v24 }
0x105c   : > { %v6466_v34 = vrot.slane %v6464_v60, 7 }
0x105d   : > { %v6457_v51 = vshrl.u32 %v6412_v52, 16  ;;  %v6460_v47 = vshll.u32 %v6412_v52, 16 }
0x105e   : > { %6512 = vrot.lane.b32.xlu1 %v6491_v35, %s12236_s0  ;;  %v6469_v23 = vor.u32 %v6467_v1, %v6466_v34 }
0x105f   : > { %6510 = vrot.lane.b32.xlu0 %v6490_v4, %s12236_s0  ;;  %v6459_v49 = vrot.slane %v6457_v51, 7 }
0x1060   : > { %v6485_v41 = vsel %vm9836_vm11, 0, %v6469_v23 }
0x1061   : > { %v6493_v0 = vsel %vm9845_vm12, %v6485_v41, 0  ;;  %v6462_v28 = vor.u32 %v6460_v47, %v6459_v49 }
0x1062   : > { %6516 = vrot.lane.b32.xlu1 %v6493_v0, %s12236_s0 }
0x1063   : > { %v6484_v36 = vsel %vm9836_vm11, 0, %v6462_v28  ;;  %vm12253_vm11 = vmmov %vm12244_vm1 }
0x1064   : > { %v6492_v16 = vsel %vm9845_vm12, %v6484_v36, 0  ;;  %vm12254_vm12 = vmmov %vm12245_vm2 }
0x1065   : > { %6514 = vrot.lane.b32.xlu0 %v6492_v16, %s12236_s0 }
0x10c8   : > { %v6505_v39 = vpop.permute.xlu1 %6504 }
0x10c9   : > { %v6521_v59 = vsel %vm2228_vm13, 0, %v6505_v39  ;;  %v6503_v8 = vpop.permute.xlu0 %6502 }
0x10ca   : > { %v11378_v5 = vsel %vm2238_vm14, %v6521_v59, 0  ;;  %v6519_v19 = vsel %vm2228_vm13, 0, %v6503_v8 }
0x10cb   : > { %v11382_v33 = vsel %vm2238_vm14, %v6519_v19, 0  ;;  %6560 = vrot.lane.b32.xlu1 %v11378_v5, %s12237_s1  ;;  %v6614_v12 = vshll.u32 %v11378_v5, 16  ;;  %v11401_v53 = vrot.slane %v11378_v5, 1  ;;  %v6612_v7 = vshrl.u32 %v11378_v5, 16 }
0x10cc   : > { %6558 = vrot.lane.b32.xlu0 %v11382_v33, %s12237_s1  ;;  %v6509_v18 = vpop.permute.xlu1 %6508  ;;  %v6608_v13 = vshll.u32 %v11382_v33, 16  ;;  %v11407_v54 = vrot.slane %v11382_v33, 1  ;;  %v6606_v14 = vshrl.u32 %v11382_v33, 16 }
0x10cd   : > { %v6525_v10 = vsel %vm2228_vm13, 0, %v6509_v18  ;;  %v6507_v20 = vpop.permute.xlu0 %6506  ;;  %v6616_v38 = vrot.slane %v6614_v12, 1 }
0x10ce   : > { %v11392_v37 = vsel %vm2238_vm14, %v6525_v10, 0  ;;  %v6523_v40 = vsel %vm2228_vm13, 0, %v6507_v20  ;;  %v6610_v27 = vrot.slane %v6608_v13, 1 }
0x10cf   : > { %v11396_v17 = vsel %vm2238_vm14, %v6523_v40, 0  ;;  %6564 = vrot.lane.b32.xlu1 %v11392_v37, %s12237_s1  ;;  %v6626_v3 = vshll.u32 %v11392_v37, 16  ;;  %v11413_v63 = vrot.slane %v11392_v37, 1  ;;  %v11415_v22 = vor.u32 %v6616_v38, %v6612_v7 }
0x10d0   : > { %6562 = vrot.lane.b32.xlu0 %v11396_v17, %s12237_s1  ;;  %v6513_v6 = vpop.permute.xlu1 %6512  ;;  %v6620_v21 = vshll.u32 %v11396_v17, 16  ;;  %v6624_v50 = vshrl.u32 %v11392_v37, 16  ;;  %v11431_v48 = vrot.slane %v11396_v17, 1  ;;  %v11443_v56 = vor.u32 %v6610_v27, %v6606_v14 }
0x10d1   : > { %v6529_v58 = vsel %vm2228_vm13, 0, %v6513_v6  ;;  %v6511_v26 = vpop.permute.xlu0 %6510  ;;  %v6628_v9 = vrot.slane %v6626_v3, 1  ;;  %v6618_v24 = vshrl.u32 %v11396_v17, 16 }
0x10d2   : > { %v11419_v15 = vsel %vm2238_vm14, %v6529_v58, 0  ;;  %v6527_v2 = vsel %vm2228_vm13, 0, %v6511_v26  ;;  %v6622_v60 = vrot.slane %v6620_v21, 1 }
0x10d3   : > { %v6842_v11 = vcombine.low %v11378_v5, %v11419_v15  ;;  %v11426_v61 = vsel %vm2238_vm14, %v6527_v2, 0  ;;  %6568 = vrot.lane.b32.xlu1 %v11419_v15, %s12237_s1  ;;  %v11434_v30 = vrot.slane %v11419_v15, 1  ;;  %v11447_v44 = vor.u32 %v6628_v9, %v6624_v50 }
0x10d4   : > { %v6774_v25 = vcombine.low %v11382_v33, %v11426_v61  ;;  %6566 = vrot.lane.b32.xlu0 %v11426_v61, %s12237_s1  ;;  %v6517_v43 = vpop.permute.xlu1 %6516  ;;  %v11441_v57 = vrot.slane %v11426_v61, 1  ;;  %v6636_v32 = vshrl.u32 %v11419_v15, 16  ;;  %v6638_v35 = vshll.u32 %v11419_v15, 16 }
0x10d5   : > { %v6533_v46 = vsel %vm2228_vm13, 0, %v6517_v43  ;;  %v11451_v52 = vrot.slane %v6842_v11, %v8980_v42  ;;  %v7250_v1 = vcombine.low %v11401_v53, %v11434_v30  ;;  %v6630_v28 = vshrl.u32 %v11426_v61, 16 }
0x10d6   : > { %v6548_v34 = vsel %vm2238_vm14, %v6533_v46, 0  ;;  %v11458_v51 = vrot.slane %v6774_v25, %v8980_v42  ;;  %v7182_v49 = vcombine.low %v11407_v54, %v11441_v57  ;;  %v6640_v0 = vrot.slane %v6638_v35, 1 }
0x10d7   : > { %v6850_v4 = vcombine.low %v11392_v37, %v6548_v34  ;;  %v6515_v23 = vpop.permute.xlu0 %6514  ;;  %6572 = vrot.lane.b32.xlu1 %v6548_v34, %s12237_s1  ;;  %v11464_v47 = vrot.slane %v6548_v34, 1  ;;  %v6632_v36 = vshll.u32 %v11426_v61, 16  ;;  %v6648_v8 = vshrl.u32 %v6548_v34, 16 }
0x10d8   : > { %v6531_v41 = vsel %vm2228_vm13, 0, %v6515_v23  ;;  %v11479_v18 = vor.u32 %v6640_v0, %v6636_v32  ;;  %v6650_v20 = vshll.u32 %v6548_v34, 16  ;;  %v11500_v21 = vrot.slane %v7250_v1, %v8980_v42  ;;  %vm12255_vm13 = vmmov %vm12244_vm1 }
0x10d9   : > { %v11470_v16 = vrot.slane %v6850_v4, %v8980_v42  ;;  %v6546_v39 = vsel %vm2238_vm14, %v6531_v41, 0  ;;  %v7258_v59 = vcombine.low %v11413_v63, %v11464_v47  ;;  %v6634_v13 = vrot.slane %v6632_v36, 1  ;;  %vm12256_vm14 = vmmov %vm12245_vm2 }
0x10da   : > { %v6782_v19 = vcombine.low %v11396_v17, %v6546_v39  ;;  %6570 = vrot.lane.b32.xlu0 %v6546_v39, %s12237_s1  ;;  %v11477_v12 = vrot.slane %v6546_v39, 1  ;;  %v6642_v38 = vshrl.u32 %v6546_v39, 16  ;;  %v6644_v40 = vshll.u32 %v6546_v39, 16  ;;  %vm12258_vm1 = vmmov %vm12245_vm2 }
0x10db   : > { %6584 = vrot.lane.b32.xlu1 %v11378_v5, %s12238_s5  ;;  %v11484_v10 = vrot.slane %v7258_v59, %v8980_v42  ;;  %v6994_v14 = vcombine.low %v11415_v22, %v11479_v18  ;;  %v6635_v27 = vor.u32 %v6634_v13, %v6630_v28  ;;  %v6652_v3 = vrot.slane %v6650_v20, 1  ;;  %vm12259_vm2 = vmmov %vm12246_vm3 }
0x10dc   : > { %v11487_v7 = vrot.slane %v6782_v19, %v8980_v42  ;;  %v7190_v6 = vcombine.low %v11431_v48, %v11477_v12  ;;  %v6646_v58 = vrot.slane %v6644_v40, 1  ;;  %v6874_v5 = vcombine.low %v11451_v52, %v11470_v16  ;;  %vm12260_vm3 = vmmov %vm12258_vm1 }
0x10dd   : > { %v6875_v26 = vcombine.high %v11451_v52, %v11470_v16  ;;  %v6926_v50 = vcombine.low %v11443_v56, %v6635_v27  ;;  %v6623_v11 = vor.u32 %v6622_v60, %v6618_v24  ;;  %v6653_v25 = vor.u32 %v6652_v3, %v6648_v8  ;;  %vm12261_vm5 = vmmov %vm12259_vm2 }
0x10de   : > { %6582 = vrot.lane.b32.xlu0 %v11382_v33, %s12238_s5  ;;  %v11503_v2 = vrot.slane %v7190_v6, %v8980_v42  ;;  %v6806_v9 = vcombine.low %v11458_v51, %v11487_v7  ;;  %v6647_v43 = vor.u32 %v6646_v58, %v6642_v38  ;;  %v6807_v33 = vcombine.high %v11458_v51, %v11487_v7  ;;  %vm12262_vm6 = vmmov %vm12258_vm1 }
0x10df   : > { %6588 = vrot.lane.b32.xlu1 %v11392_v37, %s12238_s5  ;;  %v11513_v46 = vrot.slane %v7182_v49, %v8980_v42  ;;  %v7282_v32 = vcombine.low %v11500_v21, %v11484_v10  ;;  %v7002_v1 = vcombine.low %v11447_v44, %v6653_v25  ;;  %v11525_v24 = vrot.slane %v6994_v14, %v8980_v42 }
0x10e0   : > { %v6934_v35 = vcombine.low %v6623_v11, %v6647_v43  ;;  %v11528_v60 = vrot.slane %v6926_v50, %v8980_v42  ;;  %v6889_v38 = vrot.slane %v6875_v26, %v9009_v62  ;;  %v6821_v52 = vrot.slane %v6807_v33, %v9009_v62 }
0x10e1   : > { %v7214_v37 = vcombine.low %v11513_v46, %v11503_v2  ;;  %v11531_v4 = vrot.slane %v7002_v1, %v8980_v42 }
0x10e2   : > { %6586 = vrot.lane.b32.xlu0 %v11396_v17, %s12238_s5  ;;  %v11534_v23 = vrot.slane %v6934_v35, %v8980_v42 }
0x10e3   : > { %6592 = vrot.lane.b32.xlu1 %v11419_v15, %s12238_s5  ;;  %v7026_v17 = vcombine.low %v11525_v24, %v11531_v4  ;;  %v7027_v41 = vcombine.high %v11525_v24, %v11531_v4 }
0x10e4   : > { %v6958_v49 = vcombine.low %v11528_v60, %v11534_v23  ;;  %v6959_v15 = vcombine.high %v11528_v60, %v11534_v23 }
0x10e6   : > { %6590 = vrot.lane.b32.xlu0 %v11426_v61, %s12238_s5  ;;  %v6973_v4 = vrot.slane %v6959_v15, %v9009_v62 }
0x10e7   : > { %6596 = vrot.lane.b32.xlu1 %v6548_v34, %s12238_s5 }
0x10ea   : > { %6594 = vrot.lane.b32.xlu0 %v6546_v39, %s12238_s5 }
0x10eb   : > { %6728 = vrot.lane.b32.xlu1 %v11401_v53, %s12237_s1 }
0x10ee   : > { %6726 = vrot.lane.b32.xlu0 %v11407_v54, %s12237_s1 }
0x10ef   : > { %6732 = vrot.lane.b32.xlu1 %v11413_v63, %s12237_s1 }
0x10f2   : > { %6730 = vrot.lane.b32.xlu0 %v11431_v48, %s12237_s1 }
0x10f3   : > { %6736 = vrot.lane.b32.xlu1 %v11434_v30, %s12237_s1 }
0x10f6   : > { %6734 = vrot.lane.b32.xlu0 %v11441_v57, %s12237_s1 }
0x10f7   : > { %6740 = vrot.lane.b32.xlu1 %v11464_v47, %s12237_s1 }
0x10fa   : > { %6738 = vrot.lane.b32.xlu0 %v11477_v12, %s12237_s1 }
0x10fb   : > { %6752 = vrot.lane.b32.xlu1 %v11401_v53, %s12238_s5 }
0x10fe   : > { %6750 = vrot.lane.b32.xlu0 %v11407_v54, %s12238_s5 }
0x10ff   : > { %6664 = vrot.lane.b32.xlu1 %v11415_v22, %s12237_s1 }
0x1102   : > { %6662 = vrot.lane.b32.xlu0 %v11443_v56, %s12237_s1 }
0x1103   : > { %6668 = vrot.lane.b32.xlu1 %v11447_v44, %s12237_s1 }
0x1106   : > { %6666 = vrot.lane.b32.xlu0 %v6623_v11, %s12237_s1 }
0x1107   : > { %6672 = vrot.lane.b32.xlu1 %v11479_v18, %s12237_s1 }
0x110a   : > { %6670 = vrot.lane.b32.xlu0 %v6635_v27, %s12237_s1 }
0x110b   : > { %6676 = vrot.lane.b32.xlu1 %v6653_v25, %s12237_s1 }
0x110e   : > { %6674 = vrot.lane.b32.xlu0 %v6647_v43, %s12237_s1 }
0x110f   : > { %6688 = vrot.lane.b32.xlu1 %v11415_v22, %s12238_s5 }
0x1112   : > { %6686 = vrot.lane.b32.xlu0 %v11443_v56, %s12238_s5 }
0x1113   : > { %6692 = vrot.lane.b32.xlu1 %v11447_v44, %s12238_s5 }
0x1116   : > { %6690 = vrot.lane.b32.xlu0 %v6623_v11, %s12238_s5 }
0x1117   : > { %6696 = vrot.lane.b32.xlu1 %v11479_v18, %s12238_s5 }
0x111a   : > { %6694 = vrot.lane.b32.xlu0 %v6635_v27, %s12238_s5 }
0x111b   : > { %6700 = vrot.lane.b32.xlu1 %v6653_v25, %s12238_s5 }
0x111e   : > { %6698 = vrot.lane.b32.xlu0 %v6647_v43, %s12238_s5 }
0x111f   : > { %6756 = vrot.lane.b32.xlu1 %v11413_v63, %s12238_s5 }
0x1122   : > { %6754 = vrot.lane.b32.xlu0 %v11431_v48, %s12238_s5 }
0x1123   : > { %6760 = vrot.lane.b32.xlu1 %v11434_v30, %s12238_s5 }
0x1126   : > { %6758 = vrot.lane.b32.xlu0 %v11441_v57, %s12238_s5 }
0x1127   : > { %6764 = vrot.lane.b32.xlu1 %v11464_v47, %s12238_s5 }
0x112a   : > { %6762 = vrot.lane.b32.xlu0 %v11477_v12, %s12238_s5  ;;  %v6882_v12 = vrot.slane %v6874_v5, %v9009_v62  ;;  %v6814_v5 = vrot.slane %v6806_v9, %v9009_v62 }
0x113d   : > { %v6561_v53 = vpop.permute.xlu1 %6560 }
0x113e   : > { %v6559_v54 = vpop.permute.xlu0 %6558 }
0x1141   : > { %v6565_v22 = vpop.permute.xlu1 %6564 }
0x1142   : > { %v6563_v61 = vpop.permute.xlu0 %6562 }
0x1145   : > { %v6569_v63 = vpop.permute.xlu1 %6568 }
0x1146   : > { %v6567_v56 = vpop.permute.xlu0 %6566  ;;  %v6858_v44 = vcombine.low %v6561_v53, %v6569_v63 }
0x1147   : > { %v6790_v0 = vcombine.low %v6559_v54, %v6567_v56 }
0x1148   : > { %v6865_v30 = vrot.slane %v6858_v44, %v8980_v42 }
0x1149   : > { %v6573_v48 = vpop.permute.xlu1 %6572  ;;  %v6797_v8 = vrot.slane %v6790_v0, %v8980_v42 }
0x114a   : > { %v6866_v34 = vcombine.low %v6565_v22, %v6573_v48 }
0x114c   : > { %v6873_v57 = vrot.slane %v6866_v34, %v8980_v42  ;;  %v6571_v28 = vpop.permute.xlu0 %6570 }
0x114d   : > { %v6798_v36 = vcombine.low %v6563_v61, %v6571_v28  ;;  %v6585_v47 = vpop.permute.xlu1 %6584 }
0x114e   : > { %v6890_v39 = vcombine.low %v6865_v30, %v6873_v57  ;;  %v6891_v59 = vcombine.high %v6865_v30, %v6873_v57 }
0x114f   : > { %v6805_v19 = vrot.slane %v6798_v36, %v8980_v42 }
0x1150   : > { %v6898_v18 = vrot.slane %v6890_v39, %v9009_v62  ;;  %v6905_v13 = vrot.slane %v6891_v59, %v9009_v62  ;;  %v6583_v20 = vpop.permute.xlu0 %6582 }
0x1151   : > { %v6822_v40 = vcombine.low %v6797_v8, %v6805_v19  ;;  %v6823_v6 = vcombine.high %v6797_v8, %v6805_v19  ;;  %v6589_v14 = vpop.permute.xlu1 %6588 }
0x1152   : > { %v11618_v27 = vcombine.low %v6882_v12, %v6898_v18  ;;  %v6907_v3 = vcombine.high %v6882_v12, %v6898_v18  ;;  %v6908_v58 = vcombine.low %v6889_v38, %v6905_v13  ;;  %v6909_v50 = vcombine.high %v6889_v38, %v6905_v13 }
0x1153   : > { %v6830_v11 = vrot.slane %v6822_v40, %v9009_v62  ;;  %v6837_v25 = vrot.slane %v6823_v6, %v9009_v62 }
0x1154   : > { %v6587_v16 = vpop.permute.xlu0 %6586  ;;  %v7402_v26 = vshrl.u32 %v6908_v58, 16  ;;  %v7408_v22 = vshrl.u32 %v6909_v50, 16  ;;  %v7390_v9 = vshrl.u32 %v11618_v27, 16  ;;  %v7396_v61 = vshrl.u32 %v6907_v3, 16 }
0x1155   : > { %v11630_v43 = vcombine.low %v6814_v5, %v6830_v11  ;;  %v6593_v1 = vpop.permute.xlu1 %6592  ;;  %v6839_v35 = vcombine.high %v6814_v5, %v6830_v11  ;;  %v6840_v53 = vcombine.low %v6821_v52, %v6837_v25  ;;  %v6841_v54 = vcombine.high %v6821_v52, %v6837_v25 }
0x1156   : > { %v6978_v34 = vcombine.low %v6585_v47, %v6593_v1  ;;  %v7041_v11 = vrot.slane %v7027_v41, %v9009_v62 }
0x1157   : > { %v7394_v63 = vpack.i.b16 %v6907_v3, %v6839_v35  ;;  %v7400_v56 = vpack.i.b16 %v6908_v58, %v6840_v53  ;;  %v7406_v44 = vpack.i.b16 %v6909_v50, %v6841_v54  ;;  %v7401_v48 = vshrl.u32 %v6840_v53, 16 }
0x1158   : > { %v6591_v0 = vpop.permute.xlu0 %6590  ;;  %v7407_v51 = vshrl.u32 %v6841_v54, 16  ;;  %v7389_v7 = vshrl.u32 %v11630_v43, 16  ;;  %v7395_v33 = vshrl.u32 %v6839_v35, 16  ;;  %v7388_v28 = vpack.i.b16 %v11618_v27, %v11630_v43 }
0x1159   : > { %7516 = vrot.lane.b32.xlu1 %v7394_v63, %s12239_s6  ;;  %v6597_v30 = vpop.permute.xlu1 %6596  ;;  %v7403_v57 = vpack.i.b16 %v7402_v26, %v7401_v48  ;;  %v6910_v19 = vcombine.low %v6583_v20, %v6591_v0  ;;  %v6985_v47 = vrot.slane %v6978_v34, %v8980_v42  ;;  %v7034_v20 = vrot.slane %v7026_v17, %v9009_v62 }
0x115a   : > { %v6986_v36 = vcombine.low %v6589_v14, %v6597_v30  ;;  %v7409_v39 = vpack.i.b16 %v7408_v22, %v7407_v51  ;;  %v11637_v59 = vpack.i.b16 %v7390_v9, %v7389_v7  ;;  %v11639_v8 = vpack.i.b16 %v7396_v61, %v7395_v33 }
0x115b   : > { %v6917_v3 = vrot.slane %v6910_v19, %v8980_v42  ;;  %v6966_v53 = vrot.slane %v6958_v49, %v9009_v62 }
0x115c   : > { %v6993_v12 = vrot.slane %v6986_v36, %v8980_v42  ;;  %v6595_v18 = vpop.permute.xlu0 %6594 }
0x115d   : > { %v6918_v13 = vcombine.low %v6587_v16, %v6595_v18  ;;  %7536 = vrot.lane.b32.xlu1 %v7400_v56, %s12240_s7  ;;  %v6729_v38 = vpop.permute.xlu1 %6728 }
0x115e   : > { %v7010_v40 = vcombine.low %v6985_v47, %v6993_v12  ;;  %v7011_v6 = vcombine.high %v6985_v47, %v6993_v12 }
0x115f   : > { %v6925_v14 = vrot.slane %v6918_v13, %v8980_v42 }
0x1160   : > { %v7018_v58 = vrot.slane %v7010_v40, %v9009_v62  ;;  %v7025_v50 = vrot.slane %v7011_v6, %v9009_v62  ;;  %v6727_v5 = vpop.permute.xlu0 %6726 }
0x1161   : > { %v6942_v25 = vcombine.low %v6917_v3, %v6925_v14  ;;  %v6943_v52 = vcombine.high %v6917_v3, %v6925_v14  ;;  %7556 = vrot.lane.b32.xlu1 %v7406_v44, %s12241_s14  ;;  %v6733_v16 = vpop.permute.xlu1 %6732 }
0x1162   : > { %v11657_v26 = vcombine.low %v7018_v58, %v7034_v20  ;;  %v7043_v1 = vcombine.high %v7018_v58, %v7034_v20  ;;  %v7044_v35 = vcombine.low %v7025_v50, %v7041_v11  ;;  %v7045_v17 = vcombine.high %v7025_v50, %v7041_v11 }
0x1163   : > { %v6950_v54 = vrot.slane %v6942_v25, %v9009_v62  ;;  %v6957_v24 = vrot.slane %v6943_v52, %v9009_v62 }
0x1164   : > { %v6731_v41 = vpop.permute.xlu0 %6730  ;;  %v7414_v22 = vshrl.u32 %v11657_v26, 16  ;;  %v7420_v44 = vshrl.u32 %v7043_v1, 16  ;;  %v7426_v48 = vshrl.u32 %v7044_v35, 16  ;;  %v7432_v34 = vshrl.u32 %v7045_v17, 16 }
0x1165   : > { %v11670_v9 = vcombine.low %v6950_v54, %v6966_v53  ;;  %7546 = vrot.lane.b32.xlu1 %v7403_v57, %s12194_s17  ;;  %v6737_v61 = vpop.permute.xlu1 %6736  ;;  %v6975_v63 = vcombine.high %v6950_v54, %v6966_v53  ;;  %v6976_v56 = vcombine.low %v6957_v24, %v6973_v4  ;;  %v6977_v49 = vcombine.high %v6957_v24, %v6973_v4 }
0x1166   : > { %v7266_v23 = vcombine.low %v6729_v38, %v6737_v61 }
0x1167   : > { %v7418_v0 = vpack.i.b16 %v7043_v1, %v6975_v63  ;;  %v7424_v51 = vpack.i.b16 %v7044_v35, %v6976_v56  ;;  %v7430_v7 = vpack.i.b16 %v7045_v17, %v6977_v49  ;;  %v7413_v60 = vshrl.u32 %v11670_v9, 16 }
0x1168   : > { %v6735_v15 = vpop.permute.xlu0 %6734  ;;  %v7419_v33 = vshrl.u32 %v6975_v63, 16  ;;  %v7425_v30 = vshrl.u32 %v6976_v56, 16  ;;  %v7431_v36 = vshrl.u32 %v6977_v49, 16  ;;  %v7412_v47 = vpack.i.b16 %v11657_v26, %v11670_v9 }
0x1169   : > { %7566 = vrot.lane.b32.xlu1 %v7409_v39, %s12195_s28  ;;  %7518 = vrot.lane.b32.xlu0 %v7418_v0, %s12239_s6  ;;  %v6741_v57 = vpop.permute.xlu1 %6740  ;;  %v11676_v19 = vpack.i.b16 %v7414_v22, %v7413_v60  ;;  %v7198_v40 = vcombine.low %v6727_v5, %v6735_v15  ;;  %v7273_v6 = vrot.slane %v7266_v23, %v8980_v42 }
0x116a   : > { %v7274_v12 = vcombine.low %v6733_v16, %v6741_v57  ;;  %v11680_v18 = vpack.i.b16 %v7420_v44, %v7419_v33  ;;  %v11682_v13 = vpack.i.b16 %v7426_v48, %v7425_v30  ;;  %v11684_v38 = vpack.i.b16 %v7432_v34, %v7431_v36 }
0x116b   : > { %v7283_v39 = vcombine.high %v11500_v21, %v11484_v10  ;;  %v7205_v25 = vrot.slane %v7198_v40, %v8980_v42  ;;  %v7215_v5 = vcombine.high %v11513_v46, %v11503_v2  ;;  %v7290_v16 = vrot.slane %v7282_v32, %v9009_v62 }
0x116c   : > { %v7281_v3 = vrot.slane %v7274_v12, %v8980_v42  ;;  %v6739_v14 = vpop.permute.xlu0 %6738  ;;  %v7222_v21 = vrot.slane %v7214_v37, %v9009_v62 }
0x116d   : > { %v7206_v20 = vcombine.low %v6731_v41, %v6739_v14  ;;  %7538 = vrot.lane.b32.xlu0 %v7424_v51, %s12240_s7  ;;  %v11691_v58 = vpop.permute.xlu1 %6752  ;;  %v7297_v1 = vrot.slane %v7283_v39, %v9009_v62  ;;  %v7229_v32 = vrot.slane %v7215_v5, %v9009_v62 }
0x116e   : > { %v7298_v50 = vcombine.low %v7273_v6, %v7281_v3  ;;  %v7299_v11 = vcombine.high %v7273_v6, %v7281_v3 }
0x116f   : > { %v7213_v52 = vrot.slane %v7206_v20, %v8980_v42 }
0x1170   : > { %v7306_v35 = vrot.slane %v7298_v50, %v9009_v62  ;;  %v7313_v17 = vrot.slane %v7299_v11, %v9009_v62  ;;  %v11704_v53 = vpop.permute.xlu0 %6750 }
0x1171   : > { %v7230_v54 = vcombine.low %v7205_v25, %v7213_v52  ;;  %v7231_v24 = vcombine.high %v7205_v25, %v7213_v52  ;;  %7558 = vrot.lane.b32.xlu0 %v7430_v7, %s12241_s14  ;;  %v6665_v4 = vpop.permute.xlu1 %6664 }
0x1172   : > { %v11707_v41 = vcombine.low %v7290_v16, %v7306_v35  ;;  %v11709_v22 = vcombine.high %v7290_v16, %v7306_v35  ;;  %v7316_v61 = vcombine.low %v7297_v1, %v7313_v17  ;;  %v7317_v10 = vcombine.high %v7297_v1, %v7313_v17 }
0x1173   : > { %v7238_v63 = vrot.slane %v7230_v54, %v9009_v62  ;;  %v7245_v56 = vrot.slane %v7231_v24, %v9009_v62 }
0x1174   : > { %v6663_v49 = vpop.permute.xlu0 %6662  ;;  %v7474_v44 = vshrl.u32 %v7316_v61, 16  ;;  %v7480_v48 = vshrl.u32 %v7317_v10, 16  ;;  %v7462_v23 = vshrl.u32 %v11707_v41, 16  ;;  %v7468_v2 = vshrl.u32 %v11709_v22, 16 }
0x1175   : > { %v11718_v34 = vcombine.low %v7222_v21, %v7238_v63  ;;  %v11720_v0 = vcombine.high %v7222_v21, %v7238_v63  ;;  %v7248_v51 = vcombine.low %v7229_v32, %v7245_v56  ;;  %v7249_v7 = vcombine.high %v7229_v32, %v7245_v56  ;;  %v6669_v60 = vpop.permute.xlu1 %6668 }
0x1177   : > { %v7472_v46 = vpack.i.b16 %v7316_v61, %v7248_v51  ;;  %v7478_v37 = vpack.i.b16 %v7317_v10, %v7249_v7  ;;  %v7473_v15 = vshrl.u32 %v7248_v51, 16  ;;  %v7479_v33 = vshrl.u32 %v7249_v7, 16 }
0x1178   : > { %v6667_v30 = vpop.permute.xlu0 %6666  ;;  %v7466_v36 = vpack.i.b16 %v11709_v22, %v11720_v0  ;;  %v7461_v57 = vshrl.u32 %v11718_v34, 16  ;;  %v7467_v12 = vshrl.u32 %v11720_v0, 16  ;;  %v7460_v40 = vpack.i.b16 %v11707_v41, %v11718_v34 }
0x1179   : > { %7542 = vrot.lane.b32.xlu1 %v7472_v46, %s12240_s7  ;;  %v6673_v6 = vpop.permute.xlu1 %6672  ;;  %v7475_v39 = vpack.i.b16 %v7474_v44, %v7473_v15  ;;  %v11731_v3 = vpack.i.b16 %v7480_v48, %v7479_v33 }
0x117a   : > { %v11733_v14 = vpack.i.b16 %v7462_v23, %v7461_v57  ;;  %v11735_v20 = vpack.i.b16 %v7468_v2, %v7467_v12  ;;  %v7114_v24 = vcombine.low %v6665_v4, %v6673_v6 }
0x117c   : > { %v6671_v50 = vpop.permute.xlu0 %6670  ;;  %v7121_v48 = vrot.slane %v7114_v24, %v8980_v42 }
0x117d   : > { %7562 = vrot.lane.b32.xlu1 %v7478_v37, %s12241_s14  ;;  %v6677_v11 = vpop.permute.xlu1 %6676  ;;  %v7046_v61 = vcombine.low %v6663_v49, %v6671_v50 }
0x117e   : > { %v7122_v35 = vcombine.low %v6669_v60, %v6677_v11 }
0x117f   : > { %v7053_v7 = vrot.slane %v7046_v61, %v8980_v42 }
0x1180   : > { %v6675_v25 = vpop.permute.xlu0 %6674  ;;  %v7129_v32 = vrot.slane %v7122_v35, %v8980_v42 }
0x1181   : > { %7552 = vrot.lane.b32.xlu1 %v7475_v39, %s12194_s17  ;;  %v6689_v5 = vpop.permute.xlu1 %6688  ;;  %v7054_v54 = vcombine.low %v6667_v30, %v6675_v25 }
0x1182   : > { %v7146_v4 = vcombine.low %v7121_v48, %v7129_v32  ;;  %v7147_v12 = vcombine.high %v7121_v48, %v7129_v32 }
0x1183   : > { %v7061_v56 = vrot.slane %v7054_v54, %v8980_v42 }
0x1184   : > { %v6687_v52 = vpop.permute.xlu0 %6686  ;;  %v7154_v50 = vrot.slane %v7146_v4, %v9009_v62  ;;  %v7161_v24 = vrot.slane %v7147_v12, %v9009_v62 }
0x1185   : > { %v6693_v16 = vpop.permute.xlu1 %6692  ;;  %v7078_v37 = vcombine.low %v7053_v7, %v7061_v56  ;;  %v7079_v11 = vcombine.high %v7053_v7, %v7061_v56 }
0x1188   : > { %v6691_v1 = vpop.permute.xlu0 %6690 }
0x1189   : > { %v6697_v17 = vpop.permute.xlu1 %6696 }
0x118a   : > { %v7130_v10 = vcombine.low %v6689_v5, %v6697_v17 }
0x118c   : > { %v6695_v21 = vpop.permute.xlu0 %6694  ;;  %v7137_v23 = vrot.slane %v7130_v10, %v8980_v42 }
0x118d   : > { %v6701_v63 = vpop.permute.xlu1 %6700  ;;  %v7062_v51 = vcombine.low %v6687_v52, %v6695_v21  ;;  %v7093_v21 = vrot.slane %v7079_v11, %v9009_v62 }
0x118e   : > { %v7138_v44 = vcombine.low %v6693_v16, %v6701_v63  ;;  %v7086_v16 = vrot.slane %v7078_v37, %v9009_v62 }
0x118f   : > { %v7069_v33 = vrot.slane %v7062_v51, %v8980_v42 }
0x1190   : > { %v7145_v60 = vrot.slane %v7138_v44, %v8980_v42  ;;  %v6699_v2 = vpop.permute.xlu0 %6698 }
0x1191   : > { %v7070_v49 = vcombine.low %v6691_v1, %v6699_v2  ;;  %v6757_v46 = vpop.permute.xlu1 %6756 }
0x1192   : > { %v7162_v15 = vcombine.low %v7137_v23, %v7145_v60  ;;  %v7163_v30 = vcombine.high %v7137_v23, %v7145_v60 }
0x1193   : > { %v7077_v57 = vrot.slane %v7070_v49, %v8980_v42 }
0x1194   : > { %v7170_v6 = vrot.slane %v7162_v15, %v9009_v62  ;;  %v6755_v39 = vpop.permute.xlu0 %6754  ;;  %v7177_v1 = vrot.slane %v7163_v30, %v9009_v62 }
0x1195   : > { %v7094_v25 = vcombine.low %v7069_v33, %v7077_v57  ;;  %v7095_v5 = vcombine.high %v7069_v33, %v7077_v57  ;;  %v6761_v52 = vpop.permute.xlu1 %6760 }
0x1196   : > { %v7179_v35 = vcombine.high %v7154_v50, %v7170_v6  ;;  %v7352_v61 = vcombine.low %v11691_v58, %v6761_v52  ;;  %v11756_v32 = vcombine.low %v7154_v50, %v7170_v6  ;;  %v7180_v51 = vcombine.low %v7161_v24, %v7177_v1 }
0x1197   : > { %v7102_v17 = vrot.slane %v7094_v25, %v9009_v62  ;;  %v7109_v54 = vrot.slane %v7095_v5, %v9009_v62  ;;  %v7181_v15 = vcombine.high %v7161_v24, %v7177_v1 }
0x1198   : > { %v6759_v10 = vpop.permute.xlu0 %6758  ;;  %v7359_v2 = vrot.slane %v7352_v61, %v8980_v42  ;;  %v7438_v25 = vshrl.u32 %v11756_v32, 16 }
0x1199   : > { %v11758_v63 = vcombine.low %v7086_v16, %v7102_v17  ;;  %v7111_v56 = vcombine.high %v7086_v16, %v7102_v17  ;;  %v6765_v44 = vpop.permute.xlu1 %6764  ;;  %v7112_v7 = vcombine.low %v7093_v21, %v7109_v54  ;;  %v7318_v23 = vcombine.low %v11704_v53, %v6759_v10 }
0x119a   : > { %v7360_v48 = vcombine.low %v6757_v46, %v6765_v44  ;;  %v7113_v46 = vcombine.high %v7093_v21, %v7109_v54  ;;  %v7444_v10 = vshrl.u32 %v7179_v35, 16 }
0x119b   : > { %v7442_v60 = vpack.i.b16 %v7179_v35, %v7111_v56  ;;  %v7436_v37 = vpack.i.b16 %v11756_v32, %v11758_v63  ;;  %v7325_v57 = vrot.slane %v7318_v23, %v8980_v42  ;;  %v7448_v12 = vpack.i.b16 %v7180_v51, %v7112_v7 }
0x119c   : > { %v7367_v4 = vrot.slane %v7360_v48, %v8980_v42  ;;  %v6763_v58 = vpop.permute.xlu0 %6762  ;;  %v7454_v16 = vpack.i.b16 %v7181_v15, %v7113_v46  ;;  %v7437_v1 = vshrl.u32 %v11758_v63, 16  ;;  %v7443_v61 = vshrl.u32 %v7111_v56, 16 }
0x119d   : > { %v7326_v49 = vcombine.low %v6755_v39, %v6763_v58  ;;  %7520 = vrot.lane.b32.xlu1 %v7442_v60, %s12239_s6  ;;  %v7449_v44 = vshrl.u32 %v7112_v7, 16  ;;  %v7450_v48 = vshrl.u32 %v7180_v51, 16  ;;  %v7455_v60 = vshrl.u32 %v7113_v46, 16 }
0x119e   : > { %v7368_v33 = vcombine.low %v7359_v2, %v7367_v4  ;;  %v7369_v30 = vcombine.high %v7359_v2, %v7367_v4  ;;  %v7439_v24 = vpack.i.b16 %v7438_v25, %v7437_v1  ;;  %v7445_v21 = vpack.i.b16 %v7444_v10, %v7443_v61 }
0x119f   : > { %v7333_v53 = vrot.slane %v7326_v49, %v8980_v42  ;;  %v7451_v23 = vpack.i.b16 %v7450_v48, %v7449_v44  ;;  %v7456_v2 = vshrl.u32 %v7181_v15, 16 }
0x11a0   : > { %v7383_v6 = vrot.slane %v7369_v30, %v9009_v62  ;;  %v11771_v39 = vrot.slane %v7368_v33, %v9009_v62 }
0x11a1   : > { %v7334_v50 = vcombine.low %v7325_v57, %v7333_v53  ;;  %v7335_v11 = vcombine.high %v7325_v57, %v7333_v53  ;;  %7540 = vrot.lane.b32.xlu1 %v7448_v12, %s12240_s7  ;;  %v7457_v35 = vpack.i.b16 %v7456_v2, %v7455_v60 }
0x11a2   : > { %v7385_v56 = vcombine.high %v7383_v6, %v12189_v29 }
0x11a3   : > { %v11775_v5 = vrot.slane %v7334_v50, %v9009_v62  ;;  %v7349_v52 = vrot.slane %v7335_v11, %v9009_v62 }
0x11a4   : > { %v7504_v49 = vshrl.u32 %v7385_v56, 16 }
0x11a5   : > { %7560 = vrot.lane.b32.xlu1 %v7454_v16, %s12241_s14  ;;  %v7496_v17 = vpack.i.b16 %v7383_v6, %v7349_v52  ;;  %v7484_v54 = vpack.i.b16 %v11771_v39, %v11775_v5  ;;  %v7497_v0 = vshrl.u32 %v7349_v52, 16 }
0x11a7   : > { %7544 = vrot.lane.b32.xlu0 %v7496_v17, %s12240_s7 }
0x11a9   : > { %7510 = vrot.lane.b32.xlu1 %v7439_v24, %s12196_s29 }
0x11ab   : > { %7506 = vrot.lane.b32.xlu0 %v11637_v59, %s12196_s29  ;;  %v7351_v59 = vcombine.high %v7349_v52, %v12189_v29 }
0x11ad   : > { %7530 = vrot.lane.b32.xlu1 %v7445_v21, %s12197_s20 }
0x11af   : > { %7526 = vrot.lane.b32.xlu0 %v11639_v8, %s12197_s20  ;;  %v7502_v8 = vpack.i.b16 %v7385_v56, %v7351_v59 }
0x11b1   : > { %7550 = vrot.lane.b32.xlu1 %v7451_v23, %s12194_s17 }
0x11b3   : > { %7508 = vrot.lane.b32.xlu0 %v11676_v19, %s12196_s29  ;;  %v7485_v19 = vshrl.u32 %v11775_v5, 16 }
0x11b5   : > { %7570 = vrot.lane.b32.xlu1 %v7457_v35, %s12195_s28 }
0x11b7   : > { %7528 = vrot.lane.b32.xlu0 %v11680_v18, %s12197_s20  ;;  %v7486_v18 = vshrl.u32 %v11771_v39, 16 }
0x11b9   : > { %7572 = vrot.lane.b32.xlu1 %v11731_v3, %s12195_s28  ;;  %v7487_v51 = vpack.i.b16 %v7486_v18, %v7485_v19  ;;  %v7350_v3 = vcombine.high %v11775_v5, %v12189_v29 }
0x11bb   : > { %7548 = vrot.lane.b32.xlu0 %v11682_v13, %s12194_s17  ;;  %v7384_v13 = vcombine.high %v11771_v39, %v12189_v29  ;;  %v7503_v29 = vshrl.u32 %v7351_v59, 16 }
0x11bd   : > { %7564 = vrot.lane.b32.xlu1 %v7502_v8, %s12241_s14  ;;  %v7490_v7 = vpack.i.b16 %v7384_v13, %v7350_v3  ;;  %v7492_v4 = vshrl.u32 %v7384_v13, 16  ;;  %v7505_v15 = vpack.i.b16 %v7504_v49, %v7503_v29 }
0x11bf   : > { %7568 = vrot.lane.b32.xlu0 %v11684_v38, %s12195_s28  ;;  %v7491_v38 = vshrl.u32 %v7350_v3, 16 }
0x11c1   : > { %v7493_v22 = vpack.i.b16 %v7492_v4, %v7491_v38 }
0x11c3   : > { %7522 = vrot.lane.b32.xlu0 %v7466_v36, %s12239_s6  ;;  %v7498_v36 = vshrl.u32 %v7383_v6, 16 }
0x11c5   : > { %v7499_v58 = vpack.i.b16 %v7498_v36, %v7497_v0 }
0x11c7   : > { %7514 = vrot.lane.b32.xlu0 %v7487_v51, %s12196_s29 }
0x11cb   : > { %7524 = vrot.lane.b32.xlu0 %v7490_v7, %s12239_s6  ;;  %v7517_v33 = vpop.permute.xlu1 %7516 }
0x11cf   : > { %7512 = vrot.lane.b32.xlu0 %v11733_v14, %s12196_s29  ;;  %v7537_v14 = vpop.permute.xlu1 %7536 }
0x11d3   : > { %7532 = vrot.lane.b32.xlu0 %v11735_v20, %s12197_s20  ;;  %v7557_v30 = vpop.permute.xlu1 %7556 }
0x11d7   : > { %7534 = vrot.lane.b32.xlu0 %v7493_v22, %s12197_s20  ;;  %v7547_v46 = vpop.permute.xlu1 %7546 }
0x11db   : > { %7554 = vrot.lane.b32.xlu0 %v7499_v58, %s12194_s17  ;;  %v7567_v57 = vpop.permute.xlu1 %7566  ;;  %v7519_v12 = vpop.permute.xlu0 %7518 }
0x11df   : > { %7574 = vrot.lane.b32.xlu0 %v7505_v15, %s12195_s28  ;;  %v7539_v6 = vpop.permute.xlu0 %7538 }
0x11e3   : > { %v7559_v25 = vpop.permute.xlu0 %7558 }
0x11eb   : > { %v7543_v53 = vpop.permute.xlu1 %7542 }
0x11ef   : > { %v7563_v20 = vpop.permute.xlu1 %7562 }
0x11f3   : > { %v7553_v50 = vpop.permute.xlu1 %7552 }
0x120f   : > { %v7521_v11 = vpop.permute.xlu1 %7520 }
0x1213   : > { %v7541_v52 = vpop.permute.xlu1 %7540 }
0x1217   : > { %v7561_v1 = vpop.permute.xlu1 %7560 }
0x1219   : > { %v7545_v16 = vpop.permute.xlu0 %7544 }
0x121b   : > { %v7511_v61 = vpop.permute.xlu1 %7510 }
0x121c   : > { %v7584_v56 = vsel %vm2809_vm0, %v7436_v37, %v7511_v61 }
0x121d   : > { %v7507_v17 = vpop.permute.xlu0 %7506  ;;  %v7596_v26 = vsel %vm2819_vm8, %v7584_v56, %v7521_v11 }
0x121e   : > { %v7578_v24 = vsel %vm2809_vm0, %v7388_v28, %v7507_v17 }
0x121f   : > { %v7592_v10 = vsel %vm2819_vm8, %v7578_v24, %v7517_v33  ;;  %v7531_v28 = vpop.permute.xlu1 %7530 }
0x1220   : > { %v7606_v18 = vsel %vm2826_vm7, %v7596_v26, %v7531_v28 }
0x1221   : > { %v7527_v21 = vpop.permute.xlu0 %7526  ;;  %v7616_v3 = vsel %vm2833_vm9, %v7606_v18, %v7541_v52  ;;  %v6405_v52 = vld [vmem:[%s12043_s4] sm:$0xf] }
0x1222   : > { %v7602_v44 = vsel %vm2826_vm7, %v7592_v10, %v7527_v21 }
0x1223   : > { %v7612_v48 = vsel %vm2833_vm9, %v7602_v44, %v7537_v14  ;;  %v7551_v9 = vpop.permute.xlu1 %7550 }
0x1224   : > { %v7622_v23 = vsel %vm2840_vm10, %v7612_v48, %v7547_v46  ;;  %v7626_v32 = vsel %vm2840_vm10, %v7616_v3, %v7551_v9 }
0x1225   : > { %v7509_v60 = vpop.permute.xlu0 %7508  ;;  %v7632_v2 = vsel %vm12253_vm11, %v7622_v23, %v7557_v30  ;;  %v7636_v38 = vsel %vm12257_vm15, %v7626_v32, %v7561_v1  ;;  %vm7655_vm11 = vcmask 588800  }
0x1226   : > { %v7581_v27 = vsel %vm2809_vm0, %v7412_v47, %v7509_v60  ;;  %v7642_v43 = vsel %vm12254_vm12, %v7632_v2, %v7567_v57  ;;  %vm8364_vm12 = vcmask 523264  }
0x1227   : > { %8487 = vmatpush3.bf16.msra.mxu1 %v7642_v43  ;;  %v7594_v35 = vsel %vm2819_vm8, %v7581_v27, %v7519_v12  ;;  %v7571_v37 = vpop.permute.xlu1 %7570 }
0x1228   : > { %8488 = vmatprep.subr.bf16.mxu1 %v12199_v55  ;;  %v7648_v22 = vsel %vm12258_vm1, %v7636_v38, %v7571_v37 }
0x1229   : > { %v7529_v59 = vpop.permute.xlu0 %7528 }
0x122a   : > { %v7604_v8 = vsel %vm2826_vm7, %v7594_v35, %v7529_v59 }
0x122b   : > { %v7614_v47 = vsel %vm2833_vm9, %v7604_v8, %v7539_v6  ;;  %v7573_v57 = vpop.permute.xlu1 %7572 }
0x122d   : > { %v7549_v19 = vpop.permute.xlu0 %7548 }
0x122e   : > { %v7624_v51 = vsel %vm2840_vm10, %v7614_v47, %v7549_v19 }
0x122f   : > { %v7634_v13 = vsel %vm12255_vm13, %v7624_v51, %v7559_v25  ;;  %vm12264_vm13 = vmmov %vm12258_vm1 }
0x1231   : > { %v7569_v7 = vpop.permute.xlu0 %7568 }
0x1232   : > { %v7645_v63 = vsel %vm12256_vm14, %v7634_v13, %v7569_v7 }
0x1233   : > { %8489 = vmatpush3.bf16.msra.mxu1 %v7645_v63 }
0x1234   : > { %8490 = vmatprep.subr.bf16.mxu1 %v12199_v55 }
0x1235   : > { %v7523_v4 = vpop.permute.xlu0 %7522 }
0x1237   : > { %8491 = vmatpush3.bf16.msra.mxu1 %v7648_v22 }
0x1238   : > { %8492 = vmatprep.subr.bf16.mxu1 %v12199_v55 }
0x1239   : > { %v7515_v0 = vpop.permute.xlu0 %7514 }
0x123a   : > { %v7590_v30 = vsel %vm2809_vm0, %v7484_v54, %v7515_v0  ;;  %v7565_v54 = vpop.permute.xlu1 %7564 }
0x123d   : > { %v7525_v36 = vpop.permute.xlu0 %7524 }
0x123e   : > { %v7600_v12 = vsel %vm2819_vm8, %v7590_v30, %v7525_v36 }
0x1241   : > { %v7513_v58 = vpop.permute.xlu0 %7512 }
0x1242   : > { %v7587_v29 = vsel %vm2809_vm0, %v7460_v40, %v7513_v58 }
0x1243   : > { %v7598_v49 = vsel %vm2819_vm8, %v7587_v29, %v7523_v4 }
0x1245   : > { %v7533_v15 = vpop.permute.xlu0 %7532 }
0x1246   : > { %v7608_v33 = vsel %vm2826_vm7, %v7598_v49, %v7533_v15 }
0x1247   : > { %v7618_v14 = vsel %vm2833_vm9, %v7608_v33, %v7543_v53 }
0x1248   : > { %v7628_v46 = vsel %vm2840_vm10, %v7618_v14, %v7553_v50 }
0x1249   : > { %v7535_v41 = vpop.permute.xlu0 %7534  ;;  %v7638_v34 = vsel %vm12259_vm2, %v7628_v46, %v7563_v20 }
0x124a   : > { %v7610_v40 = vsel %vm2826_vm7, %v7600_v12, %v7535_v41  ;;  %v7651_v6 = vsel %vm12260_vm3, %v7638_v34, %v7573_v57 }
0x124b   : > { %8493 = vmatpush3.bf16.msra.mxu1 %v7651_v6  ;;  %v7620_v53 = vsel %vm2833_vm9, %v7610_v40, %v7545_v16 }
0x124c   : > { %8494 = vmatprep.subr.bf16.mxu1 %v12199_v55 }
0x124d   : > { %v7555_v39 = vpop.permute.xlu0 %7554 }
0x124e   : > { %v7630_v5 = vsel %vm2840_vm10, %v7620_v53, %v7555_v39 }
0x124f   : > { %v7640_v50 = vsel %vm12261_vm5, %v7630_v5, %v7565_v54 }
0x1251   : > { %v7575_v11 = vpop.permute.xlu0 %7574 }
0x1252   : > { %v7654_v25 = vsel %vm12262_vm6, %v7640_v50, %v7575_v11 }
0x1253   : > { %v7660_v20 = vsel %vm7659_vm4, %v7654_v25, 0 }
0x1254   : > { %8495 = vmatpush3.bf16.msra.mxu1 %v7660_v20 }
0x1257   : > { %8497 = vmatmul.mubr.msk.bf16.vlgmr.msra.gmra.mrb[4].mxu1 %vm7655_vm11, %v6405_v52 }
0x132a   : > { %v7696_v55 = vpop.f32.mrb[4].mxu1 }
0x132b   : > { %7706 = vrot.lane.b32.xlu0 %v7696_v55, %s12201_s15  ;;  %7703 = vrot.lane.b32.xlu1 %v7696_v55, %s12202_s30  ;;  %v8498_v16 = vpop.f32.mrb[5].mxu1 }
0x132c   : > { %v7699_v1 = vpop.f32.mrb[6].mxu1 }
0x132d   : > { %v8499_v17 = vpop.f32.mrb[7].mxu1 }
0x132f   : > { %7712 = vrot.lane.b32.xlu0 %v7696_v55, %s12203_s27  ;;  %7709 = vrot.lane.b32.xlu1 %v7696_v55, %s12204_s24 }
0x1333   : > { %7718 = vrot.lane.b32.xlu0 %v7696_v55, %s12205_s16  ;;  %7715 = vrot.lane.b32.xlu1 %v7696_v55, %s12206_s18 }
0x1337   : > { %7721 = vrot.lane.b32.xlu1 %v7696_v55, %s12207_s23 }
0x139d   : > { %v7707_v24 = vpop.permute.xlu0 %7706  ;;  %v7704_v61 = vpop.permute.xlu1 %7703 }
0x139e   : > { %v7724_v48 = vcombine.low %v7696_v55, %v7707_v24  ;;  %v7725_v35 = vcombine.high %v7696_v55, %v7707_v24 }
0x13a0   : > { %v7732_v59 = vrot.slane %v7724_v48, %v8980_v42  ;;  %v7739_v7 = vrot.slane %v7725_v35, %v8980_v42 }
0x13a1   : > { %v7713_v10 = vpop.permute.xlu0 %7712  ;;  %v7710_v21 = vpop.permute.xlu1 %7709 }
0x13a2   : > { %v7740_v44 = vcombine.low %v7704_v61, %v7710_v21  ;;  %v7741_v2 = vcombine.high %v7704_v61, %v7710_v21 }
0x13a4   : > { %v7748_v27 = vrot.slane %v7740_v44, %v8980_v42  ;;  %v7755_v9 = vrot.slane %v7741_v2, %v8980_v42 }
0x13a5   : > { %v7719_v23 = vpop.permute.xlu0 %7718  ;;  %v7716_v60 = vpop.permute.xlu1 %7715 }
0x13a6   : > { %v7756_v43 = vcombine.low %v7713_v10, %v7719_v23  ;;  %v7757_v28 = vcombine.high %v7713_v10, %v7719_v23  ;;  %v7788_v47 = vcombine.low %v7732_v59, %v7748_v27  ;;  %v7789_v19 = vcombine.high %v7732_v59, %v7748_v27 }
0x13a7   : > { %v7804_v38 = vcombine.low %v7739_v7, %v7755_v9  ;;  %v7805_v14 = vcombine.high %v7739_v7, %v7755_v9 }
0x13a8   : > { %v7764_v18 = vrot.slane %v7756_v43, %v8980_v42  ;;  %v7771_v51 = vrot.slane %v7757_v28, %v8980_v42  ;;  %v7796_v4 = vrot.slane %v7788_v47, %v9009_v62  ;;  %v7803_v22 = vrot.slane %v7789_v19, %v9009_v62 }
0x13a9   : > { %v7722_v56 = vpop.permute.xlu1 %7721  ;;  %v7812_v30 = vrot.slane %v7804_v38, %v9009_v62  ;;  %v7819_v25 = vrot.slane %v7805_v14, %v9009_v62 }
0x13aa   : > { %v7772_v8 = vcombine.low %v7716_v60, %v7722_v56  ;;  %v7773_v26 = vcombine.high %v7716_v60, %v7722_v56 }
0x13ac   : > { %v7780_v3 = vrot.slane %v7772_v8, %v8980_v42  ;;  %v7787_v13 = vrot.slane %v7773_v26, %v8980_v42 }
0x13ae   : > { %v7820_v32 = vcombine.low %v7764_v18, %v7780_v3  ;;  %v7821_v63 = vcombine.high %v7764_v18, %v7780_v3  ;;  %v7836_v37 = vcombine.low %v7771_v51, %v7787_v13  ;;  %v7837_v58 = vcombine.high %v7771_v51, %v7787_v13 }
0x13b0   : > { %v7828_v0 = vrot.slane %v7820_v32, %v9009_v62  ;;  %v7835_v36 = vrot.slane %v7821_v63, %v9009_v62  ;;  %v7844_v29 = vrot.slane %v7836_v37, %v9009_v62  ;;  %v7851_v34 = vrot.slane %v7837_v58, %v9009_v62  ;;  %v7860_v32 = vld [vmem:[%s12050_s11] sm:$0xff] }
0x13b1   : > { %v7957_v63 = vrot.slane %v7860_v32, %v10188_v31  ;;  %v7950_v38 = vcombine.high %v7860_v32, %v7860_v32 }
0x13b2   : > { %v11900_v49 = vcombine.low %v7796_v4, %v7828_v0  ;;  %v11902_v15 = vcombine.high %v7796_v4, %v7828_v0  ;;  %v11904_v33 = vcombine.low %v7803_v22, %v7835_v36  ;;  %v11907_v46 = vcombine.high %v7803_v22, %v7835_v36 }
0x13b3   : > { %v11918_v53 = vcombine.low %v7812_v30, %v7844_v29  ;;  %v11927_v20 = vcombine.high %v7812_v30, %v7844_v29  ;;  %v11933_v17 = vcombine.low %v7819_v25, %v7851_v34  ;;  %v11940_v48 = vcombine.high %v7819_v25, %v7851_v34 }
0x13b4   : > { %v7862_v57 = vsel %vm2809_vm0, %v11900_v49, 0.0  ;;  %v7863_v12 = vsel %vm2809_vm0, %v11902_v15, 0.0  ;;  %v7886_v41 = vmul.f32 %v11900_v49, %v11900_v49  ;;  %v7887_v6 = vmul.f32 %v11902_v15, %v11902_v15 }
0x13b5   : > { %v7864_v40 = vadd.f32 %v7863_v12, %v7862_v57  ;;  %v7865_v39 = vsel %vm2809_vm0, %v11904_v33, 0.0  ;;  %v7888_v5 = vmul.f32 %v11904_v33, %v11904_v33  ;;  %v7889_v52 = vmul.f32 %v11907_v46, %v11907_v46  ;;  %v7861_v57 = vld [vmem:[%s12051_s12] sm:$0xff] }
0x13b6   : > { %v7894_v54 = vsel %vm2809_vm0, %v7886_v41, 0.0  ;;  %v7895_v50 = vsel %vm2809_vm0, %v7887_v6, 0.0  ;;  %v7867_v55 = vsel %vm2809_vm0, %v11907_v46, 0.0  ;;  %v7869_v24 = vsel %vm2809_vm0, %v11918_v53, 0.0 }
0x13b7   : > { %v7866_v11 = vadd.f32 %v7865_v39, %v7864_v40  ;;  %v7896_v1 = vadd.f32 %v7895_v50, %v7894_v54  ;;  %v7890_v61 = vmul.f32 %v11918_v53, %v11918_v53  ;;  %v7897_v10 = vsel %vm2809_vm0, %v7888_v5, 0.0 }
0x13b8   : > { %v7871_v23 = vsel %vm2809_vm0, %v11927_v20, 0.0  ;;  %v7891_v60 = vmul.f32 %v11927_v20, %v11927_v20  ;;  %v7899_v2 = vsel %vm2809_vm0, %v7889_v52, 0.0  ;;  %v7873_v28 = vsel %vm2809_vm0, %v11933_v17, 0.0 }
0x13b9   : > { %v7868_v16 = vadd.f32 %v7867_v55, %v7866_v11  ;;  %v7898_v44 = vadd.f32 %v7897_v10, %v7896_v1  ;;  %v7892_v35 = vmul.f32 %v11933_v17, %v11933_v17  ;;  %v7901_v59 = vsel %vm2809_vm0, %v7890_v61, 0.0 }
0x13ba   : > { %v7875_v26 = vsel %vm2809_vm0, %v11940_v48, 0.0  ;;  %v7893_v9 = vmul.f32 %v11940_v48, %v11940_v48  ;;  %v7903_v47 = vsel %vm2809_vm0, %v7891_v60, 0.0  ;;  %v7965_v37 = vcombine.high %v7957_v63, %v7957_v63 }
0x13bb   : > { %v7870_v21 = vadd.f32 %v7869_v24, %v7868_v16  ;;  %v7900_v43 = vadd.f32 %v7899_v2, %v7898_v44  ;;  %v7905_v51 = vsel %vm2809_vm0, %v7892_v35, 0.0  ;;  %v7964_v22 = vrot.slane %v7950_v38, %v10188_v31 }
0x13bc   : > { %v7907_v13 = vsel %vm2809_vm0, %v7893_v9, 0.0  ;;  %v7987_v4 = vrot.slane %v7965_v37, %v10188_v31  ;;  %v7973_v0 = vrot.slane %v7957_v63, %v10188_v31  ;;  %v8079_v34 = vrot.slane %v7861_v57, %v10188_v31 }
0x13bd   : > { %v7872_v27 = vadd.f32 %v7871_v23, %v7870_v21  ;;  %v7902_v8 = vadd.f32 %v7901_v59, %v7900_v43  ;;  %v7966_v29 = vcombine.high %v7964_v22, %v7964_v22  ;;  %v7980_v6 = vrot.slane %v7964_v22, %v10188_v31 }
0x13be   : > { %v8006_v36 = vrot.slane %v7987_v4, %v10192_v45  ;;  %v7997_v58 = vcombine.high %v7987_v4, %v7987_v4  ;;  %v8002_v14 = vrot.slane %v7973_v0, %v10192_v45  ;;  %v7995_v30 = vcombine.high %v7973_v0, %v7973_v0 }
0x13bf   : > { %v7874_v56 = vadd.f32 %v7873_v28, %v7872_v27  ;;  %v7904_v18 = vadd.f32 %v7903_v47, %v7902_v8  ;;  %v7994_v41 = vrot.slane %v7966_v29, %v10188_v31  ;;  %v8087_v54 = vcombine.high %v8079_v34, %v8079_v34 }
0x13c0   : > { %v8014_v12 = vrot.slane %v7997_v58, %v10192_v45  ;;  %v8010_v40 = vrot.slane %v7995_v30, %v10192_v45  ;;  %v8072_v50 = vcombine.high %v7861_v57, %v7861_v57  ;;  %v8018_v11 = vrot.slane %v7980_v6, %v10192_v45 }
0x13c1   : > { %v7876_v19 = vadd.f32 %v7875_v26, %v7874_v56  ;;  %v7906_v3 = vadd.f32 %v7905_v51, %v7904_v18  ;;  %v8022_v39 = vrot.slane %v7994_v41, %v10192_v45  ;;  %v7998_v5 = vcombine.high %v7994_v41, %v7994_v41 }
0x13c2   : > { %v7996_v25 = vcombine.high %v7980_v6, %v7980_v6  ;;  %v8109_v55 = vrot.slane %v8087_v54, %v10188_v31  ;;  %v8086_v16 = vrot.slane %v8072_v50, %v10188_v31  ;;  %v8095_v24 = vrot.slane %v8079_v34, %v10188_v31 }
0x13c3   : > { %7877 = vadd.xlane.f32.xlu0 %v7876_v19  ;;  %v7908_v7 = vadd.f32 %v7907_v13, %v7906_v3  ;;  %v8030_v52 = vrot.slane %v7998_v5, %v10192_v45 }
0x13c4   : > { %v8026_v1 = vrot.slane %v7996_v25, %v10192_v45  ;;  %v8128_v61 = vrot.slane %v8109_v55, %v10192_v45  ;;  %v8119_v10 = vcombine.high %v8109_v55, %v8109_v55  ;;  %v8088_v21 = vcombine.high %v8086_v16, %v8086_v16 }
0x13c5   : > { %7909 = vadd.xlane.f32.xlu1 %v7908_v7  ;;  %v8124_v44 = vrot.slane %v8095_v24, %v10192_v45  ;;  %v8117_v23 = vcombine.high %v8095_v24, %v8095_v24  ;;  %v8102_v43 = vrot.slane %v8086_v16, %v10188_v31 }
0x13c6   : > { %v8136_v60 = vrot.slane %v8119_v10, %v10192_v45  ;;  %v8116_v2 = vrot.slane %v8088_v21, %v10188_v31 }
0x13c7   : > { %v8132_v27 = vrot.slane %v8117_v23, %v10192_v45  ;;  %v8140_v59 = vrot.slane %v8102_v43, %v10192_v45  ;;  %v8118_v56 = vcombine.high %v8102_v43, %v8102_v43 }
0x13c8   : > { %v8144_v28 = vrot.slane %v8116_v2, %v10192_v45  ;;  %v8120_v35 = vcombine.high %v8116_v2, %v8116_v2 }
0x13c9   : > { %v8148_v26 = vrot.slane %v8118_v56, %v10192_v45 }
0x13ca   : > { %v8152_v8 = vrot.slane %v8120_v35, %v10192_v45 }
0x13d6   : > { %8036 = vperm.xlu1 %8562, %v8006_v36  }
0x13d9   : > { %8032 = vperm.xlu0 %8561, %v8002_v14  }
0x13da   : > { %8044 = vperm.xlu1 %8562, %v8014_v12  }
0x13dd   : > { %8040 = vperm.xlu0 %8561, %v8010_v40  }
0x13de   : > { %8052 = vperm.xlu1 %8562, %v8022_v39  }
0x13e1   : > { %8048 = vperm.xlu0 %8561, %v8018_v11  }
0x13e2   : > { %8060 = vperm.xlu1 %8562, %v8030_v52  }
0x13e5   : > { %8056 = vperm.xlu0 %8561, %v8026_v1  }
0x13e6   : > { %8158 = vperm.xlu1 %8562, %v8128_v61  }
0x13e9   : > { %8154 = vperm.xlu0 %8561, %v8124_v44  }
0x13ea   : > { %8166 = vperm.xlu1 %8562, %v8136_v60  }
0x13ed   : > { %8162 = vperm.xlu0 %8561, %v8132_v27  }
0x13ee   : > { %8174 = vperm.xlu1 %8562, %v8144_v28  }
0x13f1   : > { %8170 = vperm.xlu0 %8561, %v8140_v59  }
0x13f2   : > { %8182 = vperm.xlu1 %8562, %v8152_v8  }
0x13f5   : > { %8178 = vperm.xlu0 %8561, %v8148_v26  }
0x1450   : > { %v7878_v9 = vpop.xlane.xlu0 %7877 }
0x1451   : > { %v7879_v47 = vrot.slane %v7878_v9, 4 }
0x1452   : > { %v7910_v31 = vpop.xlane.xlu1 %7909 }
0x1453   : > { %v7880_v19 = vadd.f32 %v7879_v47, %v7878_v9  ;;  %v7911_v51 = vrot.slane %v7910_v31, 4 }
0x1455   : > { %v7881_v18 = vrot.slane %v7880_v19, 2  ;;  %v7912_v3 = vadd.f32 %v7911_v51, %v7910_v31 }
0x1456   : > { %v8037_v0 = vpop.permute.xlu1 %8036 }
0x1457   : > { %v7882_v13 = vadd.f32 %v7881_v18, %v7880_v19  ;;  %v7913_v7 = vrot.slane %v7912_v3, 2 }
0x1458   : > { %v8033_v36 = vpop.permute.xlu0 %8032 }
0x1459   : > { %v7883_v32 = vrot.slane %v7882_v13, 1  ;;  %v7914_v37 = vadd.f32 %v7913_v7, %v7912_v3 }
0x145a   : > { %v8045_v58 = vpop.permute.xlu1 %8044 }
0x145b   : > { %v7884_v63 = vadd.f32 %v7883_v32, %v7882_v13  ;;  %v7915_v38 = vrot.slane %v7914_v37, 1 }
0x145c   : > { %v8041_v29 = vpop.permute.xlu0 %8040 }
0x145d   : > { %8518 = vpush %v7884_v63  ;;  %v7916_v4 = vadd.f32 %v7915_v38, %v7914_v37 }
0x145e   : > { %v8053_v14 = vpop.permute.xlu1 %8052 }
0x145f   : > { %8520 = vpush %v7916_v4 }
0x1460   : > { %v8049_v30 = vpop.permute.xlu0 %8048 }
0x1462   : > { %v8061_v57 = vpop.permute.xlu1 %8060 }
0x1464   : > { %v8057_v12 = vpop.permute.xlu0 %8056 }
0x1466   : > { %v8159_v41 = vpop.permute.xlu1 %8158 }
0x1468   : > { %v8155_v34 = vpop.permute.xlu0 %8154 }
0x146a   : > { %v8167_v40 = vpop.permute.xlu1 %8166 }
0x146c   : > { %v8163_v6 = vpop.permute.xlu0 %8162 }
0x146e   : > { %v8175_v54 = vpop.permute.xlu1 %8174 }
0x1470   : > { %v8171_v50 = vpop.permute.xlu0 %8170 }
0x1474   : > { %v8179_v59 = vpop.permute.xlu0 %8178 }
0x148e   : > { %s8519_s27 = spop %8518 }
0x148f   : > { %s7920_s15 = smul.f32 0.001953125, %s8519_s27 }
0x1490   : > { %s8521_s16 = spop %8520 }
0x1491   : > { %s7924_s30 = smul.f32 %s7920_s15, %s7920_s15  ;;  %v7931_v39 = vstv %s7920_s15 }
0x1492   : > { %s7923_s18 = smul.f32 0.001953125, %s8521_s16  ;;  %v7932_v5 = vsub.f32 %v11900_v49, %v7931_v39  ;;  %v7933_v11 = vsub.f32 %v11902_v15, %v7931_v39  ;;  %v7934_v25 = vsub.f32 %v11904_v33, %v7931_v39  ;;  %v7935_v52 = vsub.f32 %v11907_v46, %v7931_v39 }
0x1493   : > { %v7936_v55 = vsub.f32 %v11918_v53, %v7931_v39  ;;  %v7937_v16 = vsub.f32 %v11927_v20, %v7931_v39  ;;  %v7938_v1 = vsub.f32 %v11933_v17, %v7931_v39  ;;  %v7939_v24 = vsub.f32 %v11940_v48, %v7931_v39  ;;  %v8183_v17 = vpop.permute.xlu1 %8182 }
0x1494   : > { %s7925_s0 = ssub.f32 %s7923_s18, %s7924_s30 }
0x1496   : > { %s7926_s1 = smax.f32 %s12210_s2, %s7925_s0 }
0x1497   : > { %s7927_s5 = sadd.f32 1e-05, %s7926_s1 }
0x1499   : > { %v7928_v45 = vstv %s7927_s5 }
0x149a   : > { %8661 = vrsqrt.f32 %v7928_v45 }
0x14a4   : > { %v8662_v22 = vpop.eup %8661 }
0x14a5   : > { %8522 = vpush %v8662_v22 }
0x14d6   : > { %s8523_s2 = spop %8522 }
0x14d7   : > { %v7940_v61 = vstv %s8523_s2 }
0x14d8   : > { %v7941_v10 = vmul.f32 %v7940_v61, %v7932_v5  ;;  %v7942_v49 = vmul.f32 %v7940_v61, %v7933_v11  ;;  %v7943_v21 = vmul.f32 %v7940_v61, %v7934_v25  ;;  %v7944_v44 = vmul.f32 %v7940_v61, %v7935_v52 }
0x14d9   : > { %v7945_v23 = vmul.f32 %v7940_v61, %v7936_v55  ;;  %v7946_v60 = vmul.f32 %v7940_v61, %v7937_v16  ;;  %v7947_v15 = vmul.f32 %v7940_v61, %v7938_v1  ;;  %v7948_v2 = vmul.f32 %v7940_v61, %v7939_v24 }
0x14da   : > { %v8063_v33 = vmul.f32 %v8033_v36, %v7941_v10  ;;  %v8064_v27 = vmul.f32 %v8037_v0, %v7942_v49  ;;  %v8065_v46 = vmul.f32 %v8041_v29, %v7943_v21  ;;  %v8066_v43 = vmul.f32 %v8045_v58, %v7944_v44 }
0x14db   : > { %v8067_v53 = vmul.f32 %v8049_v30, %v7945_v23  ;;  %v8068_v28 = vmul.f32 %v8053_v14, %v7946_v60  ;;  %v8069_v20 = vmul.f32 %v8057_v12, %v7947_v15  ;;  %v8070_v35 = vmul.f32 %v8061_v57, %v7948_v2 }
0x14dc   : > { %v8185_v48 = vadd.f32 %v8155_v34, %v8063_v33  ;;  %v8186_v56 = vadd.f32 %v8159_v41, %v8064_v27  ;;  %v8187_v8 = vadd.f32 %v8163_v6, %v8065_v46  ;;  %v8188_v26 = vadd.f32 %v8167_v40, %v8066_v43 }
0x14dd   : > { %v8189_v9 = vadd.f32 %v8171_v50, %v8067_v53  ;;  %v8190_v47 = vadd.f32 %v8175_v54, %v8068_v28  ;;  %v8191_v19 = vadd.f32 %v8179_v59, %v8069_v20  ;;  %v8192_v31 = vadd.f32 %v8183_v17, %v8070_v35 }
0x14de   : > { %v8193_v18 = vcombine.low %v8185_v48, %v8187_v8  ;;  %v8209_v51 = vcombine.low %v8186_v56, %v8188_v26  ;;  %v8194_v3 = vcombine.high %v8185_v48, %v8187_v8  ;;  %v8210_v13 = vcombine.high %v8186_v56, %v8188_v26 }
0x14df   : > { %v8225_v7 = vcombine.low %v8189_v9, %v8191_v19  ;;  %v8241_v32 = vcombine.low %v8190_v47, %v8192_v31  ;;  %v8226_v63 = vcombine.high %v8189_v9, %v8191_v19  ;;  %v8242_v37 = vcombine.high %v8190_v47, %v8192_v31 }
0x14e0   : > { %v8201_v38 = vrot.slane %v8193_v18, %v8980_v42  ;;  %v8217_v4 = vrot.slane %v8209_v51, %v8980_v42  ;;  %v8208_v45 = vrot.slane %v8194_v3, %v8980_v42  ;;  %v8224_v22 = vrot.slane %v8210_v13, %v8980_v42 }
0x14e1   : > { %v8233_v0 = vrot.slane %v8225_v7, %v8980_v42  ;;  %v8249_v36 = vrot.slane %v8241_v32, %v8980_v42  ;;  %v8240_v58 = vrot.slane %v8226_v63, %v8980_v42  ;;  %v8256_v29 = vrot.slane %v8242_v37, %v8980_v42 }
0x14e2   : > { %v8258_v14 = vcombine.high %v8201_v38, %v8217_v4  ;;  %v8257_v30 = vcombine.low %v8201_v38, %v8217_v4  ;;  %v8273_v41 = vcombine.low %v8208_v45, %v8224_v22  ;;  %v8274_v54 = vcombine.high %v8208_v45, %v8224_v22 }
0x14e3   : > { %v8290_v57 = vcombine.high %v8233_v0, %v8249_v36  ;;  %v8289_v12 = vcombine.low %v8233_v0, %v8249_v36  ;;  %v8305_v34 = vcombine.low %v8240_v58, %v8256_v29  ;;  %v8306_v50 = vcombine.high %v8240_v58, %v8256_v29 }
0x14e4   : > { %v8272_v40 = vrot.slane %v8258_v14, %v9009_v62  ;;  %v8265_v6 = vrot.slane %v8257_v30, %v9009_v62  ;;  %v8281_v42 = vrot.slane %v8273_v41, %v9009_v62  ;;  %v8288_v24 = vrot.slane %v8274_v54, %v9009_v62 }
0x14e5   : > { %v8304_v39 = vrot.slane %v8290_v57, %v9009_v62  ;;  %v8297_v5 = vrot.slane %v8289_v12, %v9009_v62  ;;  %v8313_v52 = vrot.slane %v8305_v34, %v9009_v62  ;;  %v8320_v61 = vrot.slane %v8306_v50, %v9009_v62 }
0x14e7   : > { %v8323_v11 = vcombine.low %v8272_v40, %v8304_v39  ;;  %v8322_v25 = vcombine.high %v8265_v6, %v8297_v5  ;;  %v8321_v55 = vcombine.low %v8265_v6, %v8297_v5  ;;  %v8325_v16 = vcombine.low %v8281_v42, %v8313_v52 }
0x14e8   : > { %v8324_v1 = vcombine.high %v8272_v40, %v8304_v39  ;;  %v8327_v10 = vcombine.low %v8288_v24, %v8320_v61  ;;  %v8326_v49 = vcombine.high %v8281_v42, %v8313_v52  ;;  %v8328_v21 = vcombine.high %v8288_v24, %v8320_v61 }
0x14e9   : > { %8334 = vrot.lane.b32.xlu1 %v8323_v11, %s12239_s6  ;;  %8330 = vrot.lane.b32.xlu0 %v8322_v25, %s12196_s29  ;;  %s8426_s29 = sshll.u32 %s12267_s26, 3 }
0x14ed   : > { %8342 = vrot.lane.b32.xlu1 %v8325_v16, %s12240_s7  ;;  %8338 = vrot.lane.b32.xlu0 %v8324_v1, %s12197_s20 }
0x14f1   : > { %8350 = vrot.lane.b32.xlu1 %v8327_v10, %s12241_s14  ;;  %8346 = vrot.lane.b32.xlu0 %v8326_v49, %s12194_s17 }
0x14f5   : > { %8354 = vrot.lane.b32.xlu0 %v8328_v21, %s12195_s28  ;;  %s438_s28 = scalar_lea.vmem %s12052_s13, %s8426_s29 }
0x155b   : > { %v8335_v44 = vpop.permute.xlu1 %8334  ;;  %v8331_v23 = vpop.permute.xlu0 %8330 }
0x155c   : > { %v8357_v60 = vsel %vm2809_vm0, %v8321_v55, %v8331_v23  ;;  %vm12263_vm0 = vmmov %vm12259_vm2 }
0x155d   : > { %v8358_v2 = vsel %vm2819_vm8, %v8357_v60, %v8335_v44 }
0x155f   : > { %v8343_v15 = vpop.permute.xlu1 %8342  ;;  %v8339_v62 = vpop.permute.xlu0 %8338 }
0x1560   : > { %v8359_v33 = vsel %vm2826_vm7, %v8358_v2, %v8339_v62 }
0x1561   : > { %v8360_v46 = vsel %vm2833_vm9, %v8359_v33, %v8343_v15 }
0x1563   : > { %v8347_v27 = vpop.permute.xlu0 %8346  ;;  %v8351_v43 = vpop.permute.xlu1 %8350 }
0x1564   : > { %v8361_v53 = vsel %vm2840_vm10, %v8360_v46, %v8347_v27 }
0x1565   : > { %v8362_v20 = vsel %vm12263_vm0, %v8361_v53, %v8351_v43 }
0x1567   : > { %v8355_v28 = vpop.permute.xlu0 %8354 }
0x1568   : > { %v8363_v35 = vsel %vm12264_vm13, %v8362_v20, %v8355_v28 }
0x1569   : > { %8365 = vst.msk [vmem:[%s438_s28] sm:$0xff] %vm8364_vm12, %v8363_v35 }
0x156a PF: > { %s12265_s6 = sld [smem:[#allocation2_spill]] }
0x1570   : > { %s23_s25 = sadd.s32 1, %s12265_s6  }
0x1571   : > { %p20_p4 = scmp.ge.s32.totalorder %s23_s25, 4  }
0x1573   :  { %22 = sbr.rel (!%p20_p4) target bundleno = 11 (0xb), region = 102 }

</bundles_post_ra>
